<compile_context>
chip_gen: v7x
topology: tpu7x:2x2x1
jax: 0.10.0
libtpu: 0.0.40
codegen_flags: <defaults>
</compile_context>

<pallas_src>
import jax
import jax.numpy as jnp
import numpy as np
from jax.experimental import pallas as pl
from jax.experimental.pallas import tpu as pltpu

C_OUT, KH, KW = 10, 3, 3
H_IN, W_IN = 28, 28                       # 640 = 10*8*8 forces 28x28 input
POOL = 3
H_POOL, W_POOL = 8, 8                     # (28-3+1)//3 = 8
FEAT = C_OUT * H_POOL * W_POOL            # 640
HID, N_CLS = 50, 10
WIN = KH + POOL - 1                       # 5 column phases q = px+dx in [0,5)


def _net_kernel(xcol_ref, cw_ref, cb_ref, w1_ref, b1_ref, w2_ref, b2_ref,
                out_ref, feat_ref):
    # xcol_ref: (5, 28, 8, B)   xcol[q, r, j, b] = x[b, 0, r, 3j+q]; batch on lanes
    # cw_ref  : (90,) f32 SMEM  conv weights, index c*9 + dy*3 + dx
    # cb_ref  : (10,) f32 SMEM  conv bias
    # w1_ref  : (50, 640)  b1_ref: (50, 1)  w2_ref: (10, 50)  b2_ref: (10, 1)
    # out_ref : (10, B)         transposed logits (lanes = batch)
    # feat_ref: (10, 64, B)     VMEM scratch: pooled features, row = i*8 + j
    lanes = out_ref.shape[-1]

    @pl.loop(0, C_OUT)
    def _per_channel(c):
        # Hoist this channel's 9 tap weights (and bias) into lane-wide vregs
        # ONCE; they are reused across all 8 rows x 9 pool offsets x 9 taps.
        w_bc = [jnp.full((W_POOL, lanes), cw_ref[c * (KH * KW) + k], jnp.float32)
                for k in range(KH * KW)]
        b_bc = jnp.full((W_POOL, lanes), cb_ref[c], jnp.float32)

        for i in range(H_POOL):                       # pooled output row
            pooled = None                             # (8, B) running max
            for py in range(POOL):
                for px in range(POOL):
                    acc = None                        # conv at (3i+py, 3j+px)
                    for dy in range(KH):
                        row = 3 * i + py + dy         # static leading-dim index
                        for dx in range(KW):
                            x_slab = xcol_ref[px + dx, row]          # (8, B)
                            term = x_slab * w_bc[dy * KW + dx]
                            acc = term if acc is None else acc + term
                    pooled = acc if pooled is None else jnp.maximum(pooled, acc)
            # conv bias is a per-channel constant, so it commutes with the max.
            feat_ref[c, pl.ds(i * W_POOL, W_POOL), :] = pooled + b_bc

    # (10, 64, B) -> (640, B): merges leading dims over an 8-aligned sublane
    # dim (pure tile relabel); row order c*64 + i*8 + j == torch view(-1, 640).
    feat = feat_ref[...].reshape(FEAT, lanes)
    h = jnp.dot(w1_ref[...], feat, preferred_element_type=jnp.float32)
    h = jnp.maximum(h + jnp.broadcast_to(b1_ref[...], (HID, lanes)), 0.0)
    logits = jnp.dot(w2_ref[...], h, preferred_element_type=jnp.float32)
    out_ref[...] = logits + jnp.broadcast_to(b2_ref[...], (N_CLS, lanes))


def _fullspec(shape):
    nd = len(shape)
    return pl.BlockSpec(shape, lambda g, _nd=nd: (0,) * _nd)


@jax.jit
def net_forward(x, conv_w, conv_b, fc1_w, fc1_b, fc2_w, fc2_b):
    n = x.shape[0]
    # 128-lane blocks for small batches (>=2 grid blocks sooner -> both v7x
    # TensorCores busy), 256-lane blocks for larger batches (amortizes the
    # per-step overhead and fills the MXU N dimension for fc1/fc2).
    lanes = 256 if n > 256 else 128
    n_pad = ((n + lanes - 1) // lanes) * lanes
    n_blocks = n_pad // lanes

    # ---- input glue (fused under this jit): batch -> lanes, column phases --
    xb = jnp.transpose(x[:, 0, :, :].astype(jnp.float32), (1, 2, 0))  # (28,28,N)
    if n_pad != n:
        xb = jnp.pad(xb, ((0, 0), (0, 0), (0, n_pad - n)))
    # xcol[q, r, j, b] = x[b, 0, r, 3j+q]  (only the stride-3 column gather;
    # row selection is done in-kernel by leading-dim indexing for free)
    xcol = jnp.stack([xb[:, q:q + 3 * W_POOL - 2:3, :] for q in range(WIN)], 0)

    # ---- parameters: no lane broadcasts; conv params ride in SMEM ----------
    cw = conv_w.astype(jnp.float32).reshape(C_OUT * KH * KW)          # (90,)
    cb = conv_b.astype(jnp.float32)                                   # (10,)
    w1 = fc1_w.astype(jnp.float32)                                    # (50, 640)
    b1 = fc1_b.astype(jnp.float32).reshape(HID, 1)
    w2 = fc2_w.astype(jnp.float32)                                    # (10, 50)
    b2 = fc2_b.astype(jnp.float32).reshape(N_CLS, 1)

    out_t = pl.pallas_call(
        _net_kernel,
        out_shape=jax.ShapeDtypeStruct((N_CLS, n_pad), jnp.float32),
        grid=(n_blocks,),
        in_specs=[
            pl.BlockSpec((WIN, H_IN, W_POOL, lanes), lambda g: (0, 0, 0, g)),
            pl.BlockSpec(memory_space=pltpu.MemorySpace.SMEM),
            pl.BlockSpec(memory_space=pltpu.MemorySpace.SMEM),
            _fullspec(w1.shape),
            _fullspec(b1.shape),
            _fullspec(w2.shape),
            _fullspec(b2.shape),
        ],
        out_specs=pl.BlockSpec((N_CLS, lanes), lambda g: (0, g)),
        scratch_shapes=[pltpu.VMEM((C_OUT, H_POOL * W_POOL, lanes), jnp.float32)],
        compiler_params=pltpu.CompilerParams(
            dimension_semantics=("parallel",),
            vmem_limit_bytes=16 * 1024 * 1024,
        ),
    )(xcol, cw, cb, w1, b1, w2, b2)

    # TODO(synk): F.log_softmax is computed then discarded in the PyTorch
    # forward; raw logits are returned, matching the reference semantics.
    return jnp.transpose(out_t)[:n]                                   # (N, 10)


def reference(x, conv_w, conv_b, fc1_w, fc1_b, fc2_w, fc2_b):
    conv = jax.lax.conv_general_dilated(
        x, conv_w, window_strides=(1, 1), padding="VALID",
        dimension_numbers=("NCHW", "OIHW", "NCHW")) + conv_b.reshape(1, -1, 1, 1)
    pooled = jax.lax.reduce_window(
        conv, -jnp.inf, jax.lax.max,
        (1, 1, POOL, POOL), (1, 1, POOL, POOL), "VALID")
    feat = pooled.reshape(x.shape[0], -1)
    h = jnp.maximum(feat @ fc1_w.T + fc1_b, 0.0)
    return h @ fc2_w.T + fc2_b


if __name__ == "__main__":
    key = jax.random.PRNGKey(0)
    ks = jax.random.split(key, 8)
    N = 2
    x = jax.random.normal(ks[0], (N, 1, H_IN, W_IN), jnp.float32)

    # Deterministic PyTorch-style uniform(-1/sqrt(fan_in), 1/sqrt(fan_in)) init.
    bc = 1.0 / np.sqrt(1 * KH * KW)
    conv_w = jax.random.uniform(ks[1], (C_OUT, 1, KH, KW), jnp.float32, -bc, bc)
    conv_b = jax.random.uniform(ks[2], (C_OUT,), jnp.float32, -bc, bc)
    b1s = 1.0 / np.sqrt(FEAT)
    fc1_w = jax.random.uniform(ks[3], (HID, FEAT), jnp.float32, -b1s, b1s)
    fc1_b = jax.random.uniform(ks[4], (HID,), jnp.float32, -b1s, b1s)
    b2s = 1.0 / np.sqrt(HID)
    fc2_w = jax.random.uniform(ks[5], (N_CLS, HID), jnp.float32, -b2s, b2s)
    fc2_b = jax.random.uniform(ks[6], (N_CLS,), jnp.float32, -b2s, b2s)

    out = jax.block_until_ready(
        net_forward(x, conv_w, conv_b, fc1_w, fc1_b, fc2_w, fc2_b))
    ref = reference(x, conv_w, conv_b, fc1_w, fc1_b, fc2_w, fc2_b)

    assert out.shape == (N, N_CLS) and out.dtype == jnp.float32
    np.testing.assert_allclose(np.asarray(out), np.asarray(ref), rtol=1e-2, atol=1e-2)
    print("KERNEL_OK")
</pallas_src>

<mosaic_0001>
module attributes {stable_mosaic.version = 11 : i64} {
  func.func @_net_kernel(%arg0: i32, %arg1: memref<5x28x8x128xf32, #tpu.memory_space<vmem>>, %arg2: memref<90xf32, #tpu.memory_space<smem>>, %arg3: memref<10xf32, #tpu.memory_space<smem>>, %arg4: memref<50x640xf32, #tpu.memory_space<vmem>>, %arg5: memref<50x1xf32, #tpu.memory_space<vmem>>, %arg6: memref<10x50xf32, #tpu.memory_space<vmem>>, %arg7: memref<10x1xf32, #tpu.memory_space<vmem>>, %arg8: memref<10x128xf32, #tpu.memory_space<vmem>>, %arg9: memref<10x64x128xf32, #tpu.memory_space<vmem>>) attributes {dimension_semantics = [#tpu.dimension_semantics<parallel>], iteration_bounds = array<i64: 1>, scalar_prefetch = 0 : i64, scratch_operands = 1 : i64, tpu.core_type = #tpu.core_type<tc>, window_params = [{transform_indices = @transform_0, window_bounds = array<i64: 5, 28, 8, 128>}, {transform_indices = @transform_1, window_bounds = array<i64: 90>}, {transform_indices = @transform_2, window_bounds = array<i64: 10>}, {pipeline_mode = #tpu.pipeline_mode<synchronous>, transform_indices = @transform_3, window_bounds = array<i64: 50, 640>}, {pipeline_mode = #tpu.pipeline_mode<synchronous>, transform_indices = @transform_4, window_bounds = array<i64: 50, 1>}, {pipeline_mode = #tpu.pipeline_mode<synchronous>, transform_indices = @transform_5, window_bounds = array<i64: 10, 50>}, {pipeline_mode = #tpu.pipeline_mode<synchronous>, transform_indices = @transform_6, window_bounds = array<i64: 10, 1>}, {transform_indices = @transform_7, window_bounds = array<i64: 10, 128>}]} {
    %c0_i32 = arith.constant 0 : i32
    %c10_i32 = arith.constant 10 : i32
    %0 = arith.addi %c0_i32, %c10_i32 : i32
    %c1_i32 = arith.constant 1 : i32
    scf.for %arg10 = %c0_i32 to %0 step %c1_i32  : i32 {
      %c1_i32_15 = arith.constant 1 : i32
      %18 = arith.muli %arg10, %c1_i32_15 : i32
      %c0_i32_16 = arith.constant 0 : i32
      %19 = arith.addi %c0_i32_16, %18 : i32
      %c9_i32 = arith.constant 9 : i32
      %20 = arith.muli %19, %c9_i32 : i32
      %c0_i32_17 = arith.constant 0 : i32
      %21 = arith.addi %20, %c0_i32_17 : i32
      %22 = arith.index_cast %21 : i32 to index
      %23 = memref.load %arg2[%22] : memref<90xf32, #tpu.memory_space<smem>>
      %24 = vector.broadcast %23 : f32 to vector<8x128xf32>
      %c9_i32_18 = arith.constant 9 : i32
      %25 = arith.muli %19, %c9_i32_18 : i32
      %c1_i32_19 = arith.constant 1 : i32
      %26 = arith.addi %25, %c1_i32_19 : i32
      %27 = arith.index_cast %26 : i32 to index
      %28 = memref.load %arg2[%27] : memref<90xf32, #tpu.memory_space<smem>>
      %29 = vector.broadcast %28 : f32 to vector<8x128xf32>
      %c9_i32_20 = arith.constant 9 : i32
      %30 = arith.muli %19, %c9_i32_20 : i32
      %c2_i32 = arith.constant 2 : i32
      %31 = arith.addi %30, %c2_i32 : i32
      %32 = arith.index_cast %31 : i32 to index
      %33 = memref.load %arg2[%32] : memref<90xf32, #tpu.memory_space<smem>>
      %34 = vector.broadcast %33 : f32 to vector<8x128xf32>
      %c9_i32_21 = arith.constant 9 : i32
      %35 = arith.muli %19, %c9_i32_21 : i32
      %c3_i32 = arith.constant 3 : i32
      %36 = arith.addi %35, %c3_i32 : i32
      %37 = arith.index_cast %36 : i32 to index
      %38 = memref.load %arg2[%37] : memref<90xf32, #tpu.memory_space<smem>>
      %39 = vector.broadcast %38 : f32 to vector<8x128xf32>
      %c9_i32_22 = arith.constant 9 : i32
      %40 = arith.muli %19, %c9_i32_22 : i32
      %c4_i32 = arith.constant 4 : i32
      %41 = arith.addi %40, %c4_i32 : i32
      %42 = arith.index_cast %41 : i32 to index
      %43 = memref.load %arg2[%42] : memref<90xf32, #tpu.memory_space<smem>>
      %44 = vector.broadcast %43 : f32 to vector<8x128xf32>
      %c9_i32_23 = arith.constant 9 : i32
      %45 = arith.muli %19, %c9_i32_23 : i32
      %c5_i32 = arith.constant 5 : i32
      %46 = arith.addi %45, %c5_i32 : i32
      %47 = arith.index_cast %46 : i32 to index
      %48 = memref.load %arg2[%47] : memref<90xf32, #tpu.memory_space<smem>>
      %49 = vector.broadcast %48 : f32 to vector<8x128xf32>
      %c9_i32_24 = arith.constant 9 : i32
      %50 = arith.muli %19, %c9_i32_24 : i32
      %c6_i32 = arith.constant 6 : i32
      %51 = arith.addi %50, %c6_i32 : i32
      %52 = arith.index_cast %51 : i32 to index
      %53 = memref.load %arg2[%52] : memref<90xf32, #tpu.memory_space<smem>>
      %54 = vector.broadcast %53 : f32 to vector<8x128xf32>
      %c9_i32_25 = arith.constant 9 : i32
      %55 = arith.muli %19, %c9_i32_25 : i32
      %c7_i32 = arith.constant 7 : i32
      %56 = arith.addi %55, %c7_i32 : i32
      %57 = arith.index_cast %56 : i32 to index
      %58 = memref.load %arg2[%57] : memref<90xf32, #tpu.memory_space<smem>>
      %59 = vector.broadcast %58 : f32 to vector<8x128xf32>
      %c9_i32_26 = arith.constant 9 : i32
      %60 = arith.muli %19, %c9_i32_26 : i32
      %c8_i32 = arith.constant 8 : i32
      %61 = arith.addi %60, %c8_i32 : i32
      %62 = arith.index_cast %61 : i32 to index
      %63 = memref.load %arg2[%62] : memref<90xf32, #tpu.memory_space<smem>>
      %64 = vector.broadcast %63 : f32 to vector<8x128xf32>
      %65 = arith.index_cast %19 : i32 to index
      %66 = memref.load %arg3[%65] : memref<10xf32, #tpu.memory_space<smem>>
      %67 = vector.broadcast %66 : f32 to vector<8x128xf32>
      %c0_27 = arith.constant 0 : index
      %c0_28 = arith.constant 0 : index
      %c0_29 = arith.constant 0 : index
      %c0_30 = arith.constant 0 : index
      %68 = vector.load %arg1[%c0_27, %c0_28, %c0_29, %c0_30] : memref<5x28x8x128xf32, #tpu.memory_space<vmem>>, vector<1x1x8x128xf32>
      %69 = vector.shape_cast %68 : vector<1x1x8x128xf32> to vector<8x128xf32>
      %70 = arith.mulf %69, %24 : vector<8x128xf32>
      %c1 = arith.constant 1 : index
      %c0_31 = arith.constant 0 : index
      %c0_32 = arith.constant 0 : index
      %c0_33 = arith.constant 0 : index
      %71 = vector.load %arg1[%c1, %c0_31, %c0_32, %c0_33] : memref<5x28x8x128xf32, #tpu.memory_space<vmem>>, vector<1x1x8x128xf32>
      %72 = vector.shape_cast %71 : vector<1x1x8x128xf32> to vector<8x128xf32>
      %73 = arith.mulf %72, %29 : vector<8x128xf32>
      %74 = arith.addf %70, %73 : vector<8x128xf32>
      %c2 = arith.constant 2 : index
      %c0_34 = arith.constant 0 : index
      %c0_35 = arith.constant 0 : index
      %c0_36 = arith.constant 0 : index
      %75 = vector.load %arg1[%c2, %c0_34, %c0_35, %c0_36] : memref<5x28x8x128xf32, #tpu.memory_space<vmem>>, vector<1x1x8x128xf32>
      %76 = vector.shape_cast %75 : vector<1x1x8x128xf32> to vector<8x128xf32>
      %77 = arith.mulf %76, %34 : vector<8x128xf32>
      %78 = arith.addf %74, %77 : vector<8x128xf32>
      %c0_37 = arith.constant 0 : index
      %c1_38 = arith.constant 1 : index
      %c0_39 = arith.constant 0 : index
      %c0_40 = arith.constant 0 : index
      %79 = vector.load %arg1[%c0_37, %c1_38, %c0_39, %c0_40] : memref<5x28x8x128xf32, #tpu.memory_space<vmem>>, vector<1x1x8x128xf32>
      %80 = vector.shape_cast %79 : vector<1x1x8x128xf32> to vector<8x128xf32>
      %81 = arith.mulf %80, %39 : vector<8x128xf32>
      %82 = arith.addf %78, %81 : vector<8x128xf32>
      %c1_41 = arith.constant 1 : index
      %c1_42 = arith.constant 1 : index
      %c0_43 = arith.constant 0 : index
      %c0_44 = arith.constant 0 : index
      %83 = vector.load %arg1[%c1_41, %c1_42, %c0_43, %c0_44] : memref<5x28x8x128xf32, #tpu.memory_space<vmem>>, vector<1x1x8x128xf32>
      %84 = vector.shape_cast %83 : vector<1x1x8x128xf32> to vector<8x128xf32>
      %85 = arith.mulf %84, %44 : vector<8x128xf32>
      %86 = arith.addf %82, %85 : vector<8x128xf32>
      %c2_45 = arith.constant 2 : index
      %c1_46 = arith.constant 1 : index
      %c0_47 = arith.constant 0 : index
      %c0_48 = arith.constant 0 : index
      %87 = vector.load %arg1[%c2_45, %c1_46, %c0_47, %c0_48] : memref<5x28x8x128xf32, #tpu.memory_space<vmem>>, vector<1x1x8x128xf32>
      %88 = vector.shape_cast %87 : vector<1x1x8x128xf32> to vector<8x128xf32>
      %89 = arith.mulf %88, %49 : vector<8x128xf32>
      %90 = arith.addf %86, %89 : vector<8x128xf32>
      %c0_49 = arith.constant 0 : index
      %c2_50 = arith.constant 2 : index
      %c0_51 = arith.constant 0 : index
      %c0_52 = arith.constant 0 : index
      %91 = vector.load %arg1[%c0_49, %c2_50, %c0_51, %c0_52] : memref<5x28x8x128xf32, #tpu.memory_space<vmem>>, vector<1x1x8x128xf32>
      %92 = vector.shape_cast %91 : vector<1x1x8x128xf32> to vector<8x128xf32>
      %93 = arith.mulf %92, %54 : vector<8x128xf32>
      %94 = arith.addf %90, %93 : vector<8x128xf32>
      %c1_53 = arith.constant 1 : index
      %c2_54 = arith.constant 2 : index
      %c0_55 = arith.constant 0 : index
      %c0_56 = arith.constant 0 : index
      %95 = vector.load %arg1[%c1_53, %c2_54, %c0_55, %c0_56] : memref<5x28x8x128xf32, #tpu.memory_space<vmem>>, vector<1x1x8x128xf32>
      %96 = vector.shape_cast %95 : vector<1x1x8x128xf32> to vector<8x128xf32>
      %97 = arith.mulf %96, %59 : vector<8x128xf32>
      %98 = arith.addf %94, %97 : vector<8x128xf32>
      %c2_57 = arith.constant 2 : index
      %c2_58 = arith.constant 2 : index
      %c0_59 = arith.constant 0 : index
      %c0_60 = arith.constant 0 : index
      %99 = vector.load %arg1[%c2_57, %c2_58, %c0_59, %c0_60] : memref<5x28x8x128xf32, #tpu.memory_space<vmem>>, vector<1x1x8x128xf32>
      %100 = vector.shape_cast %99 : vector<1x1x8x128xf32> to vector<8x128xf32>
      %101 = arith.mulf %100, %64 : vector<8x128xf32>
      %102 = arith.addf %98, %101 : vector<8x128xf32>
      %c1_61 = arith.constant 1 : index
      %c0_62 = arith.constant 0 : index
      %c0_63 = arith.constant 0 : index
      %c0_64 = arith.constant 0 : index
      %103 = vector.load %arg1[%c1_61, %c0_62, %c0_63, %c0_64] : memref<5x28x8x128xf32, #tpu.memory_space<vmem>>, vector<1x1x8x128xf32>
      %104 = vector.shape_cast %103 : vector<1x1x8x128xf32> to vector<8x128xf32>
      %105 = arith.mulf %104, %24 : vector<8x128xf32>
      %c2_65 = arith.constant 2 : index
      %c0_66 = arith.constant 0 : index
      %c0_67 = arith.constant 0 : index
      %c0_68 = arith.constant 0 : index
      %106 = vector.load %arg1[%c2_65, %c0_66, %c0_67, %c0_68] : memref<5x28x8x128xf32, #tpu.memory_space<vmem>>, vector<1x1x8x128xf32>
      %107 = vector.shape_cast %106 : vector<1x1x8x128xf32> to vector<8x128xf32>
      %108 = arith.mulf %107, %29 : vector<8x128xf32>
      %109 = arith.addf %105, %108 : vector<8x128xf32>
      %c3 = arith.constant 3 : index
      %c0_69 = arith.constant 0 : index
      %c0_70 = arith.constant 0 : index
      %c0_71 = arith.constant 0 : index
      %110 = vector.load %arg1[%c3, %c0_69, %c0_70, %c0_71] : memref<5x28x8x128xf32, #tpu.memory_space<vmem>>, vector<1x1x8x128xf32>
      %111 = vector.shape_cast %110 : vector<1x1x8x128xf32> to vector<8x128xf32>
      %112 = arith.mulf %111, %34 : vector<8x128xf32>
      %113 = arith.addf %109, %112 : vector<8x128xf32>
      %c1_72 = arith.constant 1 : index
      %c1_73 = arith.constant 1 : index
      %c0_74 = arith.constant 0 : index
      %c0_75 = arith.constant 0 : index
      %114 = vector.load %arg1[%c1_72, %c1_73, %c0_74, %c0_75] : memref<5x28x8x128xf32, #tpu.memory_space<vmem>>, vector<1x1x8x128xf32>
      %115 = vector.shape_cast %114 : vector<1x1x8x128xf32> to vector<8x128xf32>
      %116 = arith.mulf %115, %39 : vector<8x128xf32>
      %117 = arith.addf %113, %116 : vector<8x128xf32>
      %c2_76 = arith.constant 2 : index
      %c1_77 = arith.constant 1 : index
      %c0_78 = arith.constant 0 : index
      %c0_79 = arith.constant 0 : index
      %118 = vector.load %arg1[%c2_76, %c1_77, %c0_78, %c0_79] : memref<5x28x8x128xf32, #tpu.memory_space<vmem>>, vector<1x1x8x128xf32>
      %119 = vector.shape_cast %118 : vector<1x1x8x128xf32> to vector<8x128xf32>
      %120 = arith.mulf %119, %44 : vector<8x128xf32>
      %121 = arith.addf %117, %120 : vector<8x128xf32>
      %c3_80 = arith.constant 3 : index
      %c1_81 = arith.constant 1 : index
      %c0_82 = arith.constant 0 : index
      %c0_83 = arith.constant 0 : index
      %122 = vector.load %arg1[%c3_80, %c1_81, %c0_82, %c0_83] : memref<5x28x8x128xf32, #tpu.memory_space<vmem>>, vector<1x1x8x128xf32>
      %123 = vector.shape_cast %122 : vector<1x1x8x128xf32> to vector<8x128xf32>
      %124 = arith.mulf %123, %49 : vector<8x128xf32>
      %125 = arith.addf %121, %124 : vector<8x128xf32>
      %c1_84 = arith.constant 1 : index
      %c2_85 = arith.constant 2 : index
      %c0_86 = arith.constant 0 : index
      %c0_87 = arith.constant 0 : index
      %126 = vector.load %arg1[%c1_84, %c2_85, %c0_86, %c0_87] : memref<5x28x8x128xf32, #tpu.memory_space<vmem>>, vector<1x1x8x128xf32>
      %127 = vector.shape_cast %126 : vector<1x1x8x128xf32> to vector<8x128xf32>
      %128 = arith.mulf %127, %54 : vector<8x128xf32>
      %129 = arith.addf %125, %128 : vector<8x128xf32>
      %c2_88 = arith.constant 2 : index
      %c2_89 = arith.constant 2 : index
      %c0_90 = arith.constant 0 : index
      %c0_91 = arith.constant 0 : index
      %130 = vector.load %arg1[%c2_88, %c2_89, %c0_90, %c0_91] : memref<5x28x8x128xf32, #tpu.memory_space<vmem>>, vector<1x1x8x128xf32>
      %131 = vector.shape_cast %130 : vector<1x1x8x128xf32> to vector<8x128xf32>
      %132 = arith.mulf %131, %59 : vector<8x128xf32>
      %133 = arith.addf %129, %132 : vector<8x128xf32>
      %c3_92 = arith.constant 3 : index
      %c2_93 = arith.constant 2 : index
      %c0_94 = arith.constant 0 : index
      %c0_95 = arith.constant 0 : index
      %134 = vector.load %arg1[%c3_92, %c2_93, %c0_94, %c0_95] : memref<5x28x8x128xf32, #tpu.memory_space<vmem>>, vector<1x1x8x128xf32>
      %135 = vector.shape_cast %134 : vector<1x1x8x128xf32> to vector<8x128xf32>
      %136 = arith.mulf %135, %64 : vector<8x128xf32>
      %137 = arith.addf %133, %136 : vector<8x128xf32>
      %138 = arith.maximumf %102, %137 : vector<8x128xf32>
      %c2_96 = arith.constant 2 : index
      %c0_97 = arith.constant 0 : index
      %c0_98 = arith.constant 0 : index
      %c0_99 = arith.constant 0 : index
      %139 = vector.load %arg1[%c2_96, %c0_97, %c0_98, %c0_99] : memref<5x28x8x128xf32, #tpu.memory_space<vmem>>, vector<1x1x8x128xf32>
      %140 = vector.shape_cast %139 : vector<1x1x8x128xf32> to vector<8x128xf32>
      %141 = arith.mulf %140, %24 : vector<8x128xf32>
      %c3_100 = arith.constant 3 : index
      %c0_101 = arith.constant 0 : index
      %c0_102 = arith.constant 0 : index
      %c0_103 = arith.constant 0 : index
      %142 = vector.load %arg1[%c3_100, %c0_101, %c0_102, %c0_103] : memref<5x28x8x128xf32, #tpu.memory_space<vmem>>, vector<1x1x8x128xf32>
      %143 = vector.shape_cast %142 : vector<1x1x8x128xf32> to vector<8x128xf32>
      %144 = arith.mulf %143, %29 : vector<8x128xf32>
      %145 = arith.addf %141, %144 : vector<8x128xf32>
      %c4 = arith.constant 4 : index
      %c0_104 = arith.constant 0 : index
      %c0_105 = arith.constant 0 : index
      %c0_106 = arith.constant 0 : index
      %146 = vector.load %arg1[%c4, %c0_104, %c0_105, %c0_106] : memref<5x28x8x128xf32, #tpu.memory_space<vmem>>, vector<1x1x8x128xf32>
      %147 = vector.shape_cast %146 : vector<1x1x8x128xf32> to vector<8x128xf32>
      %148 = arith.mulf %147, %34 : vector<8x128xf32>
      %149 = arith.addf %145, %148 : vector<8x128xf32>
      %c2_107 = arith.constant 2 : index
      %c1_108 = arith.constant 1 : index
      %c0_109 = arith.constant 0 : index
      %c0_110 = arith.constant 0 : index
      %150 = vector.load %arg1[%c2_107, %c1_108, %c0_109, %c0_110] : memref<5x28x8x128xf32, #tpu.memory_space<vmem>>, vector<1x1x8x128xf32>
      %151 = vector.shape_cast %150 : vector<1x1x8x128xf32> to vector<8x128xf32>
      %152 = arith.mulf %151, %39 : vector<8x128xf32>
      %153 = arith.addf %149, %152 : vector<8x128xf32>
      %c3_111 = arith.constant 3 : index
      %c1_112 = arith.constant 1 : index
      %c0_113 = arith.constant 0 : index
      %c0_114 = arith.constant 0 : index
      %154 = vector.load %arg1[%c3_111, %c1_112, %c0_113, %c0_114] : memref<5x28x8x128xf32, #tpu.memory_space<vmem>>, vector<1x1x8x128xf32>
      %155 = vector.shape_cast %154 : vector<1x1x8x128xf32> to vector<8x128xf32>
      %156 = arith.mulf %155, %44 : vector<8x128xf32>
      %157 = arith.addf %153, %156 : vector<8x128xf32>
      %c4_115 = arith.constant 4 : index
      %c1_116 = arith.constant 1 : index
      %c0_117 = arith.constant 0 : index
      %c0_118 = arith.constant 0 : index
      %158 = vector.load %arg1[%c4_115, %c1_116, %c0_117, %c0_118] : memref<5x28x8x128xf32, #tpu.memory_space<vmem>>, vector<1x1x8x128xf32>
      %159 = vector.shape_cast %158 : vector<1x1x8x128xf32> to vector<8x128xf32>
      %160 = arith.mulf %159, %49 : vector<8x128xf32>
      %161 = arith.addf %157, %160 : vector<8x128xf32>
      %c2_119 = arith.constant 2 : index
      %c2_120 = arith.constant 2 : index
      %c0_121 = arith.constant 0 : index
      %c0_122 = arith.constant 0 : index
      %162 = vector.load %arg1[%c2_119, %c2_120, %c0_121, %c0_122] : memref<5x28x8x128xf32, #tpu.memory_space<vmem>>, vector<1x1x8x128xf32>
      %163 = vector.shape_cast %162 : vector<1x1x8x128xf32> to vector<8x128xf32>
      %164 = arith.mulf %163, %54 : vector<8x128xf32>
      %165 = arith.addf %161, %164 : vector<8x128xf32>
      %c3_123 = arith.constant 3 : index
      %c2_124 = arith.constant 2 : index
      %c0_125 = arith.constant 0 : index
      %c0_126 = arith.constant 0 : index
      %166 = vector.load %arg1[%c3_123, %c2_124, %c0_125, %c0_126] : memref<5x28x8x128xf32, #tpu.memory_space<vmem>>, vector<1x1x8x128xf32>
      %167 = vector.shape_cast %166 : vector<1x1x8x128xf32> to vector<8x128xf32>
      %168 = arith.mulf %167, %59 : vector<8x128xf32>
      %169 = arith.addf %165, %168 : vector<8x128xf32>
      %c4_127 = arith.constant 4 : index
      %c2_128 = arith.constant 2 : index
      %c0_129 = arith.constant 0 : index
      %c0_130 = arith.constant 0 : index
      %170 = vector.load %arg1[%c4_127, %c2_128, %c0_129, %c0_130] : memref<5x28x8x128xf32, #tpu.memory_space<vmem>>, vector<1x1x8x128xf32>
      %171 = vector.shape_cast %170 : vector<1x1x8x128xf32> to vector<8x128xf32>
      %172 = arith.mulf %171, %64 : vector<8x128xf32>
      %173 = arith.addf %169, %172 : vector<8x128xf32>
      %174 = arith.maximumf %138, %173 : vector<8x128xf32>
      %c0_131 = arith.constant 0 : index
      %c1_132 = arith.constant 1 : index
      %c0_133 = arith.constant 0 : index
      %c0_134 = arith.constant 0 : index
      %175 = vector.load %arg1[%c0_131, %c1_132, %c0_133, %c0_134] : memref<5x28x8x128xf32, #tpu.memory_space<vmem>>, vector<1x1x8x128xf32>
      %176 = vector.shape_cast %175 : vector<1x1x8x128xf32> to vector<8x128xf32>
      %177 = arith.mulf %176, %24 : vector<8x128xf32>
      %c1_135 = arith.constant 1 : index
      %c1_136 = arith.constant 1 : index
      %c0_137 = arith.constant 0 : index
      %c0_138 = arith.constant 0 : index
      %178 = vector.load %arg1[%c1_135, %c1_136, %c0_137, %c0_138] : memref<5x28x8x128xf32, #tpu.memory_space<vmem>>, vector<1x1x8x128xf32>
      %179 = vector.shape_cast %178 : vector<1x1x8x128xf32> to vector<8x128xf32>
      %180 = arith.mulf %179, %29 : vector<8x128xf32>
      %181 = arith.addf %177, %180 : vector<8x128xf32>
      %c2_139 = arith.constant 2 : index
      %c1_140 = arith.constant 1 : index
      %c0_141 = arith.constant 0 : index
      %c0_142 = arith.constant 0 : index
      %182 = vector.load %arg1[%c2_139, %c1_140, %c0_141, %c0_142] : memref<5x28x8x128xf32, #tpu.memory_space<vmem>>, vector<1x1x8x128xf32>
      %183 = vector.shape_cast %182 : vector<1x1x8x128xf32> to vector<8x128xf32>
      %184 = arith.mulf %183, %34 : vector<8x128xf32>
      %185 = arith.addf %181, %184 : vector<8x128xf32>
      %c0_143 = arith.constant 0 : index
      %c2_144 = arith.constant 2 : index
      %c0_145 = arith.constant 0 : index
      %c0_146 = arith.constant 0 : index
      %186 = vector.load %arg1[%c0_143, %c2_144, %c0_145, %c0_146] : memref<5x28x8x128xf32, #tpu.memory_space<vmem>>, vector<1x1x8x128xf32>
      %187 = vector.shape_cast %186 : vector<1x1x8x128xf32> to vector<8x128xf32>
      %188 = arith.mulf %187, %39 : vector<8x128xf32>
      %189 = arith.addf %185, %188 : vector<8x128xf32>
      %c1_147 = arith.constant 1 : index
      %c2_148 = arith.constant 2 : index
      %c0_149 = arith.constant 0 : index
      %c0_150 = arith.constant 0 : index
      %190 = vector.load %arg1[%c1_147, %c2_148, %c0_149, %c0_150] : memref<5x28x8x128xf32, #tpu.memory_space<vmem>>, vector<1x1x8x128xf32>
      %191 = vector.shape_cast %190 : vector<1x1x8x128xf32> to vector<8x128xf32>
      %192 = arith.mulf %191, %44 : vector<8x128xf32>
      %193 = arith.addf %189, %192 : vector<8x128xf32>
      %c2_151 = arith.constant 2 : index
      %c2_152 = arith.constant 2 : index
      %c0_153 = arith.constant 0 : index
      %c0_154 = arith.constant 0 : index
      %194 = vector.load %arg1[%c2_151, %c2_152, %c0_153, %c0_154] : memref<5x28x8x128xf32, #tpu.memory_space<vmem>>, vector<1x1x8x128xf32>
      %195 = vector.shape_cast %194 : vector<1x1x8x128xf32> to vector<8x128xf32>
      %196 = arith.mulf %195, %49 : vector<8x128xf32>
      %197 = arith.addf %193, %196 : vector<8x128xf32>
      %c0_155 = arith.constant 0 : index
      %c3_156 = arith.constant 3 : index
      %c0_157 = arith.constant 0 : index
      %c0_158 = arith.constant 0 : index
      %198 = vector.load %arg1[%c0_155, %c3_156, %c0_157, %c0_158] : memref<5x28x8x128xf32, #tpu.memory_space<vmem>>, vector<1x1x8x128xf32>
      %199 = vector.shape_cast %198 : vector<1x1x8x128xf32> to vector<8x128xf32>
      %200 = arith.mulf %199, %54 : vector<8x128xf32>
      %201 = arith.addf %197, %200 : vector<8x128xf32>
      %c1_159 = arith.constant 1 : index
      %c3_160 = arith.constant 3 : index
      %c0_161 = arith.constant 0 : index
      %c0_162 = arith.constant 0 : index
      %202 = vector.load %arg1[%c1_159, %c3_160, %c0_161, %c0_162] : memref<5x28x8x128xf32, #tpu.memory_space<vmem>>, vector<1x1x8x128xf32>
      %203 = vector.shape_cast %202 : vector<1x1x8x128xf32> to vector<8x128xf32>
      %204 = arith.mulf %203, %59 : vector<8x128xf32>
      %205 = arith.addf %201, %204 : vector<8x128xf32>
      %c2_163 = arith.constant 2 : index
      %c3_164 = arith.constant 3 : index
      %c0_165 = arith.constant 0 : index
      %c0_166 = arith.constant 0 : index
      %206 = vector.load %arg1[%c2_163, %c3_164, %c0_165, %c0_166] : memref<5x28x8x128xf32, #tpu.memory_space<vmem>>, vector<1x1x8x128xf32>
      %207 = vector.shape_cast %206 : vector<1x1x8x128xf32> to vector<8x128xf32>
      %208 = arith.mulf %207, %64 : vector<8x128xf32>
      %209 = arith.addf %205, %208 : vector<8x128xf32>
      %210 = arith.maximumf %174, %209 : vector<8x128xf32>
      %c1_167 = arith.constant 1 : index
      %c1_168 = arith.constant 1 : index
      %c0_169 = arith.constant 0 : index
      %c0_170 = arith.constant 0 : index
      %211 = vector.load %arg1[%c1_167, %c1_168, %c0_169, %c0_170] : memref<5x28x8x128xf32, #tpu.memory_space<vmem>>, vector<1x1x8x128xf32>
      %212 = vector.shape_cast %211 : vector<1x1x8x128xf32> to vector<8x128xf32>
      %213 = arith.mulf %212, %24 : vector<8x128xf32>
      %c2_171 = arith.constant 2 : index
      %c1_172 = arith.constant 1 : index
      %c0_173 = arith.constant 0 : index
      %c0_174 = arith.constant 0 : index
      %214 = vector.load %arg1[%c2_171, %c1_172, %c0_173, %c0_174] : memref<5x28x8x128xf32, #tpu.memory_space<vmem>>, vector<1x1x8x128xf32>
      %215 = vector.shape_cast %214 : vector<1x1x8x128xf32> to vector<8x128xf32>
      %216 = arith.mulf %215, %29 : vector<8x128xf32>
      %217 = arith.addf %213, %216 : vector<8x128xf32>
      %c3_175 = arith.constant 3 : index
      %c1_176 = arith.constant 1 : index
      %c0_177 = arith.constant 0 : index
      %c0_178 = arith.constant 0 : index
      %218 = vector.load %arg1[%c3_175, %c1_176, %c0_177, %c0_178] : memref<5x28x8x128xf32, #tpu.memory_space<vmem>>, vector<1x1x8x128xf32>
      %219 = vector.shape_cast %218 : vector<1x1x8x128xf32> to vector<8x128xf32>
      %220 = arith.mulf %219, %34 : vector<8x128xf32>
      %221 = arith.addf %217, %220 : vector<8x128xf32>
      %c1_179 = arith.constant 1 : index
      %c2_180 = arith.constant 2 : index
      %c0_181 = arith.constant 0 : index
      %c0_182 = arith.constant 0 : index
      %222 = vector.load %arg1[%c1_179, %c2_180, %c0_181, %c0_182] : memref<5x28x8x128xf32, #tpu.memory_space<vmem>>, vector<1x1x8x128xf32>
      %223 = vector.shape_cast %222 : vector<1x1x8x128xf32> to vector<8x128xf32>
      %224 = arith.mulf %223, %39 : vector<8x128xf32>
      %225 = arith.addf %221, %224 : vector<8x128xf32>
      %c2_183 = arith.constant 2 : index
      %c2_184 = arith.constant 2 : index
      %c0_185 = arith.constant 0 : index
      %c0_186 = arith.constant 0 : index
      %226 = vector.load %arg1[%c2_183, %c2_184, %c0_185, %c0_186] : memref<5x28x8x128xf32, #tpu.memory_space<vmem>>, vector<1x1x8x128xf32>
      %227 = vector.shape_cast %226 : vector<1x1x8x128xf32> to vector<8x128xf32>
      %228 = arith.mulf %227, %44 : vector<8x128xf32>
      %229 = arith.addf %225, %228 : vector<8x128xf32>
      %c3_187 = arith.constant 3 : index
      %c2_188 = arith.constant 2 : index
      %c0_189 = arith.constant 0 : index
      %c0_190 = arith.constant 0 : index
      %230 = vector.load %arg1[%c3_187, %c2_188, %c0_189, %c0_190] : memref<5x28x8x128xf32, #tpu.memory_space<vmem>>, vector<1x1x8x128xf32>
      %231 = vector.shape_cast %230 : vector<1x1x8x128xf32> to vector<8x128xf32>
      %232 = arith.mulf %231, %49 : vector<8x128xf32>
      %233 = arith.addf %229, %232 : vector<8x128xf32>
      %c1_191 = arith.constant 1 : index
      %c3_192 = arith.constant 3 : index
      %c0_193 = arith.constant 0 : index
      %c0_194 = arith.constant 0 : index
      %234 = vector.load %arg1[%c1_191, %c3_192, %c0_193, %c0_194] : memref<5x28x8x128xf32, #tpu.memory_space<vmem>>, vector<1x1x8x128xf32>
      %235 = vector.shape_cast %234 : vector<1x1x8x128xf32> to vector<8x128xf32>
      %236 = arith.mulf %235, %54 : vector<8x128xf32>
      %237 = arith.addf %233, %236 : vector<8x128xf32>
      %c2_195 = arith.constant 2 : index
      %c3_196 = arith.constant 3 : index
      %c0_197 = arith.constant 0 : index
      %c0_198 = arith.constant 0 : index
      %238 = vector.load %arg1[%c2_195, %c3_196, %c0_197, %c0_198] : memref<5x28x8x128xf32, #tpu.memory_space<vmem>>, vector<1x1x8x128xf32>
      %239 = vector.shape_cast %238 : vector<1x1x8x128xf32> to vector<8x128xf32>
      %240 = arith.mulf %239, %59 : vector<8x128xf32>
      %241 = arith.addf %237, %240 : vector<8x128xf32>
      %c3_199 = arith.constant 3 : index
      %c3_200 = arith.constant 3 : index
      %c0_201 = arith.constant 0 : index
      %c0_202 = arith.constant 0 : index
      %242 = vector.load %arg1[%c3_199, %c3_200, %c0_201, %c0_202] : memref<5x28x8x128xf32, #tpu.memory_space<vmem>>, vector<1x1x8x128xf32>
      %243 = vector.shape_cast %242 : vector<1x1x8x128xf32> to vector<8x128xf32>
      %244 = arith.mulf %243, %64 : vector<8x128xf32>
      %245 = arith.addf %241, %244 : vector<8x128xf32>
      %246 = arith.maximumf %210, %245 : vector<8x128xf32>
      %c2_203 = arith.constant 2 : index
      %c1_204 = arith.constant 1 : index
      %c0_205 = arith.constant 0 : index
      %c0_206 = arith.constant 0 : index
      %247 = vector.load %arg1[%c2_203, %c1_204, %c0_205, %c0_206] : memref<5x28x8x128xf32, #tpu.memory_space<vmem>>, vector<1x1x8x128xf32>
      %248 = vector.shape_cast %247 : vector<1x1x8x128xf32> to vector<8x128xf32>
      %249 = arith.mulf %248, %24 : vector<8x128xf32>
      %c3_207 = arith.constant 3 : index
      %c1_208 = arith.constant 1 : index
      %c0_209 = arith.constant 0 : index
      %c0_210 = arith.constant 0 : index
      %250 = vector.load %arg1[%c3_207, %c1_208, %c0_209, %c0_210] : memref<5x28x8x128xf32, #tpu.memory_space<vmem>>, vector<1x1x8x128xf32>
      %251 = vector.shape_cast %250 : vector<1x1x8x128xf32> to vector<8x128xf32>
      %252 = arith.mulf %251, %29 : vector<8x128xf32>
      %253 = arith.addf %249, %252 : vector<8x128xf32>
      %c4_211 = arith.constant 4 : index
      %c1_212 = arith.constant 1 : index
      %c0_213 = arith.constant 0 : index
      %c0_214 = arith.constant 0 : index
      %254 = vector.load %arg1[%c4_211, %c1_212, %c0_213, %c0_214] : memref<5x28x8x128xf32, #tpu.memory_space<vmem>>, vector<1x1x8x128xf32>
      %255 = vector.shape_cast %254 : vector<1x1x8x128xf32> to vector<8x128xf32>
      %256 = arith.mulf %255, %34 : vector<8x128xf32>
      %257 = arith.addf %253, %256 : vector<8x128xf32>
      %c2_215 = arith.constant 2 : index
      %c2_216 = arith.constant 2 : index
      %c0_217 = arith.constant 0 : index
      %c0_218 = arith.constant 0 : index
      %258 = vector.load %arg1[%c2_215, %c2_216, %c0_217, %c0_218] : memref<5x28x8x128xf32, #tpu.memory_space<vmem>>, vector<1x1x8x128xf32>
      %259 = vector.shape_cast %258 : vector<1x1x8x128xf32> to vector<8x128xf32>
      %260 = arith.mulf %259, %39 : vector<8x128xf32>
      %261 = arith.addf %257, %260 : vector<8x128xf32>
      %c3_219 = arith.constant 3 : index
      %c2_220 = arith.constant 2 : index
      %c0_221 = arith.constant 0 : index
      %c0_222 = arith.constant 0 : index
      %262 = vector.load %arg1[%c3_219, %c2_220, %c0_221, %c0_222] : memref<5x28x8x128xf32, #tpu.memory_space<vmem>>, vector<1x1x8x128xf32>
      %263 = vector.shape_cast %262 : vector<1x1x8x128xf32> to vector<8x128xf32>
      %264 = arith.mulf %263, %44 : vector<8x128xf32>
      %265 = arith.addf %261, %264 : vector<8x128xf32>
      %c4_223 = arith.constant 4 : index
      %c2_224 = arith.constant 2 : index
      %c0_225 = arith.constant 0 : index
      %c0_226 = arith.constant 0 : index
      %266 = vector.load %arg1[%c4_223, %c2_224, %c0_225, %c0_226] : memref<5x28x8x128xf32, #tpu.memory_space<vmem>>, vector<1x1x8x128xf32>
      %267 = vector.shape_cast %266 : vector<1x1x8x128xf32> to vector<8x128xf32>
      %268 = arith.mulf %267, %49 : vector<8x128xf32>
      %269 = arith.addf %265, %268 : vector<8x128xf32>
      %c2_227 = arith.constant 2 : index
      %c3_228 = arith.constant 3 : index
      %c0_229 = arith.constant 0 : index
      %c0_230 = arith.constant 0 : index
      %270 = vector.load %arg1[%c2_227, %c3_228, %c0_229, %c0_230] : memref<5x28x8x128xf32, #tpu.memory_space<vmem>>, vector<1x1x8x128xf32>
      %271 = vector.shape_cast %270 : vector<1x1x8x128xf32> to vector<8x128xf32>
      %272 = arith.mulf %271, %54 : vector<8x128xf32>
      %273 = arith.addf %269, %272 : vector<8x128xf32>
      %c3_231 = arith.constant 3 : index
      %c3_232 = arith.constant 3 : index
      %c0_233 = arith.constant 0 : index
      %c0_234 = arith.constant 0 : index
      %274 = vector.load %arg1[%c3_231, %c3_232, %c0_233, %c0_234] : memref<5x28x8x128xf32, #tpu.memory_space<vmem>>, vector<1x1x8x128xf32>
      %275 = vector.shape_cast %274 : vector<1x1x8x128xf32> to vector<8x128xf32>
      %276 = arith.mulf %275, %59 : vector<8x128xf32>
      %277 = arith.addf %273, %276 : vector<8x128xf32>
      %c4_235 = arith.constant 4 : index
      %c3_236 = arith.constant 3 : index
      %c0_237 = arith.constant 0 : index
      %c0_238 = arith.constant 0 : index
      %278 = vector.load %arg1[%c4_235, %c3_236, %c0_237, %c0_238] : memref<5x28x8x128xf32, #tpu.memory_space<vmem>>, vector<1x1x8x128xf32>
      %279 = vector.shape_cast %278 : vector<1x1x8x128xf32> to vector<8x128xf32>
      %280 = arith.mulf %279, %64 : vector<8x128xf32>
      %281 = arith.addf %277, %280 : vector<8x128xf32>
      %282 = arith.maximumf %246, %281 : vector<8x128xf32>
      %c0_239 = arith.constant 0 : index
      %c2_240 = arith.constant 2 : index
      %c0_241 = arith.constant 0 : index
      %c0_242 = arith.constant 0 : index
      %283 = vector.load %arg1[%c0_239, %c2_240, %c0_241, %c0_242] : memref<5x28x8x128xf32, #tpu.memory_space<vmem>>, vector<1x1x8x128xf32>
      %284 = vector.shape_cast %283 : vector<1x1x8x128xf32> to vector<8x128xf32>
      %285 = arith.mulf %284, %24 : vector<8x128xf32>
      %c1_243 = arith.constant 1 : index
      %c2_244 = arith.constant 2 : index
      %c0_245 = arith.constant 0 : index
      %c0_246 = arith.constant 0 : index
      %286 = vector.load %arg1[%c1_243, %c2_244, %c0_245, %c0_246] : memref<5x28x8x128xf32, #tpu.memory_space<vmem>>, vector<1x1x8x128xf32>
      %287 = vector.shape_cast %286 : vector<1x1x8x128xf32> to vector<8x128xf32>
      %288 = arith.mulf %287, %29 : vector<8x128xf32>
      %289 = arith.addf %285, %288 : vector<8x128xf32>
      %c2_247 = arith.constant 2 : index
      %c2_248 = arith.constant 2 : index
      %c0_249 = arith.constant 0 : index
      %c0_250 = arith.constant 0 : index
      %290 = vector.load %arg1[%c2_247, %c2_248, %c0_249, %c0_250] : memref<5x28x8x128xf32, #tpu.memory_space<vmem>>, vector<1x1x8x128xf32>
      %291 = vector.shape_cast %290 : vector<1x1x8x128xf32> to vector<8x128xf32>
      %292 = arith.mulf %291, %34 : vector<8x128xf32>
      %293 = arith.addf %289, %292 : vector<8x128xf32>
      %c0_251 = arith.constant 0 : index
      %c3_252 = arith.constant 3 : index
      %c0_253 = arith.constant 0 : index
      %c0_254 = arith.constant 0 : index
      %294 = vector.load %arg1[%c0_251, %c3_252, %c0_253, %c0_254] : memref<5x28x8x128xf32, #tpu.memory_space<vmem>>, vector<1x1x8x128xf32>
      %295 = vector.shape_cast %294 : vector<1x1x8x128xf32> to vector<8x128xf32>
      %296 = arith.mulf %295, %39 : vector<8x128xf32>
      %297 = arith.addf %293, %296 : vector<8x128xf32>
      %c1_255 = arith.constant 1 : index
      %c3_256 = arith.constant 3 : index
      %c0_257 = arith.constant 0 : index
      %c0_258 = arith.constant 0 : index
      %298 = vector.load %arg1[%c1_255, %c3_256, %c0_257, %c0_258] : memref<5x28x8x128xf32, #tpu.memory_space<vmem>>, vector<1x1x8x128xf32>
      %299 = vector.shape_cast %298 : vector<1x1x8x128xf32> to vector<8x128xf32>
      %300 = arith.mulf %299, %44 : vector<8x128xf32>
      %301 = arith.addf %297, %300 : vector<8x128xf32>
      %c2_259 = arith.constant 2 : index
      %c3_260 = arith.constant 3 : index
      %c0_261 = arith.constant 0 : index
      %c0_262 = arith.constant 0 : index
      %302 = vector.load %arg1[%c2_259, %c3_260, %c0_261, %c0_262] : memref<5x28x8x128xf32, #tpu.memory_space<vmem>>, vector<1x1x8x128xf32>
      %303 = vector.shape_cast %302 : vector<1x1x8x128xf32> to vector<8x128xf32>
      %304 = arith.mulf %303, %49 : vector<8x128xf32>
      %305 = arith.addf %301, %304 : vector<8x128xf32>
      %c0_263 = arith.constant 0 : index
      %c4_264 = arith.constant 4 : index
      %c0_265 = arith.constant 0 : index
      %c0_266 = arith.constant 0 : index
      %306 = vector.load %arg1[%c0_263, %c4_264, %c0_265, %c0_266] : memref<5x28x8x128xf32, #tpu.memory_space<vmem>>, vector<1x1x8x128xf32>
      %307 = vector.shape_cast %306 : vector<1x1x8x128xf32> to vector<8x128xf32>
      %308 = arith.mulf %307, %54 : vector<8x128xf32>
      %309 = arith.addf %305, %308 : vector<8x128xf32>
      %c1_267 = arith.constant 1 : index
      %c4_268 = arith.constant 4 : index
      %c0_269 = arith.constant 0 : index
      %c0_270 = arith.constant 0 : index
      %310 = vector.load %arg1[%c1_267, %c4_268, %c0_269, %c0_270] : memref<5x28x8x128xf32, #tpu.memory_space<vmem>>, vector<1x1x8x128xf32>
      %311 = vector.shape_cast %310 : vector<1x1x8x128xf32> to vector<8x128xf32>
      %312 = arith.mulf %311, %59 : vector<8x128xf32>
      %313 = arith.addf %309, %312 : vector<8x128xf32>
      %c2_271 = arith.constant 2 : index
      %c4_272 = arith.constant 4 : index
      %c0_273 = arith.constant 0 : index
      %c0_274 = arith.constant 0 : index
      %314 = vector.load %arg1[%c2_271, %c4_272, %c0_273, %c0_274] : memref<5x28x8x128xf32, #tpu.memory_space<vmem>>, vector<1x1x8x128xf32>
      %315 = vector.shape_cast %314 : vector<1x1x8x128xf32> to vector<8x128xf32>
      %316 = arith.mulf %315, %64 : vector<8x128xf32>
      %317 = arith.addf %313, %316 : vector<8x128xf32>
      %318 = arith.maximumf %282, %317 : vector<8x128xf32>
      %c1_275 = arith.constant 1 : index
      %c2_276 = arith.constant 2 : index
      %c0_277 = arith.constant 0 : index
      %c0_278 = arith.constant 0 : index
      %319 = vector.load %arg1[%c1_275, %c2_276, %c0_277, %c0_278] : memref<5x28x8x128xf32, #tpu.memory_space<vmem>>, vector<1x1x8x128xf32>
      %320 = vector.shape_cast %319 : vector<1x1x8x128xf32> to vector<8x128xf32>
      %321 = arith.mulf %320, %24 : vector<8x128xf32>
      %c2_279 = arith.constant 2 : index
      %c2_280 = arith.constant 2 : index
      %c0_281 = arith.constant 0 : index
      %c0_282 = arith.constant 0 : index
      %322 = vector.load %arg1[%c2_279, %c2_280, %c0_281, %c0_282] : memref<5x28x8x128xf32, #tpu.memory_space<vmem>>, vector<1x1x8x128xf32>
      %323 = vector.shape_cast %322 : vector<1x1x8x128xf32> to vector<8x128xf32>
      %324 = arith.mulf %323, %29 : vector<8x128xf32>
      %325 = arith.addf %321, %324 : vector<8x128xf32>
      %c3_283 = arith.constant 3 : index
      %c2_284 = arith.constant 2 : index
      %c0_285 = arith.constant 0 : index
      %c0_286 = arith.constant 0 : index
      %326 = vector.load %arg1[%c3_283, %c2_284, %c0_285, %c0_286] : memref<5x28x8x128xf32, #tpu.memory_space<vmem>>, vector<1x1x8x128xf32>
      %327 = vector.shape_cast %326 : vector<1x1x8x128xf32> to vector<8x128xf32>
      %328 = arith.mulf %327, %34 : vector<8x128xf32>
      %329 = arith.addf %325, %328 : vector<8x128xf32>
      %c1_287 = arith.constant 1 : index
      %c3_288 = arith.constant 3 : index
      %c0_289 = arith.constant 0 : index
      %c0_290 = arith.constant 0 : index
      %330 = vector.load %arg1[%c1_287, %c3_288, %c0_289, %c0_290] : memref<5x28x8x128xf32, #tpu.memory_space<vmem>>, vector<1x1x8x128xf32>
      %331 = vector.shape_cast %330 : vector<1x1x8x128xf32> to vector<8x128xf32>
      %332 = arith.mulf %331, %39 : vector<8x128xf32>
      %333 = arith.addf %329, %332 : vector<8x128xf32>
      %c2_291 = arith.constant 2 : index
      %c3_292 = arith.constant 3 : index
      %c0_293 = arith.constant 0 : index
      %c0_294 = arith.constant 0 : index
      %334 = vector.load %arg1[%c2_291, %c3_292, %c0_293, %c0_294] : memref<5x28x8x128xf32, #tpu.memory_space<vmem>>, vector<1x1x8x128xf32>
      %335 = vector.shape_cast %334 : vector<1x1x8x128xf32> to vector<8x128xf32>
      %336 = arith.mulf %335, %44 : vector<8x128xf32>
      %337 = arith.addf %333, %336 : vector<8x128xf32>
      %c3_295 = arith.constant 3 : index
      %c3_296 = arith.constant 3 : index
      %c0_297 = arith.constant 0 : index
      %c0_298 = arith.constant 0 : index
      %338 = vector.load %arg1[%c3_295, %c3_296, %c0_297, %c0_298] : memref<5x28x8x128xf32, #tpu.memory_space<vmem>>, vector<1x1x8x128xf32>
      %339 = vector.shape_cast %338 : vector<1x1x8x128xf32> to vector<8x128xf32>
      %340 = arith.mulf %339, %49 : vector<8x128xf32>
      %341 = arith.addf %337, %340 : vector<8x128xf32>
      %c1_299 = arith.constant 1 : index
      %c4_300 = arith.constant 4 : index
      %c0_301 = arith.constant 0 : index
      %c0_302 = arith.constant 0 : index
      %342 = vector.load %arg1[%c1_299, %c4_300, %c0_301, %c0_302] : memref<5x28x8x128xf32, #tpu.memory_space<vmem>>, vector<1x1x8x128xf32>
      %343 = vector.shape_cast %342 : vector<1x1x8x128xf32> to vector<8x128xf32>
      %344 = arith.mulf %343, %54 : vector<8x128xf32>
      %345 = arith.addf %341, %344 : vector<8x128xf32>
      %c2_303 = arith.constant 2 : index
      %c4_304 = arith.constant 4 : index
      %c0_305 = arith.constant 0 : index
      %c0_306 = arith.constant 0 : index
      %346 = vector.load %arg1[%c2_303, %c4_304, %c0_305, %c0_306] : memref<5x28x8x128xf32, #tpu.memory_space<vmem>>, vector<1x1x8x128xf32>
      %347 = vector.shape_cast %346 : vector<1x1x8x128xf32> to vector<8x128xf32>
      %348 = arith.mulf %347, %59 : vector<8x128xf32>
      %349 = arith.addf %345, %348 : vector<8x128xf32>
      %c3_307 = arith.constant 3 : index
      %c4_308 = arith.constant 4 : index
      %c0_309 = arith.constant 0 : index
      %c0_310 = arith.constant 0 : index
      %350 = vector.load %arg1[%c3_307, %c4_308, %c0_309, %c0_310] : memref<5x28x8x128xf32, #tpu.memory_space<vmem>>, vector<1x1x8x128xf32>
      %351 = vector.shape_cast %350 : vector<1x1x8x128xf32> to vector<8x128xf32>
      %352 = arith.mulf %351, %64 : vector<8x128xf32>
      %353 = arith.addf %349, %352 : vector<8x128xf32>
      %354 = arith.maximumf %318, %353 : vector<8x128xf32>
      %c2_311 = arith.constant 2 : index
      %c2_312 = arith.constant 2 : index
      %c0_313 = arith.constant 0 : index
      %c0_314 = arith.constant 0 : index
      %355 = vector.load %arg1[%c2_311, %c2_312, %c0_313, %c0_314] : memref<5x28x8x128xf32, #tpu.memory_space<vmem>>, vector<1x1x8x128xf32>
      %356 = vector.shape_cast %355 : vector<1x1x8x128xf32> to vector<8x128xf32>
      %357 = arith.mulf %356, %24 : vector<8x128xf32>
      %c3_315 = arith.constant 3 : index
      %c2_316 = arith.constant 2 : index
      %c0_317 = arith.constant 0 : index
      %c0_318 = arith.constant 0 : index
      %358 = vector.load %arg1[%c3_315, %c2_316, %c0_317, %c0_318] : memref<5x28x8x128xf32, #tpu.memory_space<vmem>>, vector<1x1x8x128xf32>
      %359 = vector.shape_cast %358 : vector<1x1x8x128xf32> to vector<8x128xf32>
      %360 = arith.mulf %359, %29 : vector<8x128xf32>
      %361 = arith.addf %357, %360 : vector<8x128xf32>
      %c4_319 = arith.constant 4 : index
      %c2_320 = arith.constant 2 : index
      %c0_321 = arith.constant 0 : index
      %c0_322 = arith.constant 0 : index
      %362 = vector.load %arg1[%c4_319, %c2_320, %c0_321, %c0_322] : memref<5x28x8x128xf32, #tpu.memory_space<vmem>>, vector<1x1x8x128xf32>
      %363 = vector.shape_cast %362 : vector<1x1x8x128xf32> to vector<8x128xf32>
      %364 = arith.mulf %363, %34 : vector<8x128xf32>
      %365 = arith.addf %361, %364 : vector<8x128xf32>
      %c2_323 = arith.constant 2 : index
      %c3_324 = arith.constant 3 : index
      %c0_325 = arith.constant 0 : index
      %c0_326 = arith.constant 0 : index
      %366 = vector.load %arg1[%c2_323, %c3_324, %c0_325, %c0_326] : memref<5x28x8x128xf32, #tpu.memory_space<vmem>>, vector<1x1x8x128xf32>
      %367 = vector.shape_cast %366 : vector<1x1x8x128xf32> to vector<8x128xf32>
      %368 = arith.mulf %367, %39 : vector<8x128xf32>
      %369 = arith.addf %365, %368 : vector<8x128xf32>
      %c3_327 = arith.constant 3 : index
      %c3_328 = arith.constant 3 : index
      %c0_329 = arith.constant 0 : index
      %c0_330 = arith.constant 0 : index
      %370 = vector.load %arg1[%c3_327, %c3_328, %c0_329, %c0_330] : memref<5x28x8x128xf32, #tpu.memory_space<vmem>>, vector<1x1x8x128xf32>
      %371 = vector.shape_cast %370 : vector<1x1x8x128xf32> to vector<8x128xf32>
      %372 = arith.mulf %371, %44 : vector<8x128xf32>
      %373 = arith.addf %369, %372 : vector<8x128xf32>
      %c4_331 = arith.constant 4 : index
      %c3_332 = arith.constant 3 : index
      %c0_333 = arith.constant 0 : index
      %c0_334 = arith.constant 0 : index
      %374 = vector.load %arg1[%c4_331, %c3_332, %c0_333, %c0_334] : memref<5x28x8x128xf32, #tpu.memory_space<vmem>>, vector<1x1x8x128xf32>
      %375 = vector.shape_cast %374 : vector<1x1x8x128xf32> to vector<8x128xf32>
      %376 = arith.mulf %375, %49 : vector<8x128xf32>
      %377 = arith.addf %373, %376 : vector<8x128xf32>
      %c2_335 = arith.constant 2 : index
      %c4_336 = arith.constant 4 : index
      %c0_337 = arith.constant 0 : index
      %c0_338 = arith.constant 0 : index
      %378 = vector.load %arg1[%c2_335, %c4_336, %c0_337, %c0_338] : memref<5x28x8x128xf32, #tpu.memory_space<vmem>>, vector<1x1x8x128xf32>
      %379 = vector.shape_cast %378 : vector<1x1x8x128xf32> to vector<8x128xf32>
      %380 = arith.mulf %379, %54 : vector<8x128xf32>
      %381 = arith.addf %377, %380 : vector<8x128xf32>
      %c3_339 = arith.constant 3 : index
      %c4_340 = arith.constant 4 : index
      %c0_341 = arith.constant 0 : index
      %c0_342 = arith.constant 0 : index
      %382 = vector.load %arg1[%c3_339, %c4_340, %c0_341, %c0_342] : memref<5x28x8x128xf32, #tpu.memory_space<vmem>>, vector<1x1x8x128xf32>
      %383 = vector.shape_cast %382 : vector<1x1x8x128xf32> to vector<8x128xf32>
      %384 = arith.mulf %383, %59 : vector<8x128xf32>
      %385 = arith.addf %381, %384 : vector<8x128xf32>
      %c4_343 = arith.constant 4 : index
      %c4_344 = arith.constant 4 : index
      %c0_345 = arith.constant 0 : index
      %c0_346 = arith.constant 0 : index
      %386 = vector.load %arg1[%c4_343, %c4_344, %c0_345, %c0_346] : memref<5x28x8x128xf32, #tpu.memory_space<vmem>>, vector<1x1x8x128xf32>
      %387 = vector.shape_cast %386 : vector<1x1x8x128xf32> to vector<8x128xf32>
      %388 = arith.mulf %387, %64 : vector<8x128xf32>
      %389 = arith.addf %385, %388 : vector<8x128xf32>
      %390 = arith.maximumf %354, %389 : vector<8x128xf32>
      %391 = arith.addf %390, %67 : vector<8x128xf32>
      %392 = arith.index_cast %19 : i32 to index
      %c0_347 = arith.constant 0 : index
      %c0_348 = arith.constant 0 : index
      %393 = vector.load %arg9[%392, %c0_347, %c0_348] : memref<10x64x128xf32, #tpu.memory_space<vmem>>, vector<1x8x128xf32>
      %394 = vector.shape_cast %393 : vector<1x8x128xf32> to vector<8x128xf32>
      %395 = vector.shape_cast %391 : vector<8x128xf32> to vector<1x8x128xf32>
      tpu.vector_store %arg9[%392, %c0_347, %c0_348], %395 {strides = array<i32>} : memref<10x64x128xf32, #tpu.memory_space<vmem>>, vector<1x8x128xf32>,
      %c0_349 = arith.constant 0 : index
      %c3_350 = arith.constant 3 : index
      %c0_351 = arith.constant 0 : index
      %c0_352 = arith.constant 0 : index
      %396 = vector.load %arg1[%c0_349, %c3_350, %c0_351, %c0_352] : memref<5x28x8x128xf32, #tpu.memory_space<vmem>>, vector<1x1x8x128xf32>
      %397 = vector.shape_cast %396 : vector<1x1x8x128xf32> to vector<8x128xf32>
      %398 = arith.mulf %397, %24 : vector<8x128xf32>
      %c1_353 = arith.constant 1 : index
      %c3_354 = arith.constant 3 : index
      %c0_355 = arith.constant 0 : index
      %c0_356 = arith.constant 0 : index
      %399 = vector.load %arg1[%c1_353, %c3_354, %c0_355, %c0_356] : memref<5x28x8x128xf32, #tpu.memory_space<vmem>>, vector<1x1x8x128xf32>
      %400 = vector.shape_cast %399 : vector<1x1x8x128xf32> to vector<8x128xf32>
      %401 = arith.mulf %400, %29 : vector<8x128xf32>
      %402 = arith.addf %398, %401 : vector<8x128xf32>
      %c2_357 = arith.constant 2 : index
      %c3_358 = arith.constant 3 : index
      %c0_359 = arith.constant 0 : index
      %c0_360 = arith.constant 0 : index
      %403 = vector.load %arg1[%c2_357, %c3_358, %c0_359, %c0_360] : memref<5x28x8x128xf32, #tpu.memory_space<vmem>>, vector<1x1x8x128xf32>
      %404 = vector.shape_cast %403 : vector<1x1x8x128xf32> to vector<8x128xf32>
      %405 = arith.mulf %404, %34 : vector<8x128xf32>
      %406 = arith.addf %402, %405 : vector<8x128xf32>
      %c0_361 = arith.constant 0 : index
      %c4_362 = arith.constant 4 : index
      %c0_363 = arith.constant 0 : index
      %c0_364 = arith.constant 0 : index
      %407 = vector.load %arg1[%c0_361, %c4_362, %c0_363, %c0_364] : memref<5x28x8x128xf32, #tpu.memory_space<vmem>>, vector<1x1x8x128xf32>
      %408 = vector.shape_cast %407 : vector<1x1x8x128xf32> to vector<8x128xf32>
      %409 = arith.mulf %408, %39 : vector<8x128xf32>
      %410 = arith.addf %406, %409 : vector<8x128xf32>
      %c1_365 = arith.constant 1 : index
      %c4_366 = arith.constant 4 : index
      %c0_367 = arith.constant 0 : index
      %c0_368 = arith.constant 0 : index
      %411 = vector.load %arg1[%c1_365, %c4_366, %c0_367, %c0_368] : memref<5x28x8x128xf32, #tpu.memory_space<vmem>>, vector<1x1x8x128xf32>
      %412 = vector.shape_cast %411 : vector<1x1x8x128xf32> to vector<8x128xf32>
      %413 = arith.mulf %412, %44 : vector<8x128xf32>
      %414 = arith.addf %410, %413 : vector<8x128xf32>
      %c2_369 = arith.constant 2 : index
      %c4_370 = arith.constant 4 : index
      %c0_371 = arith.constant 0 : index
      %c0_372 = arith.constant 0 : index
      %415 = vector.load %arg1[%c2_369, %c4_370, %c0_371, %c0_372] : memref<5x28x8x128xf32, #tpu.memory_space<vmem>>, vector<1x1x8x128xf32>
      %416 = vector.shape_cast %415 : vector<1x1x8x128xf32> to vector<8x128xf32>
      %417 = arith.mulf %416, %49 : vector<8x128xf32>
      %418 = arith.addf %414, %417 : vector<8x128xf32>
      %c0_373 = arith.constant 0 : index
      %c5 = arith.constant 5 : index
      %c0_374 = arith.constant 0 : index
      %c0_375 = arith.constant 0 : index
      %419 = vector.load %arg1[%c0_373, %c5, %c0_374, %c0_375] : memref<5x28x8x128xf32, #tpu.memory_space<vmem>>, vector<1x1x8x128xf32>
      %420 = vector.shape_cast %419 : vector<1x1x8x128xf32> to vector<8x128xf32>
      %421 = arith.mulf %420, %54 : vector<8x128xf32>
      %422 = arith.addf %418, %421 : vector<8x128xf32>
      %c1_376 = arith.constant 1 : index
      %c5_377 = arith.constant 5 : index
      %c0_378 = arith.constant 0 : index
      %c0_379 = arith.constant 0 : index
      %423 = vector.load %arg1[%c1_376, %c5_377, %c0_378, %c0_379] : memref<5x28x8x128xf32, #tpu.memory_space<vmem>>, vector<1x1x8x128xf32>
      %424 = vector.shape_cast %423 : vector<1x1x8x128xf32> to vector<8x128xf32>
      %425 = arith.mulf %424, %59 : vector<8x128xf32>
      %426 = arith.addf %422, %425 : vector<8x128xf32>
      %c2_380 = arith.constant 2 : index
      %c5_381 = arith.constant 5 : index
      %c0_382 = arith.constant 0 : index
      %c0_383 = arith.constant 0 : index
      %427 = vector.load %arg1[%c2_380, %c5_381, %c0_382, %c0_383] : memref<5x28x8x128xf32, #tpu.memory_space<vmem>>, vector<1x1x8x128xf32>
      %428 = vector.shape_cast %427 : vector<1x1x8x128xf32> to vector<8x128xf32>
      %429 = arith.mulf %428, %64 : vector<8x128xf32>
      %430 = arith.addf %426, %429 : vector<8x128xf32>
      %c1_384 = arith.constant 1 : index
      %c3_385 = arith.constant 3 : index
      %c0_386 = arith.constant 0 : index
      %c0_387 = arith.constant 0 : index
      %431 = vector.load %arg1[%c1_384, %c3_385, %c0_386, %c0_387] : memref<5x28x8x128xf32, #tpu.memory_space<vmem>>, vector<1x1x8x128xf32>
      %432 = vector.shape_cast %431 : vector<1x1x8x128xf32> to vector<8x128xf32>
      %433 = arith.mulf %432, %24 : vector<8x128xf32>
      %c2_388 = arith.constant 2 : index
      %c3_389 = arith.constant 3 : index
      %c0_390 = arith.constant 0 : index
      %c0_391 = arith.constant 0 : index
      %434 = vector.load %arg1[%c2_388, %c3_389, %c0_390, %c0_391] : memref<5x28x8x128xf32, #tpu.memory_space<vmem>>, vector<1x1x8x128xf32>
      %435 = vector.shape_cast %434 : vector<1x1x8x128xf32> to vector<8x128xf32>
      %436 = arith.mulf %435, %29 : vector<8x128xf32>
      %437 = arith.addf %433, %436 : vector<8x128xf32>
      %c3_392 = arith.constant 3 : index
      %c3_393 = arith.constant 3 : index
      %c0_394 = arith.constant 0 : index
      %c0_395 = arith.constant 0 : index
      %438 = vector.load %arg1[%c3_392, %c3_393, %c0_394, %c0_395] : memref<5x28x8x128xf32, #tpu.memory_space<vmem>>, vector<1x1x8x128xf32>
      %439 = vector.shape_cast %438 : vector<1x1x8x128xf32> to vector<8x128xf32>
      %440 = arith.mulf %439, %34 : vector<8x128xf32>
      %441 = arith.addf %437, %440 : vector<8x128xf32>
      %c1_396 = arith.constant 1 : index
      %c4_397 = arith.constant 4 : index
      %c0_398 = arith.constant 0 : index
      %c0_399 = arith.constant 0 : index
      %442 = vector.load %arg1[%c1_396, %c4_397, %c0_398, %c0_399] : memref<5x28x8x128xf32, #tpu.memory_space<vmem>>, vector<1x1x8x128xf32>
      %443 = vector.shape_cast %442 : vector<1x1x8x128xf32> to vector<8x128xf32>
      %444 = arith.mulf %443, %39 : vector<8x128xf32>
      %445 = arith.addf %441, %444 : vector<8x128xf32>
      %c2_400 = arith.constant 2 : index
      %c4_401 = arith.constant 4 : index
      %c0_402 = arith.constant 0 : index
      %c0_403 = arith.constant 0 : index
      %446 = vector.load %arg1[%c2_400, %c4_401, %c0_402, %c0_403] : memref<5x28x8x128xf32, #tpu.memory_space<vmem>>, vector<1x1x8x128xf32>
      %447 = vector.shape_cast %446 : vector<1x1x8x128xf32> to vector<8x128xf32>
      %448 = arith.mulf %447, %44 : vector<8x128xf32>
      %449 = arith.addf %445, %448 : vector<8x128xf32>
      %c3_404 = arith.constant 3 : index
      %c4_405 = arith.constant 4 : index
      %c0_406 = arith.constant 0 : index
      %c0_407 = arith.constant 0 : index
      %450 = vector.load %arg1[%c3_404, %c4_405, %c0_406, %c0_407] : memref<5x28x8x128xf32, #tpu.memory_space<vmem>>, vector<1x1x8x128xf32>
      %451 = vector.shape_cast %450 : vector<1x1x8x128xf32> to vector<8x128xf32>
      %452 = arith.mulf %451, %49 : vector<8x128xf32>
      %453 = arith.addf %449, %452 : vector<8x128xf32>
      %c1_408 = arith.constant 1 : index
      %c5_409 = arith.constant 5 : index
      %c0_410 = arith.constant 0 : index
      %c0_411 = arith.constant 0 : index
      %454 = vector.load %arg1[%c1_408, %c5_409, %c0_410, %c0_411] : memref<5x28x8x128xf32, #tpu.memory_space<vmem>>, vector<1x1x8x128xf32>
      %455 = vector.shape_cast %454 : vector<1x1x8x128xf32> to vector<8x128xf32>
      %456 = arith.mulf %455, %54 : vector<8x128xf32>
      %457 = arith.addf %453, %456 : vector<8x128xf32>
      %c2_412 = arith.constant 2 : index
      %c5_413 = arith.constant 5 : index
      %c0_414 = arith.constant 0 : index
      %c0_415 = arith.constant 0 : index
      %458 = vector.load %arg1[%c2_412, %c5_413, %c0_414, %c0_415] : memref<5x28x8x128xf32, #tpu.memory_space<vmem>>, vector<1x1x8x128xf32>
      %459 = vector.shape_cast %458 : vector<1x1x8x128xf32> to vector<8x128xf32>
      %460 = arith.mulf %459, %59 : vector<8x128xf32>
      %461 = arith.addf %457, %460 : vector<8x128xf32>
      %c3_416 = arith.constant 3 : index
      %c5_417 = arith.constant 5 : index
      %c0_418 = arith.constant 0 : index
      %c0_419 = arith.constant 0 : index
      %462 = vector.load %arg1[%c3_416, %c5_417, %c0_418, %c0_419] : memref<5x28x8x128xf32, #tpu.memory_space<vmem>>, vector<1x1x8x128xf32>
      %463 = vector.shape_cast %462 : vector<1x1x8x128xf32> to vector<8x128xf32>
      %464 = arith.mulf %463, %64 : vector<8x128xf32>
      %465 = arith.addf %461, %464 : vector<8x128xf32>
      %466 = arith.maximumf %430, %465 : vector<8x128xf32>
      %c2_420 = arith.constant 2 : index
      %c3_421 = arith.constant 3 : index
      %c0_422 = arith.constant 0 : index
      %c0_423 = arith.constant 0 : index
      %467 = vector.load %arg1[%c2_420, %c3_421, %c0_422, %c0_423] : memref<5x28x8x128xf32, #tpu.memory_space<vmem>>, vector<1x1x8x128xf32>
      %468 = vector.shape_cast %467 : vector<1x1x8x128xf32> to vector<8x128xf32>
      %469 = arith.mulf %468, %24 : vector<8x128xf32>
      %c3_424 = arith.constant 3 : index
      %c3_425 = arith.constant 3 : index
      %c0_426 = arith.constant 0 : index
      %c0_427 = arith.constant 0 : index
      %470 = vector.load %arg1[%c3_424, %c3_425, %c0_426, %c0_427] : memref<5x28x8x128xf32, #tpu.memory_space<vmem>>, vector<1x1x8x128xf32>
      %471 = vector.shape_cast %470 : vector<1x1x8x128xf32> to vector<8x128xf32>
      %472 = arith.mulf %471, %29 : vector<8x128xf32>
      %473 = arith.addf %469, %472 : vector<8x128xf32>
      %c4_428 = arith.constant 4 : index
      %c3_429 = arith.constant 3 : index
      %c0_430 = arith.constant 0 : index
      %c0_431 = arith.constant 0 : index
      %474 = vector.load %arg1[%c4_428, %c3_429, %c0_430, %c0_431] : memref<5x28x8x128xf32, #tpu.memory_space<vmem>>, vector<1x1x8x128xf32>
      %475 = vector.shape_cast %474 : vector<1x1x8x128xf32> to vector<8x128xf32>
      %476 = arith.mulf %475, %34 : vector<8x128xf32>
      %477 = arith.addf %473, %476 : vector<8x128xf32>
      %c2_432 = arith.constant 2 : index
      %c4_433 = arith.constant 4 : index
      %c0_434 = arith.constant 0 : index
      %c0_435 = arith.constant 0 : index
      %478 = vector.load %arg1[%c2_432, %c4_433, %c0_434, %c0_435] : memref<5x28x8x128xf32, #tpu.memory_space<vmem>>, vector<1x1x8x128xf32>
      %479 = vector.shape_cast %478 : vector<1x1x8x128xf32> to vector<8x128xf32>
      %480 = arith.mulf %479, %39 : vector<8x128xf32>
      %481 = arith.addf %477, %480 : vector<8x128xf32>
      %c3_436 = arith.constant 3 : index
      %c4_437 = arith.constant 4 : index
      %c0_438 = arith.constant 0 : index
      %c0_439 = arith.constant 0 : index
      %482 = vector.load %arg1[%c3_436, %c4_437, %c0_438, %c0_439] : memref<5x28x8x128xf32, #tpu.memory_space<vmem>>, vector<1x1x8x128xf32>
      %483 = vector.shape_cast %482 : vector<1x1x8x128xf32> to vector<8x128xf32>
      %484 = arith.mulf %483, %44 : vector<8x128xf32>
      %485 = arith.addf %481, %484 : vector<8x128xf32>
      %c4_440 = arith.constant 4 : index
      %c4_441 = arith.constant 4 : index
      %c0_442 = arith.constant 0 : index
      %c0_443 = arith.constant 0 : index
      %486 = vector.load %arg1[%c4_440, %c4_441, %c0_442, %c0_443] : memref<5x28x8x128xf32, #tpu.memory_space<vmem>>, vector<1x1x8x128xf32>
      %487 = vector.shape_cast %486 : vector<1x1x8x128xf32> to vector<8x128xf32>
      %488 = arith.mulf %487, %49 : vector<8x128xf32>
      %489 = arith.addf %485, %488 : vector<8x128xf32>
      %c2_444 = arith.constant 2 : index
      %c5_445 = arith.constant 5 : index
      %c0_446 = arith.constant 0 : index
      %c0_447 = arith.constant 0 : index
      %490 = vector.load %arg1[%c2_444, %c5_445, %c0_446, %c0_447] : memref<5x28x8x128xf32, #tpu.memory_space<vmem>>, vector<1x1x8x128xf32>
      %491 = vector.shape_cast %490 : vector<1x1x8x128xf32> to vector<8x128xf32>
      %492 = arith.mulf %491, %54 : vector<8x128xf32>
      %493 = arith.addf %489, %492 : vector<8x128xf32>
      %c3_448 = arith.constant 3 : index
      %c5_449 = arith.constant 5 : index
      %c0_450 = arith.constant 0 : index
      %c0_451 = arith.constant 0 : index
      %494 = vector.load %arg1[%c3_448, %c5_449, %c0_450, %c0_451] : memref<5x28x8x128xf32, #tpu.memory_space<vmem>>, vector<1x1x8x128xf32>
      %495 = vector.shape_cast %494 : vector<1x1x8x128xf32> to vector<8x128xf32>
      %496 = arith.mulf %495, %59 : vector<8x128xf32>
      %497 = arith.addf %493, %496 : vector<8x128xf32>
      %c4_452 = arith.constant 4 : index
      %c5_453 = arith.constant 5 : index
      %c0_454 = arith.constant 0 : index
      %c0_455 = arith.constant 0 : index
      %498 = vector.load %arg1[%c4_452, %c5_453, %c0_454, %c0_455] : memref<5x28x8x128xf32, #tpu.memory_space<vmem>>, vector<1x1x8x128xf32>
      %499 = vector.shape_cast %498 : vector<1x1x8x128xf32> to vector<8x128xf32>
      %500 = arith.mulf %499, %64 : vector<8x128xf32>
      %501 = arith.addf %497, %500 : vector<8x128xf32>
      %502 = arith.maximumf %466, %501 : vector<8x128xf32>
      %c0_456 = arith.constant 0 : index
      %c4_457 = arith.constant 4 : index
      %c0_458 = arith.constant 0 : index
      %c0_459 = arith.constant 0 : index
      %503 = vector.load %arg1[%c0_456, %c4_457, %c0_458, %c0_459] : memref<5x28x8x128xf32, #tpu.memory_space<vmem>>, vector<1x1x8x128xf32>
      %504 = vector.shape_cast %503 : vector<1x1x8x128xf32> to vector<8x128xf32>
      %505 = arith.mulf %504, %24 : vector<8x128xf32>
      %c1_460 = arith.constant 1 : index
      %c4_461 = arith.constant 4 : index
      %c0_462 = arith.constant 0 : index
      %c0_463 = arith.constant 0 : index
      %506 = vector.load %arg1[%c1_460, %c4_461, %c0_462, %c0_463] : memref<5x28x8x128xf32, #tpu.memory_space<vmem>>, vector<1x1x8x128xf32>
      %507 = vector.shape_cast %506 : vector<1x1x8x128xf32> to vector<8x128xf32>
      %508 = arith.mulf %507, %29 : vector<8x128xf32>
      %509 = arith.addf %505, %508 : vector<8x128xf32>
      %c2_464 = arith.constant 2 : index
      %c4_465 = arith.constant 4 : index
      %c0_466 = arith.constant 0 : index
      %c0_467 = arith.constant 0 : index
      %510 = vector.load %arg1[%c2_464, %c4_465, %c0_466, %c0_467] : memref<5x28x8x128xf32, #tpu.memory_space<vmem>>, vector<1x1x8x128xf32>
      %511 = vector.shape_cast %510 : vector<1x1x8x128xf32> to vector<8x128xf32>
      %512 = arith.mulf %511, %34 : vector<8x128xf32>
      %513 = arith.addf %509, %512 : vector<8x128xf32>
      %c0_468 = arith.constant 0 : index
      %c5_469 = arith.constant 5 : index
      %c0_470 = arith.constant 0 : index
      %c0_471 = arith.constant 0 : index
      %514 = vector.load %arg1[%c0_468, %c5_469, %c0_470, %c0_471] : memref<5x28x8x128xf32, #tpu.memory_space<vmem>>, vector<1x1x8x128xf32>
      %515 = vector.shape_cast %514 : vector<1x1x8x128xf32> to vector<8x128xf32>
      %516 = arith.mulf %515, %39 : vector<8x128xf32>
      %517 = arith.addf %513, %516 : vector<8x128xf32>
      %c1_472 = arith.constant 1 : index
      %c5_473 = arith.constant 5 : index
      %c0_474 = arith.constant 0 : index
      %c0_475 = arith.constant 0 : index
      %518 = vector.load %arg1[%c1_472, %c5_473, %c0_474, %c0_475] : memref<5x28x8x128xf32, #tpu.memory_space<vmem>>, vector<1x1x8x128xf32>
      %519 = vector.shape_cast %518 : vector<1x1x8x128xf32> to vector<8x128xf32>
      %520 = arith.mulf %519, %44 : vector<8x128xf32>
      %521 = arith.addf %517, %520 : vector<8x128xf32>
      %c2_476 = arith.constant 2 : index
      %c5_477 = arith.constant 5 : index
      %c0_478 = arith.constant 0 : index
      %c0_479 = arith.constant 0 : index
      %522 = vector.load %arg1[%c2_476, %c5_477, %c0_478, %c0_479] : memref<5x28x8x128xf32, #tpu.memory_space<vmem>>, vector<1x1x8x128xf32>
      %523 = vector.shape_cast %522 : vector<1x1x8x128xf32> to vector<8x128xf32>
      %524 = arith.mulf %523, %49 : vector<8x128xf32>
      %525 = arith.addf %521, %524 : vector<8x128xf32>
      %c0_480 = arith.constant 0 : index
      %c6 = arith.constant 6 : index
      %c0_481 = arith.constant 0 : index
      %c0_482 = arith.constant 0 : index
      %526 = vector.load %arg1[%c0_480, %c6, %c0_481, %c0_482] : memref<5x28x8x128xf32, #tpu.memory_space<vmem>>, vector<1x1x8x128xf32>
      %527 = vector.shape_cast %526 : vector<1x1x8x128xf32> to vector<8x128xf32>
      %528 = arith.mulf %527, %54 : vector<8x128xf32>
      %529 = arith.addf %525, %528 : vector<8x128xf32>
      %c1_483 = arith.constant 1 : index
      %c6_484 = arith.constant 6 : index
      %c0_485 = arith.constant 0 : index
      %c0_486 = arith.constant 0 : index
      %530 = vector.load %arg1[%c1_483, %c6_484, %c0_485, %c0_486] : memref<5x28x8x128xf32, #tpu.memory_space<vmem>>, vector<1x1x8x128xf32>
      %531 = vector.shape_cast %530 : vector<1x1x8x128xf32> to vector<8x128xf32>
      %532 = arith.mulf %531, %59 : vector<8x128xf32>
      %533 = arith.addf %529, %532 : vector<8x128xf32>
      %c2_487 = arith.constant 2 : index
      %c6_488 = arith.constant 6 : index
      %c0_489 = arith.constant 0 : index
      %c0_490 = arith.constant 0 : index
      %534 = vector.load %arg1[%c2_487, %c6_488, %c0_489, %c0_490] : memref<5x28x8x128xf32, #tpu.memory_space<vmem>>, vector<1x1x8x128xf32>
      %535 = vector.shape_cast %534 : vector<1x1x8x128xf32> to vector<8x128xf32>
      %536 = arith.mulf %535, %64 : vector<8x128xf32>
      %537 = arith.addf %533, %536 : vector<8x128xf32>
      %538 = arith.maximumf %502, %537 : vector<8x128xf32>
      %c1_491 = arith.constant 1 : index
      %c4_492 = arith.constant 4 : index
      %c0_493 = arith.constant 0 : index
      %c0_494 = arith.constant 0 : index
      %539 = vector.load %arg1[%c1_491, %c4_492, %c0_493, %c0_494] : memref<5x28x8x128xf32, #tpu.memory_space<vmem>>, vector<1x1x8x128xf32>
      %540 = vector.shape_cast %539 : vector<1x1x8x128xf32> to vector<8x128xf32>
      %541 = arith.mulf %540, %24 : vector<8x128xf32>
      %c2_495 = arith.constant 2 : index
      %c4_496 = arith.constant 4 : index
      %c0_497 = arith.constant 0 : index
      %c0_498 = arith.constant 0 : index
      %542 = vector.load %arg1[%c2_495, %c4_496, %c0_497, %c0_498] : memref<5x28x8x128xf32, #tpu.memory_space<vmem>>, vector<1x1x8x128xf32>
      %543 = vector.shape_cast %542 : vector<1x1x8x128xf32> to vector<8x128xf32>
      %544 = arith.mulf %543, %29 : vector<8x128xf32>
      %545 = arith.addf %541, %544 : vector<8x128xf32>
      %c3_499 = arith.constant 3 : index
      %c4_500 = arith.constant 4 : index
      %c0_501 = arith.constant 0 : index
      %c0_502 = arith.constant 0 : index
      %546 = vector.load %arg1[%c3_499, %c4_500, %c0_501, %c0_502] : memref<5x28x8x128xf32, #tpu.memory_space<vmem>>, vector<1x1x8x128xf32>
      %547 = vector.shape_cast %546 : vector<1x1x8x128xf32> to vector<8x128xf32>
      %548 = arith.mulf %547, %34 : vector<8x128xf32>
      %549 = arith.addf %545, %548 : vector<8x128xf32>
      %c1_503 = arith.constant 1 : index
      %c5_504 = arith.constant 5 : index
      %c0_505 = arith.constant 0 : index
      %c0_506 = arith.constant 0 : index
      %550 = vector.load %arg1[%c1_503, %c5_504, %c0_505, %c0_506] : memref<5x28x8x128xf32, #tpu.memory_space<vmem>>, vector<1x1x8x128xf32>
      %551 = vector.shape_cast %550 : vector<1x1x8x128xf32> to vector<8x128xf32>
      %552 = arith.mulf %551, %39 : vector<8x128xf32>
      %553 = arith.addf %549, %552 : vector<8x128xf32>
      %c2_507 = arith.constant 2 : index
      %c5_508 = arith.constant 5 : index
      %c0_509 = arith.constant 0 : index
      %c0_510 = arith.constant 0 : index
      %554 = vector.load %arg1[%c2_507, %c5_508, %c0_509, %c0_510] : memref<5x28x8x128xf32, #tpu.memory_space<vmem>>, vector<1x1x8x128xf32>
      %555 = vector.shape_cast %554 : vector<1x1x8x128xf32> to vector<8x128xf32>
      %556 = arith.mulf %555, %44 : vector<8x128xf32>
      %557 = arith.addf %553, %556 : vector<8x128xf32>
      %c3_511 = arith.constant 3 : index
      %c5_512 = arith.constant 5 : index
      %c0_513 = arith.constant 0 : index
      %c0_514 = arith.constant 0 : index
      %558 = vector.load %arg1[%c3_511, %c5_512, %c0_513, %c0_514] : memref<5x28x8x128xf32, #tpu.memory_space<vmem>>, vector<1x1x8x128xf32>
      %559 = vector.shape_cast %558 : vector<1x1x8x128xf32> to vector<8x128xf32>
      %560 = arith.mulf %559, %49 : vector<8x128xf32>
      %561 = arith.addf %557, %560 : vector<8x128xf32>
      %c1_515 = arith.constant 1 : index
      %c6_516 = arith.constant 6 : index
      %c0_517 = arith.constant 0 : index
      %c0_518 = arith.constant 0 : index
      %562 = vector.load %arg1[%c1_515, %c6_516, %c0_517, %c0_518] : memref<5x28x8x128xf32, #tpu.memory_space<vmem>>, vector<1x1x8x128xf32>
      %563 = vector.shape_cast %562 : vector<1x1x8x128xf32> to vector<8x128xf32>
      %564 = arith.mulf %563, %54 : vector<8x128xf32>
      %565 = arith.addf %561, %564 : vector<8x128xf32>
      %c2_519 = arith.constant 2 : index
      %c6_520 = arith.constant 6 : index
      %c0_521 = arith.constant 0 : index
      %c0_522 = arith.constant 0 : index
      %566 = vector.load %arg1[%c2_519, %c6_520, %c0_521, %c0_522] : memref<5x28x8x128xf32, #tpu.memory_space<vmem>>, vector<1x1x8x128xf32>
      %567 = vector.shape_cast %566 : vector<1x1x8x128xf32> to vector<8x128xf32>
      %568 = arith.mulf %567, %59 : vector<8x128xf32>
      %569 = arith.addf %565, %568 : vector<8x128xf32>
      %c3_523 = arith.constant 3 : index
      %c6_524 = arith.constant 6 : index
      %c0_525 = arith.constant 0 : index
      %c0_526 = arith.constant 0 : index
      %570 = vector.load %arg1[%c3_523, %c6_524, %c0_525, %c0_526] : memref<5x28x8x128xf32, #tpu.memory_space<vmem>>, vector<1x1x8x128xf32>
      %571 = vector.shape_cast %570 : vector<1x1x8x128xf32> to vector<8x128xf32>
      %572 = arith.mulf %571, %64 : vector<8x128xf32>
      %573 = arith.addf %569, %572 : vector<8x128xf32>
      %574 = arith.maximumf %538, %573 : vector<8x128xf32>
      %c2_527 = arith.constant 2 : index
      %c4_528 = arith.constant 4 : index
      %c0_529 = arith.constant 0 : index
      %c0_530 = arith.constant 0 : index
      %575 = vector.load %arg1[%c2_527, %c4_528, %c0_529, %c0_530] : memref<5x28x8x128xf32, #tpu.memory_space<vmem>>, vector<1x1x8x128xf32>
      %576 = vector.shape_cast %575 : vector<1x1x8x128xf32> to vector<8x128xf32>
      %577 = arith.mulf %576, %24 : vector<8x128xf32>
      %c3_531 = arith.constant 3 : index
      %c4_532 = arith.constant 4 : index
      %c0_533 = arith.constant 0 : index
      %c0_534 = arith.constant 0 : index
      %578 = vector.load %arg1[%c3_531, %c4_532, %c0_533, %c0_534] : memref<5x28x8x128xf32, #tpu.memory_space<vmem>>, vector<1x1x8x128xf32>
      %579 = vector.shape_cast %578 : vector<1x1x8x128xf32> to vector<8x128xf32>
      %580 = arith.mulf %579, %29 : vector<8x128xf32>
      %581 = arith.addf %577, %580 : vector<8x128xf32>
      %c4_535 = arith.constant 4 : index
      %c4_536 = arith.constant 4 : index
      %c0_537 = arith.constant 0 : index
      %c0_538 = arith.constant 0 : index
      %582 = vector.load %arg1[%c4_535, %c4_536, %c0_537, %c0_538] : memref<5x28x8x128xf32, #tpu.memory_space<vmem>>, vector<1x1x8x128xf32>
      %583 = vector.shape_cast %582 : vector<1x1x8x128xf32> to vector<8x128xf32>
      %584 = arith.mulf %583, %34 : vector<8x128xf32>
      %585 = arith.addf %581, %584 : vector<8x128xf32>
      %c2_539 = arith.constant 2 : index
      %c5_540 = arith.constant 5 : index
      %c0_541 = arith.constant 0 : index
      %c0_542 = arith.constant 0 : index
      %586 = vector.load %arg1[%c2_539, %c5_540, %c0_541, %c0_542] : memref<5x28x8x128xf32, #tpu.memory_space<vmem>>, vector<1x1x8x128xf32>
      %587 = vector.shape_cast %586 : vector<1x1x8x128xf32> to vector<8x128xf32>
      %588 = arith.mulf %587, %39 : vector<8x128xf32>
      %589 = arith.addf %585, %588 : vector<8x128xf32>
      %c3_543 = arith.constant 3 : index
      %c5_544 = arith.constant 5 : index
      %c0_545 = arith.constant 0 : index
      %c0_546 = arith.constant 0 : index
      %590 = vector.load %arg1[%c3_543, %c5_544, %c0_545, %c0_546] : memref<5x28x8x128xf32, #tpu.memory_space<vmem>>, vector<1x1x8x128xf32>
      %591 = vector.shape_cast %590 : vector<1x1x8x128xf32> to vector<8x128xf32>
      %592 = arith.mulf %591, %44 : vector<8x128xf32>
      %593 = arith.addf %589, %592 : vector<8x128xf32>
      %c4_547 = arith.constant 4 : index
      %c5_548 = arith.constant 5 : index
      %c0_549 = arith.constant 0 : index
      %c0_550 = arith.constant 0 : index
      %594 = vector.load %arg1[%c4_547, %c5_548, %c0_549, %c0_550] : memref<5x28x8x128xf32, #tpu.memory_space<vmem>>, vector<1x1x8x128xf32>
      %595 = vector.shape_cast %594 : vector<1x1x8x128xf32> to vector<8x128xf32>
      %596 = arith.mulf %595, %49 : vector<8x128xf32>
      %597 = arith.addf %593, %596 : vector<8x128xf32>
      %c2_551 = arith.constant 2 : index
      %c6_552 = arith.constant 6 : index
      %c0_553 = arith.constant 0 : index
      %c0_554 = arith.constant 0 : index
      %598 = vector.load %arg1[%c2_551, %c6_552, %c0_553, %c0_554] : memref<5x28x8x128xf32, #tpu.memory_space<vmem>>, vector<1x1x8x128xf32>
      %599 = vector.shape_cast %598 : vector<1x1x8x128xf32> to vector<8x128xf32>
      %600 = arith.mulf %599, %54 : vector<8x128xf32>
      %601 = arith.addf %597, %600 : vector<8x128xf32>
      %c3_555 = arith.constant 3 : index
      %c6_556 = arith.constant 6 : index
      %c0_557 = arith.constant 0 : index
      %c0_558 = arith.constant 0 : index
      %602 = vector.load %arg1[%c3_555, %c6_556, %c0_557, %c0_558] : memref<5x28x8x128xf32, #tpu.memory_space<vmem>>, vector<1x1x8x128xf32>
      %603 = vector.shape_cast %602 : vector<1x1x8x128xf32> to vector<8x128xf32>
      %604 = arith.mulf %603, %59 : vector<8x128xf32>
      %605 = arith.addf %601, %604 : vector<8x128xf32>
      %c4_559 = arith.constant 4 : index
      %c6_560 = arith.constant 6 : index
      %c0_561 = arith.constant 0 : index
      %c0_562 = arith.constant 0 : index
      %606 = vector.load %arg1[%c4_559, %c6_560, %c0_561, %c0_562] : memref<5x28x8x128xf32, #tpu.memory_space<vmem>>, vector<1x1x8x128xf32>
      %607 = vector.shape_cast %606 : vector<1x1x8x128xf32> to vector<8x128xf32>
      %608 = arith.mulf %607, %64 : vector<8x128xf32>
      %609 = arith.addf %605, %608 : vector<8x128xf32>
      %610 = arith.maximumf %574, %609 : vector<8x128xf32>
      %c0_563 = arith.constant 0 : index
      %c5_564 = arith.constant 5 : index
      %c0_565 = arith.constant 0 : index
      %c0_566 = arith.constant 0 : index
      %611 = vector.load %arg1[%c0_563, %c5_564, %c0_565, %c0_566] : memref<5x28x8x128xf32, #tpu.memory_space<vmem>>, vector<1x1x8x128xf32>
      %612 = vector.shape_cast %611 : vector<1x1x8x128xf32> to vector<8x128xf32>
      %613 = arith.mulf %612, %24 : vector<8x128xf32>
      %c1_567 = arith.constant 1 : index
      %c5_568 = arith.constant 5 : index
      %c0_569 = arith.constant 0 : index
      %c0_570 = arith.constant 0 : index
      %614 = vector.load %arg1[%c1_567, %c5_568, %c0_569, %c0_570] : memref<5x28x8x128xf32, #tpu.memory_space<vmem>>, vector<1x1x8x128xf32>
      %615 = vector.shape_cast %614 : vector<1x1x8x128xf32> to vector<8x128xf32>
      %616 = arith.mulf %615, %29 : vector<8x128xf32>
      %617 = arith.addf %613, %616 : vector<8x128xf32>
      %c2_571 = arith.constant 2 : index
      %c5_572 = arith.constant 5 : index
      %c0_573 = arith.constant 0 : index
      %c0_574 = arith.constant 0 : index
      %618 = vector.load %arg1[%c2_571, %c5_572, %c0_573, %c0_574] : memref<5x28x8x128xf32, #tpu.memory_space<vmem>>, vector<1x1x8x128xf32>
      %619 = vector.shape_cast %618 : vector<1x1x8x128xf32> to vector<8x128xf32>
      %620 = arith.mulf %619, %34 : vector<8x128xf32>
      %621 = arith.addf %617, %620 : vector<8x128xf32>
      %c0_575 = arith.constant 0 : index
      %c6_576 = arith.constant 6 : index
      %c0_577 = arith.constant 0 : index
      %c0_578 = arith.constant 0 : index
      %622 = vector.load %arg1[%c0_575, %c6_576, %c0_577, %c0_578] : memref<5x28x8x128xf32, #tpu.memory_space<vmem>>, vector<1x1x8x128xf32>
      %623 = vector.shape_cast %622 : vector<1x1x8x128xf32> to vector<8x128xf32>
      %624 = arith.mulf %623, %39 : vector<8x128xf32>
      %625 = arith.addf %621, %624 : vector<8x128xf32>
      %c1_579 = arith.constant 1 : index
      %c6_580 = arith.constant 6 : index
      %c0_581 = arith.constant 0 : index
      %c0_582 = arith.constant 0 : index
      %626 = vector.load %arg1[%c1_579, %c6_580, %c0_581, %c0_582] : memref<5x28x8x128xf32, #tpu.memory_space<vmem>>, vector<1x1x8x128xf32>
      %627 = vector.shape_cast %626 : vector<1x1x8x128xf32> to vector<8x128xf32>
      %628 = arith.mulf %627, %44 : vector<8x128xf32>
      %629 = arith.addf %625, %628 : vector<8x128xf32>
      %c2_583 = arith.constant 2 : index
      %c6_584 = arith.constant 6 : index
      %c0_585 = arith.constant 0 : index
      %c0_586 = arith.constant 0 : index
      %630 = vector.load %arg1[%c2_583, %c6_584, %c0_585, %c0_586] : memref<5x28x8x128xf32, #tpu.memory_space<vmem>>, vector<1x1x8x128xf32>
      %631 = vector.shape_cast %630 : vector<1x1x8x128xf32> to vector<8x128xf32>
      %632 = arith.mulf %631, %49 : vector<8x128xf32>
      %633 = arith.addf %629, %632 : vector<8x128xf32>
      %c0_587 = arith.constant 0 : index
      %c7 = arith.constant 7 : index
      %c0_588 = arith.constant 0 : index
      %c0_589 = arith.constant 0 : index
      %634 = vector.load %arg1[%c0_587, %c7, %c0_588, %c0_589] : memref<5x28x8x128xf32, #tpu.memory_space<vmem>>, vector<1x1x8x128xf32>
      %635 = vector.shape_cast %634 : vector<1x1x8x128xf32> to vector<8x128xf32>
      %636 = arith.mulf %635, %54 : vector<8x128xf32>
      %637 = arith.addf %633, %636 : vector<8x128xf32>
      %c1_590 = arith.constant 1 : index
      %c7_591 = arith.constant 7 : index
      %c0_592 = arith.constant 0 : index
      %c0_593 = arith.constant 0 : index
      %638 = vector.load %arg1[%c1_590, %c7_591, %c0_592, %c0_593] : memref<5x28x8x128xf32, #tpu.memory_space<vmem>>, vector<1x1x8x128xf32>
      %639 = vector.shape_cast %638 : vector<1x1x8x128xf32> to vector<8x128xf32>
      %640 = arith.mulf %639, %59 : vector<8x128xf32>
      %641 = arith.addf %637, %640 : vector<8x128xf32>
      %c2_594 = arith.constant 2 : index
      %c7_595 = arith.constant 7 : index
      %c0_596 = arith.constant 0 : index
      %c0_597 = arith.constant 0 : index
      %642 = vector.load %arg1[%c2_594, %c7_595, %c0_596, %c0_597] : memref<5x28x8x128xf32, #tpu.memory_space<vmem>>, vector<1x1x8x128xf32>
      %643 = vector.shape_cast %642 : vector<1x1x8x128xf32> to vector<8x128xf32>
      %644 = arith.mulf %643, %64 : vector<8x128xf32>
      %645 = arith.addf %641, %644 : vector<8x128xf32>
      %646 = arith.maximumf %610, %645 : vector<8x128xf32>
      %c1_598 = arith.constant 1 : index
      %c5_599 = arith.constant 5 : index
      %c0_600 = arith.constant 0 : index
      %c0_601 = arith.constant 0 : index
      %647 = vector.load %arg1[%c1_598, %c5_599, %c0_600, %c0_601] : memref<5x28x8x128xf32, #tpu.memory_space<vmem>>, vector<1x1x8x128xf32>
      %648 = vector.shape_cast %647 : vector<1x1x8x128xf32> to vector<8x128xf32>
      %649 = arith.mulf %648, %24 : vector<8x128xf32>
      %c2_602 = arith.constant 2 : index
      %c5_603 = arith.constant 5 : index
      %c0_604 = arith.constant 0 : index
      %c0_605 = arith.constant 0 : index
      %650 = vector.load %arg1[%c2_602, %c5_603, %c0_604, %c0_605] : memref<5x28x8x128xf32, #tpu.memory_space<vmem>>, vector<1x1x8x128xf32>
      %651 = vector.shape_cast %650 : vector<1x1x8x128xf32> to vector<8x128xf32>
      %652 = arith.mulf %651, %29 : vector<8x128xf32>
      %653 = arith.addf %649, %652 : vector<8x128xf32>
      %c3_606 = arith.constant 3 : index
      %c5_607 = arith.constant 5 : index
      %c0_608 = arith.constant 0 : index
      %c0_609 = arith.constant 0 : index
      %654 = vector.load %arg1[%c3_606, %c5_607, %c0_608, %c0_609] : memref<5x28x8x128xf32, #tpu.memory_space<vmem>>, vector<1x1x8x128xf32>
      %655 = vector.shape_cast %654 : vector<1x1x8x128xf32> to vector<8x128xf32>
      %656 = arith.mulf %655, %34 : vector<8x128xf32>
      %657 = arith.addf %653, %656 : vector<8x128xf32>
      %c1_610 = arith.constant 1 : index
      %c6_611 = arith.constant 6 : index
      %c0_612 = arith.constant 0 : index
      %c0_613 = arith.constant 0 : index
      %658 = vector.load %arg1[%c1_610, %c6_611, %c0_612, %c0_613] : memref<5x28x8x128xf32, #tpu.memory_space<vmem>>, vector<1x1x8x128xf32>
      %659 = vector.shape_cast %658 : vector<1x1x8x128xf32> to vector<8x128xf32>
      %660 = arith.mulf %659, %39 : vector<8x128xf32>
      %661 = arith.addf %657, %660 : vector<8x128xf32>
      %c2_614 = arith.constant 2 : index
      %c6_615 = arith.constant 6 : index
      %c0_616 = arith.constant 0 : index
      %c0_617 = arith.constant 0 : index
      %662 = vector.load %arg1[%c2_614, %c6_615, %c0_616, %c0_617] : memref<5x28x8x128xf32, #tpu.memory_space<vmem>>, vector<1x1x8x128xf32>
      %663 = vector.shape_cast %662 : vector<1x1x8x128xf32> to vector<8x128xf32>
      %664 = arith.mulf %663, %44 : vector<8x128xf32>
      %665 = arith.addf %661, %664 : vector<8x128xf32>
      %c3_618 = arith.constant 3 : index
      %c6_619 = arith.constant 6 : index
      %c0_620 = arith.constant 0 : index
      %c0_621 = arith.constant 0 : index
      %666 = vector.load %arg1[%c3_618, %c6_619, %c0_620, %c0_621] : memref<5x28x8x128xf32, #tpu.memory_space<vmem>>, vector<1x1x8x128xf32>
      %667 = vector.shape_cast %666 : vector<1x1x8x128xf32> to vector<8x128xf32>
      %668 = arith.mulf %667, %49 : vector<8x128xf32>
      %669 = arith.addf %665, %668 : vector<8x128xf32>
      %c1_622 = arith.constant 1 : index
      %c7_623 = arith.constant 7 : index
      %c0_624 = arith.constant 0 : index
      %c0_625 = arith.constant 0 : index
      %670 = vector.load %arg1[%c1_622, %c7_623, %c0_624, %c0_625] : memref<5x28x8x128xf32, #tpu.memory_space<vmem>>, vector<1x1x8x128xf32>
      %671 = vector.shape_cast %670 : vector<1x1x8x128xf32> to vector<8x128xf32>
      %672 = arith.mulf %671, %54 : vector<8x128xf32>
      %673 = arith.addf %669, %672 : vector<8x128xf32>
      %c2_626 = arith.constant 2 : index
      %c7_627 = arith.constant 7 : index
      %c0_628 = arith.constant 0 : index
      %c0_629 = arith.constant 0 : index
      %674 = vector.load %arg1[%c2_626, %c7_627, %c0_628, %c0_629] : memref<5x28x8x128xf32, #tpu.memory_space<vmem>>, vector<1x1x8x128xf32>
      %675 = vector.shape_cast %674 : vector<1x1x8x128xf32> to vector<8x128xf32>
      %676 = arith.mulf %675, %59 : vector<8x128xf32>
      %677 = arith.addf %673, %676 : vector<8x128xf32>
      %c3_630 = arith.constant 3 : index
      %c7_631 = arith.constant 7 : index
      %c0_632 = arith.constant 0 : index
      %c0_633 = arith.constant 0 : index
      %678 = vector.load %arg1[%c3_630, %c7_631, %c0_632, %c0_633] : memref<5x28x8x128xf32, #tpu.memory_space<vmem>>, vector<1x1x8x128xf32>
      %679 = vector.shape_cast %678 : vector<1x1x8x128xf32> to vector<8x128xf32>
      %680 = arith.mulf %679, %64 : vector<8x128xf32>
      %681 = arith.addf %677, %680 : vector<8x128xf32>
      %682 = arith.maximumf %646, %681 : vector<8x128xf32>
      %c2_634 = arith.constant 2 : index
      %c5_635 = arith.constant 5 : index
      %c0_636 = arith.constant 0 : index
      %c0_637 = arith.constant 0 : index
      %683 = vector.load %arg1[%c2_634, %c5_635, %c0_636, %c0_637] : memref<5x28x8x128xf32, #tpu.memory_space<vmem>>, vector<1x1x8x128xf32>
      %684 = vector.shape_cast %683 : vector<1x1x8x128xf32> to vector<8x128xf32>
      %685 = arith.mulf %684, %24 : vector<8x128xf32>
      %c3_638 = arith.constant 3 : index
      %c5_639 = arith.constant 5 : index
      %c0_640 = arith.constant 0 : index
      %c0_641 = arith.constant 0 : index
      %686 = vector.load %arg1[%c3_638, %c5_639, %c0_640, %c0_641] : memref<5x28x8x128xf32, #tpu.memory_space<vmem>>, vector<1x1x8x128xf32>
      %687 = vector.shape_cast %686 : vector<1x1x8x128xf32> to vector<8x128xf32>
      %688 = arith.mulf %687, %29 : vector<8x128xf32>
      %689 = arith.addf %685, %688 : vector<8x128xf32>
      %c4_642 = arith.constant 4 : index
      %c5_643 = arith.constant 5 : index
      %c0_644 = arith.constant 0 : index
      %c0_645 = arith.constant 0 : index
      %690 = vector.load %arg1[%c4_642, %c5_643, %c0_644, %c0_645] : memref<5x28x8x128xf32, #tpu.memory_space<vmem>>, vector<1x1x8x128xf32>
      %691 = vector.shape_cast %690 : vector<1x1x8x128xf32> to vector<8x128xf32>
      %692 = arith.mulf %691, %34 : vector<8x128xf32>
      %693 = arith.addf %689, %692 : vector<8x128xf32>
      %c2_646 = arith.constant 2 : index
      %c6_647 = arith.constant 6 : index
      %c0_648 = arith.constant 0 : index
      %c0_649 = arith.constant 0 : index
      %694 = vector.load %arg1[%c2_646, %c6_647, %c0_648, %c0_649] : memref<5x28x8x128xf32, #tpu.memory_space<vmem>>, vector<1x1x8x128xf32>
      %695 = vector.shape_cast %694 : vector<1x1x8x128xf32> to vector<8x128xf32>
      %696 = arith.mulf %695, %39 : vector<8x128xf32>
      %697 = arith.addf %693, %696 : vector<8x128xf32>
      %c3_650 = arith.constant 3 : index
      %c6_651 = arith.constant 6 : index
      %c0_652 = arith.constant 0 : index
      %c0_653 = arith.constant 0 : index
      %698 = vector.load %arg1[%c3_650, %c6_651, %c0_652, %c0_653] : memref<5x28x8x128xf32, #tpu.memory_space<vmem>>, vector<1x1x8x128xf32>
      %699 = vector.shape_cast %698 : vector<1x1x8x128xf32> to vector<8x128xf32>
      %700 = arith.mulf %699, %44 : vector<8x128xf32>
      %701 = arith.addf %697, %700 : vector<8x128xf32>
      %c4_654 = arith.constant 4 : index
      %c6_655 = arith.constant 6 : index
      %c0_656 = arith.constant 0 : index
      %c0_657 = arith.constant 0 : index
      %702 = vector.load %arg1[%c4_654, %c6_655, %c0_656, %c0_657] : memref<5x28x8x128xf32, #tpu.memory_space<vmem>>, vector<1x1x8x128xf32>
      %703 = vector.shape_cast %702 : vector<1x1x8x128xf32> to vector<8x128xf32>
      %704 = arith.mulf %703, %49 : vector<8x128xf32>
      %705 = arith.addf %701, %704 : vector<8x128xf32>
      %c2_658 = arith.constant 2 : index
      %c7_659 = arith.constant 7 : index
      %c0_660 = arith.constant 0 : index
      %c0_661 = arith.constant 0 : index
      %706 = vector.load %arg1[%c2_658, %c7_659, %c0_660, %c0_661] : memref<5x28x8x128xf32, #tpu.memory_space<vmem>>, vector<1x1x8x128xf32>
      %707 = vector.shape_cast %706 : vector<1x1x8x128xf32> to vector<8x128xf32>
      %708 = arith.mulf %707, %54 : vector<8x128xf32>
      %709 = arith.addf %705, %708 : vector<8x128xf32>
      %c3_662 = arith.constant 3 : index
      %c7_663 = arith.constant 7 : index
      %c0_664 = arith.constant 0 : index
      %c0_665 = arith.constant 0 : index
      %710 = vector.load %arg1[%c3_662, %c7_663, %c0_664, %c0_665] : memref<5x28x8x128xf32, #tpu.memory_space<vmem>>, vector<1x1x8x128xf32>
      %711 = vector.shape_cast %710 : vector<1x1x8x128xf32> to vector<8x128xf32>
      %712 = arith.mulf %711, %59 : vector<8x128xf32>
      %713 = arith.addf %709, %712 : vector<8x128xf32>
      %c4_666 = arith.constant 4 : index
      %c7_667 = arith.constant 7 : index
      %c0_668 = arith.constant 0 : index
      %c0_669 = arith.constant 0 : index
      %714 = vector.load %arg1[%c4_666, %c7_667, %c0_668, %c0_669] : memref<5x28x8x128xf32, #tpu.memory_space<vmem>>, vector<1x1x8x128xf32>
      %715 = vector.shape_cast %714 : vector<1x1x8x128xf32> to vector<8x128xf32>
      %716 = arith.mulf %715, %64 : vector<8x128xf32>
      %717 = arith.addf %713, %716 : vector<8x128xf32>
      %718 = arith.maximumf %682, %717 : vector<8x128xf32>
      %719 = arith.addf %718, %67 : vector<8x128xf32>
      %720 = arith.index_cast %19 : i32 to index
      %c8 = arith.constant 8 : index
      %c0_670 = arith.constant 0 : index
      %721 = vector.load %arg9[%720, %c8, %c0_670] : memref<10x64x128xf32, #tpu.memory_space<vmem>>, vector<1x8x128xf32>
      %722 = vector.shape_cast %721 : vector<1x8x128xf32> to vector<8x128xf32>
      %723 = vector.shape_cast %719 : vector<8x128xf32> to vector<1x8x128xf32>
      tpu.vector_store %arg9[%720, %c8, %c0_670], %723 {strides = array<i32>} : memref<10x64x128xf32, #tpu.memory_space<vmem>>, vector<1x8x128xf32>,
      %c0_671 = arith.constant 0 : index
      %c6_672 = arith.constant 6 : index
      %c0_673 = arith.constant 0 : index
      %c0_674 = arith.constant 0 : index
      %724 = vector.load %arg1[%c0_671, %c6_672, %c0_673, %c0_674] : memref<5x28x8x128xf32, #tpu.memory_space<vmem>>, vector<1x1x8x128xf32>
      %725 = vector.shape_cast %724 : vector<1x1x8x128xf32> to vector<8x128xf32>
      %726 = arith.mulf %725, %24 : vector<8x128xf32>
      %c1_675 = arith.constant 1 : index
      %c6_676 = arith.constant 6 : index
      %c0_677 = arith.constant 0 : index
      %c0_678 = arith.constant 0 : index
      %727 = vector.load %arg1[%c1_675, %c6_676, %c0_677, %c0_678] : memref<5x28x8x128xf32, #tpu.memory_space<vmem>>, vector<1x1x8x128xf32>
      %728 = vector.shape_cast %727 : vector<1x1x8x128xf32> to vector<8x128xf32>
      %729 = arith.mulf %728, %29 : vector<8x128xf32>
      %730 = arith.addf %726, %729 : vector<8x128xf32>
      %c2_679 = arith.constant 2 : index
      %c6_680 = arith.constant 6 : index
      %c0_681 = arith.constant 0 : index
      %c0_682 = arith.constant 0 : index
      %731 = vector.load %arg1[%c2_679, %c6_680, %c0_681, %c0_682] : memref<5x28x8x128xf32, #tpu.memory_space<vmem>>, vector<1x1x8x128xf32>
      %732 = vector.shape_cast %731 : vector<1x1x8x128xf32> to vector<8x128xf32>
      %733 = arith.mulf %732, %34 : vector<8x128xf32>
      %734 = arith.addf %730, %733 : vector<8x128xf32>
      %c0_683 = arith.constant 0 : index
      %c7_684 = arith.constant 7 : index
      %c0_685 = arith.constant 0 : index
      %c0_686 = arith.constant 0 : index
      %735 = vector.load %arg1[%c0_683, %c7_684, %c0_685, %c0_686] : memref<5x28x8x128xf32, #tpu.memory_space<vmem>>, vector<1x1x8x128xf32>
      %736 = vector.shape_cast %735 : vector<1x1x8x128xf32> to vector<8x128xf32>
      %737 = arith.mulf %736, %39 : vector<8x128xf32>
      %738 = arith.addf %734, %737 : vector<8x128xf32>
      %c1_687 = arith.constant 1 : index
      %c7_688 = arith.constant 7 : index
      %c0_689 = arith.constant 0 : index
      %c0_690 = arith.constant 0 : index
      %739 = vector.load %arg1[%c1_687, %c7_688, %c0_689, %c0_690] : memref<5x28x8x128xf32, #tpu.memory_space<vmem>>, vector<1x1x8x128xf32>
      %740 = vector.shape_cast %739 : vector<1x1x8x128xf32> to vector<8x128xf32>
      %741 = arith.mulf %740, %44 : vector<8x128xf32>
      %742 = arith.addf %738, %741 : vector<8x128xf32>
      %c2_691 = arith.constant 2 : index
      %c7_692 = arith.constant 7 : index
      %c0_693 = arith.constant 0 : index
      %c0_694 = arith.constant 0 : index
      %743 = vector.load %arg1[%c2_691, %c7_692, %c0_693, %c0_694] : memref<5x28x8x128xf32, #tpu.memory_space<vmem>>, vector<1x1x8x128xf32>
      %744 = vector.shape_cast %743 : vector<1x1x8x128xf32> to vector<8x128xf32>
      %745 = arith.mulf %744, %49 : vector<8x128xf32>
      %746 = arith.addf %742, %745 : vector<8x128xf32>
      %c0_695 = arith.constant 0 : index
      %c8_696 = arith.constant 8 : index
      %c0_697 = arith.constant 0 : index
      %c0_698 = arith.constant 0 : index
      %747 = vector.load %arg1[%c0_695, %c8_696, %c0_697, %c0_698] : memref<5x28x8x128xf32, #tpu.memory_space<vmem>>, vector<1x1x8x128xf32>
      %748 = vector.shape_cast %747 : vector<1x1x8x128xf32> to vector<8x128xf32>
      %749 = arith.mulf %748, %54 : vector<8x128xf32>
      %750 = arith.addf %746, %749 : vector<8x128xf32>
      %c1_699 = arith.constant 1 : index
      %c8_700 = arith.constant 8 : index
      %c0_701 = arith.constant 0 : index
      %c0_702 = arith.constant 0 : index
      %751 = vector.load %arg1[%c1_699, %c8_700, %c0_701, %c0_702] : memref<5x28x8x128xf32, #tpu.memory_space<vmem>>, vector<1x1x8x128xf32>
      %752 = vector.shape_cast %751 : vector<1x1x8x128xf32> to vector<8x128xf32>
      %753 = arith.mulf %752, %59 : vector<8x128xf32>
      %754 = arith.addf %750, %753 : vector<8x128xf32>
      %c2_703 = arith.constant 2 : index
      %c8_704 = arith.constant 8 : index
      %c0_705 = arith.constant 0 : index
      %c0_706 = arith.constant 0 : index
      %755 = vector.load %arg1[%c2_703, %c8_704, %c0_705, %c0_706] : memref<5x28x8x128xf32, #tpu.memory_space<vmem>>, vector<1x1x8x128xf32>
      %756 = vector.shape_cast %755 : vector<1x1x8x128xf32> to vector<8x128xf32>
      %757 = arith.mulf %756, %64 : vector<8x128xf32>
      %758 = arith.addf %754, %757 : vector<8x128xf32>
      %c1_707 = arith.constant 1 : index
      %c6_708 = arith.constant 6 : index
      %c0_709 = arith.constant 0 : index
      %c0_710 = arith.constant 0 : index
      %759 = vector.load %arg1[%c1_707, %c6_708, %c0_709, %c0_710] : memref<5x28x8x128xf32, #tpu.memory_space<vmem>>, vector<1x1x8x128xf32>
      %760 = vector.shape_cast %759 : vector<1x1x8x128xf32> to vector<8x128xf32>
      %761 = arith.mulf %760, %24 : vector<8x128xf32>
      %c2_711 = arith.constant 2 : index
      %c6_712 = arith.constant 6 : index
      %c0_713 = arith.constant 0 : index
      %c0_714 = arith.constant 0 : index
      %762 = vector.load %arg1[%c2_711, %c6_712, %c0_713, %c0_714] : memref<5x28x8x128xf32, #tpu.memory_space<vmem>>, vector<1x1x8x128xf32>
      %763 = vector.shape_cast %762 : vector<1x1x8x128xf32> to vector<8x128xf32>
      %764 = arith.mulf %763, %29 : vector<8x128xf32>
      %765 = arith.addf %761, %764 : vector<8x128xf32>
      %c3_715 = arith.constant 3 : index
      %c6_716 = arith.constant 6 : index
      %c0_717 = arith.constant 0 : index
      %c0_718 = arith.constant 0 : index
      %766 = vector.load %arg1[%c3_715, %c6_716, %c0_717, %c0_718] : memref<5x28x8x128xf32, #tpu.memory_space<vmem>>, vector<1x1x8x128xf32>
      %767 = vector.shape_cast %766 : vector<1x1x8x128xf32> to vector<8x128xf32>
      %768 = arith.mulf %767, %34 : vector<8x128xf32>
      %769 = arith.addf %765, %768 : vector<8x128xf32>
      %c1_719 = arith.constant 1 : index
      %c7_720 = arith.constant 7 : index
      %c0_721 = arith.constant 0 : index
      %c0_722 = arith.constant 0 : index
      %770 = vector.load %arg1[%c1_719, %c7_720, %c0_721, %c0_722] : memref<5x28x8x128xf32, #tpu.memory_space<vmem>>, vector<1x1x8x128xf32>
      %771 = vector.shape_cast %770 : vector<1x1x8x128xf32> to vector<8x128xf32>
      %772 = arith.mulf %771, %39 : vector<8x128xf32>
      %773 = arith.addf %769, %772 : vector<8x128xf32>
      %c2_723 = arith.constant 2 : index
      %c7_724 = arith.constant 7 : index
      %c0_725 = arith.constant 0 : index
      %c0_726 = arith.constant 0 : index
      %774 = vector.load %arg1[%c2_723, %c7_724, %c0_725, %c0_726] : memref<5x28x8x128xf32, #tpu.memory_space<vmem>>, vector<1x1x8x128xf32>
      %775 = vector.shape_cast %774 : vector<1x1x8x128xf32> to vector<8x128xf32>
      %776 = arith.mulf %775, %44 : vector<8x128xf32>
      %777 = arith.addf %773, %776 : vector<8x128xf32>
      %c3_727 = arith.constant 3 : index
      %c7_728 = arith.constant 7 : index
      %c0_729 = arith.constant 0 : index
      %c0_730 = arith.constant 0 : index
      %778 = vector.load %arg1[%c3_727, %c7_728, %c0_729, %c0_730] : memref<5x28x8x128xf32, #tpu.memory_space<vmem>>, vector<1x1x8x128xf32>
      %779 = vector.shape_cast %778 : vector<1x1x8x128xf32> to vector<8x128xf32>
      %780 = arith.mulf %779, %49 : vector<8x128xf32>
      %781 = arith.addf %777, %780 : vector<8x128xf32>
      %c1_731 = arith.constant 1 : index
      %c8_732 = arith.constant 8 : index
      %c0_733 = arith.constant 0 : index
      %c0_734 = arith.constant 0 : index
      %782 = vector.load %arg1[%c1_731, %c8_732, %c0_733, %c0_734] : memref<5x28x8x128xf32, #tpu.memory_space<vmem>>, vector<1x1x8x128xf32>
      %783 = vector.shape_cast %782 : vector<1x1x8x128xf32> to vector<8x128xf32>
      %784 = arith.mulf %783, %54 : vector<8x128xf32>
      %785 = arith.addf %781, %784 : vector<8x128xf32>
      %c2_735 = arith.constant 2 : index
      %c8_736 = arith.constant 8 : index
      %c0_737 = arith.constant 0 : index
      %c0_738 = arith.constant 0 : index
      %786 = vector.load %arg1[%c2_735, %c8_736, %c0_737, %c0_738] : memref<5x28x8x128xf32, #tpu.memory_space<vmem>>, vector<1x1x8x128xf32>
      %787 = vector.shape_cast %786 : vector<1x1x8x128xf32> to vector<8x128xf32>
      %788 = arith.mulf %787, %59 : vector<8x128xf32>
      %789 = arith.addf %785, %788 : vector<8x128xf32>
      %c3_739 = arith.constant 3 : index
      %c8_740 = arith.constant 8 : index
      %c0_741 = arith.constant 0 : index
      %c0_742 = arith.constant 0 : index
      %790 = vector.load %arg1[%c3_739, %c8_740, %c0_741, %c0_742] : memref<5x28x8x128xf32, #tpu.memory_space<vmem>>, vector<1x1x8x128xf32>
      %791 = vector.shape_cast %790 : vector<1x1x8x128xf32> to vector<8x128xf32>
      %792 = arith.mulf %791, %64 : vector<8x128xf32>
      %793 = arith.addf %789, %792 : vector<8x128xf32>
      %794 = arith.maximumf %758, %793 : vector<8x128xf32>
      %c2_743 = arith.constant 2 : index
      %c6_744 = arith.constant 6 : index
      %c0_745 = arith.constant 0 : index
      %c0_746 = arith.constant 0 : index
      %795 = vector.load %arg1[%c2_743, %c6_744, %c0_745, %c0_746] : memref<5x28x8x128xf32, #tpu.memory_space<vmem>>, vector<1x1x8x128xf32>
      %796 = vector.shape_cast %795 : vector<1x1x8x128xf32> to vector<8x128xf32>
      %797 = arith.mulf %796, %24 : vector<8x128xf32>
      %c3_747 = arith.constant 3 : index
      %c6_748 = arith.constant 6 : index
      %c0_749 = arith.constant 0 : index
      %c0_750 = arith.constant 0 : index
      %798 = vector.load %arg1[%c3_747, %c6_748, %c0_749, %c0_750] : memref<5x28x8x128xf32, #tpu.memory_space<vmem>>, vector<1x1x8x128xf32>
      %799 = vector.shape_cast %798 : vector<1x1x8x128xf32> to vector<8x128xf32>
      %800 = arith.mulf %799, %29 : vector<8x128xf32>
      %801 = arith.addf %797, %800 : vector<8x128xf32>
      %c4_751 = arith.constant 4 : index
      %c6_752 = arith.constant 6 : index
      %c0_753 = arith.constant 0 : index
      %c0_754 = arith.constant 0 : index
      %802 = vector.load %arg1[%c4_751, %c6_752, %c0_753, %c0_754] : memref<5x28x8x128xf32, #tpu.memory_space<vmem>>, vector<1x1x8x128xf32>
      %803 = vector.shape_cast %802 : vector<1x1x8x128xf32> to vector<8x128xf32>
      %804 = arith.mulf %803, %34 : vector<8x128xf32>
      %805 = arith.addf %801, %804 : vector<8x128xf32>
      %c2_755 = arith.constant 2 : index
      %c7_756 = arith.constant 7 : index
      %c0_757 = arith.constant 0 : index
      %c0_758 = arith.constant 0 : index
      %806 = vector.load %arg1[%c2_755, %c7_756, %c0_757, %c0_758] : memref<5x28x8x128xf32, #tpu.memory_space<vmem>>, vector<1x1x8x128xf32>
      %807 = vector.shape_cast %806 : vector<1x1x8x128xf32> to vector<8x128xf32>
      %808 = arith.mulf %807, %39 : vector<8x128xf32>
      %809 = arith.addf %805, %808 : vector<8x128xf32>
      %c3_759 = arith.constant 3 : index
      %c7_760 = arith.constant 7 : index
      %c0_761 = arith.constant 0 : index
      %c0_762 = arith.constant 0 : index
      %810 = vector.load %arg1[%c3_759, %c7_760, %c0_761, %c0_762] : memref<5x28x8x128xf32, #tpu.memory_space<vmem>>, vector<1x1x8x128xf32>
      %811 = vector.shape_cast %810 : vector<1x1x8x128xf32> to vector<8x128xf32>
      %812 = arith.mulf %811, %44 : vector<8x128xf32>
      %813 = arith.addf %809, %812 : vector<8x128xf32>
      %c4_763 = arith.constant 4 : index
      %c7_764 = arith.constant 7 : index
      %c0_765 = arith.constant 0 : index
      %c0_766 = arith.constant 0 : index
      %814 = vector.load %arg1[%c4_763, %c7_764, %c0_765, %c0_766] : memref<5x28x8x128xf32, #tpu.memory_space<vmem>>, vector<1x1x8x128xf32>
      %815 = vector.shape_cast %814 : vector<1x1x8x128xf32> to vector<8x128xf32>
      %816 = arith.mulf %815, %49 : vector<8x128xf32>
      %817 = arith.addf %813, %816 : vector<8x128xf32>
      %c2_767 = arith.constant 2 : index
      %c8_768 = arith.constant 8 : index
      %c0_769 = arith.constant 0 : index
      %c0_770 = arith.constant 0 : index
      %818 = vector.load %arg1[%c2_767, %c8_768, %c0_769, %c0_770] : memref<5x28x8x128xf32, #tpu.memory_space<vmem>>, vector<1x1x8x128xf32>
      %819 = vector.shape_cast %818 : vector<1x1x8x128xf32> to vector<8x128xf32>
      %820 = arith.mulf %819, %54 : vector<8x128xf32>
      %821 = arith.addf %817, %820 : vector<8x128xf32>
      %c3_771 = arith.constant 3 : index
      %c8_772 = arith.constant 8 : index
      %c0_773 = arith.constant 0 : index
      %c0_774 = arith.constant 0 : index
      %822 = vector.load %arg1[%c3_771, %c8_772, %c0_773, %c0_774] : memref<5x28x8x128xf32, #tpu.memory_space<vmem>>, vector<1x1x8x128xf32>
      %823 = vector.shape_cast %822 : vector<1x1x8x128xf32> to vector<8x128xf32>
      %824 = arith.mulf %823, %59 : vector<8x128xf32>
      %825 = arith.addf %821, %824 : vector<8x128xf32>
      %c4_775 = arith.constant 4 : index
      %c8_776 = arith.constant 8 : index
      %c0_777 = arith.constant 0 : index
      %c0_778 = arith.constant 0 : index
      %826 = vector.load %arg1[%c4_775, %c8_776, %c0_777, %c0_778] : memref<5x28x8x128xf32, #tpu.memory_space<vmem>>, vector<1x1x8x128xf32>
      %827 = vector.shape_cast %826 : vector<1x1x8x128xf32> to vector<8x128xf32>
      %828 = arith.mulf %827, %64 : vector<8x128xf32>
      %829 = arith.addf %825, %828 : vector<8x128xf32>
      %830 = arith.maximumf %794, %829 : vector<8x128xf32>
      %c0_779 = arith.constant 0 : index
      %c7_780 = arith.constant 7 : index
      %c0_781 = arith.constant 0 : index
      %c0_782 = arith.constant 0 : index
      %831 = vector.load %arg1[%c0_779, %c7_780, %c0_781, %c0_782] : memref<5x28x8x128xf32, #tpu.memory_space<vmem>>, vector<1x1x8x128xf32>
      %832 = vector.shape_cast %831 : vector<1x1x8x128xf32> to vector<8x128xf32>
      %833 = arith.mulf %832, %24 : vector<8x128xf32>
      %c1_783 = arith.constant 1 : index
      %c7_784 = arith.constant 7 : index
      %c0_785 = arith.constant 0 : index
      %c0_786 = arith.constant 0 : index
      %834 = vector.load %arg1[%c1_783, %c7_784, %c0_785, %c0_786] : memref<5x28x8x128xf32, #tpu.memory_space<vmem>>, vector<1x1x8x128xf32>
      %835 = vector.shape_cast %834 : vector<1x1x8x128xf32> to vector<8x128xf32>
      %836 = arith.mulf %835, %29 : vector<8x128xf32>
      %837 = arith.addf %833, %836 : vector<8x128xf32>
      %c2_787 = arith.constant 2 : index
      %c7_788 = arith.constant 7 : index
      %c0_789 = arith.constant 0 : index
      %c0_790 = arith.constant 0 : index
      %838 = vector.load %arg1[%c2_787, %c7_788, %c0_789, %c0_790] : memref<5x28x8x128xf32, #tpu.memory_space<vmem>>, vector<1x1x8x128xf32>
      %839 = vector.shape_cast %838 : vector<1x1x8x128xf32> to vector<8x128xf32>
      %840 = arith.mulf %839, %34 : vector<8x128xf32>
      %841 = arith.addf %837, %840 : vector<8x128xf32>
      %c0_791 = arith.constant 0 : index
      %c8_792 = arith.constant 8 : index
      %c0_793 = arith.constant 0 : index
      %c0_794 = arith.constant 0 : index
      %842 = vector.load %arg1[%c0_791, %c8_792, %c0_793, %c0_794] : memref<5x28x8x128xf32, #tpu.memory_space<vmem>>, vector<1x1x8x128xf32>
      %843 = vector.shape_cast %842 : vector<1x1x8x128xf32> to vector<8x128xf32>
      %844 = arith.mulf %843, %39 : vector<8x128xf32>
      %845 = arith.addf %841, %844 : vector<8x128xf32>
      %c1_795 = arith.constant 1 : index
      %c8_796 = arith.constant 8 : index
      %c0_797 = arith.constant 0 : index
      %c0_798 = arith.constant 0 : index
      %846 = vector.load %arg1[%c1_795, %c8_796, %c0_797, %c0_798] : memref<5x28x8x128xf32, #tpu.memory_space<vmem>>, vector<1x1x8x128xf32>
      %847 = vector.shape_cast %846 : vector<1x1x8x128xf32> to vector<8x128xf32>
      %848 = arith.mulf %847, %44 : vector<8x128xf32>
      %849 = arith.addf %845, %848 : vector<8x128xf32>
      %c2_799 = arith.constant 2 : index
      %c8_800 = arith.constant 8 : index
      %c0_801 = arith.constant 0 : index
      %c0_802 = arith.constant 0 : index
      %850 = vector.load %arg1[%c2_799, %c8_800, %c0_801, %c0_802] : memref<5x28x8x128xf32, #tpu.memory_space<vmem>>, vector<1x1x8x128xf32>
      %851 = vector.shape_cast %850 : vector<1x1x8x128xf32> to vector<8x128xf32>
      %852 = arith.mulf %851, %49 : vector<8x128xf32>
      %853 = arith.addf %849, %852 : vector<8x128xf32>
      %c0_803 = arith.constant 0 : index
      %c9 = arith.constant 9 : index
      %c0_804 = arith.constant 0 : index
      %c0_805 = arith.constant 0 : index
      %854 = vector.load %arg1[%c0_803, %c9, %c0_804, %c0_805] : memref<5x28x8x128xf32, #tpu.memory_space<vmem>>, vector<1x1x8x128xf32>
      %855 = vector.shape_cast %854 : vector<1x1x8x128xf32> to vector<8x128xf32>
      %856 = arith.mulf %855, %54 : vector<8x128xf32>
      %857 = arith.addf %853, %856 : vector<8x128xf32>
      %c1_806 = arith.constant 1 : index
      %c9_807 = arith.constant 9 : index
      %c0_808 = arith.constant 0 : index
      %c0_809 = arith.constant 0 : index
      %858 = vector.load %arg1[%c1_806, %c9_807, %c0_808, %c0_809] : memref<5x28x8x128xf32, #tpu.memory_space<vmem>>, vector<1x1x8x128xf32>
      %859 = vector.shape_cast %858 : vector<1x1x8x128xf32> to vector<8x128xf32>
      %860 = arith.mulf %859, %59 : vector<8x128xf32>
      %861 = arith.addf %857, %860 : vector<8x128xf32>
      %c2_810 = arith.constant 2 : index
      %c9_811 = arith.constant 9 : index
      %c0_812 = arith.constant 0 : index
      %c0_813 = arith.constant 0 : index
      %862 = vector.load %arg1[%c2_810, %c9_811, %c0_812, %c0_813] : memref<5x28x8x128xf32, #tpu.memory_space<vmem>>, vector<1x1x8x128xf32>
      %863 = vector.shape_cast %862 : vector<1x1x8x128xf32> to vector<8x128xf32>
      %864 = arith.mulf %863, %64 : vector<8x128xf32>
      %865 = arith.addf %861, %864 : vector<8x128xf32>
      %866 = arith.maximumf %830, %865 : vector<8x128xf32>
      %c1_814 = arith.constant 1 : index
      %c7_815 = arith.constant 7 : index
      %c0_816 = arith.constant 0 : index
      %c0_817 = arith.constant 0 : index
      %867 = vector.load %arg1[%c1_814, %c7_815, %c0_816, %c0_817] : memref<5x28x8x128xf32, #tpu.memory_space<vmem>>, vector<1x1x8x128xf32>
      %868 = vector.shape_cast %867 : vector<1x1x8x128xf32> to vector<8x128xf32>
      %869 = arith.mulf %868, %24 : vector<8x128xf32>
      %c2_818 = arith.constant 2 : index
      %c7_819 = arith.constant 7 : index
      %c0_820 = arith.constant 0 : index
      %c0_821 = arith.constant 0 : index
      %870 = vector.load %arg1[%c2_818, %c7_819, %c0_820, %c0_821] : memref<5x28x8x128xf32, #tpu.memory_space<vmem>>, vector<1x1x8x128xf32>
      %871 = vector.shape_cast %870 : vector<1x1x8x128xf32> to vector<8x128xf32>
      %872 = arith.mulf %871, %29 : vector<8x128xf32>
      %873 = arith.addf %869, %872 : vector<8x128xf32>
      %c3_822 = arith.constant 3 : index
      %c7_823 = arith.constant 7 : index
      %c0_824 = arith.constant 0 : index
      %c0_825 = arith.constant 0 : index
      %874 = vector.load %arg1[%c3_822, %c7_823, %c0_824, %c0_825] : memref<5x28x8x128xf32, #tpu.memory_space<vmem>>, vector<1x1x8x128xf32>
      %875 = vector.shape_cast %874 : vector<1x1x8x128xf32> to vector<8x128xf32>
      %876 = arith.mulf %875, %34 : vector<8x128xf32>
      %877 = arith.addf %873, %876 : vector<8x128xf32>
      %c1_826 = arith.constant 1 : index
      %c8_827 = arith.constant 8 : index
      %c0_828 = arith.constant 0 : index
      %c0_829 = arith.constant 0 : index
      %878 = vector.load %arg1[%c1_826, %c8_827, %c0_828, %c0_829] : memref<5x28x8x128xf32, #tpu.memory_space<vmem>>, vector<1x1x8x128xf32>
      %879 = vector.shape_cast %878 : vector<1x1x8x128xf32> to vector<8x128xf32>
      %880 = arith.mulf %879, %39 : vector<8x128xf32>
      %881 = arith.addf %877, %880 : vector<8x128xf32>
      %c2_830 = arith.constant 2 : index
      %c8_831 = arith.constant 8 : index
      %c0_832 = arith.constant 0 : index
      %c0_833 = arith.constant 0 : index
      %882 = vector.load %arg1[%c2_830, %c8_831, %c0_832, %c0_833] : memref<5x28x8x128xf32, #tpu.memory_space<vmem>>, vector<1x1x8x128xf32>
      %883 = vector.shape_cast %882 : vector<1x1x8x128xf32> to vector<8x128xf32>
      %884 = arith.mulf %883, %44 : vector<8x128xf32>
      %885 = arith.addf %881, %884 : vector<8x128xf32>
      %c3_834 = arith.constant 3 : index
      %c8_835 = arith.constant 8 : index
      %c0_836 = arith.constant 0 : index
      %c0_837 = arith.constant 0 : index
      %886 = vector.load %arg1[%c3_834, %c8_835, %c0_836, %c0_837] : memref<5x28x8x128xf32, #tpu.memory_space<vmem>>, vector<1x1x8x128xf32>
      %887 = vector.shape_cast %886 : vector<1x1x8x128xf32> to vector<8x128xf32>
      %888 = arith.mulf %887, %49 : vector<8x128xf32>
      %889 = arith.addf %885, %888 : vector<8x128xf32>
      %c1_838 = arith.constant 1 : index
      %c9_839 = arith.constant 9 : index
      %c0_840 = arith.constant 0 : index
      %c0_841 = arith.constant 0 : index
      %890 = vector.load %arg1[%c1_838, %c9_839, %c0_840, %c0_841] : memref<5x28x8x128xf32, #tpu.memory_space<vmem>>, vector<1x1x8x128xf32>
      %891 = vector.shape_cast %890 : vector<1x1x8x128xf32> to vector<8x128xf32>
      %892 = arith.mulf %891, %54 : vector<8x128xf32>
      %893 = arith.addf %889, %892 : vector<8x128xf32>
      %c2_842 = arith.constant 2 : index
      %c9_843 = arith.constant 9 : index
      %c0_844 = arith.constant 0 : index
      %c0_845 = arith.constant 0 : index
      %894 = vector.load %arg1[%c2_842, %c9_843, %c0_844, %c0_845] : memref<5x28x8x128xf32, #tpu.memory_space<vmem>>, vector<1x1x8x128xf32>
      %895 = vector.shape_cast %894 : vector<1x1x8x128xf32> to vector<8x128xf32>
      %896 = arith.mulf %895, %59 : vector<8x128xf32>
      %897 = arith.addf %893, %896 : vector<8x128xf32>
      %c3_846 = arith.constant 3 : index
      %c9_847 = arith.constant 9 : index
      %c0_848 = arith.constant 0 : index
      %c0_849 = arith.constant 0 : index
      %898 = vector.load %arg1[%c3_846, %c9_847, %c0_848, %c0_849] : memref<5x28x8x128xf32, #tpu.memory_space<vmem>>, vector<1x1x8x128xf32>
      %899 = vector.shape_cast %898 : vector<1x1x8x128xf32> to vector<8x128xf32>
      %900 = arith.mulf %899, %64 : vector<8x128xf32>
      %901 = arith.addf %897, %900 : vector<8x128xf32>
      %902 = arith.maximumf %866, %901 : vector<8x128xf32>
      %c2_850 = arith.constant 2 : index
      %c7_851 = arith.constant 7 : index
      %c0_852 = arith.constant 0 : index
      %c0_853 = arith.constant 0 : index
      %903 = vector.load %arg1[%c2_850, %c7_851, %c0_852, %c0_853] : memref<5x28x8x128xf32, #tpu.memory_space<vmem>>, vector<1x1x8x128xf32>
      %904 = vector.shape_cast %903 : vector<1x1x8x128xf32> to vector<8x128xf32>
      %905 = arith.mulf %904, %24 : vector<8x128xf32>
      %c3_854 = arith.constant 3 : index
      %c7_855 = arith.constant 7 : index
      %c0_856 = arith.constant 0 : index
      %c0_857 = arith.constant 0 : index
      %906 = vector.load %arg1[%c3_854, %c7_855, %c0_856, %c0_857] : memref<5x28x8x128xf32, #tpu.memory_space<vmem>>, vector<1x1x8x128xf32>
      %907 = vector.shape_cast %906 : vector<1x1x8x128xf32> to vector<8x128xf32>
      %908 = arith.mulf %907, %29 : vector<8x128xf32>
      %909 = arith.addf %905, %908 : vector<8x128xf32>
      %c4_858 = arith.constant 4 : index
      %c7_859 = arith.constant 7 : index
      %c0_860 = arith.constant 0 : index
      %c0_861 = arith.constant 0 : index
      %910 = vector.load %arg1[%c4_858, %c7_859, %c0_860, %c0_861] : memref<5x28x8x128xf32, #tpu.memory_space<vmem>>, vector<1x1x8x128xf32>
      %911 = vector.shape_cast %910 : vector<1x1x8x128xf32> to vector<8x128xf32>
      %912 = arith.mulf %911, %34 : vector<8x128xf32>
      %913 = arith.addf %909, %912 : vector<8x128xf32>
      %c2_862 = arith.constant 2 : index
      %c8_863 = arith.constant 8 : index
      %c0_864 = arith.constant 0 : index
      %c0_865 = arith.constant 0 : index
      %914 = vector.load %arg1[%c2_862, %c8_863, %c0_864, %c0_865] : memref<5x28x8x128xf32, #tpu.memory_space<vmem>>, vector<1x1x8x128xf32>
      %915 = vector.shape_cast %914 : vector<1x1x8x128xf32> to vector<8x128xf32>
      %916 = arith.mulf %915, %39 : vector<8x128xf32>
      %917 = arith.addf %913, %916 : vector<8x128xf32>
      %c3_866 = arith.constant 3 : index
      %c8_867 = arith.constant 8 : index
      %c0_868 = arith.constant 0 : index
      %c0_869 = arith.constant 0 : index
      %918 = vector.load %arg1[%c3_866, %c8_867, %c0_868, %c0_869] : memref<5x28x8x128xf32, #tpu.memory_space<vmem>>, vector<1x1x8x128xf32>
      %919 = vector.shape_cast %918 : vector<1x1x8x128xf32> to vector<8x128xf32>
      %920 = arith.mulf %919, %44 : vector<8x128xf32>
      %921 = arith.addf %917, %920 : vector<8x128xf32>
      %c4_870 = arith.constant 4 : index
      %c8_871 = arith.constant 8 : index
      %c0_872 = arith.constant 0 : index
      %c0_873 = arith.constant 0 : index
      %922 = vector.load %arg1[%c4_870, %c8_871, %c0_872, %c0_873] : memref<5x28x8x128xf32, #tpu.memory_space<vmem>>, vector<1x1x8x128xf32>
      %923 = vector.shape_cast %922 : vector<1x1x8x128xf32> to vector<8x128xf32>
      %924 = arith.mulf %923, %49 : vector<8x128xf32>
      %925 = arith.addf %921, %924 : vector<8x128xf32>
      %c2_874 = arith.constant 2 : index
      %c9_875 = arith.constant 9 : index
      %c0_876 = arith.constant 0 : index
      %c0_877 = arith.constant 0 : index
      %926 = vector.load %arg1[%c2_874, %c9_875, %c0_876, %c0_877] : memref<5x28x8x128xf32, #tpu.memory_space<vmem>>, vector<1x1x8x128xf32>
      %927 = vector.shape_cast %926 : vector<1x1x8x128xf32> to vector<8x128xf32>
      %928 = arith.mulf %927, %54 : vector<8x128xf32>
      %929 = arith.addf %925, %928 : vector<8x128xf32>
      %c3_878 = arith.constant 3 : index
      %c9_879 = arith.constant 9 : index
      %c0_880 = arith.constant 0 : index
      %c0_881 = arith.constant 0 : index
      %930 = vector.load %arg1[%c3_878, %c9_879, %c0_880, %c0_881] : memref<5x28x8x128xf32, #tpu.memory_space<vmem>>, vector<1x1x8x128xf32>
      %931 = vector.shape_cast %930 : vector<1x1x8x128xf32> to vector<8x128xf32>
      %932 = arith.mulf %931, %59 : vector<8x128xf32>
      %933 = arith.addf %929, %932 : vector<8x128xf32>
      %c4_882 = arith.constant 4 : index
      %c9_883 = arith.constant 9 : index
      %c0_884 = arith.constant 0 : index
      %c0_885 = arith.constant 0 : index
      %934 = vector.load %arg1[%c4_882, %c9_883, %c0_884, %c0_885] : memref<5x28x8x128xf32, #tpu.memory_space<vmem>>, vector<1x1x8x128xf32>
      %935 = vector.shape_cast %934 : vector<1x1x8x128xf32> to vector<8x128xf32>
      %936 = arith.mulf %935, %64 : vector<8x128xf32>
      %937 = arith.addf %933, %936 : vector<8x128xf32>
      %938 = arith.maximumf %902, %937 : vector<8x128xf32>
      %c0_886 = arith.constant 0 : index
      %c8_887 = arith.constant 8 : index
      %c0_888 = arith.constant 0 : index
      %c0_889 = arith.constant 0 : index
      %939 = vector.load %arg1[%c0_886, %c8_887, %c0_888, %c0_889] : memref<5x28x8x128xf32, #tpu.memory_space<vmem>>, vector<1x1x8x128xf32>
      %940 = vector.shape_cast %939 : vector<1x1x8x128xf32> to vector<8x128xf32>
      %941 = arith.mulf %940, %24 : vector<8x128xf32>
      %c1_890 = arith.constant 1 : index
      %c8_891 = arith.constant 8 : index
      %c0_892 = arith.constant 0 : index
      %c0_893 = arith.constant 0 : index
      %942 = vector.load %arg1[%c1_890, %c8_891, %c0_892, %c0_893] : memref<5x28x8x128xf32, #tpu.memory_space<vmem>>, vector<1x1x8x128xf32>
      %943 = vector.shape_cast %942 : vector<1x1x8x128xf32> to vector<8x128xf32>
      %944 = arith.mulf %943, %29 : vector<8x128xf32>
      %945 = arith.addf %941, %944 : vector<8x128xf32>
      %c2_894 = arith.constant 2 : index
      %c8_895 = arith.constant 8 : index
      %c0_896 = arith.constant 0 : index
      %c0_897 = arith.constant 0 : index
      %946 = vector.load %arg1[%c2_894, %c8_895, %c0_896, %c0_897] : memref<5x28x8x128xf32, #tpu.memory_space<vmem>>, vector<1x1x8x128xf32>
      %947 = vector.shape_cast %946 : vector<1x1x8x128xf32> to vector<8x128xf32>
      %948 = arith.mulf %947, %34 : vector<8x128xf32>
      %949 = arith.addf %945, %948 : vector<8x128xf32>
      %c0_898 = arith.constant 0 : index
      %c9_899 = arith.constant 9 : index
      %c0_900 = arith.constant 0 : index
      %c0_901 = arith.constant 0 : index
      %950 = vector.load %arg1[%c0_898, %c9_899, %c0_900, %c0_901] : memref<5x28x8x128xf32, #tpu.memory_space<vmem>>, vector<1x1x8x128xf32>
      %951 = vector.shape_cast %950 : vector<1x1x8x128xf32> to vector<8x128xf32>
      %952 = arith.mulf %951, %39 : vector<8x128xf32>
      %953 = arith.addf %949, %952 : vector<8x128xf32>
      %c1_902 = arith.constant 1 : index
      %c9_903 = arith.constant 9 : index
      %c0_904 = arith.constant 0 : index
      %c0_905 = arith.constant 0 : index
      %954 = vector.load %arg1[%c1_902, %c9_903, %c0_904, %c0_905] : memref<5x28x8x128xf32, #tpu.memory_space<vmem>>, vector<1x1x8x128xf32>
      %955 = vector.shape_cast %954 : vector<1x1x8x128xf32> to vector<8x128xf32>
      %956 = arith.mulf %955, %44 : vector<8x128xf32>
      %957 = arith.addf %953, %956 : vector<8x128xf32>
      %c2_906 = arith.constant 2 : index
      %c9_907 = arith.constant 9 : index
      %c0_908 = arith.constant 0 : index
      %c0_909 = arith.constant 0 : index
      %958 = vector.load %arg1[%c2_906, %c9_907, %c0_908, %c0_909] : memref<5x28x8x128xf32, #tpu.memory_space<vmem>>, vector<1x1x8x128xf32>
      %959 = vector.shape_cast %958 : vector<1x1x8x128xf32> to vector<8x128xf32>
      %960 = arith.mulf %959, %49 : vector<8x128xf32>
      %961 = arith.addf %957, %960 : vector<8x128xf32>
      %c0_910 = arith.constant 0 : index
      %c10 = arith.constant 10 : index
      %c0_911 = arith.constant 0 : index
      %c0_912 = arith.constant 0 : index
      %962 = vector.load %arg1[%c0_910, %c10, %c0_911, %c0_912] : memref<5x28x8x128xf32, #tpu.memory_space<vmem>>, vector<1x1x8x128xf32>
      %963 = vector.shape_cast %962 : vector<1x1x8x128xf32> to vector<8x128xf32>
      %964 = arith.mulf %963, %54 : vector<8x128xf32>
      %965 = arith.addf %961, %964 : vector<8x128xf32>
      %c1_913 = arith.constant 1 : index
      %c10_914 = arith.constant 10 : index
      %c0_915 = arith.constant 0 : index
      %c0_916 = arith.constant 0 : index
      %966 = vector.load %arg1[%c1_913, %c10_914, %c0_915, %c0_916] : memref<5x28x8x128xf32, #tpu.memory_space<vmem>>, vector<1x1x8x128xf32>
      %967 = vector.shape_cast %966 : vector<1x1x8x128xf32> to vector<8x128xf32>
      %968 = arith.mulf %967, %59 : vector<8x128xf32>
      %969 = arith.addf %965, %968 : vector<8x128xf32>
      %c2_917 = arith.constant 2 : index
      %c10_918 = arith.constant 10 : index
      %c0_919 = arith.constant 0 : index
      %c0_920 = arith.constant 0 : index
      %970 = vector.load %arg1[%c2_917, %c10_918, %c0_919, %c0_920] : memref<5x28x8x128xf32, #tpu.memory_space<vmem>>, vector<1x1x8x128xf32>
      %971 = vector.shape_cast %970 : vector<1x1x8x128xf32> to vector<8x128xf32>
      %972 = arith.mulf %971, %64 : vector<8x128xf32>
      %973 = arith.addf %969, %972 : vector<8x128xf32>
      %974 = arith.maximumf %938, %973 : vector<8x128xf32>
      %c1_921 = arith.constant 1 : index
      %c8_922 = arith.constant 8 : index
      %c0_923 = arith.constant 0 : index
      %c0_924 = arith.constant 0 : index
      %975 = vector.load %arg1[%c1_921, %c8_922, %c0_923, %c0_924] : memref<5x28x8x128xf32, #tpu.memory_space<vmem>>, vector<1x1x8x128xf32>
      %976 = vector.shape_cast %975 : vector<1x1x8x128xf32> to vector<8x128xf32>
      %977 = arith.mulf %976, %24 : vector<8x128xf32>
      %c2_925 = arith.constant 2 : index
      %c8_926 = arith.constant 8 : index
      %c0_927 = arith.constant 0 : index
      %c0_928 = arith.constant 0 : index
      %978 = vector.load %arg1[%c2_925, %c8_926, %c0_927, %c0_928] : memref<5x28x8x128xf32, #tpu.memory_space<vmem>>, vector<1x1x8x128xf32>
      %979 = vector.shape_cast %978 : vector<1x1x8x128xf32> to vector<8x128xf32>
      %980 = arith.mulf %979, %29 : vector<8x128xf32>
      %981 = arith.addf %977, %980 : vector<8x128xf32>
      %c3_929 = arith.constant 3 : index
      %c8_930 = arith.constant 8 : index
      %c0_931 = arith.constant 0 : index
      %c0_932 = arith.constant 0 : index
      %982 = vector.load %arg1[%c3_929, %c8_930, %c0_931, %c0_932] : memref<5x28x8x128xf32, #tpu.memory_space<vmem>>, vector<1x1x8x128xf32>
      %983 = vector.shape_cast %982 : vector<1x1x8x128xf32> to vector<8x128xf32>
      %984 = arith.mulf %983, %34 : vector<8x128xf32>
      %985 = arith.addf %981, %984 : vector<8x128xf32>
      %c1_933 = arith.constant 1 : index
      %c9_934 = arith.constant 9 : index
      %c0_935 = arith.constant 0 : index
      %c0_936 = arith.constant 0 : index
      %986 = vector.load %arg1[%c1_933, %c9_934, %c0_935, %c0_936] : memref<5x28x8x128xf32, #tpu.memory_space<vmem>>, vector<1x1x8x128xf32>
      %987 = vector.shape_cast %986 : vector<1x1x8x128xf32> to vector<8x128xf32>
      %988 = arith.mulf %987, %39 : vector<8x128xf32>
      %989 = arith.addf %985, %988 : vector<8x128xf32>
      %c2_937 = arith.constant 2 : index
      %c9_938 = arith.constant 9 : index
      %c0_939 = arith.constant 0 : index
      %c0_940 = arith.constant 0 : index
      %990 = vector.load %arg1[%c2_937, %c9_938, %c0_939, %c0_940] : memref<5x28x8x128xf32, #tpu.memory_space<vmem>>, vector<1x1x8x128xf32>
      %991 = vector.shape_cast %990 : vector<1x1x8x128xf32> to vector<8x128xf32>
      %992 = arith.mulf %991, %44 : vector<8x128xf32>
      %993 = arith.addf %989, %992 : vector<8x128xf32>
      %c3_941 = arith.constant 3 : index
      %c9_942 = arith.constant 9 : index
      %c0_943 = arith.constant 0 : index
      %c0_944 = arith.constant 0 : index
      %994 = vector.load %arg1[%c3_941, %c9_942, %c0_943, %c0_944] : memref<5x28x8x128xf32, #tpu.memory_space<vmem>>, vector<1x1x8x128xf32>
      %995 = vector.shape_cast %994 : vector<1x1x8x128xf32> to vector<8x128xf32>
      %996 = arith.mulf %995, %49 : vector<8x128xf32>
      %997 = arith.addf %993, %996 : vector<8x128xf32>
      %c1_945 = arith.constant 1 : index
      %c10_946 = arith.constant 10 : index
      %c0_947 = arith.constant 0 : index
      %c0_948 = arith.constant 0 : index
      %998 = vector.load %arg1[%c1_945, %c10_946, %c0_947, %c0_948] : memref<5x28x8x128xf32, #tpu.memory_space<vmem>>, vector<1x1x8x128xf32>
      %999 = vector.shape_cast %998 : vector<1x1x8x128xf32> to vector<8x128xf32>
      %1000 = arith.mulf %999, %54 : vector<8x128xf32>
      %1001 = arith.addf %997, %1000 : vector<8x128xf32>
      %c2_949 = arith.constant 2 : index
      %c10_950 = arith.constant 10 : index
      %c0_951 = arith.constant 0 : index
      %c0_952 = arith.constant 0 : index
      %1002 = vector.load %arg1[%c2_949, %c10_950, %c0_951, %c0_952] : memref<5x28x8x128xf32, #tpu.memory_space<vmem>>, vector<1x1x8x128xf32>
      %1003 = vector.shape_cast %1002 : vector<1x1x8x128xf32> to vector<8x128xf32>
      %1004 = arith.mulf %1003, %59 : vector<8x128xf32>
      %1005 = arith.addf %1001, %1004 : vector<8x128xf32>
      %c3_953 = arith.constant 3 : index
      %c10_954 = arith.constant 10 : index
      %c0_955 = arith.constant 0 : index
      %c0_956 = arith.constant 0 : index
      %1006 = vector.load %arg1[%c3_953, %c10_954, %c0_955, %c0_956] : memref<5x28x8x128xf32, #tpu.memory_space<vmem>>, vector<1x1x8x128xf32>
      %1007 = vector.shape_cast %1006 : vector<1x1x8x128xf32> to vector<8x128xf32>
      %1008 = arith.mulf %1007, %64 : vector<8x128xf32>
      %1009 = arith.addf %1005, %1008 : vector<8x128xf32>
      %1010 = arith.maximumf %974, %1009 : vector<8x128xf32>
      %c2_957 = arith.constant 2 : index
      %c8_958 = arith.constant 8 : index
      %c0_959 = arith.constant 0 : index
      %c0_960 = arith.constant 0 : index
      %1011 = vector.load %arg1[%c2_957, %c8_958, %c0_959, %c0_960] : memref<5x28x8x128xf32, #tpu.memory_space<vmem>>, vector<1x1x8x128xf32>
      %1012 = vector.shape_cast %1011 : vector<1x1x8x128xf32> to vector<8x128xf32>
      %1013 = arith.mulf %1012, %24 : vector<8x128xf32>
      %c3_961 = arith.constant 3 : index
      %c8_962 = arith.constant 8 : index
      %c0_963 = arith.constant 0 : index
      %c0_964 = arith.constant 0 : index
      %1014 = vector.load %arg1[%c3_961, %c8_962, %c0_963, %c0_964] : memref<5x28x8x128xf32, #tpu.memory_space<vmem>>, vector<1x1x8x128xf32>
      %1015 = vector.shape_cast %1014 : vector<1x1x8x128xf32> to vector<8x128xf32>
      %1016 = arith.mulf %1015, %29 : vector<8x128xf32>
      %1017 = arith.addf %1013, %1016 : vector<8x128xf32>
      %c4_965 = arith.constant 4 : index
      %c8_966 = arith.constant 8 : index
      %c0_967 = arith.constant 0 : index
      %c0_968 = arith.constant 0 : index
      %1018 = vector.load %arg1[%c4_965, %c8_966, %c0_967, %c0_968] : memref<5x28x8x128xf32, #tpu.memory_space<vmem>>, vector<1x1x8x128xf32>
      %1019 = vector.shape_cast %1018 : vector<1x1x8x128xf32> to vector<8x128xf32>
      %1020 = arith.mulf %1019, %34 : vector<8x128xf32>
      %1021 = arith.addf %1017, %1020 : vector<8x128xf32>
      %c2_969 = arith.constant 2 : index
      %c9_970 = arith.constant 9 : index
      %c0_971 = arith.constant 0 : index
      %c0_972 = arith.constant 0 : index
      %1022 = vector.load %arg1[%c2_969, %c9_970, %c0_971, %c0_972] : memref<5x28x8x128xf32, #tpu.memory_space<vmem>>, vector<1x1x8x128xf32>
      %1023 = vector.shape_cast %1022 : vector<1x1x8x128xf32> to vector<8x128xf32>
      %1024 = arith.mulf %1023, %39 : vector<8x128xf32>
      %1025 = arith.addf %1021, %1024 : vector<8x128xf32>
      %c3_973 = arith.constant 3 : index
      %c9_974 = arith.constant 9 : index
      %c0_975 = arith.constant 0 : index
      %c0_976 = arith.constant 0 : index
      %1026 = vector.load %arg1[%c3_973, %c9_974, %c0_975, %c0_976] : memref<5x28x8x128xf32, #tpu.memory_space<vmem>>, vector<1x1x8x128xf32>
      %1027 = vector.shape_cast %1026 : vector<1x1x8x128xf32> to vector<8x128xf32>
      %1028 = arith.mulf %1027, %44 : vector<8x128xf32>
      %1029 = arith.addf %1025, %1028 : vector<8x128xf32>
      %c4_977 = arith.constant 4 : index
      %c9_978 = arith.constant 9 : index
      %c0_979 = arith.constant 0 : index
      %c0_980 = arith.constant 0 : index
      %1030 = vector.load %arg1[%c4_977, %c9_978, %c0_979, %c0_980] : memref<5x28x8x128xf32, #tpu.memory_space<vmem>>, vector<1x1x8x128xf32>
      %1031 = vector.shape_cast %1030 : vector<1x1x8x128xf32> to vector<8x128xf32>
      %1032 = arith.mulf %1031, %49 : vector<8x128xf32>
      %1033 = arith.addf %1029, %1032 : vector<8x128xf32>
      %c2_981 = arith.constant 2 : index
      %c10_982 = arith.constant 10 : index
      %c0_983 = arith.constant 0 : index
      %c0_984 = arith.constant 0 : index
      %1034 = vector.load %arg1[%c2_981, %c10_982, %c0_983, %c0_984] : memref<5x28x8x128xf32, #tpu.memory_space<vmem>>, vector<1x1x8x128xf32>
      %1035 = vector.shape_cast %1034 : vector<1x1x8x128xf32> to vector<8x128xf32>
      %1036 = arith.mulf %1035, %54 : vector<8x128xf32>
      %1037 = arith.addf %1033, %1036 : vector<8x128xf32>
      %c3_985 = arith.constant 3 : index
      %c10_986 = arith.constant 10 : index
      %c0_987 = arith.constant 0 : index
      %c0_988 = arith.constant 0 : index
      %1038 = vector.load %arg1[%c3_985, %c10_986, %c0_987, %c0_988] : memref<5x28x8x128xf32, #tpu.memory_space<vmem>>, vector<1x1x8x128xf32>
      %1039 = vector.shape_cast %1038 : vector<1x1x8x128xf32> to vector<8x128xf32>
      %1040 = arith.mulf %1039, %59 : vector<8x128xf32>
      %1041 = arith.addf %1037, %1040 : vector<8x128xf32>
      %c4_989 = arith.constant 4 : index
      %c10_990 = arith.constant 10 : index
      %c0_991 = arith.constant 0 : index
      %c0_992 = arith.constant 0 : index
      %1042 = vector.load %arg1[%c4_989, %c10_990, %c0_991, %c0_992] : memref<5x28x8x128xf32, #tpu.memory_space<vmem>>, vector<1x1x8x128xf32>
      %1043 = vector.shape_cast %1042 : vector<1x1x8x128xf32> to vector<8x128xf32>
      %1044 = arith.mulf %1043, %64 : vector<8x128xf32>
      %1045 = arith.addf %1041, %1044 : vector<8x128xf32>
      %1046 = arith.maximumf %1010, %1045 : vector<8x128xf32>
      %1047 = arith.addf %1046, %67 : vector<8x128xf32>
      %1048 = arith.index_cast %19 : i32 to index
      %c16 = arith.constant 16 : index
      %c0_993 = arith.constant 0 : index
      %1049 = vector.load %arg9[%1048, %c16, %c0_993] : memref<10x64x128xf32, #tpu.memory_space<vmem>>, vector<1x8x128xf32>
      %1050 = vector.shape_cast %1049 : vector<1x8x128xf32> to vector<8x128xf32>
      %1051 = vector.shape_cast %1047 : vector<8x128xf32> to vector<1x8x128xf32>
      tpu.vector_store %arg9[%1048, %c16, %c0_993], %1051 {strides = array<i32>} : memref<10x64x128xf32, #tpu.memory_space<vmem>>, vector<1x8x128xf32>,
      %c0_994 = arith.constant 0 : index
      %c9_995 = arith.constant 9 : index
      %c0_996 = arith.constant 0 : index
      %c0_997 = arith.constant 0 : index
      %1052 = vector.load %arg1[%c0_994, %c9_995, %c0_996, %c0_997] : memref<5x28x8x128xf32, #tpu.memory_space<vmem>>, vector<1x1x8x128xf32>
      %1053 = vector.shape_cast %1052 : vector<1x1x8x128xf32> to vector<8x128xf32>
      %1054 = arith.mulf %1053, %24 : vector<8x128xf32>
      %c1_998 = arith.constant 1 : index
      %c9_999 = arith.constant 9 : index
      %c0_1000 = arith.constant 0 : index
      %c0_1001 = arith.constant 0 : index
      %1055 = vector.load %arg1[%c1_998, %c9_999, %c0_1000, %c0_1001] : memref<5x28x8x128xf32, #tpu.memory_space<vmem>>, vector<1x1x8x128xf32>
      %1056 = vector.shape_cast %1055 : vector<1x1x8x128xf32> to vector<8x128xf32>
      %1057 = arith.mulf %1056, %29 : vector<8x128xf32>
      %1058 = arith.addf %1054, %1057 : vector<8x128xf32>
      %c2_1002 = arith.constant 2 : index
      %c9_1003 = arith.constant 9 : index
      %c0_1004 = arith.constant 0 : index
      %c0_1005 = arith.constant 0 : index
      %1059 = vector.load %arg1[%c2_1002, %c9_1003, %c0_1004, %c0_1005] : memref<5x28x8x128xf32, #tpu.memory_space<vmem>>, vector<1x1x8x128xf32>
      %1060 = vector.shape_cast %1059 : vector<1x1x8x128xf32> to vector<8x128xf32>
      %1061 = arith.mulf %1060, %34 : vector<8x128xf32>
      %1062 = arith.addf %1058, %1061 : vector<8x128xf32>
      %c0_1006 = arith.constant 0 : index
      %c10_1007 = arith.constant 10 : index
      %c0_1008 = arith.constant 0 : index
      %c0_1009 = arith.constant 0 : index
      %1063 = vector.load %arg1[%c0_1006, %c10_1007, %c0_1008, %c0_1009] : memref<5x28x8x128xf32, #tpu.memory_space<vmem>>, vector<1x1x8x128xf32>
      %1064 = vector.shape_cast %1063 : vector<1x1x8x128xf32> to vector<8x128xf32>
      %1065 = arith.mulf %1064, %39 : vector<8x128xf32>
      %1066 = arith.addf %1062, %1065 : vector<8x128xf32>
      %c1_1010 = arith.constant 1 : index
      %c10_1011 = arith.constant 10 : index
      %c0_1012 = arith.constant 0 : index
      %c0_1013 = arith.constant 0 : index
      %1067 = vector.load %arg1[%c1_1010, %c10_1011, %c0_1012, %c0_1013] : memref<5x28x8x128xf32, #tpu.memory_space<vmem>>, vector<1x1x8x128xf32>
      %1068 = vector.shape_cast %1067 : vector<1x1x8x128xf32> to vector<8x128xf32>
      %1069 = arith.mulf %1068, %44 : vector<8x128xf32>
      %1070 = arith.addf %1066, %1069 : vector<8x128xf32>
      %c2_1014 = arith.constant 2 : index
      %c10_1015 = arith.constant 10 : index
      %c0_1016 = arith.constant 0 : index
      %c0_1017 = arith.constant 0 : index
      %1071 = vector.load %arg1[%c2_1014, %c10_1015, %c0_1016, %c0_1017] : memref<5x28x8x128xf32, #tpu.memory_space<vmem>>, vector<1x1x8x128xf32>
      %1072 = vector.shape_cast %1071 : vector<1x1x8x128xf32> to vector<8x128xf32>
      %1073 = arith.mulf %1072, %49 : vector<8x128xf32>
      %1074 = arith.addf %1070, %1073 : vector<8x128xf32>
      %c0_1018 = arith.constant 0 : index
      %c11 = arith.constant 11 : index
      %c0_1019 = arith.constant 0 : index
      %c0_1020 = arith.constant 0 : index
      %1075 = vector.load %arg1[%c0_1018, %c11, %c0_1019, %c0_1020] : memref<5x28x8x128xf32, #tpu.memory_space<vmem>>, vector<1x1x8x128xf32>
      %1076 = vector.shape_cast %1075 : vector<1x1x8x128xf32> to vector<8x128xf32>
      %1077 = arith.mulf %1076, %54 : vector<8x128xf32>
      %1078 = arith.addf %1074, %1077 : vector<8x128xf32>
      %c1_1021 = arith.constant 1 : index
      %c11_1022 = arith.constant 11 : index
      %c0_1023 = arith.constant 0 : index
      %c0_1024 = arith.constant 0 : index
      %1079 = vector.load %arg1[%c1_1021, %c11_1022, %c0_1023, %c0_1024] : memref<5x28x8x128xf32, #tpu.memory_space<vmem>>, vector<1x1x8x128xf32>
      %1080 = vector.shape_cast %1079 : vector<1x1x8x128xf32> to vector<8x128xf32>
      %1081 = arith.mulf %1080, %59 : vector<8x128xf32>
      %1082 = arith.addf %1078, %1081 : vector<8x128xf32>
      %c2_1025 = arith.constant 2 : index
      %c11_1026 = arith.constant 11 : index
      %c0_1027 = arith.constant 0 : index
      %c0_1028 = arith.constant 0 : index
      %1083 = vector.load %arg1[%c2_1025, %c11_1026, %c0_1027, %c0_1028] : memref<5x28x8x128xf32, #tpu.memory_space<vmem>>, vector<1x1x8x128xf32>
      %1084 = vector.shape_cast %1083 : vector<1x1x8x128xf32> to vector<8x128xf32>
      %1085 = arith.mulf %1084, %64 : vector<8x128xf32>
      %1086 = arith.addf %1082, %1085 : vector<8x128xf32>
      %c1_1029 = arith.constant 1 : index
      %c9_1030 = arith.constant 9 : index
      %c0_1031 = arith.constant 0 : index
      %c0_1032 = arith.constant 0 : index
      %1087 = vector.load %arg1[%c1_1029, %c9_1030, %c0_1031, %c0_1032] : memref<5x28x8x128xf32, #tpu.memory_space<vmem>>, vector<1x1x8x128xf32>
      %1088 = vector.shape_cast %1087 : vector<1x1x8x128xf32> to vector<8x128xf32>
      %1089 = arith.mulf %1088, %24 : vector<8x128xf32>
      %c2_1033 = arith.constant 2 : index
      %c9_1034 = arith.constant 9 : index
      %c0_1035 = arith.constant 0 : index
      %c0_1036 = arith.constant 0 : index
      %1090 = vector.load %arg1[%c2_1033, %c9_1034, %c0_1035, %c0_1036] : memref<5x28x8x128xf32, #tpu.memory_space<vmem>>, vector<1x1x8x128xf32>
      %1091 = vector.shape_cast %1090 : vector<1x1x8x128xf32> to vector<8x128xf32>
      %1092 = arith.mulf %1091, %29 : vector<8x128xf32>
      %1093 = arith.addf %1089, %1092 : vector<8x128xf32>
      %c3_1037 = arith.constant 3 : index
      %c9_1038 = arith.constant 9 : index
      %c0_1039 = arith.constant 0 : index
      %c0_1040 = arith.constant 0 : index
      %1094 = vector.load %arg1[%c3_1037, %c9_1038, %c0_1039, %c0_1040] : memref<5x28x8x128xf32, #tpu.memory_space<vmem>>, vector<1x1x8x128xf32>
      %1095 = vector.shape_cast %1094 : vector<1x1x8x128xf32> to vector<8x128xf32>
      %1096 = arith.mulf %1095, %34 : vector<8x128xf32>
      %1097 = arith.addf %1093, %1096 : vector<8x128xf32>
      %c1_1041 = arith.constant 1 : index
      %c10_1042 = arith.constant 10 : index
      %c0_1043 = arith.constant 0 : index
      %c0_1044 = arith.constant 0 : index
      %1098 = vector.load %arg1[%c1_1041, %c10_1042, %c0_1043, %c0_1044] : memref<5x28x8x128xf32, #tpu.memory_space<vmem>>, vector<1x1x8x128xf32>
      %1099 = vector.shape_cast %1098 : vector<1x1x8x128xf32> to vector<8x128xf32>
      %1100 = arith.mulf %1099, %39 : vector<8x128xf32>
      %1101 = arith.addf %1097, %1100 : vector<8x128xf32>
      %c2_1045 = arith.constant 2 : index
      %c10_1046 = arith.constant 10 : index
      %c0_1047 = arith.constant 0 : index
      %c0_1048 = arith.constant 0 : index
      %1102 = vector.load %arg1[%c2_1045, %c10_1046, %c0_1047, %c0_1048] : memref<5x28x8x128xf32, #tpu.memory_space<vmem>>, vector<1x1x8x128xf32>
      %1103 = vector.shape_cast %1102 : vector<1x1x8x128xf32> to vector<8x128xf32>
      %1104 = arith.mulf %1103, %44 : vector<8x128xf32>
      %1105 = arith.addf %1101, %1104 : vector<8x128xf32>
      %c3_1049 = arith.constant 3 : index
      %c10_1050 = arith.constant 10 : index
      %c0_1051 = arith.constant 0 : index
      %c0_1052 = arith.constant 0 : index
      %1106 = vector.load %arg1[%c3_1049, %c10_1050, %c0_1051, %c0_1052] : memref<5x28x8x128xf32, #tpu.memory_space<vmem>>, vector<1x1x8x128xf32>
      %1107 = vector.shape_cast %1106 : vector<1x1x8x128xf32> to vector<8x128xf32>
      %1108 = arith.mulf %1107, %49 : vector<8x128xf32>
      %1109 = arith.addf %1105, %1108 : vector<8x128xf32>
      %c1_1053 = arith.constant 1 : index
      %c11_1054 = arith.constant 11 : index
      %c0_1055 = arith.constant 0 : index
      %c0_1056 = arith.constant 0 : index
      %1110 = vector.load %arg1[%c1_1053, %c11_1054, %c0_1055, %c0_1056] : memref<5x28x8x128xf32, #tpu.memory_space<vmem>>, vector<1x1x8x128xf32>
      %1111 = vector.shape_cast %1110 : vector<1x1x8x128xf32> to vector<8x128xf32>
      %1112 = arith.mulf %1111, %54 : vector<8x128xf32>
      %1113 = arith.addf %1109, %1112 : vector<8x128xf32>
      %c2_1057 = arith.constant 2 : index
      %c11_1058 = arith.constant 11 : index
      %c0_1059 = arith.constant 0 : index
      %c0_1060 = arith.constant 0 : index
      %1114 = vector.load %arg1[%c2_1057, %c11_1058, %c0_1059, %c0_1060] : memref<5x28x8x128xf32, #tpu.memory_space<vmem>>, vector<1x1x8x128xf32>
      %1115 = vector.shape_cast %1114 : vector<1x1x8x128xf32> to vector<8x128xf32>
      %1116 = arith.mulf %1115, %59 : vector<8x128xf32>
      %1117 = arith.addf %1113, %1116 : vector<8x128xf32>
      %c3_1061 = arith.constant 3 : index
      %c11_1062 = arith.constant 11 : index
      %c0_1063 = arith.constant 0 : index
      %c0_1064 = arith.constant 0 : index
      %1118 = vector.load %arg1[%c3_1061, %c11_1062, %c0_1063, %c0_1064] : memref<5x28x8x128xf32, #tpu.memory_space<vmem>>, vector<1x1x8x128xf32>
      %1119 = vector.shape_cast %1118 : vector<1x1x8x128xf32> to vector<8x128xf32>
      %1120 = arith.mulf %1119, %64 : vector<8x128xf32>
      %1121 = arith.addf %1117, %1120 : vector<8x128xf32>
      %1122 = arith.maximumf %1086, %1121 : vector<8x128xf32>
      %c2_1065 = arith.constant 2 : index
      %c9_1066 = arith.constant 9 : index
      %c0_1067 = arith.constant 0 : index
      %c0_1068 = arith.constant 0 : index
      %1123 = vector.load %arg1[%c2_1065, %c9_1066, %c0_1067, %c0_1068] : memref<5x28x8x128xf32, #tpu.memory_space<vmem>>, vector<1x1x8x128xf32>
      %1124 = vector.shape_cast %1123 : vector<1x1x8x128xf32> to vector<8x128xf32>
      %1125 = arith.mulf %1124, %24 : vector<8x128xf32>
      %c3_1069 = arith.constant 3 : index
      %c9_1070 = arith.constant 9 : index
      %c0_1071 = arith.constant 0 : index
      %c0_1072 = arith.constant 0 : index
      %1126 = vector.load %arg1[%c3_1069, %c9_1070, %c0_1071, %c0_1072] : memref<5x28x8x128xf32, #tpu.memory_space<vmem>>, vector<1x1x8x128xf32>
      %1127 = vector.shape_cast %1126 : vector<1x1x8x128xf32> to vector<8x128xf32>
      %1128 = arith.mulf %1127, %29 : vector<8x128xf32>
      %1129 = arith.addf %1125, %1128 : vector<8x128xf32>
      %c4_1073 = arith.constant 4 : index
      %c9_1074 = arith.constant 9 : index
      %c0_1075 = arith.constant 0 : index
      %c0_1076 = arith.constant 0 : index
      %1130 = vector.load %arg1[%c4_1073, %c9_1074, %c0_1075, %c0_1076] : memref<5x28x8x128xf32, #tpu.memory_space<vmem>>, vector<1x1x8x128xf32>
      %1131 = vector.shape_cast %1130 : vector<1x1x8x128xf32> to vector<8x128xf32>
      %1132 = arith.mulf %1131, %34 : vector<8x128xf32>
      %1133 = arith.addf %1129, %1132 : vector<8x128xf32>
      %c2_1077 = arith.constant 2 : index
      %c10_1078 = arith.constant 10 : index
      %c0_1079 = arith.constant 0 : index
      %c0_1080 = arith.constant 0 : index
      %1134 = vector.load %arg1[%c2_1077, %c10_1078, %c0_1079, %c0_1080] : memref<5x28x8x128xf32, #tpu.memory_space<vmem>>, vector<1x1x8x128xf32>
      %1135 = vector.shape_cast %1134 : vector<1x1x8x128xf32> to vector<8x128xf32>
      %1136 = arith.mulf %1135, %39 : vector<8x128xf32>
      %1137 = arith.addf %1133, %1136 : vector<8x128xf32>
      %c3_1081 = arith.constant 3 : index
      %c10_1082 = arith.constant 10 : index
      %c0_1083 = arith.constant 0 : index
      %c0_1084 = arith.constant 0 : index
      %1138 = vector.load %arg1[%c3_1081, %c10_1082, %c0_1083, %c0_1084] : memref<5x28x8x128xf32, #tpu.memory_space<vmem>>, vector<1x1x8x128xf32>
      %1139 = vector.shape_cast %1138 : vector<1x1x8x128xf32> to vector<8x128xf32>
      %1140 = arith.mulf %1139, %44 : vector<8x128xf32>
      %1141 = arith.addf %1137, %1140 : vector<8x128xf32>
      %c4_1085 = arith.constant 4 : index
      %c10_1086 = arith.constant 10 : index
      %c0_1087 = arith.constant 0 : index
      %c0_1088 = arith.constant 0 : index
      %1142 = vector.load %arg1[%c4_1085, %c10_1086, %c0_1087, %c0_1088] : memref<5x28x8x128xf32, #tpu.memory_space<vmem>>, vector<1x1x8x128xf32>
      %1143 = vector.shape_cast %1142 : vector<1x1x8x128xf32> to vector<8x128xf32>
      %1144 = arith.mulf %1143, %49 : vector<8x128xf32>
      %1145 = arith.addf %1141, %1144 : vector<8x128xf32>
      %c2_1089 = arith.constant 2 : index
      %c11_1090 = arith.constant 11 : index
      %c0_1091 = arith.constant 0 : index
      %c0_1092 = arith.constant 0 : index
      %1146 = vector.load %arg1[%c2_1089, %c11_1090, %c0_1091, %c0_1092] : memref<5x28x8x128xf32, #tpu.memory_space<vmem>>, vector<1x1x8x128xf32>
      %1147 = vector.shape_cast %1146 : vector<1x1x8x128xf32> to vector<8x128xf32>
      %1148 = arith.mulf %1147, %54 : vector<8x128xf32>
      %1149 = arith.addf %1145, %1148 : vector<8x128xf32>
      %c3_1093 = arith.constant 3 : index
      %c11_1094 = arith.constant 11 : index
      %c0_1095 = arith.constant 0 : index
      %c0_1096 = arith.constant 0 : index
      %1150 = vector.load %arg1[%c3_1093, %c11_1094, %c0_1095, %c0_1096] : memref<5x28x8x128xf32, #tpu.memory_space<vmem>>, vector<1x1x8x128xf32>
      %1151 = vector.shape_cast %1150 : vector<1x1x8x128xf32> to vector<8x128xf32>
      %1152 = arith.mulf %1151, %59 : vector<8x128xf32>
      %1153 = arith.addf %1149, %1152 : vector<8x128xf32>
      %c4_1097 = arith.constant 4 : index
      %c11_1098 = arith.constant 11 : index
      %c0_1099 = arith.constant 0 : index
      %c0_1100 = arith.constant 0 : index
      %1154 = vector.load %arg1[%c4_1097, %c11_1098, %c0_1099, %c0_1100] : memref<5x28x8x128xf32, #tpu.memory_space<vmem>>, vector<1x1x8x128xf32>
      %1155 = vector.shape_cast %1154 : vector<1x1x8x128xf32> to vector<8x128xf32>
      %1156 = arith.mulf %1155, %64 : vector<8x128xf32>
      %1157 = arith.addf %1153, %1156 : vector<8x128xf32>
      %1158 = arith.maximumf %1122, %1157 : vector<8x128xf32>
      %c0_1101 = arith.constant 0 : index
      %c10_1102 = arith.constant 10 : index
      %c0_1103 = arith.constant 0 : index
      %c0_1104 = arith.constant 0 : index
      %1159 = vector.load %arg1[%c0_1101, %c10_1102, %c0_1103, %c0_1104] : memref<5x28x8x128xf32, #tpu.memory_space<vmem>>, vector<1x1x8x128xf32>
      %1160 = vector.shape_cast %1159 : vector<1x1x8x128xf32> to vector<8x128xf32>
      %1161 = arith.mulf %1160, %24 : vector<8x128xf32>
      %c1_1105 = arith.constant 1 : index
      %c10_1106 = arith.constant 10 : index
      %c0_1107 = arith.constant 0 : index
      %c0_1108 = arith.constant 0 : index
      %1162 = vector.load %arg1[%c1_1105, %c10_1106, %c0_1107, %c0_1108] : memref<5x28x8x128xf32, #tpu.memory_space<vmem>>, vector<1x1x8x128xf32>
      %1163 = vector.shape_cast %1162 : vector<1x1x8x128xf32> to vector<8x128xf32>
      %1164 = arith.mulf %1163, %29 : vector<8x128xf32>
      %1165 = arith.addf %1161, %1164 : vector<8x128xf32>
      %c2_1109 = arith.constant 2 : index
      %c10_1110 = arith.constant 10 : index
      %c0_1111 = arith.constant 0 : index
      %c0_1112 = arith.constant 0 : index
      %1166 = vector.load %arg1[%c2_1109, %c10_1110, %c0_1111, %c0_1112] : memref<5x28x8x128xf32, #tpu.memory_space<vmem>>, vector<1x1x8x128xf32>
      %1167 = vector.shape_cast %1166 : vector<1x1x8x128xf32> to vector<8x128xf32>
      %1168 = arith.mulf %1167, %34 : vector<8x128xf32>
      %1169 = arith.addf %1165, %1168 : vector<8x128xf32>
      %c0_1113 = arith.constant 0 : index
      %c11_1114 = arith.constant 11 : index
      %c0_1115 = arith.constant 0 : index
      %c0_1116 = arith.constant 0 : index
      %1170 = vector.load %arg1[%c0_1113, %c11_1114, %c0_1115, %c0_1116] : memref<5x28x8x128xf32, #tpu.memory_space<vmem>>, vector<1x1x8x128xf32>
      %1171 = vector.shape_cast %1170 : vector<1x1x8x128xf32> to vector<8x128xf32>
      %1172 = arith.mulf %1171, %39 : vector<8x128xf32>
      %1173 = arith.addf %1169, %1172 : vector<8x128xf32>
      %c1_1117 = arith.constant 1 : index
      %c11_1118 = arith.constant 11 : index
      %c0_1119 = arith.constant 0 : index
      %c0_1120 = arith.constant 0 : index
      %1174 = vector.load %arg1[%c1_1117, %c11_1118, %c0_1119, %c0_1120] : memref<5x28x8x128xf32, #tpu.memory_space<vmem>>, vector<1x1x8x128xf32>
      %1175 = vector.shape_cast %1174 : vector<1x1x8x128xf32> to vector<8x128xf32>
      %1176 = arith.mulf %1175, %44 : vector<8x128xf32>
      %1177 = arith.addf %1173, %1176 : vector<8x128xf32>
      %c2_1121 = arith.constant 2 : index
      %c11_1122 = arith.constant 11 : index
      %c0_1123 = arith.constant 0 : index
      %c0_1124 = arith.constant 0 : index
      %1178 = vector.load %arg1[%c2_1121, %c11_1122, %c0_1123, %c0_1124] : memref<5x28x8x128xf32, #tpu.memory_space<vmem>>, vector<1x1x8x128xf32>
      %1179 = vector.shape_cast %1178 : vector<1x1x8x128xf32> to vector<8x128xf32>
      %1180 = arith.mulf %1179, %49 : vector<8x128xf32>
      %1181 = arith.addf %1177, %1180 : vector<8x128xf32>
      %c0_1125 = arith.constant 0 : index
      %c12 = arith.constant 12 : index
      %c0_1126 = arith.constant 0 : index
      %c0_1127 = arith.constant 0 : index
      %1182 = vector.load %arg1[%c0_1125, %c12, %c0_1126, %c0_1127] : memref<5x28x8x128xf32, #tpu.memory_space<vmem>>, vector<1x1x8x128xf32>
      %1183 = vector.shape_cast %1182 : vector<1x1x8x128xf32> to vector<8x128xf32>
      %1184 = arith.mulf %1183, %54 : vector<8x128xf32>
      %1185 = arith.addf %1181, %1184 : vector<8x128xf32>
      %c1_1128 = arith.constant 1 : index
      %c12_1129 = arith.constant 12 : index
      %c0_1130 = arith.constant 0 : index
      %c0_1131 = arith.constant 0 : index
      %1186 = vector.load %arg1[%c1_1128, %c12_1129, %c0_1130, %c0_1131] : memref<5x28x8x128xf32, #tpu.memory_space<vmem>>, vector<1x1x8x128xf32>
      %1187 = vector.shape_cast %1186 : vector<1x1x8x128xf32> to vector<8x128xf32>
      %1188 = arith.mulf %1187, %59 : vector<8x128xf32>
      %1189 = arith.addf %1185, %1188 : vector<8x128xf32>
      %c2_1132 = arith.constant 2 : index
      %c12_1133 = arith.constant 12 : index
      %c0_1134 = arith.constant 0 : index
      %c0_1135 = arith.constant 0 : index
      %1190 = vector.load %arg1[%c2_1132, %c12_1133, %c0_1134, %c0_1135] : memref<5x28x8x128xf32, #tpu.memory_space<vmem>>, vector<1x1x8x128xf32>
      %1191 = vector.shape_cast %1190 : vector<1x1x8x128xf32> to vector<8x128xf32>
      %1192 = arith.mulf %1191, %64 : vector<8x128xf32>
      %1193 = arith.addf %1189, %1192 : vector<8x128xf32>
      %1194 = arith.maximumf %1158, %1193 : vector<8x128xf32>
      %c1_1136 = arith.constant 1 : index
      %c10_1137 = arith.constant 10 : index
      %c0_1138 = arith.constant 0 : index
      %c0_1139 = arith.constant 0 : index
      %1195 = vector.load %arg1[%c1_1136, %c10_1137, %c0_1138, %c0_1139] : memref<5x28x8x128xf32, #tpu.memory_space<vmem>>, vector<1x1x8x128xf32>
      %1196 = vector.shape_cast %1195 : vector<1x1x8x128xf32> to vector<8x128xf32>
      %1197 = arith.mulf %1196, %24 : vector<8x128xf32>
      %c2_1140 = arith.constant 2 : index
      %c10_1141 = arith.constant 10 : index
      %c0_1142 = arith.constant 0 : index
      %c0_1143 = arith.constant 0 : index
      %1198 = vector.load %arg1[%c2_1140, %c10_1141, %c0_1142, %c0_1143] : memref<5x28x8x128xf32, #tpu.memory_space<vmem>>, vector<1x1x8x128xf32>
      %1199 = vector.shape_cast %1198 : vector<1x1x8x128xf32> to vector<8x128xf32>
      %1200 = arith.mulf %1199, %29 : vector<8x128xf32>
      %1201 = arith.addf %1197, %1200 : vector<8x128xf32>
      %c3_1144 = arith.constant 3 : index
      %c10_1145 = arith.constant 10 : index
      %c0_1146 = arith.constant 0 : index
      %c0_1147 = arith.constant 0 : index
      %1202 = vector.load %arg1[%c3_1144, %c10_1145, %c0_1146, %c0_1147] : memref<5x28x8x128xf32, #tpu.memory_space<vmem>>, vector<1x1x8x128xf32>
      %1203 = vector.shape_cast %1202 : vector<1x1x8x128xf32> to vector<8x128xf32>
      %1204 = arith.mulf %1203, %34 : vector<8x128xf32>
      %1205 = arith.addf %1201, %1204 : vector<8x128xf32>
      %c1_1148 = arith.constant 1 : index
      %c11_1149 = arith.constant 11 : index
      %c0_1150 = arith.constant 0 : index
      %c0_1151 = arith.constant 0 : index
      %1206 = vector.load %arg1[%c1_1148, %c11_1149, %c0_1150, %c0_1151] : memref<5x28x8x128xf32, #tpu.memory_space<vmem>>, vector<1x1x8x128xf32>
      %1207 = vector.shape_cast %1206 : vector<1x1x8x128xf32> to vector<8x128xf32>
      %1208 = arith.mulf %1207, %39 : vector<8x128xf32>
      %1209 = arith.addf %1205, %1208 : vector<8x128xf32>
      %c2_1152 = arith.constant 2 : index
      %c11_1153 = arith.constant 11 : index
      %c0_1154 = arith.constant 0 : index
      %c0_1155 = arith.constant 0 : index
      %1210 = vector.load %arg1[%c2_1152, %c11_1153, %c0_1154, %c0_1155] : memref<5x28x8x128xf32, #tpu.memory_space<vmem>>, vector<1x1x8x128xf32>
      %1211 = vector.shape_cast %1210 : vector<1x1x8x128xf32> to vector<8x128xf32>
      %1212 = arith.mulf %1211, %44 : vector<8x128xf32>
      %1213 = arith.addf %1209, %1212 : vector<8x128xf32>
      %c3_1156 = arith.constant 3 : index
      %c11_1157 = arith.constant 11 : index
      %c0_1158 = arith.constant 0 : index
      %c0_1159 = arith.constant 0 : index
      %1214 = vector.load %arg1[%c3_1156, %c11_1157, %c0_1158, %c0_1159] : memref<5x28x8x128xf32, #tpu.memory_space<vmem>>, vector<1x1x8x128xf32>
      %1215 = vector.shape_cast %1214 : vector<1x1x8x128xf32> to vector<8x128xf32>
      %1216 = arith.mulf %1215, %49 : vector<8x128xf32>
      %1217 = arith.addf %1213, %1216 : vector<8x128xf32>
      %c1_1160 = arith.constant 1 : index
      %c12_1161 = arith.constant 12 : index
      %c0_1162 = arith.constant 0 : index
      %c0_1163 = arith.constant 0 : index
      %1218 = vector.load %arg1[%c1_1160, %c12_1161, %c0_1162, %c0_1163] : memref<5x28x8x128xf32, #tpu.memory_space<vmem>>, vector<1x1x8x128xf32>
      %1219 = vector.shape_cast %1218 : vector<1x1x8x128xf32> to vector<8x128xf32>
      %1220 = arith.mulf %1219, %54 : vector<8x128xf32>
      %1221 = arith.addf %1217, %1220 : vector<8x128xf32>
      %c2_1164 = arith.constant 2 : index
      %c12_1165 = arith.constant 12 : index
      %c0_1166 = arith.constant 0 : index
      %c0_1167 = arith.constant 0 : index
      %1222 = vector.load %arg1[%c2_1164, %c12_1165, %c0_1166, %c0_1167] : memref<5x28x8x128xf32, #tpu.memory_space<vmem>>, vector<1x1x8x128xf32>
      %1223 = vector.shape_cast %1222 : vector<1x1x8x128xf32> to vector<8x128xf32>
      %1224 = arith.mulf %1223, %59 : vector<8x128xf32>
      %1225 = arith.addf %1221, %1224 : vector<8x128xf32>
      %c3_1168 = arith.constant 3 : index
      %c12_1169 = arith.constant 12 : index
      %c0_1170 = arith.constant 0 : index
      %c0_1171 = arith.constant 0 : index
      %1226 = vector.load %arg1[%c3_1168, %c12_1169, %c0_1170, %c0_1171] : memref<5x28x8x128xf32, #tpu.memory_space<vmem>>, vector<1x1x8x128xf32>
      %1227 = vector.shape_cast %1226 : vector<1x1x8x128xf32> to vector<8x128xf32>
      %1228 = arith.mulf %1227, %64 : vector<8x128xf32>
      %1229 = arith.addf %1225, %1228 : vector<8x128xf32>
      %1230 = arith.maximumf %1194, %1229 : vector<8x128xf32>
      %c2_1172 = arith.constant 2 : index
      %c10_1173 = arith.constant 10 : index
      %c0_1174 = arith.constant 0 : index
      %c0_1175 = arith.constant 0 : index
      %1231 = vector.load %arg1[%c2_1172, %c10_1173, %c0_1174, %c0_1175] : memref<5x28x8x128xf32, #tpu.memory_space<vmem>>, vector<1x1x8x128xf32>
      %1232 = vector.shape_cast %1231 : vector<1x1x8x128xf32> to vector<8x128xf32>
      %1233 = arith.mulf %1232, %24 : vector<8x128xf32>
      %c3_1176 = arith.constant 3 : index
      %c10_1177 = arith.constant 10 : index
      %c0_1178 = arith.constant 0 : index
      %c0_1179 = arith.constant 0 : index
      %1234 = vector.load %arg1[%c3_1176, %c10_1177, %c0_1178, %c0_1179] : memref<5x28x8x128xf32, #tpu.memory_space<vmem>>, vector<1x1x8x128xf32>
      %1235 = vector.shape_cast %1234 : vector<1x1x8x128xf32> to vector<8x128xf32>
      %1236 = arith.mulf %1235, %29 : vector<8x128xf32>
      %1237 = arith.addf %1233, %1236 : vector<8x128xf32>
      %c4_1180 = arith.constant 4 : index
      %c10_1181 = arith.constant 10 : index
      %c0_1182 = arith.constant 0 : index
      %c0_1183 = arith.constant 0 : index
      %1238 = vector.load %arg1[%c4_1180, %c10_1181, %c0_1182, %c0_1183] : memref<5x28x8x128xf32, #tpu.memory_space<vmem>>, vector<1x1x8x128xf32>
      %1239 = vector.shape_cast %1238 : vector<1x1x8x128xf32> to vector<8x128xf32>
      %1240 = arith.mulf %1239, %34 : vector<8x128xf32>
      %1241 = arith.addf %1237, %1240 : vector<8x128xf32>
      %c2_1184 = arith.constant 2 : index
      %c11_1185 = arith.constant 11 : index
      %c0_1186 = arith.constant 0 : index
      %c0_1187 = arith.constant 0 : index
      %1242 = vector.load %arg1[%c2_1184, %c11_1185, %c0_1186, %c0_1187] : memref<5x28x8x128xf32, #tpu.memory_space<vmem>>, vector<1x1x8x128xf32>
      %1243 = vector.shape_cast %1242 : vector<1x1x8x128xf32> to vector<8x128xf32>
      %1244 = arith.mulf %1243, %39 : vector<8x128xf32>
      %1245 = arith.addf %1241, %1244 : vector<8x128xf32>
      %c3_1188 = arith.constant 3 : index
      %c11_1189 = arith.constant 11 : index
      %c0_1190 = arith.constant 0 : index
      %c0_1191 = arith.constant 0 : index
      %1246 = vector.load %arg1[%c3_1188, %c11_1189, %c0_1190, %c0_1191] : memref<5x28x8x128xf32, #tpu.memory_space<vmem>>, vector<1x1x8x128xf32>
      %1247 = vector.shape_cast %1246 : vector<1x1x8x128xf32> to vector<8x128xf32>
      %1248 = arith.mulf %1247, %44 : vector<8x128xf32>
      %1249 = arith.addf %1245, %1248 : vector<8x128xf32>
      %c4_1192 = arith.constant 4 : index
      %c11_1193 = arith.constant 11 : index
      %c0_1194 = arith.constant 0 : index
      %c0_1195 = arith.constant 0 : index
      %1250 = vector.load %arg1[%c4_1192, %c11_1193, %c0_1194, %c0_1195] : memref<5x28x8x128xf32, #tpu.memory_space<vmem>>, vector<1x1x8x128xf32>
      %1251 = vector.shape_cast %1250 : vector<1x1x8x128xf32> to vector<8x128xf32>
      %1252 = arith.mulf %1251, %49 : vector<8x128xf32>
      %1253 = arith.addf %1249, %1252 : vector<8x128xf32>
      %c2_1196 = arith.constant 2 : index
      %c12_1197 = arith.constant 12 : index
      %c0_1198 = arith.constant 0 : index
      %c0_1199 = arith.constant 0 : index
      %1254 = vector.load %arg1[%c2_1196, %c12_1197, %c0_1198, %c0_1199] : memref<5x28x8x128xf32, #tpu.memory_space<vmem>>, vector<1x1x8x128xf32>
      %1255 = vector.shape_cast %1254 : vector<1x1x8x128xf32> to vector<8x128xf32>
      %1256 = arith.mulf %1255, %54 : vector<8x128xf32>
      %1257 = arith.addf %1253, %1256 : vector<8x128xf32>
      %c3_1200 = arith.constant 3 : index
      %c12_1201 = arith.constant 12 : index
      %c0_1202 = arith.constant 0 : index
      %c0_1203 = arith.constant 0 : index
      %1258 = vector.load %arg1[%c3_1200, %c12_1201, %c0_1202, %c0_1203] : memref<5x28x8x128xf32, #tpu.memory_space<vmem>>, vector<1x1x8x128xf32>
      %1259 = vector.shape_cast %1258 : vector<1x1x8x128xf32> to vector<8x128xf32>
      %1260 = arith.mulf %1259, %59 : vector<8x128xf32>
      %1261 = arith.addf %1257, %1260 : vector<8x128xf32>
      %c4_1204 = arith.constant 4 : index
      %c12_1205 = arith.constant 12 : index
      %c0_1206 = arith.constant 0 : index
      %c0_1207 = arith.constant 0 : index
      %1262 = vector.load %arg1[%c4_1204, %c12_1205, %c0_1206, %c0_1207] : memref<5x28x8x128xf32, #tpu.memory_space<vmem>>, vector<1x1x8x128xf32>
      %1263 = vector.shape_cast %1262 : vector<1x1x8x128xf32> to vector<8x128xf32>
      %1264 = arith.mulf %1263, %64 : vector<8x128xf32>
      %1265 = arith.addf %1261, %1264 : vector<8x128xf32>
      %1266 = arith.maximumf %1230, %1265 : vector<8x128xf32>
      %c0_1208 = arith.constant 0 : index
      %c11_1209 = arith.constant 11 : index
      %c0_1210 = arith.constant 0 : index
      %c0_1211 = arith.constant 0 : index
      %1267 = vector.load %arg1[%c0_1208, %c11_1209, %c0_1210, %c0_1211] : memref<5x28x8x128xf32, #tpu.memory_space<vmem>>, vector<1x1x8x128xf32>
      %1268 = vector.shape_cast %1267 : vector<1x1x8x128xf32> to vector<8x128xf32>
      %1269 = arith.mulf %1268, %24 : vector<8x128xf32>
      %c1_1212 = arith.constant 1 : index
      %c11_1213 = arith.constant 11 : index
      %c0_1214 = arith.constant 0 : index
      %c0_1215 = arith.constant 0 : index
      %1270 = vector.load %arg1[%c1_1212, %c11_1213, %c0_1214, %c0_1215] : memref<5x28x8x128xf32, #tpu.memory_space<vmem>>, vector<1x1x8x128xf32>
      %1271 = vector.shape_cast %1270 : vector<1x1x8x128xf32> to vector<8x128xf32>
      %1272 = arith.mulf %1271, %29 : vector<8x128xf32>
      %1273 = arith.addf %1269, %1272 : vector<8x128xf32>
      %c2_1216 = arith.constant 2 : index
      %c11_1217 = arith.constant 11 : index
      %c0_1218 = arith.constant 0 : index
      %c0_1219 = arith.constant 0 : index
      %1274 = vector.load %arg1[%c2_1216, %c11_1217, %c0_1218, %c0_1219] : memref<5x28x8x128xf32, #tpu.memory_space<vmem>>, vector<1x1x8x128xf32>
      %1275 = vector.shape_cast %1274 : vector<1x1x8x128xf32> to vector<8x128xf32>
      %1276 = arith.mulf %1275, %34 : vector<8x128xf32>
      %1277 = arith.addf %1273, %1276 : vector<8x128xf32>
      %c0_1220 = arith.constant 0 : index
      %c12_1221 = arith.constant 12 : index
      %c0_1222 = arith.constant 0 : index
      %c0_1223 = arith.constant 0 : index
      %1278 = vector.load %arg1[%c0_1220, %c12_1221, %c0_1222, %c0_1223] : memref<5x28x8x128xf32, #tpu.memory_space<vmem>>, vector<1x1x8x128xf32>
      %1279 = vector.shape_cast %1278 : vector<1x1x8x128xf32> to vector<8x128xf32>
      %1280 = arith.mulf %1279, %39 : vector<8x128xf32>
      %1281 = arith.addf %1277, %1280 : vector<8x128xf32>
      %c1_1224 = arith.constant 1 : index
      %c12_1225 = arith.constant 12 : index
      %c0_1226 = arith.constant 0 : index
      %c0_1227 = arith.constant 0 : index
      %1282 = vector.load %arg1[%c1_1224, %c12_1225, %c0_1226, %c0_1227] : memref<5x28x8x128xf32, #tpu.memory_space<vmem>>, vector<1x1x8x128xf32>
      %1283 = vector.shape_cast %1282 : vector<1x1x8x128xf32> to vector<8x128xf32>
      %1284 = arith.mulf %1283, %44 : vector<8x128xf32>
      %1285 = arith.addf %1281, %1284 : vector<8x128xf32>
      %c2_1228 = arith.constant 2 : index
      %c12_1229 = arith.constant 12 : index
      %c0_1230 = arith.constant 0 : index
      %c0_1231 = arith.constant 0 : index
      %1286 = vector.load %arg1[%c2_1228, %c12_1229, %c0_1230, %c0_1231] : memref<5x28x8x128xf32, #tpu.memory_space<vmem>>, vector<1x1x8x128xf32>
      %1287 = vector.shape_cast %1286 : vector<1x1x8x128xf32> to vector<8x128xf32>
      %1288 = arith.mulf %1287, %49 : vector<8x128xf32>
      %1289 = arith.addf %1285, %1288 : vector<8x128xf32>
      %c0_1232 = arith.constant 0 : index
      %c13 = arith.constant 13 : index
      %c0_1233 = arith.constant 0 : index
      %c0_1234 = arith.constant 0 : index
      %1290 = vector.load %arg1[%c0_1232, %c13, %c0_1233, %c0_1234] : memref<5x28x8x128xf32, #tpu.memory_space<vmem>>, vector<1x1x8x128xf32>
      %1291 = vector.shape_cast %1290 : vector<1x1x8x128xf32> to vector<8x128xf32>
      %1292 = arith.mulf %1291, %54 : vector<8x128xf32>
      %1293 = arith.addf %1289, %1292 : vector<8x128xf32>
      %c1_1235 = arith.constant 1 : index
      %c13_1236 = arith.constant 13 : index
      %c0_1237 = arith.constant 0 : index
      %c0_1238 = arith.constant 0 : index
      %1294 = vector.load %arg1[%c1_1235, %c13_1236, %c0_1237, %c0_1238] : memref<5x28x8x128xf32, #tpu.memory_space<vmem>>, vector<1x1x8x128xf32>
      %1295 = vector.shape_cast %1294 : vector<1x1x8x128xf32> to vector<8x128xf32>
      %1296 = arith.mulf %1295, %59 : vector<8x128xf32>
      %1297 = arith.addf %1293, %1296 : vector<8x128xf32>
      %c2_1239 = arith.constant 2 : index
      %c13_1240 = arith.constant 13 : index
      %c0_1241 = arith.constant 0 : index
      %c0_1242 = arith.constant 0 : index
      %1298 = vector.load %arg1[%c2_1239, %c13_1240, %c0_1241, %c0_1242] : memref<5x28x8x128xf32, #tpu.memory_space<vmem>>, vector<1x1x8x128xf32>
      %1299 = vector.shape_cast %1298 : vector<1x1x8x128xf32> to vector<8x128xf32>
      %1300 = arith.mulf %1299, %64 : vector<8x128xf32>
      %1301 = arith.addf %1297, %1300 : vector<8x128xf32>
      %1302 = arith.maximumf %1266, %1301 : vector<8x128xf32>
      %c1_1243 = arith.constant 1 : index
      %c11_1244 = arith.constant 11 : index
      %c0_1245 = arith.constant 0 : index
      %c0_1246 = arith.constant 0 : index
      %1303 = vector.load %arg1[%c1_1243, %c11_1244, %c0_1245, %c0_1246] : memref<5x28x8x128xf32, #tpu.memory_space<vmem>>, vector<1x1x8x128xf32>
      %1304 = vector.shape_cast %1303 : vector<1x1x8x128xf32> to vector<8x128xf32>
      %1305 = arith.mulf %1304, %24 : vector<8x128xf32>
      %c2_1247 = arith.constant 2 : index
      %c11_1248 = arith.constant 11 : index
      %c0_1249 = arith.constant 0 : index
      %c0_1250 = arith.constant 0 : index
      %1306 = vector.load %arg1[%c2_1247, %c11_1248, %c0_1249, %c0_1250] : memref<5x28x8x128xf32, #tpu.memory_space<vmem>>, vector<1x1x8x128xf32>
      %1307 = vector.shape_cast %1306 : vector<1x1x8x128xf32> to vector<8x128xf32>
      %1308 = arith.mulf %1307, %29 : vector<8x128xf32>
      %1309 = arith.addf %1305, %1308 : vector<8x128xf32>
      %c3_1251 = arith.constant 3 : index
      %c11_1252 = arith.constant 11 : index
      %c0_1253 = arith.constant 0 : index
      %c0_1254 = arith.constant 0 : index
      %1310 = vector.load %arg1[%c3_1251, %c11_1252, %c0_1253, %c0_1254] : memref<5x28x8x128xf32, #tpu.memory_space<vmem>>, vector<1x1x8x128xf32>
      %1311 = vector.shape_cast %1310 : vector<1x1x8x128xf32> to vector<8x128xf32>
      %1312 = arith.mulf %1311, %34 : vector<8x128xf32>
      %1313 = arith.addf %1309, %1312 : vector<8x128xf32>
      %c1_1255 = arith.constant 1 : index
      %c12_1256 = arith.constant 12 : index
      %c0_1257 = arith.constant 0 : index
      %c0_1258 = arith.constant 0 : index
      %1314 = vector.load %arg1[%c1_1255, %c12_1256, %c0_1257, %c0_1258] : memref<5x28x8x128xf32, #tpu.memory_space<vmem>>, vector<1x1x8x128xf32>
      %1315 = vector.shape_cast %1314 : vector<1x1x8x128xf32> to vector<8x128xf32>
      %1316 = arith.mulf %1315, %39 : vector<8x128xf32>
      %1317 = arith.addf %1313, %1316 : vector<8x128xf32>
      %c2_1259 = arith.constant 2 : index
      %c12_1260 = arith.constant 12 : index
      %c0_1261 = arith.constant 0 : index
      %c0_1262 = arith.constant 0 : index
      %1318 = vector.load %arg1[%c2_1259, %c12_1260, %c0_1261, %c0_1262] : memref<5x28x8x128xf32, #tpu.memory_space<vmem>>, vector<1x1x8x128xf32>
      %1319 = vector.shape_cast %1318 : vector<1x1x8x128xf32> to vector<8x128xf32>
      %1320 = arith.mulf %1319, %44 : vector<8x128xf32>
      %1321 = arith.addf %1317, %1320 : vector<8x128xf32>
      %c3_1263 = arith.constant 3 : index
      %c12_1264 = arith.constant 12 : index
      %c0_1265 = arith.constant 0 : index
      %c0_1266 = arith.constant 0 : index
      %1322 = vector.load %arg1[%c3_1263, %c12_1264, %c0_1265, %c0_1266] : memref<5x28x8x128xf32, #tpu.memory_space<vmem>>, vector<1x1x8x128xf32>
      %1323 = vector.shape_cast %1322 : vector<1x1x8x128xf32> to vector<8x128xf32>
      %1324 = arith.mulf %1323, %49 : vector<8x128xf32>
      %1325 = arith.addf %1321, %1324 : vector<8x128xf32>
      %c1_1267 = arith.constant 1 : index
      %c13_1268 = arith.constant 13 : index
      %c0_1269 = arith.constant 0 : index
      %c0_1270 = arith.constant 0 : index
      %1326 = vector.load %arg1[%c1_1267, %c13_1268, %c0_1269, %c0_1270] : memref<5x28x8x128xf32, #tpu.memory_space<vmem>>, vector<1x1x8x128xf32>
      %1327 = vector.shape_cast %1326 : vector<1x1x8x128xf32> to vector<8x128xf32>
      %1328 = arith.mulf %1327, %54 : vector<8x128xf32>
      %1329 = arith.addf %1325, %1328 : vector<8x128xf32>
      %c2_1271 = arith.constant 2 : index
      %c13_1272 = arith.constant 13 : index
      %c0_1273 = arith.constant 0 : index
      %c0_1274 = arith.constant 0 : index
      %1330 = vector.load %arg1[%c2_1271, %c13_1272, %c0_1273, %c0_1274] : memref<5x28x8x128xf32, #tpu.memory_space<vmem>>, vector<1x1x8x128xf32>
      %1331 = vector.shape_cast %1330 : vector<1x1x8x128xf32> to vector<8x128xf32>
      %1332 = arith.mulf %1331, %59 : vector<8x128xf32>
      %1333 = arith.addf %1329, %1332 : vector<8x128xf32>
      %c3_1275 = arith.constant 3 : index
      %c13_1276 = arith.constant 13 : index
      %c0_1277 = arith.constant 0 : index
      %c0_1278 = arith.constant 0 : index
      %1334 = vector.load %arg1[%c3_1275, %c13_1276, %c0_1277, %c0_1278] : memref<5x28x8x128xf32, #tpu.memory_space<vmem>>, vector<1x1x8x128xf32>
      %1335 = vector.shape_cast %1334 : vector<1x1x8x128xf32> to vector<8x128xf32>
      %1336 = arith.mulf %1335, %64 : vector<8x128xf32>
      %1337 = arith.addf %1333, %1336 : vector<8x128xf32>
      %1338 = arith.maximumf %1302, %1337 : vector<8x128xf32>
      %c2_1279 = arith.constant 2 : index
      %c11_1280 = arith.constant 11 : index
      %c0_1281 = arith.constant 0 : index
      %c0_1282 = arith.constant 0 : index
      %1339 = vector.load %arg1[%c2_1279, %c11_1280, %c0_1281, %c0_1282] : memref<5x28x8x128xf32, #tpu.memory_space<vmem>>, vector<1x1x8x128xf32>
      %1340 = vector.shape_cast %1339 : vector<1x1x8x128xf32> to vector<8x128xf32>
      %1341 = arith.mulf %1340, %24 : vector<8x128xf32>
      %c3_1283 = arith.constant 3 : index
      %c11_1284 = arith.constant 11 : index
      %c0_1285 = arith.constant 0 : index
      %c0_1286 = arith.constant 0 : index
      %1342 = vector.load %arg1[%c3_1283, %c11_1284, %c0_1285, %c0_1286] : memref<5x28x8x128xf32, #tpu.memory_space<vmem>>, vector<1x1x8x128xf32>
      %1343 = vector.shape_cast %1342 : vector<1x1x8x128xf32> to vector<8x128xf32>
      %1344 = arith.mulf %1343, %29 : vector<8x128xf32>
      %1345 = arith.addf %1341, %1344 : vector<8x128xf32>
      %c4_1287 = arith.constant 4 : index
      %c11_1288 = arith.constant 11 : index
      %c0_1289 = arith.constant 0 : index
      %c0_1290 = arith.constant 0 : index
      %1346 = vector.load %arg1[%c4_1287, %c11_1288, %c0_1289, %c0_1290] : memref<5x28x8x128xf32, #tpu.memory_space<vmem>>, vector<1x1x8x128xf32>
      %1347 = vector.shape_cast %1346 : vector<1x1x8x128xf32> to vector<8x128xf32>
      %1348 = arith.mulf %1347, %34 : vector<8x128xf32>
      %1349 = arith.addf %1345, %1348 : vector<8x128xf32>
      %c2_1291 = arith.constant 2 : index
      %c12_1292 = arith.constant 12 : index
      %c0_1293 = arith.constant 0 : index
      %c0_1294 = arith.constant 0 : index
      %1350 = vector.load %arg1[%c2_1291, %c12_1292, %c0_1293, %c0_1294] : memref<5x28x8x128xf32, #tpu.memory_space<vmem>>, vector<1x1x8x128xf32>
      %1351 = vector.shape_cast %1350 : vector<1x1x8x128xf32> to vector<8x128xf32>
      %1352 = arith.mulf %1351, %39 : vector<8x128xf32>
      %1353 = arith.addf %1349, %1352 : vector<8x128xf32>
      %c3_1295 = arith.constant 3 : index
      %c12_1296 = arith.constant 12 : index
      %c0_1297 = arith.constant 0 : index
      %c0_1298 = arith.constant 0 : index
      %1354 = vector.load %arg1[%c3_1295, %c12_1296, %c0_1297, %c0_1298] : memref<5x28x8x128xf32, #tpu.memory_space<vmem>>, vector<1x1x8x128xf32>
      %1355 = vector.shape_cast %1354 : vector<1x1x8x128xf32> to vector<8x128xf32>
      %1356 = arith.mulf %1355, %44 : vector<8x128xf32>
      %1357 = arith.addf %1353, %1356 : vector<8x128xf32>
      %c4_1299 = arith.constant 4 : index
      %c12_1300 = arith.constant 12 : index
      %c0_1301 = arith.constant 0 : index
      %c0_1302 = arith.constant 0 : index
      %1358 = vector.load %arg1[%c4_1299, %c12_1300, %c0_1301, %c0_1302] : memref<5x28x8x128xf32, #tpu.memory_space<vmem>>, vector<1x1x8x128xf32>
      %1359 = vector.shape_cast %1358 : vector<1x1x8x128xf32> to vector<8x128xf32>
      %1360 = arith.mulf %1359, %49 : vector<8x128xf32>
      %1361 = arith.addf %1357, %1360 : vector<8x128xf32>
      %c2_1303 = arith.constant 2 : index
      %c13_1304 = arith.constant 13 : index
      %c0_1305 = arith.constant 0 : index
      %c0_1306 = arith.constant 0 : index
      %1362 = vector.load %arg1[%c2_1303, %c13_1304, %c0_1305, %c0_1306] : memref<5x28x8x128xf32, #tpu.memory_space<vmem>>, vector<1x1x8x128xf32>
      %1363 = vector.shape_cast %1362 : vector<1x1x8x128xf32> to vector<8x128xf32>
      %1364 = arith.mulf %1363, %54 : vector<8x128xf32>
      %1365 = arith.addf %1361, %1364 : vector<8x128xf32>
      %c3_1307 = arith.constant 3 : index
      %c13_1308 = arith.constant 13 : index
      %c0_1309 = arith.constant 0 : index
      %c0_1310 = arith.constant 0 : index
      %1366 = vector.load %arg1[%c3_1307, %c13_1308, %c0_1309, %c0_1310] : memref<5x28x8x128xf32, #tpu.memory_space<vmem>>, vector<1x1x8x128xf32>
      %1367 = vector.shape_cast %1366 : vector<1x1x8x128xf32> to vector<8x128xf32>
      %1368 = arith.mulf %1367, %59 : vector<8x128xf32>
      %1369 = arith.addf %1365, %1368 : vector<8x128xf32>
      %c4_1311 = arith.constant 4 : index
      %c13_1312 = arith.constant 13 : index
      %c0_1313 = arith.constant 0 : index
      %c0_1314 = arith.constant 0 : index
      %1370 = vector.load %arg1[%c4_1311, %c13_1312, %c0_1313, %c0_1314] : memref<5x28x8x128xf32, #tpu.memory_space<vmem>>, vector<1x1x8x128xf32>
      %1371 = vector.shape_cast %1370 : vector<1x1x8x128xf32> to vector<8x128xf32>
      %1372 = arith.mulf %1371, %64 : vector<8x128xf32>
      %1373 = arith.addf %1369, %1372 : vector<8x128xf32>
      %1374 = arith.maximumf %1338, %1373 : vector<8x128xf32>
      %1375 = arith.addf %1374, %67 : vector<8x128xf32>
      %1376 = arith.index_cast %19 : i32 to index
      %c24 = arith.constant 24 : index
      %c0_1315 = arith.constant 0 : index
      %1377 = vector.load %arg9[%1376, %c24, %c0_1315] : memref<10x64x128xf32, #tpu.memory_space<vmem>>, vector<1x8x128xf32>
      %1378 = vector.shape_cast %1377 : vector<1x8x128xf32> to vector<8x128xf32>
      %1379 = vector.shape_cast %1375 : vector<8x128xf32> to vector<1x8x128xf32>
      tpu.vector_store %arg9[%1376, %c24, %c0_1315], %1379 {strides = array<i32>} : memref<10x64x128xf32, #tpu.memory_space<vmem>>, vector<1x8x128xf32>,
      %c0_1316 = arith.constant 0 : index
      %c12_1317 = arith.constant 12 : index
      %c0_1318 = arith.constant 0 : index
      %c0_1319 = arith.constant 0 : index
      %1380 = vector.load %arg1[%c0_1316, %c12_1317, %c0_1318, %c0_1319] : memref<5x28x8x128xf32, #tpu.memory_space<vmem>>, vector<1x1x8x128xf32>
      %1381 = vector.shape_cast %1380 : vector<1x1x8x128xf32> to vector<8x128xf32>
      %1382 = arith.mulf %1381, %24 : vector<8x128xf32>
      %c1_1320 = arith.constant 1 : index
      %c12_1321 = arith.constant 12 : index
      %c0_1322 = arith.constant 0 : index
      %c0_1323 = arith.constant 0 : index
      %1383 = vector.load %arg1[%c1_1320, %c12_1321, %c0_1322, %c0_1323] : memref<5x28x8x128xf32, #tpu.memory_space<vmem>>, vector<1x1x8x128xf32>
      %1384 = vector.shape_cast %1383 : vector<1x1x8x128xf32> to vector<8x128xf32>
      %1385 = arith.mulf %1384, %29 : vector<8x128xf32>
      %1386 = arith.addf %1382, %1385 : vector<8x128xf32>
      %c2_1324 = arith.constant 2 : index
      %c12_1325 = arith.constant 12 : index
      %c0_1326 = arith.constant 0 : index
      %c0_1327 = arith.constant 0 : index
      %1387 = vector.load %arg1[%c2_1324, %c12_1325, %c0_1326, %c0_1327] : memref<5x28x8x128xf32, #tpu.memory_space<vmem>>, vector<1x1x8x128xf32>
      %1388 = vector.shape_cast %1387 : vector<1x1x8x128xf32> to vector<8x128xf32>
      %1389 = arith.mulf %1388, %34 : vector<8x128xf32>
      %1390 = arith.addf %1386, %1389 : vector<8x128xf32>
      %c0_1328 = arith.constant 0 : index
      %c13_1329 = arith.constant 13 : index
      %c0_1330 = arith.constant 0 : index
      %c0_1331 = arith.constant 0 : index
      %1391 = vector.load %arg1[%c0_1328, %c13_1329, %c0_1330, %c0_1331] : memref<5x28x8x128xf32, #tpu.memory_space<vmem>>, vector<1x1x8x128xf32>
      %1392 = vector.shape_cast %1391 : vector<1x1x8x128xf32> to vector<8x128xf32>
      %1393 = arith.mulf %1392, %39 : vector<8x128xf32>
      %1394 = arith.addf %1390, %1393 : vector<8x128xf32>
      %c1_1332 = arith.constant 1 : index
      %c13_1333 = arith.constant 13 : index
      %c0_1334 = arith.constant 0 : index
      %c0_1335 = arith.constant 0 : index
      %1395 = vector.load %arg1[%c1_1332, %c13_1333, %c0_1334, %c0_1335] : memref<5x28x8x128xf32, #tpu.memory_space<vmem>>, vector<1x1x8x128xf32>
      %1396 = vector.shape_cast %1395 : vector<1x1x8x128xf32> to vector<8x128xf32>
      %1397 = arith.mulf %1396, %44 : vector<8x128xf32>
      %1398 = arith.addf %1394, %1397 : vector<8x128xf32>
      %c2_1336 = arith.constant 2 : index
      %c13_1337 = arith.constant 13 : index
      %c0_1338 = arith.constant 0 : index
      %c0_1339 = arith.constant 0 : index
      %1399 = vector.load %arg1[%c2_1336, %c13_1337, %c0_1338, %c0_1339] : memref<5x28x8x128xf32, #tpu.memory_space<vmem>>, vector<1x1x8x128xf32>
      %1400 = vector.shape_cast %1399 : vector<1x1x8x128xf32> to vector<8x128xf32>
      %1401 = arith.mulf %1400, %49 : vector<8x128xf32>
      %1402 = arith.addf %1398, %1401 : vector<8x128xf32>
      %c0_1340 = arith.constant 0 : index
      %c14 = arith.constant 14 : index
      %c0_1341 = arith.constant 0 : index
      %c0_1342 = arith.constant 0 : index
      %1403 = vector.load %arg1[%c0_1340, %c14, %c0_1341, %c0_1342] : memref<5x28x8x128xf32, #tpu.memory_space<vmem>>, vector<1x1x8x128xf32>
      %1404 = vector.shape_cast %1403 : vector<1x1x8x128xf32> to vector<8x128xf32>
      %1405 = arith.mulf %1404, %54 : vector<8x128xf32>
      %1406 = arith.addf %1402, %1405 : vector<8x128xf32>
      %c1_1343 = arith.constant 1 : index
      %c14_1344 = arith.constant 14 : index
      %c0_1345 = arith.constant 0 : index
      %c0_1346 = arith.constant 0 : index
      %1407 = vector.load %arg1[%c1_1343, %c14_1344, %c0_1345, %c0_1346] : memref<5x28x8x128xf32, #tpu.memory_space<vmem>>, vector<1x1x8x128xf32>
      %1408 = vector.shape_cast %1407 : vector<1x1x8x128xf32> to vector<8x128xf32>
      %1409 = arith.mulf %1408, %59 : vector<8x128xf32>
      %1410 = arith.addf %1406, %1409 : vector<8x128xf32>
      %c2_1347 = arith.constant 2 : index
      %c14_1348 = arith.constant 14 : index
      %c0_1349 = arith.constant 0 : index
      %c0_1350 = arith.constant 0 : index
      %1411 = vector.load %arg1[%c2_1347, %c14_1348, %c0_1349, %c0_1350] : memref<5x28x8x128xf32, #tpu.memory_space<vmem>>, vector<1x1x8x128xf32>
      %1412 = vector.shape_cast %1411 : vector<1x1x8x128xf32> to vector<8x128xf32>
      %1413 = arith.mulf %1412, %64 : vector<8x128xf32>
      %1414 = arith.addf %1410, %1413 : vector<8x128xf32>
      %c1_1351 = arith.constant 1 : index
      %c12_1352 = arith.constant 12 : index
      %c0_1353 = arith.constant 0 : index
      %c0_1354 = arith.constant 0 : index
      %1415 = vector.load %arg1[%c1_1351, %c12_1352, %c0_1353, %c0_1354] : memref<5x28x8x128xf32, #tpu.memory_space<vmem>>, vector<1x1x8x128xf32>
      %1416 = vector.shape_cast %1415 : vector<1x1x8x128xf32> to vector<8x128xf32>
      %1417 = arith.mulf %1416, %24 : vector<8x128xf32>
      %c2_1355 = arith.constant 2 : index
      %c12_1356 = arith.constant 12 : index
      %c0_1357 = arith.constant 0 : index
      %c0_1358 = arith.constant 0 : index
      %1418 = vector.load %arg1[%c2_1355, %c12_1356, %c0_1357, %c0_1358] : memref<5x28x8x128xf32, #tpu.memory_space<vmem>>, vector<1x1x8x128xf32>
      %1419 = vector.shape_cast %1418 : vector<1x1x8x128xf32> to vector<8x128xf32>
      %1420 = arith.mulf %1419, %29 : vector<8x128xf32>
      %1421 = arith.addf %1417, %1420 : vector<8x128xf32>
      %c3_1359 = arith.constant 3 : index
      %c12_1360 = arith.constant 12 : index
      %c0_1361 = arith.constant 0 : index
      %c0_1362 = arith.constant 0 : index
      %1422 = vector.load %arg1[%c3_1359, %c12_1360, %c0_1361, %c0_1362] : memref<5x28x8x128xf32, #tpu.memory_space<vmem>>, vector<1x1x8x128xf32>
      %1423 = vector.shape_cast %1422 : vector<1x1x8x128xf32> to vector<8x128xf32>
      %1424 = arith.mulf %1423, %34 : vector<8x128xf32>
      %1425 = arith.addf %1421, %1424 : vector<8x128xf32>
      %c1_1363 = arith.constant 1 : index
      %c13_1364 = arith.constant 13 : index
      %c0_1365 = arith.constant 0 : index
      %c0_1366 = arith.constant 0 : index
      %1426 = vector.load %arg1[%c1_1363, %c13_1364, %c0_1365, %c0_1366] : memref<5x28x8x128xf32, #tpu.memory_space<vmem>>, vector<1x1x8x128xf32>
      %1427 = vector.shape_cast %1426 : vector<1x1x8x128xf32> to vector<8x128xf32>
      %1428 = arith.mulf %1427, %39 : vector<8x128xf32>
      %1429 = arith.addf %1425, %1428 : vector<8x128xf32>
      %c2_1367 = arith.constant 2 : index
      %c13_1368 = arith.constant 13 : index
      %c0_1369 = arith.constant 0 : index
      %c0_1370 = arith.constant 0 : index
      %1430 = vector.load %arg1[%c2_1367, %c13_1368, %c0_1369, %c0_1370] : memref<5x28x8x128xf32, #tpu.memory_space<vmem>>, vector<1x1x8x128xf32>
      %1431 = vector.shape_cast %1430 : vector<1x1x8x128xf32> to vector<8x128xf32>
      %1432 = arith.mulf %1431, %44 : vector<8x128xf32>
      %1433 = arith.addf %1429, %1432 : vector<8x128xf32>
      %c3_1371 = arith.constant 3 : index
      %c13_1372 = arith.constant 13 : index
      %c0_1373 = arith.constant 0 : index
      %c0_1374 = arith.constant 0 : index
      %1434 = vector.load %arg1[%c3_1371, %c13_1372, %c0_1373, %c0_1374] : memref<5x28x8x128xf32, #tpu.memory_space<vmem>>, vector<1x1x8x128xf32>
      %1435 = vector.shape_cast %1434 : vector<1x1x8x128xf32> to vector<8x128xf32>
      %1436 = arith.mulf %1435, %49 : vector<8x128xf32>
      %1437 = arith.addf %1433, %1436 : vector<8x128xf32>
      %c1_1375 = arith.constant 1 : index
      %c14_1376 = arith.constant 14 : index
      %c0_1377 = arith.constant 0 : index
      %c0_1378 = arith.constant 0 : index
      %1438 = vector.load %arg1[%c1_1375, %c14_1376, %c0_1377, %c0_1378] : memref<5x28x8x128xf32, #tpu.memory_space<vmem>>, vector<1x1x8x128xf32>
      %1439 = vector.shape_cast %1438 : vector<1x1x8x128xf32> to vector<8x128xf32>
      %1440 = arith.mulf %1439, %54 : vector<8x128xf32>
      %1441 = arith.addf %1437, %1440 : vector<8x128xf32>
      %c2_1379 = arith.constant 2 : index
      %c14_1380 = arith.constant 14 : index
      %c0_1381 = arith.constant 0 : index
      %c0_1382 = arith.constant 0 : index
      %1442 = vector.load %arg1[%c2_1379, %c14_1380, %c0_1381, %c0_1382] : memref<5x28x8x128xf32, #tpu.memory_space<vmem>>, vector<1x1x8x128xf32>
      %1443 = vector.shape_cast %1442 : vector<1x1x8x128xf32> to vector<8x128xf32>
      %1444 = arith.mulf %1443, %59 : vector<8x128xf32>
      %1445 = arith.addf %1441, %1444 : vector<8x128xf32>
      %c3_1383 = arith.constant 3 : index
      %c14_1384 = arith.constant 14 : index
      %c0_1385 = arith.constant 0 : index
      %c0_1386 = arith.constant 0 : index
      %1446 = vector.load %arg1[%c3_1383, %c14_1384, %c0_1385, %c0_1386] : memref<5x28x8x128xf32, #tpu.memory_space<vmem>>, vector<1x1x8x128xf32>
      %1447 = vector.shape_cast %1446 : vector<1x1x8x128xf32> to vector<8x128xf32>
      %1448 = arith.mulf %1447, %64 : vector<8x128xf32>
      %1449 = arith.addf %1445, %1448 : vector<8x128xf32>
      %1450 = arith.maximumf %1414, %1449 : vector<8x128xf32>
      %c2_1387 = arith.constant 2 : index
      %c12_1388 = arith.constant 12 : index
      %c0_1389 = arith.constant 0 : index
      %c0_1390 = arith.constant 0 : index
      %1451 = vector.load %arg1[%c2_1387, %c12_1388, %c0_1389, %c0_1390] : memref<5x28x8x128xf32, #tpu.memory_space<vmem>>, vector<1x1x8x128xf32>
      %1452 = vector.shape_cast %1451 : vector<1x1x8x128xf32> to vector<8x128xf32>
      %1453 = arith.mulf %1452, %24 : vector<8x128xf32>
      %c3_1391 = arith.constant 3 : index
      %c12_1392 = arith.constant 12 : index
      %c0_1393 = arith.constant 0 : index
      %c0_1394 = arith.constant 0 : index
      %1454 = vector.load %arg1[%c3_1391, %c12_1392, %c0_1393, %c0_1394] : memref<5x28x8x128xf32, #tpu.memory_space<vmem>>, vector<1x1x8x128xf32>
      %1455 = vector.shape_cast %1454 : vector<1x1x8x128xf32> to vector<8x128xf32>
      %1456 = arith.mulf %1455, %29 : vector<8x128xf32>
      %1457 = arith.addf %1453, %1456 : vector<8x128xf32>
      %c4_1395 = arith.constant 4 : index
      %c12_1396 = arith.constant 12 : index
      %c0_1397 = arith.constant 0 : index
      %c0_1398 = arith.constant 0 : index
      %1458 = vector.load %arg1[%c4_1395, %c12_1396, %c0_1397, %c0_1398] : memref<5x28x8x128xf32, #tpu.memory_space<vmem>>, vector<1x1x8x128xf32>
      %1459 = vector.shape_cast %1458 : vector<1x1x8x128xf32> to vector<8x128xf32>
      %1460 = arith.mulf %1459, %34 : vector<8x128xf32>
      %1461 = arith.addf %1457, %1460 : vector<8x128xf32>
      %c2_1399 = arith.constant 2 : index
      %c13_1400 = arith.constant 13 : index
      %c0_1401 = arith.constant 0 : index
      %c0_1402 = arith.constant 0 : index
      %1462 = vector.load %arg1[%c2_1399, %c13_1400, %c0_1401, %c0_1402] : memref<5x28x8x128xf32, #tpu.memory_space<vmem>>, vector<1x1x8x128xf32>
      %1463 = vector.shape_cast %1462 : vector<1x1x8x128xf32> to vector<8x128xf32>
      %1464 = arith.mulf %1463, %39 : vector<8x128xf32>
      %1465 = arith.addf %1461, %1464 : vector<8x128xf32>
      %c3_1403 = arith.constant 3 : index
      %c13_1404 = arith.constant 13 : index
      %c0_1405 = arith.constant 0 : index
      %c0_1406 = arith.constant 0 : index
      %1466 = vector.load %arg1[%c3_1403, %c13_1404, %c0_1405, %c0_1406] : memref<5x28x8x128xf32, #tpu.memory_space<vmem>>, vector<1x1x8x128xf32>
      %1467 = vector.shape_cast %1466 : vector<1x1x8x128xf32> to vector<8x128xf32>
      %1468 = arith.mulf %1467, %44 : vector<8x128xf32>
      %1469 = arith.addf %1465, %1468 : vector<8x128xf32>
      %c4_1407 = arith.constant 4 : index
      %c13_1408 = arith.constant 13 : index
      %c0_1409 = arith.constant 0 : index
      %c0_1410 = arith.constant 0 : index
      %1470 = vector.load %arg1[%c4_1407, %c13_1408, %c0_1409, %c0_1410] : memref<5x28x8x128xf32, #tpu.memory_space<vmem>>, vector<1x1x8x128xf32>
      %1471 = vector.shape_cast %1470 : vector<1x1x8x128xf32> to vector<8x128xf32>
      %1472 = arith.mulf %1471, %49 : vector<8x128xf32>
      %1473 = arith.addf %1469, %1472 : vector<8x128xf32>
      %c2_1411 = arith.constant 2 : index
      %c14_1412 = arith.constant 14 : index
      %c0_1413 = arith.constant 0 : index
      %c0_1414 = arith.constant 0 : index
      %1474 = vector.load %arg1[%c2_1411, %c14_1412, %c0_1413, %c0_1414] : memref<5x28x8x128xf32, #tpu.memory_space<vmem>>, vector<1x1x8x128xf32>
      %1475 = vector.shape_cast %1474 : vector<1x1x8x128xf32> to vector<8x128xf32>
      %1476 = arith.mulf %1475, %54 : vector<8x128xf32>
      %1477 = arith.addf %1473, %1476 : vector<8x128xf32>
      %c3_1415 = arith.constant 3 : index
      %c14_1416 = arith.constant 14 : index
      %c0_1417 = arith.constant 0 : index
      %c0_1418 = arith.constant 0 : index
      %1478 = vector.load %arg1[%c3_1415, %c14_1416, %c0_1417, %c0_1418] : memref<5x28x8x128xf32, #tpu.memory_space<vmem>>, vector<1x1x8x128xf32>
      %1479 = vector.shape_cast %1478 : vector<1x1x8x128xf32> to vector<8x128xf32>
      %1480 = arith.mulf %1479, %59 : vector<8x128xf32>
      %1481 = arith.addf %1477, %1480 : vector<8x128xf32>
      %c4_1419 = arith.constant 4 : index
      %c14_1420 = arith.constant 14 : index
      %c0_1421 = arith.constant 0 : index
      %c0_1422 = arith.constant 0 : index
      %1482 = vector.load %arg1[%c4_1419, %c14_1420, %c0_1421, %c0_1422] : memref<5x28x8x128xf32, #tpu.memory_space<vmem>>, vector<1x1x8x128xf32>
      %1483 = vector.shape_cast %1482 : vector<1x1x8x128xf32> to vector<8x128xf32>
      %1484 = arith.mulf %1483, %64 : vector<8x128xf32>
      %1485 = arith.addf %1481, %1484 : vector<8x128xf32>
      %1486 = arith.maximumf %1450, %1485 : vector<8x128xf32>
      %c0_1423 = arith.constant 0 : index
      %c13_1424 = arith.constant 13 : index
      %c0_1425 = arith.constant 0 : index
      %c0_1426 = arith.constant 0 : index
      %1487 = vector.load %arg1[%c0_1423, %c13_1424, %c0_1425, %c0_1426] : memref<5x28x8x128xf32, #tpu.memory_space<vmem>>, vector<1x1x8x128xf32>
      %1488 = vector.shape_cast %1487 : vector<1x1x8x128xf32> to vector<8x128xf32>
      %1489 = arith.mulf %1488, %24 : vector<8x128xf32>
      %c1_1427 = arith.constant 1 : index
      %c13_1428 = arith.constant 13 : index
      %c0_1429 = arith.constant 0 : index
      %c0_1430 = arith.constant 0 : index
      %1490 = vector.load %arg1[%c1_1427, %c13_1428, %c0_1429, %c0_1430] : memref<5x28x8x128xf32, #tpu.memory_space<vmem>>, vector<1x1x8x128xf32>
      %1491 = vector.shape_cast %1490 : vector<1x1x8x128xf32> to vector<8x128xf32>
      %1492 = arith.mulf %1491, %29 : vector<8x128xf32>
      %1493 = arith.addf %1489, %1492 : vector<8x128xf32>
      %c2_1431 = arith.constant 2 : index
      %c13_1432 = arith.constant 13 : index
      %c0_1433 = arith.constant 0 : index
      %c0_1434 = arith.constant 0 : index
      %1494 = vector.load %arg1[%c2_1431, %c13_1432, %c0_1433, %c0_1434] : memref<5x28x8x128xf32, #tpu.memory_space<vmem>>, vector<1x1x8x128xf32>
      %1495 = vector.shape_cast %1494 : vector<1x1x8x128xf32> to vector<8x128xf32>
      %1496 = arith.mulf %1495, %34 : vector<8x128xf32>
      %1497 = arith.addf %1493, %1496 : vector<8x128xf32>
      %c0_1435 = arith.constant 0 : index
      %c14_1436 = arith.constant 14 : index
      %c0_1437 = arith.constant 0 : index
      %c0_1438 = arith.constant 0 : index
      %1498 = vector.load %arg1[%c0_1435, %c14_1436, %c0_1437, %c0_1438] : memref<5x28x8x128xf32, #tpu.memory_space<vmem>>, vector<1x1x8x128xf32>
      %1499 = vector.shape_cast %1498 : vector<1x1x8x128xf32> to vector<8x128xf32>
      %1500 = arith.mulf %1499, %39 : vector<8x128xf32>
      %1501 = arith.addf %1497, %1500 : vector<8x128xf32>
      %c1_1439 = arith.constant 1 : index
      %c14_1440 = arith.constant 14 : index
      %c0_1441 = arith.constant 0 : index
      %c0_1442 = arith.constant 0 : index
      %1502 = vector.load %arg1[%c1_1439, %c14_1440, %c0_1441, %c0_1442] : memref<5x28x8x128xf32, #tpu.memory_space<vmem>>, vector<1x1x8x128xf32>
      %1503 = vector.shape_cast %1502 : vector<1x1x8x128xf32> to vector<8x128xf32>
      %1504 = arith.mulf %1503, %44 : vector<8x128xf32>
      %1505 = arith.addf %1501, %1504 : vector<8x128xf32>
      %c2_1443 = arith.constant 2 : index
      %c14_1444 = arith.constant 14 : index
      %c0_1445 = arith.constant 0 : index
      %c0_1446 = arith.constant 0 : index
      %1506 = vector.load %arg1[%c2_1443, %c14_1444, %c0_1445, %c0_1446] : memref<5x28x8x128xf32, #tpu.memory_space<vmem>>, vector<1x1x8x128xf32>
      %1507 = vector.shape_cast %1506 : vector<1x1x8x128xf32> to vector<8x128xf32>
      %1508 = arith.mulf %1507, %49 : vector<8x128xf32>
      %1509 = arith.addf %1505, %1508 : vector<8x128xf32>
      %c0_1447 = arith.constant 0 : index
      %c15 = arith.constant 15 : index
      %c0_1448 = arith.constant 0 : index
      %c0_1449 = arith.constant 0 : index
      %1510 = vector.load %arg1[%c0_1447, %c15, %c0_1448, %c0_1449] : memref<5x28x8x128xf32, #tpu.memory_space<vmem>>, vector<1x1x8x128xf32>
      %1511 = vector.shape_cast %1510 : vector<1x1x8x128xf32> to vector<8x128xf32>
      %1512 = arith.mulf %1511, %54 : vector<8x128xf32>
      %1513 = arith.addf %1509, %1512 : vector<8x128xf32>
      %c1_1450 = arith.constant 1 : index
      %c15_1451 = arith.constant 15 : index
      %c0_1452 = arith.constant 0 : index
      %c0_1453 = arith.constant 0 : index
      %1514 = vector.load %arg1[%c1_1450, %c15_1451, %c0_1452, %c0_1453] : memref<5x28x8x128xf32, #tpu.memory_space<vmem>>, vector<1x1x8x128xf32>
      %1515 = vector.shape_cast %1514 : vector<1x1x8x128xf32> to vector<8x128xf32>
      %1516 = arith.mulf %1515, %59 : vector<8x128xf32>
      %1517 = arith.addf %1513, %1516 : vector<8x128xf32>
      %c2_1454 = arith.constant 2 : index
      %c15_1455 = arith.constant 15 : index
      %c0_1456 = arith.constant 0 : index
      %c0_1457 = arith.constant 0 : index
      %1518 = vector.load %arg1[%c2_1454, %c15_1455, %c0_1456, %c0_1457] : memref<5x28x8x128xf32, #tpu.memory_space<vmem>>, vector<1x1x8x128xf32>
      %1519 = vector.shape_cast %1518 : vector<1x1x8x128xf32> to vector<8x128xf32>
      %1520 = arith.mulf %1519, %64 : vector<8x128xf32>
      %1521 = arith.addf %1517, %1520 : vector<8x128xf32>
      %1522 = arith.maximumf %1486, %1521 : vector<8x128xf32>
      %c1_1458 = arith.constant 1 : index
      %c13_1459 = arith.constant 13 : index
      %c0_1460 = arith.constant 0 : index
      %c0_1461 = arith.constant 0 : index
      %1523 = vector.load %arg1[%c1_1458, %c13_1459, %c0_1460, %c0_1461] : memref<5x28x8x128xf32, #tpu.memory_space<vmem>>, vector<1x1x8x128xf32>
      %1524 = vector.shape_cast %1523 : vector<1x1x8x128xf32> to vector<8x128xf32>
      %1525 = arith.mulf %1524, %24 : vector<8x128xf32>
      %c2_1462 = arith.constant 2 : index
      %c13_1463 = arith.constant 13 : index
      %c0_1464 = arith.constant 0 : index
      %c0_1465 = arith.constant 0 : index
      %1526 = vector.load %arg1[%c2_1462, %c13_1463, %c0_1464, %c0_1465] : memref<5x28x8x128xf32, #tpu.memory_space<vmem>>, vector<1x1x8x128xf32>
      %1527 = vector.shape_cast %1526 : vector<1x1x8x128xf32> to vector<8x128xf32>
      %1528 = arith.mulf %1527, %29 : vector<8x128xf32>
      %1529 = arith.addf %1525, %1528 : vector<8x128xf32>
      %c3_1466 = arith.constant 3 : index
      %c13_1467 = arith.constant 13 : index
      %c0_1468 = arith.constant 0 : index
      %c0_1469 = arith.constant 0 : index
      %1530 = vector.load %arg1[%c3_1466, %c13_1467, %c0_1468, %c0_1469] : memref<5x28x8x128xf32, #tpu.memory_space<vmem>>, vector<1x1x8x128xf32>
      %1531 = vector.shape_cast %1530 : vector<1x1x8x128xf32> to vector<8x128xf32>
      %1532 = arith.mulf %1531, %34 : vector<8x128xf32>
      %1533 = arith.addf %1529, %1532 : vector<8x128xf32>
      %c1_1470 = arith.constant 1 : index
      %c14_1471 = arith.constant 14 : index
      %c0_1472 = arith.constant 0 : index
      %c0_1473 = arith.constant 0 : index
      %1534 = vector.load %arg1[%c1_1470, %c14_1471, %c0_1472, %c0_1473] : memref<5x28x8x128xf32, #tpu.memory_space<vmem>>, vector<1x1x8x128xf32>
      %1535 = vector.shape_cast %1534 : vector<1x1x8x128xf32> to vector<8x128xf32>
      %1536 = arith.mulf %1535, %39 : vector<8x128xf32>
      %1537 = arith.addf %1533, %1536 : vector<8x128xf32>
      %c2_1474 = arith.constant 2 : index
      %c14_1475 = arith.constant 14 : index
      %c0_1476 = arith.constant 0 : index
      %c0_1477 = arith.constant 0 : index
      %1538 = vector.load %arg1[%c2_1474, %c14_1475, %c0_1476, %c0_1477] : memref<5x28x8x128xf32, #tpu.memory_space<vmem>>, vector<1x1x8x128xf32>
      %1539 = vector.shape_cast %1538 : vector<1x1x8x128xf32> to vector<8x128xf32>
      %1540 = arith.mulf %1539, %44 : vector<8x128xf32>
      %1541 = arith.addf %1537, %1540 : vector<8x128xf32>
      %c3_1478 = arith.constant 3 : index
      %c14_1479 = arith.constant 14 : index
      %c0_1480 = arith.constant 0 : index
      %c0_1481 = arith.constant 0 : index
      %1542 = vector.load %arg1[%c3_1478, %c14_1479, %c0_1480, %c0_1481] : memref<5x28x8x128xf32, #tpu.memory_space<vmem>>, vector<1x1x8x128xf32>
      %1543 = vector.shape_cast %1542 : vector<1x1x8x128xf32> to vector<8x128xf32>
      %1544 = arith.mulf %1543, %49 : vector<8x128xf32>
      %1545 = arith.addf %1541, %1544 : vector<8x128xf32>
      %c1_1482 = arith.constant 1 : index
      %c15_1483 = arith.constant 15 : index
      %c0_1484 = arith.constant 0 : index
      %c0_1485 = arith.constant 0 : index
      %1546 = vector.load %arg1[%c1_1482, %c15_1483, %c0_1484, %c0_1485] : memref<5x28x8x128xf32, #tpu.memory_space<vmem>>, vector<1x1x8x128xf32>
      %1547 = vector.shape_cast %1546 : vector<1x1x8x128xf32> to vector<8x128xf32>
      %1548 = arith.mulf %1547, %54 : vector<8x128xf32>
      %1549 = arith.addf %1545, %1548 : vector<8x128xf32>
      %c2_1486 = arith.constant 2 : index
      %c15_1487 = arith.constant 15 : index
      %c0_1488 = arith.constant 0 : index
      %c0_1489 = arith.constant 0 : index
      %1550 = vector.load %arg1[%c2_1486, %c15_1487, %c0_1488, %c0_1489] : memref<5x28x8x128xf32, #tpu.memory_space<vmem>>, vector<1x1x8x128xf32>
      %1551 = vector.shape_cast %1550 : vector<1x1x8x128xf32> to vector<8x128xf32>
      %1552 = arith.mulf %1551, %59 : vector<8x128xf32>
      %1553 = arith.addf %1549, %1552 : vector<8x128xf32>
      %c3_1490 = arith.constant 3 : index
      %c15_1491 = arith.constant 15 : index
      %c0_1492 = arith.constant 0 : index
      %c0_1493 = arith.constant 0 : index
      %1554 = vector.load %arg1[%c3_1490, %c15_1491, %c0_1492, %c0_1493] : memref<5x28x8x128xf32, #tpu.memory_space<vmem>>, vector<1x1x8x128xf32>
      %1555 = vector.shape_cast %1554 : vector<1x1x8x128xf32> to vector<8x128xf32>
      %1556 = arith.mulf %1555, %64 : vector<8x128xf32>
      %1557 = arith.addf %1553, %1556 : vector<8x128xf32>
      %1558 = arith.maximumf %1522, %1557 : vector<8x128xf32>
      %c2_1494 = arith.constant 2 : index
      %c13_1495 = arith.constant 13 : index
      %c0_1496 = arith.constant 0 : index
      %c0_1497 = arith.constant 0 : index
      %1559 = vector.load %arg1[%c2_1494, %c13_1495, %c0_1496, %c0_1497] : memref<5x28x8x128xf32, #tpu.memory_space<vmem>>, vector<1x1x8x128xf32>
      %1560 = vector.shape_cast %1559 : vector<1x1x8x128xf32> to vector<8x128xf32>
      %1561 = arith.mulf %1560, %24 : vector<8x128xf32>
      %c3_1498 = arith.constant 3 : index
      %c13_1499 = arith.constant 13 : index
      %c0_1500 = arith.constant 0 : index
      %c0_1501 = arith.constant 0 : index
      %1562 = vector.load %arg1[%c3_1498, %c13_1499, %c0_1500, %c0_1501] : memref<5x28x8x128xf32, #tpu.memory_space<vmem>>, vector<1x1x8x128xf32>
      %1563 = vector.shape_cast %1562 : vector<1x1x8x128xf32> to vector<8x128xf32>
      %1564 = arith.mulf %1563, %29 : vector<8x128xf32>
      %1565 = arith.addf %1561, %1564 : vector<8x128xf32>
      %c4_1502 = arith.constant 4 : index
      %c13_1503 = arith.constant 13 : index
      %c0_1504 = arith.constant 0 : index
      %c0_1505 = arith.constant 0 : index
      %1566 = vector.load %arg1[%c4_1502, %c13_1503, %c0_1504, %c0_1505] : memref<5x28x8x128xf32, #tpu.memory_space<vmem>>, vector<1x1x8x128xf32>
      %1567 = vector.shape_cast %1566 : vector<1x1x8x128xf32> to vector<8x128xf32>
      %1568 = arith.mulf %1567, %34 : vector<8x128xf32>
      %1569 = arith.addf %1565, %1568 : vector<8x128xf32>
      %c2_1506 = arith.constant 2 : index
      %c14_1507 = arith.constant 14 : index
      %c0_1508 = arith.constant 0 : index
      %c0_1509 = arith.constant 0 : index
      %1570 = vector.load %arg1[%c2_1506, %c14_1507, %c0_1508, %c0_1509] : memref<5x28x8x128xf32, #tpu.memory_space<vmem>>, vector<1x1x8x128xf32>
      %1571 = vector.shape_cast %1570 : vector<1x1x8x128xf32> to vector<8x128xf32>
      %1572 = arith.mulf %1571, %39 : vector<8x128xf32>
      %1573 = arith.addf %1569, %1572 : vector<8x128xf32>
      %c3_1510 = arith.constant 3 : index
      %c14_1511 = arith.constant 14 : index
      %c0_1512 = arith.constant 0 : index
      %c0_1513 = arith.constant 0 : index
      %1574 = vector.load %arg1[%c3_1510, %c14_1511, %c0_1512, %c0_1513] : memref<5x28x8x128xf32, #tpu.memory_space<vmem>>, vector<1x1x8x128xf32>
      %1575 = vector.shape_cast %1574 : vector<1x1x8x128xf32> to vector<8x128xf32>
      %1576 = arith.mulf %1575, %44 : vector<8x128xf32>
      %1577 = arith.addf %1573, %1576 : vector<8x128xf32>
      %c4_1514 = arith.constant 4 : index
      %c14_1515 = arith.constant 14 : index
      %c0_1516 = arith.constant 0 : index
      %c0_1517 = arith.constant 0 : index
      %1578 = vector.load %arg1[%c4_1514, %c14_1515, %c0_1516, %c0_1517] : memref<5x28x8x128xf32, #tpu.memory_space<vmem>>, vector<1x1x8x128xf32>
      %1579 = vector.shape_cast %1578 : vector<1x1x8x128xf32> to vector<8x128xf32>
      %1580 = arith.mulf %1579, %49 : vector<8x128xf32>
      %1581 = arith.addf %1577, %1580 : vector<8x128xf32>
      %c2_1518 = arith.constant 2 : index
      %c15_1519 = arith.constant 15 : index
      %c0_1520 = arith.constant 0 : index
      %c0_1521 = arith.constant 0 : index
      %1582 = vector.load %arg1[%c2_1518, %c15_1519, %c0_1520, %c0_1521] : memref<5x28x8x128xf32, #tpu.memory_space<vmem>>, vector<1x1x8x128xf32>
      %1583 = vector.shape_cast %1582 : vector<1x1x8x128xf32> to vector<8x128xf32>
      %1584 = arith.mulf %1583, %54 : vector<8x128xf32>
      %1585 = arith.addf %1581, %1584 : vector<8x128xf32>
      %c3_1522 = arith.constant 3 : index
      %c15_1523 = arith.constant 15 : index
      %c0_1524 = arith.constant 0 : index
      %c0_1525 = arith.constant 0 : index
      %1586 = vector.load %arg1[%c3_1522, %c15_1523, %c0_1524, %c0_1525] : memref<5x28x8x128xf32, #tpu.memory_space<vmem>>, vector<1x1x8x128xf32>
      %1587 = vector.shape_cast %1586 : vector<1x1x8x128xf32> to vector<8x128xf32>
      %1588 = arith.mulf %1587, %59 : vector<8x128xf32>
      %1589 = arith.addf %1585, %1588 : vector<8x128xf32>
      %c4_1526 = arith.constant 4 : index
      %c15_1527 = arith.constant 15 : index
      %c0_1528 = arith.constant 0 : index
      %c0_1529 = arith.constant 0 : index
      %1590 = vector.load %arg1[%c4_1526, %c15_1527, %c0_1528, %c0_1529] : memref<5x28x8x128xf32, #tpu.memory_space<vmem>>, vector<1x1x8x128xf32>
      %1591 = vector.shape_cast %1590 : vector<1x1x8x128xf32> to vector<8x128xf32>
      %1592 = arith.mulf %1591, %64 : vector<8x128xf32>
      %1593 = arith.addf %1589, %1592 : vector<8x128xf32>
      %1594 = arith.maximumf %1558, %1593 : vector<8x128xf32>
      %c0_1530 = arith.constant 0 : index
      %c14_1531 = arith.constant 14 : index
      %c0_1532 = arith.constant 0 : index
      %c0_1533 = arith.constant 0 : index
      %1595 = vector.load %arg1[%c0_1530, %c14_1531, %c0_1532, %c0_1533] : memref<5x28x8x128xf32, #tpu.memory_space<vmem>>, vector<1x1x8x128xf32>
      %1596 = vector.shape_cast %1595 : vector<1x1x8x128xf32> to vector<8x128xf32>
      %1597 = arith.mulf %1596, %24 : vector<8x128xf32>
      %c1_1534 = arith.constant 1 : index
      %c14_1535 = arith.constant 14 : index
      %c0_1536 = arith.constant 0 : index
      %c0_1537 = arith.constant 0 : index
      %1598 = vector.load %arg1[%c1_1534, %c14_1535, %c0_1536, %c0_1537] : memref<5x28x8x128xf32, #tpu.memory_space<vmem>>, vector<1x1x8x128xf32>
      %1599 = vector.shape_cast %1598 : vector<1x1x8x128xf32> to vector<8x128xf32>
      %1600 = arith.mulf %1599, %29 : vector<8x128xf32>
      %1601 = arith.addf %1597, %1600 : vector<8x128xf32>
      %c2_1538 = arith.constant 2 : index
      %c14_1539 = arith.constant 14 : index
      %c0_1540 = arith.constant 0 : index
      %c0_1541 = arith.constant 0 : index
      %1602 = vector.load %arg1[%c2_1538, %c14_1539, %c0_1540, %c0_1541] : memref<5x28x8x128xf32, #tpu.memory_space<vmem>>, vector<1x1x8x128xf32>
      %1603 = vector.shape_cast %1602 : vector<1x1x8x128xf32> to vector<8x128xf32>
      %1604 = arith.mulf %1603, %34 : vector<8x128xf32>
      %1605 = arith.addf %1601, %1604 : vector<8x128xf32>
      %c0_1542 = arith.constant 0 : index
      %c15_1543 = arith.constant 15 : index
      %c0_1544 = arith.constant 0 : index
      %c0_1545 = arith.constant 0 : index
      %1606 = vector.load %arg1[%c0_1542, %c15_1543, %c0_1544, %c0_1545] : memref<5x28x8x128xf32, #tpu.memory_space<vmem>>, vector<1x1x8x128xf32>
      %1607 = vector.shape_cast %1606 : vector<1x1x8x128xf32> to vector<8x128xf32>
      %1608 = arith.mulf %1607, %39 : vector<8x128xf32>
      %1609 = arith.addf %1605, %1608 : vector<8x128xf32>
      %c1_1546 = arith.constant 1 : index
      %c15_1547 = arith.constant 15 : index
      %c0_1548 = arith.constant 0 : index
      %c0_1549 = arith.constant 0 : index
      %1610 = vector.load %arg1[%c1_1546, %c15_1547, %c0_1548, %c0_1549] : memref<5x28x8x128xf32, #tpu.memory_space<vmem>>, vector<1x1x8x128xf32>
      %1611 = vector.shape_cast %1610 : vector<1x1x8x128xf32> to vector<8x128xf32>
      %1612 = arith.mulf %1611, %44 : vector<8x128xf32>
      %1613 = arith.addf %1609, %1612 : vector<8x128xf32>
      %c2_1550 = arith.constant 2 : index
      %c15_1551 = arith.constant 15 : index
      %c0_1552 = arith.constant 0 : index
      %c0_1553 = arith.constant 0 : index
      %1614 = vector.load %arg1[%c2_1550, %c15_1551, %c0_1552, %c0_1553] : memref<5x28x8x128xf32, #tpu.memory_space<vmem>>, vector<1x1x8x128xf32>
      %1615 = vector.shape_cast %1614 : vector<1x1x8x128xf32> to vector<8x128xf32>
      %1616 = arith.mulf %1615, %49 : vector<8x128xf32>
      %1617 = arith.addf %1613, %1616 : vector<8x128xf32>
      %c0_1554 = arith.constant 0 : index
      %c16_1555 = arith.constant 16 : index
      %c0_1556 = arith.constant 0 : index
      %c0_1557 = arith.constant 0 : index
      %1618 = vector.load %arg1[%c0_1554, %c16_1555, %c0_1556, %c0_1557] : memref<5x28x8x128xf32, #tpu.memory_space<vmem>>, vector<1x1x8x128xf32>
      %1619 = vector.shape_cast %1618 : vector<1x1x8x128xf32> to vector<8x128xf32>
      %1620 = arith.mulf %1619, %54 : vector<8x128xf32>
      %1621 = arith.addf %1617, %1620 : vector<8x128xf32>
      %c1_1558 = arith.constant 1 : index
      %c16_1559 = arith.constant 16 : index
      %c0_1560 = arith.constant 0 : index
      %c0_1561 = arith.constant 0 : index
      %1622 = vector.load %arg1[%c1_1558, %c16_1559, %c0_1560, %c0_1561] : memref<5x28x8x128xf32, #tpu.memory_space<vmem>>, vector<1x1x8x128xf32>
      %1623 = vector.shape_cast %1622 : vector<1x1x8x128xf32> to vector<8x128xf32>
      %1624 = arith.mulf %1623, %59 : vector<8x128xf32>
      %1625 = arith.addf %1621, %1624 : vector<8x128xf32>
      %c2_1562 = arith.constant 2 : index
      %c16_1563 = arith.constant 16 : index
      %c0_1564 = arith.constant 0 : index
      %c0_1565 = arith.constant 0 : index
      %1626 = vector.load %arg1[%c2_1562, %c16_1563, %c0_1564, %c0_1565] : memref<5x28x8x128xf32, #tpu.memory_space<vmem>>, vector<1x1x8x128xf32>
      %1627 = vector.shape_cast %1626 : vector<1x1x8x128xf32> to vector<8x128xf32>
      %1628 = arith.mulf %1627, %64 : vector<8x128xf32>
      %1629 = arith.addf %1625, %1628 : vector<8x128xf32>
      %1630 = arith.maximumf %1594, %1629 : vector<8x128xf32>
      %c1_1566 = arith.constant 1 : index
      %c14_1567 = arith.constant 14 : index
      %c0_1568 = arith.constant 0 : index
      %c0_1569 = arith.constant 0 : index
      %1631 = vector.load %arg1[%c1_1566, %c14_1567, %c0_1568, %c0_1569] : memref<5x28x8x128xf32, #tpu.memory_space<vmem>>, vector<1x1x8x128xf32>
      %1632 = vector.shape_cast %1631 : vector<1x1x8x128xf32> to vector<8x128xf32>
      %1633 = arith.mulf %1632, %24 : vector<8x128xf32>
      %c2_1570 = arith.constant 2 : index
      %c14_1571 = arith.constant 14 : index
      %c0_1572 = arith.constant 0 : index
      %c0_1573 = arith.constant 0 : index
      %1634 = vector.load %arg1[%c2_1570, %c14_1571, %c0_1572, %c0_1573] : memref<5x28x8x128xf32, #tpu.memory_space<vmem>>, vector<1x1x8x128xf32>
      %1635 = vector.shape_cast %1634 : vector<1x1x8x128xf32> to vector<8x128xf32>
      %1636 = arith.mulf %1635, %29 : vector<8x128xf32>
      %1637 = arith.addf %1633, %1636 : vector<8x128xf32>
      %c3_1574 = arith.constant 3 : index
      %c14_1575 = arith.constant 14 : index
      %c0_1576 = arith.constant 0 : index
      %c0_1577 = arith.constant 0 : index
      %1638 = vector.load %arg1[%c3_1574, %c14_1575, %c0_1576, %c0_1577] : memref<5x28x8x128xf32, #tpu.memory_space<vmem>>, vector<1x1x8x128xf32>
      %1639 = vector.shape_cast %1638 : vector<1x1x8x128xf32> to vector<8x128xf32>
      %1640 = arith.mulf %1639, %34 : vector<8x128xf32>
      %1641 = arith.addf %1637, %1640 : vector<8x128xf32>
      %c1_1578 = arith.constant 1 : index
      %c15_1579 = arith.constant 15 : index
      %c0_1580 = arith.constant 0 : index
      %c0_1581 = arith.constant 0 : index
      %1642 = vector.load %arg1[%c1_1578, %c15_1579, %c0_1580, %c0_1581] : memref<5x28x8x128xf32, #tpu.memory_space<vmem>>, vector<1x1x8x128xf32>
      %1643 = vector.shape_cast %1642 : vector<1x1x8x128xf32> to vector<8x128xf32>
      %1644 = arith.mulf %1643, %39 : vector<8x128xf32>
      %1645 = arith.addf %1641, %1644 : vector<8x128xf32>
      %c2_1582 = arith.constant 2 : index
      %c15_1583 = arith.constant 15 : index
      %c0_1584 = arith.constant 0 : index
      %c0_1585 = arith.constant 0 : index
      %1646 = vector.load %arg1[%c2_1582, %c15_1583, %c0_1584, %c0_1585] : memref<5x28x8x128xf32, #tpu.memory_space<vmem>>, vector<1x1x8x128xf32>
      %1647 = vector.shape_cast %1646 : vector<1x1x8x128xf32> to vector<8x128xf32>
      %1648 = arith.mulf %1647, %44 : vector<8x128xf32>
      %1649 = arith.addf %1645, %1648 : vector<8x128xf32>
      %c3_1586 = arith.constant 3 : index
      %c15_1587 = arith.constant 15 : index
      %c0_1588 = arith.constant 0 : index
      %c0_1589 = arith.constant 0 : index
      %1650 = vector.load %arg1[%c3_1586, %c15_1587, %c0_1588, %c0_1589] : memref<5x28x8x128xf32, #tpu.memory_space<vmem>>, vector<1x1x8x128xf32>
      %1651 = vector.shape_cast %1650 : vector<1x1x8x128xf32> to vector<8x128xf32>
      %1652 = arith.mulf %1651, %49 : vector<8x128xf32>
      %1653 = arith.addf %1649, %1652 : vector<8x128xf32>
      %c1_1590 = arith.constant 1 : index
      %c16_1591 = arith.constant 16 : index
      %c0_1592 = arith.constant 0 : index
      %c0_1593 = arith.constant 0 : index
      %1654 = vector.load %arg1[%c1_1590, %c16_1591, %c0_1592, %c0_1593] : memref<5x28x8x128xf32, #tpu.memory_space<vmem>>, vector<1x1x8x128xf32>
      %1655 = vector.shape_cast %1654 : vector<1x1x8x128xf32> to vector<8x128xf32>
      %1656 = arith.mulf %1655, %54 : vector<8x128xf32>
      %1657 = arith.addf %1653, %1656 : vector<8x128xf32>
      %c2_1594 = arith.constant 2 : index
      %c16_1595 = arith.constant 16 : index
      %c0_1596 = arith.constant 0 : index
      %c0_1597 = arith.constant 0 : index
      %1658 = vector.load %arg1[%c2_1594, %c16_1595, %c0_1596, %c0_1597] : memref<5x28x8x128xf32, #tpu.memory_space<vmem>>, vector<1x1x8x128xf32>
      %1659 = vector.shape_cast %1658 : vector<1x1x8x128xf32> to vector<8x128xf32>
      %1660 = arith.mulf %1659, %59 : vector<8x128xf32>
      %1661 = arith.addf %1657, %1660 : vector<8x128xf32>
      %c3_1598 = arith.constant 3 : index
      %c16_1599 = arith.constant 16 : index
      %c0_1600 = arith.constant 0 : index
      %c0_1601 = arith.constant 0 : index
      %1662 = vector.load %arg1[%c3_1598, %c16_1599, %c0_1600, %c0_1601] : memref<5x28x8x128xf32, #tpu.memory_space<vmem>>, vector<1x1x8x128xf32>
      %1663 = vector.shape_cast %1662 : vector<1x1x8x128xf32> to vector<8x128xf32>
      %1664 = arith.mulf %1663, %64 : vector<8x128xf32>
      %1665 = arith.addf %1661, %1664 : vector<8x128xf32>
      %1666 = arith.maximumf %1630, %1665 : vector<8x128xf32>
      %c2_1602 = arith.constant 2 : index
      %c14_1603 = arith.constant 14 : index
      %c0_1604 = arith.constant 0 : index
      %c0_1605 = arith.constant 0 : index
      %1667 = vector.load %arg1[%c2_1602, %c14_1603, %c0_1604, %c0_1605] : memref<5x28x8x128xf32, #tpu.memory_space<vmem>>, vector<1x1x8x128xf32>
      %1668 = vector.shape_cast %1667 : vector<1x1x8x128xf32> to vector<8x128xf32>
      %1669 = arith.mulf %1668, %24 : vector<8x128xf32>
      %c3_1606 = arith.constant 3 : index
      %c14_1607 = arith.constant 14 : index
      %c0_1608 = arith.constant 0 : index
      %c0_1609 = arith.constant 0 : index
      %1670 = vector.load %arg1[%c3_1606, %c14_1607, %c0_1608, %c0_1609] : memref<5x28x8x128xf32, #tpu.memory_space<vmem>>, vector<1x1x8x128xf32>
      %1671 = vector.shape_cast %1670 : vector<1x1x8x128xf32> to vector<8x128xf32>
      %1672 = arith.mulf %1671, %29 : vector<8x128xf32>
      %1673 = arith.addf %1669, %1672 : vector<8x128xf32>
      %c4_1610 = arith.constant 4 : index
      %c14_1611 = arith.constant 14 : index
      %c0_1612 = arith.constant 0 : index
      %c0_1613 = arith.constant 0 : index
      %1674 = vector.load %arg1[%c4_1610, %c14_1611, %c0_1612, %c0_1613] : memref<5x28x8x128xf32, #tpu.memory_space<vmem>>, vector<1x1x8x128xf32>
      %1675 = vector.shape_cast %1674 : vector<1x1x8x128xf32> to vector<8x128xf32>
      %1676 = arith.mulf %1675, %34 : vector<8x128xf32>
      %1677 = arith.addf %1673, %1676 : vector<8x128xf32>
      %c2_1614 = arith.constant 2 : index
      %c15_1615 = arith.constant 15 : index
      %c0_1616 = arith.constant 0 : index
      %c0_1617 = arith.constant 0 : index
      %1678 = vector.load %arg1[%c2_1614, %c15_1615, %c0_1616, %c0_1617] : memref<5x28x8x128xf32, #tpu.memory_space<vmem>>, vector<1x1x8x128xf32>
      %1679 = vector.shape_cast %1678 : vector<1x1x8x128xf32> to vector<8x128xf32>
      %1680 = arith.mulf %1679, %39 : vector<8x128xf32>
      %1681 = arith.addf %1677, %1680 : vector<8x128xf32>
      %c3_1618 = arith.constant 3 : index
      %c15_1619 = arith.constant 15 : index
      %c0_1620 = arith.constant 0 : index
      %c0_1621 = arith.constant 0 : index
      %1682 = vector.load %arg1[%c3_1618, %c15_1619, %c0_1620, %c0_1621] : memref<5x28x8x128xf32, #tpu.memory_space<vmem>>, vector<1x1x8x128xf32>
      %1683 = vector.shape_cast %1682 : vector<1x1x8x128xf32> to vector<8x128xf32>
      %1684 = arith.mulf %1683, %44 : vector<8x128xf32>
      %1685 = arith.addf %1681, %1684 : vector<8x128xf32>
      %c4_1622 = arith.constant 4 : index
      %c15_1623 = arith.constant 15 : index
      %c0_1624 = arith.constant 0 : index
      %c0_1625 = arith.constant 0 : index
      %1686 = vector.load %arg1[%c4_1622, %c15_1623, %c0_1624, %c0_1625] : memref<5x28x8x128xf32, #tpu.memory_space<vmem>>, vector<1x1x8x128xf32>
      %1687 = vector.shape_cast %1686 : vector<1x1x8x128xf32> to vector<8x128xf32>
      %1688 = arith.mulf %1687, %49 : vector<8x128xf32>
      %1689 = arith.addf %1685, %1688 : vector<8x128xf32>
      %c2_1626 = arith.constant 2 : index
      %c16_1627 = arith.constant 16 : index
      %c0_1628 = arith.constant 0 : index
      %c0_1629 = arith.constant 0 : index
      %1690 = vector.load %arg1[%c2_1626, %c16_1627, %c0_1628, %c0_1629] : memref<5x28x8x128xf32, #tpu.memory_space<vmem>>, vector<1x1x8x128xf32>
      %1691 = vector.shape_cast %1690 : vector<1x1x8x128xf32> to vector<8x128xf32>
      %1692 = arith.mulf %1691, %54 : vector<8x128xf32>
      %1693 = arith.addf %1689, %1692 : vector<8x128xf32>
      %c3_1630 = arith.constant 3 : index
      %c16_1631 = arith.constant 16 : index
      %c0_1632 = arith.constant 0 : index
      %c0_1633 = arith.constant 0 : index
      %1694 = vector.load %arg1[%c3_1630, %c16_1631, %c0_1632, %c0_1633] : memref<5x28x8x128xf32, #tpu.memory_space<vmem>>, vector<1x1x8x128xf32>
      %1695 = vector.shape_cast %1694 : vector<1x1x8x128xf32> to vector<8x128xf32>
      %1696 = arith.mulf %1695, %59 : vector<8x128xf32>
      %1697 = arith.addf %1693, %1696 : vector<8x128xf32>
      %c4_1634 = arith.constant 4 : index
      %c16_1635 = arith.constant 16 : index
      %c0_1636 = arith.constant 0 : index
      %c0_1637 = arith.constant 0 : index
      %1698 = vector.load %arg1[%c4_1634, %c16_1635, %c0_1636, %c0_1637] : memref<5x28x8x128xf32, #tpu.memory_space<vmem>>, vector<1x1x8x128xf32>
      %1699 = vector.shape_cast %1698 : vector<1x1x8x128xf32> to vector<8x128xf32>
      %1700 = arith.mulf %1699, %64 : vector<8x128xf32>
      %1701 = arith.addf %1697, %1700 : vector<8x128xf32>
      %1702 = arith.maximumf %1666, %1701 : vector<8x128xf32>
      %1703 = arith.addf %1702, %67 : vector<8x128xf32>
      %1704 = arith.index_cast %19 : i32 to index
      %c32 = arith.constant 32 : index
      %c0_1638 = arith.constant 0 : index
      %1705 = vector.load %arg9[%1704, %c32, %c0_1638] : memref<10x64x128xf32, #tpu.memory_space<vmem>>, vector<1x8x128xf32>
      %1706 = vector.shape_cast %1705 : vector<1x8x128xf32> to vector<8x128xf32>
      %1707 = vector.shape_cast %1703 : vector<8x128xf32> to vector<1x8x128xf32>
      tpu.vector_store %arg9[%1704, %c32, %c0_1638], %1707 {strides = array<i32>} : memref<10x64x128xf32, #tpu.memory_space<vmem>>, vector<1x8x128xf32>,
      %c0_1639 = arith.constant 0 : index
      %c15_1640 = arith.constant 15 : index
      %c0_1641 = arith.constant 0 : index
      %c0_1642 = arith.constant 0 : index
      %1708 = vector.load %arg1[%c0_1639, %c15_1640, %c0_1641, %c0_1642] : memref<5x28x8x128xf32, #tpu.memory_space<vmem>>, vector<1x1x8x128xf32>
      %1709 = vector.shape_cast %1708 : vector<1x1x8x128xf32> to vector<8x128xf32>
      %1710 = arith.mulf %1709, %24 : vector<8x128xf32>
      %c1_1643 = arith.constant 1 : index
      %c15_1644 = arith.constant 15 : index
      %c0_1645 = arith.constant 0 : index
      %c0_1646 = arith.constant 0 : index
      %1711 = vector.load %arg1[%c1_1643, %c15_1644, %c0_1645, %c0_1646] : memref<5x28x8x128xf32, #tpu.memory_space<vmem>>, vector<1x1x8x128xf32>
      %1712 = vector.shape_cast %1711 : vector<1x1x8x128xf32> to vector<8x128xf32>
      %1713 = arith.mulf %1712, %29 : vector<8x128xf32>
      %1714 = arith.addf %1710, %1713 : vector<8x128xf32>
      %c2_1647 = arith.constant 2 : index
      %c15_1648 = arith.constant 15 : index
      %c0_1649 = arith.constant 0 : index
      %c0_1650 = arith.constant 0 : index
      %1715 = vector.load %arg1[%c2_1647, %c15_1648, %c0_1649, %c0_1650] : memref<5x28x8x128xf32, #tpu.memory_space<vmem>>, vector<1x1x8x128xf32>
      %1716 = vector.shape_cast %1715 : vector<1x1x8x128xf32> to vector<8x128xf32>
      %1717 = arith.mulf %1716, %34 : vector<8x128xf32>
      %1718 = arith.addf %1714, %1717 : vector<8x128xf32>
      %c0_1651 = arith.constant 0 : index
      %c16_1652 = arith.constant 16 : index
      %c0_1653 = arith.constant 0 : index
      %c0_1654 = arith.constant 0 : index
      %1719 = vector.load %arg1[%c0_1651, %c16_1652, %c0_1653, %c0_1654] : memref<5x28x8x128xf32, #tpu.memory_space<vmem>>, vector<1x1x8x128xf32>
      %1720 = vector.shape_cast %1719 : vector<1x1x8x128xf32> to vector<8x128xf32>
      %1721 = arith.mulf %1720, %39 : vector<8x128xf32>
      %1722 = arith.addf %1718, %1721 : vector<8x128xf32>
      %c1_1655 = arith.constant 1 : index
      %c16_1656 = arith.constant 16 : index
      %c0_1657 = arith.constant 0 : index
      %c0_1658 = arith.constant 0 : index
      %1723 = vector.load %arg1[%c1_1655, %c16_1656, %c0_1657, %c0_1658] : memref<5x28x8x128xf32, #tpu.memory_space<vmem>>, vector<1x1x8x128xf32>
      %1724 = vector.shape_cast %1723 : vector<1x1x8x128xf32> to vector<8x128xf32>
      %1725 = arith.mulf %1724, %44 : vector<8x128xf32>
      %1726 = arith.addf %1722, %1725 : vector<8x128xf32>
      %c2_1659 = arith.constant 2 : index
      %c16_1660 = arith.constant 16 : index
      %c0_1661 = arith.constant 0 : index
      %c0_1662 = arith.constant 0 : index
      %1727 = vector.load %arg1[%c2_1659, %c16_1660, %c0_1661, %c0_1662] : memref<5x28x8x128xf32, #tpu.memory_space<vmem>>, vector<1x1x8x128xf32>
      %1728 = vector.shape_cast %1727 : vector<1x1x8x128xf32> to vector<8x128xf32>
      %1729 = arith.mulf %1728, %49 : vector<8x128xf32>
      %1730 = arith.addf %1726, %1729 : vector<8x128xf32>
      %c0_1663 = arith.constant 0 : index
      %c17 = arith.constant 17 : index
      %c0_1664 = arith.constant 0 : index
      %c0_1665 = arith.constant 0 : index
      %1731 = vector.load %arg1[%c0_1663, %c17, %c0_1664, %c0_1665] : memref<5x28x8x128xf32, #tpu.memory_space<vmem>>, vector<1x1x8x128xf32>
      %1732 = vector.shape_cast %1731 : vector<1x1x8x128xf32> to vector<8x128xf32>
      %1733 = arith.mulf %1732, %54 : vector<8x128xf32>
      %1734 = arith.addf %1730, %1733 : vector<8x128xf32>
      %c1_1666 = arith.constant 1 : index
      %c17_1667 = arith.constant 17 : index
      %c0_1668 = arith.constant 0 : index
      %c0_1669 = arith.constant 0 : index
      %1735 = vector.load %arg1[%c1_1666, %c17_1667, %c0_1668, %c0_1669] : memref<5x28x8x128xf32, #tpu.memory_space<vmem>>, vector<1x1x8x128xf32>
      %1736 = vector.shape_cast %1735 : vector<1x1x8x128xf32> to vector<8x128xf32>
      %1737 = arith.mulf %1736, %59 : vector<8x128xf32>
      %1738 = arith.addf %1734, %1737 : vector<8x128xf32>
      %c2_1670 = arith.constant 2 : index
      %c17_1671 = arith.constant 17 : index
      %c0_1672 = arith.constant 0 : index
      %c0_1673 = arith.constant 0 : index
      %1739 = vector.load %arg1[%c2_1670, %c17_1671, %c0_1672, %c0_1673] : memref<5x28x8x128xf32, #tpu.memory_space<vmem>>, vector<1x1x8x128xf32>
      %1740 = vector.shape_cast %1739 : vector<1x1x8x128xf32> to vector<8x128xf32>
      %1741 = arith.mulf %1740, %64 : vector<8x128xf32>
      %1742 = arith.addf %1738, %1741 : vector<8x128xf32>
      %c1_1674 = arith.constant 1 : index
      %c15_1675 = arith.constant 15 : index
      %c0_1676 = arith.constant 0 : index
      %c0_1677 = arith.constant 0 : index
      %1743 = vector.load %arg1[%c1_1674, %c15_1675, %c0_1676, %c0_1677] : memref<5x28x8x128xf32, #tpu.memory_space<vmem>>, vector<1x1x8x128xf32>
      %1744 = vector.shape_cast %1743 : vector<1x1x8x128xf32> to vector<8x128xf32>
      %1745 = arith.mulf %1744, %24 : vector<8x128xf32>
      %c2_1678 = arith.constant 2 : index
      %c15_1679 = arith.constant 15 : index
      %c0_1680 = arith.constant 0 : index
      %c0_1681 = arith.constant 0 : index
      %1746 = vector.load %arg1[%c2_1678, %c15_1679, %c0_1680, %c0_1681] : memref<5x28x8x128xf32, #tpu.memory_space<vmem>>, vector<1x1x8x128xf32>
      %1747 = vector.shape_cast %1746 : vector<1x1x8x128xf32> to vector<8x128xf32>
      %1748 = arith.mulf %1747, %29 : vector<8x128xf32>
      %1749 = arith.addf %1745, %1748 : vector<8x128xf32>
      %c3_1682 = arith.constant 3 : index
      %c15_1683 = arith.constant 15 : index
      %c0_1684 = arith.constant 0 : index
      %c0_1685 = arith.constant 0 : index
      %1750 = vector.load %arg1[%c3_1682, %c15_1683, %c0_1684, %c0_1685] : memref<5x28x8x128xf32, #tpu.memory_space<vmem>>, vector<1x1x8x128xf32>
      %1751 = vector.shape_cast %1750 : vector<1x1x8x128xf32> to vector<8x128xf32>
      %1752 = arith.mulf %1751, %34 : vector<8x128xf32>
      %1753 = arith.addf %1749, %1752 : vector<8x128xf32>
      %c1_1686 = arith.constant 1 : index
      %c16_1687 = arith.constant 16 : index
      %c0_1688 = arith.constant 0 : index
      %c0_1689 = arith.constant 0 : index
      %1754 = vector.load %arg1[%c1_1686, %c16_1687, %c0_1688, %c0_1689] : memref<5x28x8x128xf32, #tpu.memory_space<vmem>>, vector<1x1x8x128xf32>
      %1755 = vector.shape_cast %1754 : vector<1x1x8x128xf32> to vector<8x128xf32>
      %1756 = arith.mulf %1755, %39 : vector<8x128xf32>
      %1757 = arith.addf %1753, %1756 : vector<8x128xf32>
      %c2_1690 = arith.constant 2 : index
      %c16_1691 = arith.constant 16 : index
      %c0_1692 = arith.constant 0 : index
      %c0_1693 = arith.constant 0 : index
      %1758 = vector.load %arg1[%c2_1690, %c16_1691, %c0_1692, %c0_1693] : memref<5x28x8x128xf32, #tpu.memory_space<vmem>>, vector<1x1x8x128xf32>
      %1759 = vector.shape_cast %1758 : vector<1x1x8x128xf32> to vector<8x128xf32>
      %1760 = arith.mulf %1759, %44 : vector<8x128xf32>
      %1761 = arith.addf %1757, %1760 : vector<8x128xf32>
      %c3_1694 = arith.constant 3 : index
      %c16_1695 = arith.constant 16 : index
      %c0_1696 = arith.constant 0 : index
      %c0_1697 = arith.constant 0 : index
      %1762 = vector.load %arg1[%c3_1694, %c16_1695, %c0_1696, %c0_1697] : memref<5x28x8x128xf32, #tpu.memory_space<vmem>>, vector<1x1x8x128xf32>
      %1763 = vector.shape_cast %1762 : vector<1x1x8x128xf32> to vector<8x128xf32>
      %1764 = arith.mulf %1763, %49 : vector<8x128xf32>
      %1765 = arith.addf %1761, %1764 : vector<8x128xf32>
      %c1_1698 = arith.constant 1 : index
      %c17_1699 = arith.constant 17 : index
      %c0_1700 = arith.constant 0 : index
      %c0_1701 = arith.constant 0 : index
      %1766 = vector.load %arg1[%c1_1698, %c17_1699, %c0_1700, %c0_1701] : memref<5x28x8x128xf32, #tpu.memory_space<vmem>>, vector<1x1x8x128xf32>
      %1767 = vector.shape_cast %1766 : vector<1x1x8x128xf32> to vector<8x128xf32>
      %1768 = arith.mulf %1767, %54 : vector<8x128xf32>
      %1769 = arith.addf %1765, %1768 : vector<8x128xf32>
      %c2_1702 = arith.constant 2 : index
      %c17_1703 = arith.constant 17 : index
      %c0_1704 = arith.constant 0 : index
      %c0_1705 = arith.constant 0 : index
      %1770 = vector.load %arg1[%c2_1702, %c17_1703, %c0_1704, %c0_1705] : memref<5x28x8x128xf32, #tpu.memory_space<vmem>>, vector<1x1x8x128xf32>
      %1771 = vector.shape_cast %1770 : vector<1x1x8x128xf32> to vector<8x128xf32>
      %1772 = arith.mulf %1771, %59 : vector<8x128xf32>
      %1773 = arith.addf %1769, %1772 : vector<8x128xf32>
      %c3_1706 = arith.constant 3 : index
      %c17_1707 = arith.constant 17 : index
      %c0_1708 = arith.constant 0 : index
      %c0_1709 = arith.constant 0 : index
      %1774 = vector.load %arg1[%c3_1706, %c17_1707, %c0_1708, %c0_1709] : memref<5x28x8x128xf32, #tpu.memory_space<vmem>>, vector<1x1x8x128xf32>
      %1775 = vector.shape_cast %1774 : vector<1x1x8x128xf32> to vector<8x128xf32>
      %1776 = arith.mulf %1775, %64 : vector<8x128xf32>
      %1777 = arith.addf %1773, %1776 : vector<8x128xf32>
      %1778 = arith.maximumf %1742, %1777 : vector<8x128xf32>
      %c2_1710 = arith.constant 2 : index
      %c15_1711 = arith.constant 15 : index
      %c0_1712 = arith.constant 0 : index
      %c0_1713 = arith.constant 0 : index
      %1779 = vector.load %arg1[%c2_1710, %c15_1711, %c0_1712, %c0_1713] : memref<5x28x8x128xf32, #tpu.memory_space<vmem>>, vector<1x1x8x128xf32>
      %1780 = vector.shape_cast %1779 : vector<1x1x8x128xf32> to vector<8x128xf32>
      %1781 = arith.mulf %1780, %24 : vector<8x128xf32>
      %c3_1714 = arith.constant 3 : index
      %c15_1715 = arith.constant 15 : index
      %c0_1716 = arith.constant 0 : index
      %c0_1717 = arith.constant 0 : index
      %1782 = vector.load %arg1[%c3_1714, %c15_1715, %c0_1716, %c0_1717] : memref<5x28x8x128xf32, #tpu.memory_space<vmem>>, vector<1x1x8x128xf32>
      %1783 = vector.shape_cast %1782 : vector<1x1x8x128xf32> to vector<8x128xf32>
      %1784 = arith.mulf %1783, %29 : vector<8x128xf32>
      %1785 = arith.addf %1781, %1784 : vector<8x128xf32>
      %c4_1718 = arith.constant 4 : index
      %c15_1719 = arith.constant 15 : index
      %c0_1720 = arith.constant 0 : index
      %c0_1721 = arith.constant 0 : index
      %1786 = vector.load %arg1[%c4_1718, %c15_1719, %c0_1720, %c0_1721] : memref<5x28x8x128xf32, #tpu.memory_space<vmem>>, vector<1x1x8x128xf32>
      %1787 = vector.shape_cast %1786 : vector<1x1x8x128xf32> to vector<8x128xf32>
      %1788 = arith.mulf %1787, %34 : vector<8x128xf32>
      %1789 = arith.addf %1785, %1788 : vector<8x128xf32>
      %c2_1722 = arith.constant 2 : index
      %c16_1723 = arith.constant 16 : index
      %c0_1724 = arith.constant 0 : index
      %c0_1725 = arith.constant 0 : index
      %1790 = vector.load %arg1[%c2_1722, %c16_1723, %c0_1724, %c0_1725] : memref<5x28x8x128xf32, #tpu.memory_space<vmem>>, vector<1x1x8x128xf32>
      %1791 = vector.shape_cast %1790 : vector<1x1x8x128xf32> to vector<8x128xf32>
      %1792 = arith.mulf %1791, %39 : vector<8x128xf32>
      %1793 = arith.addf %1789, %1792 : vector<8x128xf32>
      %c3_1726 = arith.constant 3 : index
      %c16_1727 = arith.constant 16 : index
      %c0_1728 = arith.constant 0 : index
      %c0_1729 = arith.constant 0 : index
      %1794 = vector.load %arg1[%c3_1726, %c16_1727, %c0_1728, %c0_1729] : memref<5x28x8x128xf32, #tpu.memory_space<vmem>>, vector<1x1x8x128xf32>
      %1795 = vector.shape_cast %1794 : vector<1x1x8x128xf32> to vector<8x128xf32>
      %1796 = arith.mulf %1795, %44 : vector<8x128xf32>
      %1797 = arith.addf %1793, %1796 : vector<8x128xf32>
      %c4_1730 = arith.constant 4 : index
      %c16_1731 = arith.constant 16 : index
      %c0_1732 = arith.constant 0 : index
      %c0_1733 = arith.constant 0 : index
      %1798 = vector.load %arg1[%c4_1730, %c16_1731, %c0_1732, %c0_1733] : memref<5x28x8x128xf32, #tpu.memory_space<vmem>>, vector<1x1x8x128xf32>
      %1799 = vector.shape_cast %1798 : vector<1x1x8x128xf32> to vector<8x128xf32>
      %1800 = arith.mulf %1799, %49 : vector<8x128xf32>
      %1801 = arith.addf %1797, %1800 : vector<8x128xf32>
      %c2_1734 = arith.constant 2 : index
      %c17_1735 = arith.constant 17 : index
      %c0_1736 = arith.constant 0 : index
      %c0_1737 = arith.constant 0 : index
      %1802 = vector.load %arg1[%c2_1734, %c17_1735, %c0_1736, %c0_1737] : memref<5x28x8x128xf32, #tpu.memory_space<vmem>>, vector<1x1x8x128xf32>
      %1803 = vector.shape_cast %1802 : vector<1x1x8x128xf32> to vector<8x128xf32>
      %1804 = arith.mulf %1803, %54 : vector<8x128xf32>
      %1805 = arith.addf %1801, %1804 : vector<8x128xf32>
      %c3_1738 = arith.constant 3 : index
      %c17_1739 = arith.constant 17 : index
      %c0_1740 = arith.constant 0 : index
      %c0_1741 = arith.constant 0 : index
      %1806 = vector.load %arg1[%c3_1738, %c17_1739, %c0_1740, %c0_1741] : memref<5x28x8x128xf32, #tpu.memory_space<vmem>>, vector<1x1x8x128xf32>
      %1807 = vector.shape_cast %1806 : vector<1x1x8x128xf32> to vector<8x128xf32>
      %1808 = arith.mulf %1807, %59 : vector<8x128xf32>
      %1809 = arith.addf %1805, %1808 : vector<8x128xf32>
      %c4_1742 = arith.constant 4 : index
      %c17_1743 = arith.constant 17 : index
      %c0_1744 = arith.constant 0 : index
      %c0_1745 = arith.constant 0 : index
      %1810 = vector.load %arg1[%c4_1742, %c17_1743, %c0_1744, %c0_1745] : memref<5x28x8x128xf32, #tpu.memory_space<vmem>>, vector<1x1x8x128xf32>
      %1811 = vector.shape_cast %1810 : vector<1x1x8x128xf32> to vector<8x128xf32>
      %1812 = arith.mulf %1811, %64 : vector<8x128xf32>
      %1813 = arith.addf %1809, %1812 : vector<8x128xf32>
      %1814 = arith.maximumf %1778, %1813 : vector<8x128xf32>
      %c0_1746 = arith.constant 0 : index
      %c16_1747 = arith.constant 16 : index
      %c0_1748 = arith.constant 0 : index
      %c0_1749 = arith.constant 0 : index
      %1815 = vector.load %arg1[%c0_1746, %c16_1747, %c0_1748, %c0_1749] : memref<5x28x8x128xf32, #tpu.memory_space<vmem>>, vector<1x1x8x128xf32>
      %1816 = vector.shape_cast %1815 : vector<1x1x8x128xf32> to vector<8x128xf32>
      %1817 = arith.mulf %1816, %24 : vector<8x128xf32>
      %c1_1750 = arith.constant 1 : index
      %c16_1751 = arith.constant 16 : index
      %c0_1752 = arith.constant 0 : index
      %c0_1753 = arith.constant 0 : index
      %1818 = vector.load %arg1[%c1_1750, %c16_1751, %c0_1752, %c0_1753] : memref<5x28x8x128xf32, #tpu.memory_space<vmem>>, vector<1x1x8x128xf32>
      %1819 = vector.shape_cast %1818 : vector<1x1x8x128xf32> to vector<8x128xf32>
      %1820 = arith.mulf %1819, %29 : vector<8x128xf32>
      %1821 = arith.addf %1817, %1820 : vector<8x128xf32>
      %c2_1754 = arith.constant 2 : index
      %c16_1755 = arith.constant 16 : index
      %c0_1756 = arith.constant 0 : index
      %c0_1757 = arith.constant 0 : index
      %1822 = vector.load %arg1[%c2_1754, %c16_1755, %c0_1756, %c0_1757] : memref<5x28x8x128xf32, #tpu.memory_space<vmem>>, vector<1x1x8x128xf32>
      %1823 = vector.shape_cast %1822 : vector<1x1x8x128xf32> to vector<8x128xf32>
      %1824 = arith.mulf %1823, %34 : vector<8x128xf32>
      %1825 = arith.addf %1821, %1824 : vector<8x128xf32>
      %c0_1758 = arith.constant 0 : index
      %c17_1759 = arith.constant 17 : index
      %c0_1760 = arith.constant 0 : index
      %c0_1761 = arith.constant 0 : index
      %1826 = vector.load %arg1[%c0_1758, %c17_1759, %c0_1760, %c0_1761] : memref<5x28x8x128xf32, #tpu.memory_space<vmem>>, vector<1x1x8x128xf32>
      %1827 = vector.shape_cast %1826 : vector<1x1x8x128xf32> to vector<8x128xf32>
      %1828 = arith.mulf %1827, %39 : vector<8x128xf32>
      %1829 = arith.addf %1825, %1828 : vector<8x128xf32>
      %c1_1762 = arith.constant 1 : index
      %c17_1763 = arith.constant 17 : index
      %c0_1764 = arith.constant 0 : index
      %c0_1765 = arith.constant 0 : index
      %1830 = vector.load %arg1[%c1_1762, %c17_1763, %c0_1764, %c0_1765] : memref<5x28x8x128xf32, #tpu.memory_space<vmem>>, vector<1x1x8x128xf32>
      %1831 = vector.shape_cast %1830 : vector<1x1x8x128xf32> to vector<8x128xf32>
      %1832 = arith.mulf %1831, %44 : vector<8x128xf32>
      %1833 = arith.addf %1829, %1832 : vector<8x128xf32>
      %c2_1766 = arith.constant 2 : index
      %c17_1767 = arith.constant 17 : index
      %c0_1768 = arith.constant 0 : index
      %c0_1769 = arith.constant 0 : index
      %1834 = vector.load %arg1[%c2_1766, %c17_1767, %c0_1768, %c0_1769] : memref<5x28x8x128xf32, #tpu.memory_space<vmem>>, vector<1x1x8x128xf32>
      %1835 = vector.shape_cast %1834 : vector<1x1x8x128xf32> to vector<8x128xf32>
      %1836 = arith.mulf %1835, %49 : vector<8x128xf32>
      %1837 = arith.addf %1833, %1836 : vector<8x128xf32>
      %c0_1770 = arith.constant 0 : index
      %c18 = arith.constant 18 : index
      %c0_1771 = arith.constant 0 : index
      %c0_1772 = arith.constant 0 : index
      %1838 = vector.load %arg1[%c0_1770, %c18, %c0_1771, %c0_1772] : memref<5x28x8x128xf32, #tpu.memory_space<vmem>>, vector<1x1x8x128xf32>
      %1839 = vector.shape_cast %1838 : vector<1x1x8x128xf32> to vector<8x128xf32>
      %1840 = arith.mulf %1839, %54 : vector<8x128xf32>
      %1841 = arith.addf %1837, %1840 : vector<8x128xf32>
      %c1_1773 = arith.constant 1 : index
      %c18_1774 = arith.constant 18 : index
      %c0_1775 = arith.constant 0 : index
      %c0_1776 = arith.constant 0 : index
      %1842 = vector.load %arg1[%c1_1773, %c18_1774, %c0_1775, %c0_1776] : memref<5x28x8x128xf32, #tpu.memory_space<vmem>>, vector<1x1x8x128xf32>
      %1843 = vector.shape_cast %1842 : vector<1x1x8x128xf32> to vector<8x128xf32>
      %1844 = arith.mulf %1843, %59 : vector<8x128xf32>
      %1845 = arith.addf %1841, %1844 : vector<8x128xf32>
      %c2_1777 = arith.constant 2 : index
      %c18_1778 = arith.constant 18 : index
      %c0_1779 = arith.constant 0 : index
      %c0_1780 = arith.constant 0 : index
      %1846 = vector.load %arg1[%c2_1777, %c18_1778, %c0_1779, %c0_1780] : memref<5x28x8x128xf32, #tpu.memory_space<vmem>>, vector<1x1x8x128xf32>
      %1847 = vector.shape_cast %1846 : vector<1x1x8x128xf32> to vector<8x128xf32>
      %1848 = arith.mulf %1847, %64 : vector<8x128xf32>
      %1849 = arith.addf %1845, %1848 : vector<8x128xf32>
      %1850 = arith.maximumf %1814, %1849 : vector<8x128xf32>
      %c1_1781 = arith.constant 1 : index
      %c16_1782 = arith.constant 16 : index
      %c0_1783 = arith.constant 0 : index
      %c0_1784 = arith.constant 0 : index
      %1851 = vector.load %arg1[%c1_1781, %c16_1782, %c0_1783, %c0_1784] : memref<5x28x8x128xf32, #tpu.memory_space<vmem>>, vector<1x1x8x128xf32>
      %1852 = vector.shape_cast %1851 : vector<1x1x8x128xf32> to vector<8x128xf32>
      %1853 = arith.mulf %1852, %24 : vector<8x128xf32>
      %c2_1785 = arith.constant 2 : index
      %c16_1786 = arith.constant 16 : index
      %c0_1787 = arith.constant 0 : index
      %c0_1788 = arith.constant 0 : index
      %1854 = vector.load %arg1[%c2_1785, %c16_1786, %c0_1787, %c0_1788] : memref<5x28x8x128xf32, #tpu.memory_space<vmem>>, vector<1x1x8x128xf32>
      %1855 = vector.shape_cast %1854 : vector<1x1x8x128xf32> to vector<8x128xf32>
      %1856 = arith.mulf %1855, %29 : vector<8x128xf32>
      %1857 = arith.addf %1853, %1856 : vector<8x128xf32>
      %c3_1789 = arith.constant 3 : index
      %c16_1790 = arith.constant 16 : index
      %c0_1791 = arith.constant 0 : index
      %c0_1792 = arith.constant 0 : index
      %1858 = vector.load %arg1[%c3_1789, %c16_1790, %c0_1791, %c0_1792] : memref<5x28x8x128xf32, #tpu.memory_space<vmem>>, vector<1x1x8x128xf32>
      %1859 = vector.shape_cast %1858 : vector<1x1x8x128xf32> to vector<8x128xf32>
      %1860 = arith.mulf %1859, %34 : vector<8x128xf32>
      %1861 = arith.addf %1857, %1860 : vector<8x128xf32>
      %c1_1793 = arith.constant 1 : index
      %c17_1794 = arith.constant 17 : index
      %c0_1795 = arith.constant 0 : index
      %c0_1796 = arith.constant 0 : index
      %1862 = vector.load %arg1[%c1_1793, %c17_1794, %c0_1795, %c0_1796] : memref<5x28x8x128xf32, #tpu.memory_space<vmem>>, vector<1x1x8x128xf32>
      %1863 = vector.shape_cast %1862 : vector<1x1x8x128xf32> to vector<8x128xf32>
      %1864 = arith.mulf %1863, %39 : vector<8x128xf32>
      %1865 = arith.addf %1861, %1864 : vector<8x128xf32>
      %c2_1797 = arith.constant 2 : index
      %c17_1798 = arith.constant 17 : index
      %c0_1799 = arith.constant 0 : index
      %c0_1800 = arith.constant 0 : index
      %1866 = vector.load %arg1[%c2_1797, %c17_1798, %c0_1799, %c0_1800] : memref<5x28x8x128xf32, #tpu.memory_space<vmem>>, vector<1x1x8x128xf32>
      %1867 = vector.shape_cast %1866 : vector<1x1x8x128xf32> to vector<8x128xf32>
      %1868 = arith.mulf %1867, %44 : vector<8x128xf32>
      %1869 = arith.addf %1865, %1868 : vector<8x128xf32>
      %c3_1801 = arith.constant 3 : index
      %c17_1802 = arith.constant 17 : index
      %c0_1803 = arith.constant 0 : index
      %c0_1804 = arith.constant 0 : index
      %1870 = vector.load %arg1[%c3_1801, %c17_1802, %c0_1803, %c0_1804] : memref<5x28x8x128xf32, #tpu.memory_space<vmem>>, vector<1x1x8x128xf32>
      %1871 = vector.shape_cast %1870 : vector<1x1x8x128xf32> to vector<8x128xf32>
      %1872 = arith.mulf %1871, %49 : vector<8x128xf32>
      %1873 = arith.addf %1869, %1872 : vector<8x128xf32>
      %c1_1805 = arith.constant 1 : index
      %c18_1806 = arith.constant 18 : index
      %c0_1807 = arith.constant 0 : index
      %c0_1808 = arith.constant 0 : index
      %1874 = vector.load %arg1[%c1_1805, %c18_1806, %c0_1807, %c0_1808] : memref<5x28x8x128xf32, #tpu.memory_space<vmem>>, vector<1x1x8x128xf32>
      %1875 = vector.shape_cast %1874 : vector<1x1x8x128xf32> to vector<8x128xf32>
      %1876 = arith.mulf %1875, %54 : vector<8x128xf32>
      %1877 = arith.addf %1873, %1876 : vector<8x128xf32>
      %c2_1809 = arith.constant 2 : index
      %c18_1810 = arith.constant 18 : index
      %c0_1811 = arith.constant 0 : index
      %c0_1812 = arith.constant 0 : index
      %1878 = vector.load %arg1[%c2_1809, %c18_1810, %c0_1811, %c0_1812] : memref<5x28x8x128xf32, #tpu.memory_space<vmem>>, vector<1x1x8x128xf32>
      %1879 = vector.shape_cast %1878 : vector<1x1x8x128xf32> to vector<8x128xf32>
      %1880 = arith.mulf %1879, %59 : vector<8x128xf32>
      %1881 = arith.addf %1877, %1880 : vector<8x128xf32>
      %c3_1813 = arith.constant 3 : index
      %c18_1814 = arith.constant 18 : index
      %c0_1815 = arith.constant 0 : index
      %c0_1816 = arith.constant 0 : index
      %1882 = vector.load %arg1[%c3_1813, %c18_1814, %c0_1815, %c0_1816] : memref<5x28x8x128xf32, #tpu.memory_space<vmem>>, vector<1x1x8x128xf32>
      %1883 = vector.shape_cast %1882 : vector<1x1x8x128xf32> to vector<8x128xf32>
      %1884 = arith.mulf %1883, %64 : vector<8x128xf32>
      %1885 = arith.addf %1881, %1884 : vector<8x128xf32>
      %1886 = arith.maximumf %1850, %1885 : vector<8x128xf32>
      %c2_1817 = arith.constant 2 : index
      %c16_1818 = arith.constant 16 : index
      %c0_1819 = arith.constant 0 : index
      %c0_1820 = arith.constant 0 : index
      %1887 = vector.load %arg1[%c2_1817, %c16_1818, %c0_1819, %c0_1820] : memref<5x28x8x128xf32, #tpu.memory_space<vmem>>, vector<1x1x8x128xf32>
      %1888 = vector.shape_cast %1887 : vector<1x1x8x128xf32> to vector<8x128xf32>
      %1889 = arith.mulf %1888, %24 : vector<8x128xf32>
      %c3_1821 = arith.constant 3 : index
      %c16_1822 = arith.constant 16 : index
      %c0_1823 = arith.constant 0 : index
      %c0_1824 = arith.constant 0 : index
      %1890 = vector.load %arg1[%c3_1821, %c16_1822, %c0_1823, %c0_1824] : memref<5x28x8x128xf32, #tpu.memory_space<vmem>>, vector<1x1x8x128xf32>
      %1891 = vector.shape_cast %1890 : vector<1x1x8x128xf32> to vector<8x128xf32>
      %1892 = arith.mulf %1891, %29 : vector<8x128xf32>
      %1893 = arith.addf %1889, %1892 : vector<8x128xf32>
      %c4_1825 = arith.constant 4 : index
      %c16_1826 = arith.constant 16 : index
      %c0_1827 = arith.constant 0 : index
      %c0_1828 = arith.constant 0 : index
      %1894 = vector.load %arg1[%c4_1825, %c16_1826, %c0_1827, %c0_1828] : memref<5x28x8x128xf32, #tpu.memory_space<vmem>>, vector<1x1x8x128xf32>
      %1895 = vector.shape_cast %1894 : vector<1x1x8x128xf32> to vector<8x128xf32>
      %1896 = arith.mulf %1895, %34 : vector<8x128xf32>
      %1897 = arith.addf %1893, %1896 : vector<8x128xf32>
      %c2_1829 = arith.constant 2 : index
      %c17_1830 = arith.constant 17 : index
      %c0_1831 = arith.constant 0 : index
      %c0_1832 = arith.constant 0 : index
      %1898 = vector.load %arg1[%c2_1829, %c17_1830, %c0_1831, %c0_1832] : memref<5x28x8x128xf32, #tpu.memory_space<vmem>>, vector<1x1x8x128xf32>
      %1899 = vector.shape_cast %1898 : vector<1x1x8x128xf32> to vector<8x128xf32>
      %1900 = arith.mulf %1899, %39 : vector<8x128xf32>
      %1901 = arith.addf %1897, %1900 : vector<8x128xf32>
      %c3_1833 = arith.constant 3 : index
      %c17_1834 = arith.constant 17 : index
      %c0_1835 = arith.constant 0 : index
      %c0_1836 = arith.constant 0 : index
      %1902 = vector.load %arg1[%c3_1833, %c17_1834, %c0_1835, %c0_1836] : memref<5x28x8x128xf32, #tpu.memory_space<vmem>>, vector<1x1x8x128xf32>
      %1903 = vector.shape_cast %1902 : vector<1x1x8x128xf32> to vector<8x128xf32>
      %1904 = arith.mulf %1903, %44 : vector<8x128xf32>
      %1905 = arith.addf %1901, %1904 : vector<8x128xf32>
      %c4_1837 = arith.constant 4 : index
      %c17_1838 = arith.constant 17 : index
      %c0_1839 = arith.constant 0 : index
      %c0_1840 = arith.constant 0 : index
      %1906 = vector.load %arg1[%c4_1837, %c17_1838, %c0_1839, %c0_1840] : memref<5x28x8x128xf32, #tpu.memory_space<vmem>>, vector<1x1x8x128xf32>
      %1907 = vector.shape_cast %1906 : vector<1x1x8x128xf32> to vector<8x128xf32>
      %1908 = arith.mulf %1907, %49 : vector<8x128xf32>
      %1909 = arith.addf %1905, %1908 : vector<8x128xf32>
      %c2_1841 = arith.constant 2 : index
      %c18_1842 = arith.constant 18 : index
      %c0_1843 = arith.constant 0 : index
      %c0_1844 = arith.constant 0 : index
      %1910 = vector.load %arg1[%c2_1841, %c18_1842, %c0_1843, %c0_1844] : memref<5x28x8x128xf32, #tpu.memory_space<vmem>>, vector<1x1x8x128xf32>
      %1911 = vector.shape_cast %1910 : vector<1x1x8x128xf32> to vector<8x128xf32>
      %1912 = arith.mulf %1911, %54 : vector<8x128xf32>
      %1913 = arith.addf %1909, %1912 : vector<8x128xf32>
      %c3_1845 = arith.constant 3 : index
      %c18_1846 = arith.constant 18 : index
      %c0_1847 = arith.constant 0 : index
      %c0_1848 = arith.constant 0 : index
      %1914 = vector.load %arg1[%c3_1845, %c18_1846, %c0_1847, %c0_1848] : memref<5x28x8x128xf32, #tpu.memory_space<vmem>>, vector<1x1x8x128xf32>
      %1915 = vector.shape_cast %1914 : vector<1x1x8x128xf32> to vector<8x128xf32>
      %1916 = arith.mulf %1915, %59 : vector<8x128xf32>
      %1917 = arith.addf %1913, %1916 : vector<8x128xf32>
      %c4_1849 = arith.constant 4 : index
      %c18_1850 = arith.constant 18 : index
      %c0_1851 = arith.constant 0 : index
      %c0_1852 = arith.constant 0 : index
      %1918 = vector.load %arg1[%c4_1849, %c18_1850, %c0_1851, %c0_1852] : memref<5x28x8x128xf32, #tpu.memory_space<vmem>>, vector<1x1x8x128xf32>
      %1919 = vector.shape_cast %1918 : vector<1x1x8x128xf32> to vector<8x128xf32>
      %1920 = arith.mulf %1919, %64 : vector<8x128xf32>
      %1921 = arith.addf %1917, %1920 : vector<8x128xf32>
      %1922 = arith.maximumf %1886, %1921 : vector<8x128xf32>
      %c0_1853 = arith.constant 0 : index
      %c17_1854 = arith.constant 17 : index
      %c0_1855 = arith.constant 0 : index
      %c0_1856 = arith.constant 0 : index
      %1923 = vector.load %arg1[%c0_1853, %c17_1854, %c0_1855, %c0_1856] : memref<5x28x8x128xf32, #tpu.memory_space<vmem>>, vector<1x1x8x128xf32>
      %1924 = vector.shape_cast %1923 : vector<1x1x8x128xf32> to vector<8x128xf32>
      %1925 = arith.mulf %1924, %24 : vector<8x128xf32>
      %c1_1857 = arith.constant 1 : index
      %c17_1858 = arith.constant 17 : index
      %c0_1859 = arith.constant 0 : index
      %c0_1860 = arith.constant 0 : index
      %1926 = vector.load %arg1[%c1_1857, %c17_1858, %c0_1859, %c0_1860] : memref<5x28x8x128xf32, #tpu.memory_space<vmem>>, vector<1x1x8x128xf32>
      %1927 = vector.shape_cast %1926 : vector<1x1x8x128xf32> to vector<8x128xf32>
      %1928 = arith.mulf %1927, %29 : vector<8x128xf32>
      %1929 = arith.addf %1925, %1928 : vector<8x128xf32>
      %c2_1861 = arith.constant 2 : index
      %c17_1862 = arith.constant 17 : index
      %c0_1863 = arith.constant 0 : index
      %c0_1864 = arith.constant 0 : index
      %1930 = vector.load %arg1[%c2_1861, %c17_1862, %c0_1863, %c0_1864] : memref<5x28x8x128xf32, #tpu.memory_space<vmem>>, vector<1x1x8x128xf32>
      %1931 = vector.shape_cast %1930 : vector<1x1x8x128xf32> to vector<8x128xf32>
      %1932 = arith.mulf %1931, %34 : vector<8x128xf32>
      %1933 = arith.addf %1929, %1932 : vector<8x128xf32>
      %c0_1865 = arith.constant 0 : index
      %c18_1866 = arith.constant 18 : index
      %c0_1867 = arith.constant 0 : index
      %c0_1868 = arith.constant 0 : index
      %1934 = vector.load %arg1[%c0_1865, %c18_1866, %c0_1867, %c0_1868] : memref<5x28x8x128xf32, #tpu.memory_space<vmem>>, vector<1x1x8x128xf32>
      %1935 = vector.shape_cast %1934 : vector<1x1x8x128xf32> to vector<8x128xf32>
      %1936 = arith.mulf %1935, %39 : vector<8x128xf32>
      %1937 = arith.addf %1933, %1936 : vector<8x128xf32>
      %c1_1869 = arith.constant 1 : index
      %c18_1870 = arith.constant 18 : index
      %c0_1871 = arith.constant 0 : index
      %c0_1872 = arith.constant 0 : index
      %1938 = vector.load %arg1[%c1_1869, %c18_1870, %c0_1871, %c0_1872] : memref<5x28x8x128xf32, #tpu.memory_space<vmem>>, vector<1x1x8x128xf32>
      %1939 = vector.shape_cast %1938 : vector<1x1x8x128xf32> to vector<8x128xf32>
      %1940 = arith.mulf %1939, %44 : vector<8x128xf32>
      %1941 = arith.addf %1937, %1940 : vector<8x128xf32>
      %c2_1873 = arith.constant 2 : index
      %c18_1874 = arith.constant 18 : index
      %c0_1875 = arith.constant 0 : index
      %c0_1876 = arith.constant 0 : index
      %1942 = vector.load %arg1[%c2_1873, %c18_1874, %c0_1875, %c0_1876] : memref<5x28x8x128xf32, #tpu.memory_space<vmem>>, vector<1x1x8x128xf32>
      %1943 = vector.shape_cast %1942 : vector<1x1x8x128xf32> to vector<8x128xf32>
      %1944 = arith.mulf %1943, %49 : vector<8x128xf32>
      %1945 = arith.addf %1941, %1944 : vector<8x128xf32>
      %c0_1877 = arith.constant 0 : index
      %c19 = arith.constant 19 : index
      %c0_1878 = arith.constant 0 : index
      %c0_1879 = arith.constant 0 : index
      %1946 = vector.load %arg1[%c0_1877, %c19, %c0_1878, %c0_1879] : memref<5x28x8x128xf32, #tpu.memory_space<vmem>>, vector<1x1x8x128xf32>
      %1947 = vector.shape_cast %1946 : vector<1x1x8x128xf32> to vector<8x128xf32>
      %1948 = arith.mulf %1947, %54 : vector<8x128xf32>
      %1949 = arith.addf %1945, %1948 : vector<8x128xf32>
      %c1_1880 = arith.constant 1 : index
      %c19_1881 = arith.constant 19 : index
      %c0_1882 = arith.constant 0 : index
      %c0_1883 = arith.constant 0 : index
      %1950 = vector.load %arg1[%c1_1880, %c19_1881, %c0_1882, %c0_1883] : memref<5x28x8x128xf32, #tpu.memory_space<vmem>>, vector<1x1x8x128xf32>
      %1951 = vector.shape_cast %1950 : vector<1x1x8x128xf32> to vector<8x128xf32>
      %1952 = arith.mulf %1951, %59 : vector<8x128xf32>
      %1953 = arith.addf %1949, %1952 : vector<8x128xf32>
      %c2_1884 = arith.constant 2 : index
      %c19_1885 = arith.constant 19 : index
      %c0_1886 = arith.constant 0 : index
      %c0_1887 = arith.constant 0 : index
      %1954 = vector.load %arg1[%c2_1884, %c19_1885, %c0_1886, %c0_1887] : memref<5x28x8x128xf32, #tpu.memory_space<vmem>>, vector<1x1x8x128xf32>
      %1955 = vector.shape_cast %1954 : vector<1x1x8x128xf32> to vector<8x128xf32>
      %1956 = arith.mulf %1955, %64 : vector<8x128xf32>
      %1957 = arith.addf %1953, %1956 : vector<8x128xf32>
      %1958 = arith.maximumf %1922, %1957 : vector<8x128xf32>
      %c1_1888 = arith.constant 1 : index
      %c17_1889 = arith.constant 17 : index
      %c0_1890 = arith.constant 0 : index
      %c0_1891 = arith.constant 0 : index
      %1959 = vector.load %arg1[%c1_1888, %c17_1889, %c0_1890, %c0_1891] : memref<5x28x8x128xf32, #tpu.memory_space<vmem>>, vector<1x1x8x128xf32>
      %1960 = vector.shape_cast %1959 : vector<1x1x8x128xf32> to vector<8x128xf32>
      %1961 = arith.mulf %1960, %24 : vector<8x128xf32>
      %c2_1892 = arith.constant 2 : index
      %c17_1893 = arith.constant 17 : index
      %c0_1894 = arith.constant 0 : index
      %c0_1895 = arith.constant 0 : index
      %1962 = vector.load %arg1[%c2_1892, %c17_1893, %c0_1894, %c0_1895] : memref<5x28x8x128xf32, #tpu.memory_space<vmem>>, vector<1x1x8x128xf32>
      %1963 = vector.shape_cast %1962 : vector<1x1x8x128xf32> to vector<8x128xf32>
      %1964 = arith.mulf %1963, %29 : vector<8x128xf32>
      %1965 = arith.addf %1961, %1964 : vector<8x128xf32>
      %c3_1896 = arith.constant 3 : index
      %c17_1897 = arith.constant 17 : index
      %c0_1898 = arith.constant 0 : index
      %c0_1899 = arith.constant 0 : index
      %1966 = vector.load %arg1[%c3_1896, %c17_1897, %c0_1898, %c0_1899] : memref<5x28x8x128xf32, #tpu.memory_space<vmem>>, vector<1x1x8x128xf32>
      %1967 = vector.shape_cast %1966 : vector<1x1x8x128xf32> to vector<8x128xf32>
      %1968 = arith.mulf %1967, %34 : vector<8x128xf32>
      %1969 = arith.addf %1965, %1968 : vector<8x128xf32>
      %c1_1900 = arith.constant 1 : index
      %c18_1901 = arith.constant 18 : index
      %c0_1902 = arith.constant 0 : index
      %c0_1903 = arith.constant 0 : index
      %1970 = vector.load %arg1[%c1_1900, %c18_1901, %c0_1902, %c0_1903] : memref<5x28x8x128xf32, #tpu.memory_space<vmem>>, vector<1x1x8x128xf32>
      %1971 = vector.shape_cast %1970 : vector<1x1x8x128xf32> to vector<8x128xf32>
      %1972 = arith.mulf %1971, %39 : vector<8x128xf32>
      %1973 = arith.addf %1969, %1972 : vector<8x128xf32>
      %c2_1904 = arith.constant 2 : index
      %c18_1905 = arith.constant 18 : index
      %c0_1906 = arith.constant 0 : index
      %c0_1907 = arith.constant 0 : index
      %1974 = vector.load %arg1[%c2_1904, %c18_1905, %c0_1906, %c0_1907] : memref<5x28x8x128xf32, #tpu.memory_space<vmem>>, vector<1x1x8x128xf32>
      %1975 = vector.shape_cast %1974 : vector<1x1x8x128xf32> to vector<8x128xf32>
      %1976 = arith.mulf %1975, %44 : vector<8x128xf32>
      %1977 = arith.addf %1973, %1976 : vector<8x128xf32>
      %c3_1908 = arith.constant 3 : index
      %c18_1909 = arith.constant 18 : index
      %c0_1910 = arith.constant 0 : index
      %c0_1911 = arith.constant 0 : index
      %1978 = vector.load %arg1[%c3_1908, %c18_1909, %c0_1910, %c0_1911] : memref<5x28x8x128xf32, #tpu.memory_space<vmem>>, vector<1x1x8x128xf32>
      %1979 = vector.shape_cast %1978 : vector<1x1x8x128xf32> to vector<8x128xf32>
      %1980 = arith.mulf %1979, %49 : vector<8x128xf32>
      %1981 = arith.addf %1977, %1980 : vector<8x128xf32>
      %c1_1912 = arith.constant 1 : index
      %c19_1913 = arith.constant 19 : index
      %c0_1914 = arith.constant 0 : index
      %c0_1915 = arith.constant 0 : index
      %1982 = vector.load %arg1[%c1_1912, %c19_1913, %c0_1914, %c0_1915] : memref<5x28x8x128xf32, #tpu.memory_space<vmem>>, vector<1x1x8x128xf32>
      %1983 = vector.shape_cast %1982 : vector<1x1x8x128xf32> to vector<8x128xf32>
      %1984 = arith.mulf %1983, %54 : vector<8x128xf32>
      %1985 = arith.addf %1981, %1984 : vector<8x128xf32>
      %c2_1916 = arith.constant 2 : index
      %c19_1917 = arith.constant 19 : index
      %c0_1918 = arith.constant 0 : index
      %c0_1919 = arith.constant 0 : index
      %1986 = vector.load %arg1[%c2_1916, %c19_1917, %c0_1918, %c0_1919] : memref<5x28x8x128xf32, #tpu.memory_space<vmem>>, vector<1x1x8x128xf32>
      %1987 = vector.shape_cast %1986 : vector<1x1x8x128xf32> to vector<8x128xf32>
      %1988 = arith.mulf %1987, %59 : vector<8x128xf32>
      %1989 = arith.addf %1985, %1988 : vector<8x128xf32>
      %c3_1920 = arith.constant 3 : index
      %c19_1921 = arith.constant 19 : index
      %c0_1922 = arith.constant 0 : index
      %c0_1923 = arith.constant 0 : index
      %1990 = vector.load %arg1[%c3_1920, %c19_1921, %c0_1922, %c0_1923] : memref<5x28x8x128xf32, #tpu.memory_space<vmem>>, vector<1x1x8x128xf32>
      %1991 = vector.shape_cast %1990 : vector<1x1x8x128xf32> to vector<8x128xf32>
      %1992 = arith.mulf %1991, %64 : vector<8x128xf32>
      %1993 = arith.addf %1989, %1992 : vector<8x128xf32>
      %1994 = arith.maximumf %1958, %1993 : vector<8x128xf32>
      %c2_1924 = arith.constant 2 : index
      %c17_1925 = arith.constant 17 : index
      %c0_1926 = arith.constant 0 : index
      %c0_1927 = arith.constant 0 : index
      %1995 = vector.load %arg1[%c2_1924, %c17_1925, %c0_1926, %c0_1927] : memref<5x28x8x128xf32, #tpu.memory_space<vmem>>, vector<1x1x8x128xf32>
      %1996 = vector.shape_cast %1995 : vector<1x1x8x128xf32> to vector<8x128xf32>
      %1997 = arith.mulf %1996, %24 : vector<8x128xf32>
      %c3_1928 = arith.constant 3 : index
      %c17_1929 = arith.constant 17 : index
      %c0_1930 = arith.constant 0 : index
      %c0_1931 = arith.constant 0 : index
      %1998 = vector.load %arg1[%c3_1928, %c17_1929, %c0_1930, %c0_1931] : memref<5x28x8x128xf32, #tpu.memory_space<vmem>>, vector<1x1x8x128xf32>
      %1999 = vector.shape_cast %1998 : vector<1x1x8x128xf32> to vector<8x128xf32>
      %2000 = arith.mulf %1999, %29 : vector<8x128xf32>
      %2001 = arith.addf %1997, %2000 : vector<8x128xf32>
      %c4_1932 = arith.constant 4 : index
      %c17_1933 = arith.constant 17 : index
      %c0_1934 = arith.constant 0 : index
      %c0_1935 = arith.constant 0 : index
      %2002 = vector.load %arg1[%c4_1932, %c17_1933, %c0_1934, %c0_1935] : memref<5x28x8x128xf32, #tpu.memory_space<vmem>>, vector<1x1x8x128xf32>
      %2003 = vector.shape_cast %2002 : vector<1x1x8x128xf32> to vector<8x128xf32>
      %2004 = arith.mulf %2003, %34 : vector<8x128xf32>
      %2005 = arith.addf %2001, %2004 : vector<8x128xf32>
      %c2_1936 = arith.constant 2 : index
      %c18_1937 = arith.constant 18 : index
      %c0_1938 = arith.constant 0 : index
      %c0_1939 = arith.constant 0 : index
      %2006 = vector.load %arg1[%c2_1936, %c18_1937, %c0_1938, %c0_1939] : memref<5x28x8x128xf32, #tpu.memory_space<vmem>>, vector<1x1x8x128xf32>
      %2007 = vector.shape_cast %2006 : vector<1x1x8x128xf32> to vector<8x128xf32>
      %2008 = arith.mulf %2007, %39 : vector<8x128xf32>
      %2009 = arith.addf %2005, %2008 : vector<8x128xf32>
      %c3_1940 = arith.constant 3 : index
      %c18_1941 = arith.constant 18 : index
      %c0_1942 = arith.constant 0 : index
      %c0_1943 = arith.constant 0 : index
      %2010 = vector.load %arg1[%c3_1940, %c18_1941, %c0_1942, %c0_1943] : memref<5x28x8x128xf32, #tpu.memory_space<vmem>>, vector<1x1x8x128xf32>
      %2011 = vector.shape_cast %2010 : vector<1x1x8x128xf32> to vector<8x128xf32>
      %2012 = arith.mulf %2011, %44 : vector<8x128xf32>
      %2013 = arith.addf %2009, %2012 : vector<8x128xf32>
      %c4_1944 = arith.constant 4 : index
      %c18_1945 = arith.constant 18 : index
      %c0_1946 = arith.constant 0 : index
      %c0_1947 = arith.constant 0 : index
      %2014 = vector.load %arg1[%c4_1944, %c18_1945, %c0_1946, %c0_1947] : memref<5x28x8x128xf32, #tpu.memory_space<vmem>>, vector<1x1x8x128xf32>
      %2015 = vector.shape_cast %2014 : vector<1x1x8x128xf32> to vector<8x128xf32>
      %2016 = arith.mulf %2015, %49 : vector<8x128xf32>
      %2017 = arith.addf %2013, %2016 : vector<8x128xf32>
      %c2_1948 = arith.constant 2 : index
      %c19_1949 = arith.constant 19 : index
      %c0_1950 = arith.constant 0 : index
      %c0_1951 = arith.constant 0 : index
      %2018 = vector.load %arg1[%c2_1948, %c19_1949, %c0_1950, %c0_1951] : memref<5x28x8x128xf32, #tpu.memory_space<vmem>>, vector<1x1x8x128xf32>
      %2019 = vector.shape_cast %2018 : vector<1x1x8x128xf32> to vector<8x128xf32>
      %2020 = arith.mulf %2019, %54 : vector<8x128xf32>
      %2021 = arith.addf %2017, %2020 : vector<8x128xf32>
      %c3_1952 = arith.constant 3 : index
      %c19_1953 = arith.constant 19 : index
      %c0_1954 = arith.constant 0 : index
      %c0_1955 = arith.constant 0 : index
      %2022 = vector.load %arg1[%c3_1952, %c19_1953, %c0_1954, %c0_1955] : memref<5x28x8x128xf32, #tpu.memory_space<vmem>>, vector<1x1x8x128xf32>
      %2023 = vector.shape_cast %2022 : vector<1x1x8x128xf32> to vector<8x128xf32>
      %2024 = arith.mulf %2023, %59 : vector<8x128xf32>
      %2025 = arith.addf %2021, %2024 : vector<8x128xf32>
      %c4_1956 = arith.constant 4 : index
      %c19_1957 = arith.constant 19 : index
      %c0_1958 = arith.constant 0 : index
      %c0_1959 = arith.constant 0 : index
      %2026 = vector.load %arg1[%c4_1956, %c19_1957, %c0_1958, %c0_1959] : memref<5x28x8x128xf32, #tpu.memory_space<vmem>>, vector<1x1x8x128xf32>
      %2027 = vector.shape_cast %2026 : vector<1x1x8x128xf32> to vector<8x128xf32>
      %2028 = arith.mulf %2027, %64 : vector<8x128xf32>
      %2029 = arith.addf %2025, %2028 : vector<8x128xf32>
      %2030 = arith.maximumf %1994, %2029 : vector<8x128xf32>
      %2031 = arith.addf %2030, %67 : vector<8x128xf32>
      %2032 = arith.index_cast %19 : i32 to index
      %c40 = arith.constant 40 : index
      %c0_1960 = arith.constant 0 : index
      %2033 = vector.load %arg9[%2032, %c40, %c0_1960] : memref<10x64x128xf32, #tpu.memory_space<vmem>>, vector<1x8x128xf32>
      %2034 = vector.shape_cast %2033 : vector<1x8x128xf32> to vector<8x128xf32>
      %2035 = vector.shape_cast %2031 : vector<8x128xf32> to vector<1x8x128xf32>
      tpu.vector_store %arg9[%2032, %c40, %c0_1960], %2035 {strides = array<i32>} : memref<10x64x128xf32, #tpu.memory_space<vmem>>, vector<1x8x128xf32>,
      %c0_1961 = arith.constant 0 : index
      %c18_1962 = arith.constant 18 : index
      %c0_1963 = arith.constant 0 : index
      %c0_1964 = arith.constant 0 : index
      %2036 = vector.load %arg1[%c0_1961, %c18_1962, %c0_1963, %c0_1964] : memref<5x28x8x128xf32, #tpu.memory_space<vmem>>, vector<1x1x8x128xf32>
      %2037 = vector.shape_cast %2036 : vector<1x1x8x128xf32> to vector<8x128xf32>
      %2038 = arith.mulf %2037, %24 : vector<8x128xf32>
      %c1_1965 = arith.constant 1 : index
      %c18_1966 = arith.constant 18 : index
      %c0_1967 = arith.constant 0 : index
      %c0_1968 = arith.constant 0 : index
      %2039 = vector.load %arg1[%c1_1965, %c18_1966, %c0_1967, %c0_1968] : memref<5x28x8x128xf32, #tpu.memory_space<vmem>>, vector<1x1x8x128xf32>
      %2040 = vector.shape_cast %2039 : vector<1x1x8x128xf32> to vector<8x128xf32>
      %2041 = arith.mulf %2040, %29 : vector<8x128xf32>
      %2042 = arith.addf %2038, %2041 : vector<8x128xf32>
      %c2_1969 = arith.constant 2 : index
      %c18_1970 = arith.constant 18 : index
      %c0_1971 = arith.constant 0 : index
      %c0_1972 = arith.constant 0 : index
      %2043 = vector.load %arg1[%c2_1969, %c18_1970, %c0_1971, %c0_1972] : memref<5x28x8x128xf32, #tpu.memory_space<vmem>>, vector<1x1x8x128xf32>
      %2044 = vector.shape_cast %2043 : vector<1x1x8x128xf32> to vector<8x128xf32>
      %2045 = arith.mulf %2044, %34 : vector<8x128xf32>
      %2046 = arith.addf %2042, %2045 : vector<8x128xf32>
      %c0_1973 = arith.constant 0 : index
      %c19_1974 = arith.constant 19 : index
      %c0_1975 = arith.constant 0 : index
      %c0_1976 = arith.constant 0 : index
      %2047 = vector.load %arg1[%c0_1973, %c19_1974, %c0_1975, %c0_1976] : memref<5x28x8x128xf32, #tpu.memory_space<vmem>>, vector<1x1x8x128xf32>
      %2048 = vector.shape_cast %2047 : vector<1x1x8x128xf32> to vector<8x128xf32>
      %2049 = arith.mulf %2048, %39 : vector<8x128xf32>
      %2050 = arith.addf %2046, %2049 : vector<8x128xf32>
      %c1_1977 = arith.constant 1 : index
      %c19_1978 = arith.constant 19 : index
      %c0_1979 = arith.constant 0 : index
      %c0_1980 = arith.constant 0 : index
      %2051 = vector.load %arg1[%c1_1977, %c19_1978, %c0_1979, %c0_1980] : memref<5x28x8x128xf32, #tpu.memory_space<vmem>>, vector<1x1x8x128xf32>
      %2052 = vector.shape_cast %2051 : vector<1x1x8x128xf32> to vector<8x128xf32>
      %2053 = arith.mulf %2052, %44 : vector<8x128xf32>
      %2054 = arith.addf %2050, %2053 : vector<8x128xf32>
      %c2_1981 = arith.constant 2 : index
      %c19_1982 = arith.constant 19 : index
      %c0_1983 = arith.constant 0 : index
      %c0_1984 = arith.constant 0 : index
      %2055 = vector.load %arg1[%c2_1981, %c19_1982, %c0_1983, %c0_1984] : memref<5x28x8x128xf32, #tpu.memory_space<vmem>>, vector<1x1x8x128xf32>
      %2056 = vector.shape_cast %2055 : vector<1x1x8x128xf32> to vector<8x128xf32>
      %2057 = arith.mulf %2056, %49 : vector<8x128xf32>
      %2058 = arith.addf %2054, %2057 : vector<8x128xf32>
      %c0_1985 = arith.constant 0 : index
      %c20 = arith.constant 20 : index
      %c0_1986 = arith.constant 0 : index
      %c0_1987 = arith.constant 0 : index
      %2059 = vector.load %arg1[%c0_1985, %c20, %c0_1986, %c0_1987] : memref<5x28x8x128xf32, #tpu.memory_space<vmem>>, vector<1x1x8x128xf32>
      %2060 = vector.shape_cast %2059 : vector<1x1x8x128xf32> to vector<8x128xf32>
      %2061 = arith.mulf %2060, %54 : vector<8x128xf32>
      %2062 = arith.addf %2058, %2061 : vector<8x128xf32>
      %c1_1988 = arith.constant 1 : index
      %c20_1989 = arith.constant 20 : index
      %c0_1990 = arith.constant 0 : index
      %c0_1991 = arith.constant 0 : index
      %2063 = vector.load %arg1[%c1_1988, %c20_1989, %c0_1990, %c0_1991] : memref<5x28x8x128xf32, #tpu.memory_space<vmem>>, vector<1x1x8x128xf32>
      %2064 = vector.shape_cast %2063 : vector<1x1x8x128xf32> to vector<8x128xf32>
      %2065 = arith.mulf %2064, %59 : vector<8x128xf32>
      %2066 = arith.addf %2062, %2065 : vector<8x128xf32>
      %c2_1992 = arith.constant 2 : index
      %c20_1993 = arith.constant 20 : index
      %c0_1994 = arith.constant 0 : index
      %c0_1995 = arith.constant 0 : index
      %2067 = vector.load %arg1[%c2_1992, %c20_1993, %c0_1994, %c0_1995] : memref<5x28x8x128xf32, #tpu.memory_space<vmem>>, vector<1x1x8x128xf32>
      %2068 = vector.shape_cast %2067 : vector<1x1x8x128xf32> to vector<8x128xf32>
      %2069 = arith.mulf %2068, %64 : vector<8x128xf32>
      %2070 = arith.addf %2066, %2069 : vector<8x128xf32>
      %c1_1996 = arith.constant 1 : index
      %c18_1997 = arith.constant 18 : index
      %c0_1998 = arith.constant 0 : index
      %c0_1999 = arith.constant 0 : index
      %2071 = vector.load %arg1[%c1_1996, %c18_1997, %c0_1998, %c0_1999] : memref<5x28x8x128xf32, #tpu.memory_space<vmem>>, vector<1x1x8x128xf32>
      %2072 = vector.shape_cast %2071 : vector<1x1x8x128xf32> to vector<8x128xf32>
      %2073 = arith.mulf %2072, %24 : vector<8x128xf32>
      %c2_2000 = arith.constant 2 : index
      %c18_2001 = arith.constant 18 : index
      %c0_2002 = arith.constant 0 : index
      %c0_2003 = arith.constant 0 : index
      %2074 = vector.load %arg1[%c2_2000, %c18_2001, %c0_2002, %c0_2003] : memref<5x28x8x128xf32, #tpu.memory_space<vmem>>, vector<1x1x8x128xf32>
      %2075 = vector.shape_cast %2074 : vector<1x1x8x128xf32> to vector<8x128xf32>
      %2076 = arith.mulf %2075, %29 : vector<8x128xf32>
      %2077 = arith.addf %2073, %2076 : vector<8x128xf32>
      %c3_2004 = arith.constant 3 : index
      %c18_2005 = arith.constant 18 : index
      %c0_2006 = arith.constant 0 : index
      %c0_2007 = arith.constant 0 : index
      %2078 = vector.load %arg1[%c3_2004, %c18_2005, %c0_2006, %c0_2007] : memref<5x28x8x128xf32, #tpu.memory_space<vmem>>, vector<1x1x8x128xf32>
      %2079 = vector.shape_cast %2078 : vector<1x1x8x128xf32> to vector<8x128xf32>
      %2080 = arith.mulf %2079, %34 : vector<8x128xf32>
      %2081 = arith.addf %2077, %2080 : vector<8x128xf32>
      %c1_2008 = arith.constant 1 : index
      %c19_2009 = arith.constant 19 : index
      %c0_2010 = arith.constant 0 : index
      %c0_2011 = arith.constant 0 : index
      %2082 = vector.load %arg1[%c1_2008, %c19_2009, %c0_2010, %c0_2011] : memref<5x28x8x128xf32, #tpu.memory_space<vmem>>, vector<1x1x8x128xf32>
      %2083 = vector.shape_cast %2082 : vector<1x1x8x128xf32> to vector<8x128xf32>
      %2084 = arith.mulf %2083, %39 : vector<8x128xf32>
      %2085 = arith.addf %2081, %2084 : vector<8x128xf32>
      %c2_2012 = arith.constant 2 : index
      %c19_2013 = arith.constant 19 : index
      %c0_2014 = arith.constant 0 : index
      %c0_2015 = arith.constant 0 : index
      %2086 = vector.load %arg1[%c2_2012, %c19_2013, %c0_2014, %c0_2015] : memref<5x28x8x128xf32, #tpu.memory_space<vmem>>, vector<1x1x8x128xf32>
      %2087 = vector.shape_cast %2086 : vector<1x1x8x128xf32> to vector<8x128xf32>
      %2088 = arith.mulf %2087, %44 : vector<8x128xf32>
      %2089 = arith.addf %2085, %2088 : vector<8x128xf32>
      %c3_2016 = arith.constant 3 : index
      %c19_2017 = arith.constant 19 : index
      %c0_2018 = arith.constant 0 : index
      %c0_2019 = arith.constant 0 : index
      %2090 = vector.load %arg1[%c3_2016, %c19_2017, %c0_2018, %c0_2019] : memref<5x28x8x128xf32, #tpu.memory_space<vmem>>, vector<1x1x8x128xf32>
      %2091 = vector.shape_cast %2090 : vector<1x1x8x128xf32> to vector<8x128xf32>
      %2092 = arith.mulf %2091, %49 : vector<8x128xf32>
      %2093 = arith.addf %2089, %2092 : vector<8x128xf32>
      %c1_2020 = arith.constant 1 : index
      %c20_2021 = arith.constant 20 : index
      %c0_2022 = arith.constant 0 : index
      %c0_2023 = arith.constant 0 : index
      %2094 = vector.load %arg1[%c1_2020, %c20_2021, %c0_2022, %c0_2023] : memref<5x28x8x128xf32, #tpu.memory_space<vmem>>, vector<1x1x8x128xf32>
      %2095 = vector.shape_cast %2094 : vector<1x1x8x128xf32> to vector<8x128xf32>
      %2096 = arith.mulf %2095, %54 : vector<8x128xf32>
      %2097 = arith.addf %2093, %2096 : vector<8x128xf32>
      %c2_2024 = arith.constant 2 : index
      %c20_2025 = arith.constant 20 : index
      %c0_2026 = arith.constant 0 : index
      %c0_2027 = arith.constant 0 : index
      %2098 = vector.load %arg1[%c2_2024, %c20_2025, %c0_2026, %c0_2027] : memref<5x28x8x128xf32, #tpu.memory_space<vmem>>, vector<1x1x8x128xf32>
      %2099 = vector.shape_cast %2098 : vector<1x1x8x128xf32> to vector<8x128xf32>
      %2100 = arith.mulf %2099, %59 : vector<8x128xf32>
      %2101 = arith.addf %2097, %2100 : vector<8x128xf32>
      %c3_2028 = arith.constant 3 : index
      %c20_2029 = arith.constant 20 : index
      %c0_2030 = arith.constant 0 : index
      %c0_2031 = arith.constant 0 : index
      %2102 = vector.load %arg1[%c3_2028, %c20_2029, %c0_2030, %c0_2031] : memref<5x28x8x128xf32, #tpu.memory_space<vmem>>, vector<1x1x8x128xf32>
      %2103 = vector.shape_cast %2102 : vector<1x1x8x128xf32> to vector<8x128xf32>
      %2104 = arith.mulf %2103, %64 : vector<8x128xf32>
      %2105 = arith.addf %2101, %2104 : vector<8x128xf32>
      %2106 = arith.maximumf %2070, %2105 : vector<8x128xf32>
      %c2_2032 = arith.constant 2 : index
      %c18_2033 = arith.constant 18 : index
      %c0_2034 = arith.constant 0 : index
      %c0_2035 = arith.constant 0 : index
      %2107 = vector.load %arg1[%c2_2032, %c18_2033, %c0_2034, %c0_2035] : memref<5x28x8x128xf32, #tpu.memory_space<vmem>>, vector<1x1x8x128xf32>
      %2108 = vector.shape_cast %2107 : vector<1x1x8x128xf32> to vector<8x128xf32>
      %2109 = arith.mulf %2108, %24 : vector<8x128xf32>
      %c3_2036 = arith.constant 3 : index
      %c18_2037 = arith.constant 18 : index
      %c0_2038 = arith.constant 0 : index
      %c0_2039 = arith.constant 0 : index
      %2110 = vector.load %arg1[%c3_2036, %c18_2037, %c0_2038, %c0_2039] : memref<5x28x8x128xf32, #tpu.memory_space<vmem>>, vector<1x1x8x128xf32>
      %2111 = vector.shape_cast %2110 : vector<1x1x8x128xf32> to vector<8x128xf32>
      %2112 = arith.mulf %2111, %29 : vector<8x128xf32>
      %2113 = arith.addf %2109, %2112 : vector<8x128xf32>
      %c4_2040 = arith.constant 4 : index
      %c18_2041 = arith.constant 18 : index
      %c0_2042 = arith.constant 0 : index
      %c0_2043 = arith.constant 0 : index
      %2114 = vector.load %arg1[%c4_2040, %c18_2041, %c0_2042, %c0_2043] : memref<5x28x8x128xf32, #tpu.memory_space<vmem>>, vector<1x1x8x128xf32>
      %2115 = vector.shape_cast %2114 : vector<1x1x8x128xf32> to vector<8x128xf32>
      %2116 = arith.mulf %2115, %34 : vector<8x128xf32>
      %2117 = arith.addf %2113, %2116 : vector<8x128xf32>
      %c2_2044 = arith.constant 2 : index
      %c19_2045 = arith.constant 19 : index
      %c0_2046 = arith.constant 0 : index
      %c0_2047 = arith.constant 0 : index
      %2118 = vector.load %arg1[%c2_2044, %c19_2045, %c0_2046, %c0_2047] : memref<5x28x8x128xf32, #tpu.memory_space<vmem>>, vector<1x1x8x128xf32>
      %2119 = vector.shape_cast %2118 : vector<1x1x8x128xf32> to vector<8x128xf32>
      %2120 = arith.mulf %2119, %39 : vector<8x128xf32>
      %2121 = arith.addf %2117, %2120 : vector<8x128xf32>
      %c3_2048 = arith.constant 3 : index
      %c19_2049 = arith.constant 19 : index
      %c0_2050 = arith.constant 0 : index
      %c0_2051 = arith.constant 0 : index
      %2122 = vector.load %arg1[%c3_2048, %c19_2049, %c0_2050, %c0_2051] : memref<5x28x8x128xf32, #tpu.memory_space<vmem>>, vector<1x1x8x128xf32>
      %2123 = vector.shape_cast %2122 : vector<1x1x8x128xf32> to vector<8x128xf32>
      %2124 = arith.mulf %2123, %44 : vector<8x128xf32>
      %2125 = arith.addf %2121, %2124 : vector<8x128xf32>
      %c4_2052 = arith.constant 4 : index
      %c19_2053 = arith.constant 19 : index
      %c0_2054 = arith.constant 0 : index
      %c0_2055 = arith.constant 0 : index
      %2126 = vector.load %arg1[%c4_2052, %c19_2053, %c0_2054, %c0_2055] : memref<5x28x8x128xf32, #tpu.memory_space<vmem>>, vector<1x1x8x128xf32>
      %2127 = vector.shape_cast %2126 : vector<1x1x8x128xf32> to vector<8x128xf32>
      %2128 = arith.mulf %2127, %49 : vector<8x128xf32>
      %2129 = arith.addf %2125, %2128 : vector<8x128xf32>
      %c2_2056 = arith.constant 2 : index
      %c20_2057 = arith.constant 20 : index
      %c0_2058 = arith.constant 0 : index
      %c0_2059 = arith.constant 0 : index
      %2130 = vector.load %arg1[%c2_2056, %c20_2057, %c0_2058, %c0_2059] : memref<5x28x8x128xf32, #tpu.memory_space<vmem>>, vector<1x1x8x128xf32>
      %2131 = vector.shape_cast %2130 : vector<1x1x8x128xf32> to vector<8x128xf32>
      %2132 = arith.mulf %2131, %54 : vector<8x128xf32>
      %2133 = arith.addf %2129, %2132 : vector<8x128xf32>
      %c3_2060 = arith.constant 3 : index
      %c20_2061 = arith.constant 20 : index
      %c0_2062 = arith.constant 0 : index
      %c0_2063 = arith.constant 0 : index
      %2134 = vector.load %arg1[%c3_2060, %c20_2061, %c0_2062, %c0_2063] : memref<5x28x8x128xf32, #tpu.memory_space<vmem>>, vector<1x1x8x128xf32>
      %2135 = vector.shape_cast %2134 : vector<1x1x8x128xf32> to vector<8x128xf32>
      %2136 = arith.mulf %2135, %59 : vector<8x128xf32>
      %2137 = arith.addf %2133, %2136 : vector<8x128xf32>
      %c4_2064 = arith.constant 4 : index
      %c20_2065 = arith.constant 20 : index
      %c0_2066 = arith.constant 0 : index
      %c0_2067 = arith.constant 0 : index
      %2138 = vector.load %arg1[%c4_2064, %c20_2065, %c0_2066, %c0_2067] : memref<5x28x8x128xf32, #tpu.memory_space<vmem>>, vector<1x1x8x128xf32>
      %2139 = vector.shape_cast %2138 : vector<1x1x8x128xf32> to vector<8x128xf32>
      %2140 = arith.mulf %2139, %64 : vector<8x128xf32>
      %2141 = arith.addf %2137, %2140 : vector<8x128xf32>
      %2142 = arith.maximumf %2106, %2141 : vector<8x128xf32>
      %c0_2068 = arith.constant 0 : index
      %c19_2069 = arith.constant 19 : index
      %c0_2070 = arith.constant 0 : index
      %c0_2071 = arith.constant 0 : index
      %2143 = vector.load %arg1[%c0_2068, %c19_2069, %c0_2070, %c0_2071] : memref<5x28x8x128xf32, #tpu.memory_space<vmem>>, vector<1x1x8x128xf32>
      %2144 = vector.shape_cast %2143 : vector<1x1x8x128xf32> to vector<8x128xf32>
      %2145 = arith.mulf %2144, %24 : vector<8x128xf32>
      %c1_2072 = arith.constant 1 : index
      %c19_2073 = arith.constant 19 : index
      %c0_2074 = arith.constant 0 : index
      %c0_2075 = arith.constant 0 : index
      %2146 = vector.load %arg1[%c1_2072, %c19_2073, %c0_2074, %c0_2075] : memref<5x28x8x128xf32, #tpu.memory_space<vmem>>, vector<1x1x8x128xf32>
      %2147 = vector.shape_cast %2146 : vector<1x1x8x128xf32> to vector<8x128xf32>
      %2148 = arith.mulf %2147, %29 : vector<8x128xf32>
      %2149 = arith.addf %2145, %2148 : vector<8x128xf32>
      %c2_2076 = arith.constant 2 : index
      %c19_2077 = arith.constant 19 : index
      %c0_2078 = arith.constant 0 : index
      %c0_2079 = arith.constant 0 : index
      %2150 = vector.load %arg1[%c2_2076, %c19_2077, %c0_2078, %c0_2079] : memref<5x28x8x128xf32, #tpu.memory_space<vmem>>, vector<1x1x8x128xf32>
      %2151 = vector.shape_cast %2150 : vector<1x1x8x128xf32> to vector<8x128xf32>
      %2152 = arith.mulf %2151, %34 : vector<8x128xf32>
      %2153 = arith.addf %2149, %2152 : vector<8x128xf32>
      %c0_2080 = arith.constant 0 : index
      %c20_2081 = arith.constant 20 : index
      %c0_2082 = arith.constant 0 : index
      %c0_2083 = arith.constant 0 : index
      %2154 = vector.load %arg1[%c0_2080, %c20_2081, %c0_2082, %c0_2083] : memref<5x28x8x128xf32, #tpu.memory_space<vmem>>, vector<1x1x8x128xf32>
      %2155 = vector.shape_cast %2154 : vector<1x1x8x128xf32> to vector<8x128xf32>
      %2156 = arith.mulf %2155, %39 : vector<8x128xf32>
      %2157 = arith.addf %2153, %2156 : vector<8x128xf32>
      %c1_2084 = arith.constant 1 : index
      %c20_2085 = arith.constant 20 : index
      %c0_2086 = arith.constant 0 : index
      %c0_2087 = arith.constant 0 : index
      %2158 = vector.load %arg1[%c1_2084, %c20_2085, %c0_2086, %c0_2087] : memref<5x28x8x128xf32, #tpu.memory_space<vmem>>, vector<1x1x8x128xf32>
      %2159 = vector.shape_cast %2158 : vector<1x1x8x128xf32> to vector<8x128xf32>
      %2160 = arith.mulf %2159, %44 : vector<8x128xf32>
      %2161 = arith.addf %2157, %2160 : vector<8x128xf32>
      %c2_2088 = arith.constant 2 : index
      %c20_2089 = arith.constant 20 : index
      %c0_2090 = arith.constant 0 : index
      %c0_2091 = arith.constant 0 : index
      %2162 = vector.load %arg1[%c2_2088, %c20_2089, %c0_2090, %c0_2091] : memref<5x28x8x128xf32, #tpu.memory_space<vmem>>, vector<1x1x8x128xf32>
      %2163 = vector.shape_cast %2162 : vector<1x1x8x128xf32> to vector<8x128xf32>
      %2164 = arith.mulf %2163, %49 : vector<8x128xf32>
      %2165 = arith.addf %2161, %2164 : vector<8x128xf32>
      %c0_2092 = arith.constant 0 : index
      %c21 = arith.constant 21 : index
      %c0_2093 = arith.constant 0 : index
      %c0_2094 = arith.constant 0 : index
      %2166 = vector.load %arg1[%c0_2092, %c21, %c0_2093, %c0_2094] : memref<5x28x8x128xf32, #tpu.memory_space<vmem>>, vector<1x1x8x128xf32>
      %2167 = vector.shape_cast %2166 : vector<1x1x8x128xf32> to vector<8x128xf32>
      %2168 = arith.mulf %2167, %54 : vector<8x128xf32>
      %2169 = arith.addf %2165, %2168 : vector<8x128xf32>
      %c1_2095 = arith.constant 1 : index
      %c21_2096 = arith.constant 21 : index
      %c0_2097 = arith.constant 0 : index
      %c0_2098 = arith.constant 0 : index
      %2170 = vector.load %arg1[%c1_2095, %c21_2096, %c0_2097, %c0_2098] : memref<5x28x8x128xf32, #tpu.memory_space<vmem>>, vector<1x1x8x128xf32>
      %2171 = vector.shape_cast %2170 : vector<1x1x8x128xf32> to vector<8x128xf32>
      %2172 = arith.mulf %2171, %59 : vector<8x128xf32>
      %2173 = arith.addf %2169, %2172 : vector<8x128xf32>
      %c2_2099 = arith.constant 2 : index
      %c21_2100 = arith.constant 21 : index
      %c0_2101 = arith.constant 0 : index
      %c0_2102 = arith.constant 0 : index
      %2174 = vector.load %arg1[%c2_2099, %c21_2100, %c0_2101, %c0_2102] : memref<5x28x8x128xf32, #tpu.memory_space<vmem>>, vector<1x1x8x128xf32>
      %2175 = vector.shape_cast %2174 : vector<1x1x8x128xf32> to vector<8x128xf32>
      %2176 = arith.mulf %2175, %64 : vector<8x128xf32>
      %2177 = arith.addf %2173, %2176 : vector<8x128xf32>
      %2178 = arith.maximumf %2142, %2177 : vector<8x128xf32>
      %c1_2103 = arith.constant 1 : index
      %c19_2104 = arith.constant 19 : index
      %c0_2105 = arith.constant 0 : index
      %c0_2106 = arith.constant 0 : index
      %2179 = vector.load %arg1[%c1_2103, %c19_2104, %c0_2105, %c0_2106] : memref<5x28x8x128xf32, #tpu.memory_space<vmem>>, vector<1x1x8x128xf32>
      %2180 = vector.shape_cast %2179 : vector<1x1x8x128xf32> to vector<8x128xf32>
      %2181 = arith.mulf %2180, %24 : vector<8x128xf32>
      %c2_2107 = arith.constant 2 : index
      %c19_2108 = arith.constant 19 : index
      %c0_2109 = arith.constant 0 : index
      %c0_2110 = arith.constant 0 : index
      %2182 = vector.load %arg1[%c2_2107, %c19_2108, %c0_2109, %c0_2110] : memref<5x28x8x128xf32, #tpu.memory_space<vmem>>, vector<1x1x8x128xf32>
      %2183 = vector.shape_cast %2182 : vector<1x1x8x128xf32> to vector<8x128xf32>
      %2184 = arith.mulf %2183, %29 : vector<8x128xf32>
      %2185 = arith.addf %2181, %2184 : vector<8x128xf32>
      %c3_2111 = arith.constant 3 : index
      %c19_2112 = arith.constant 19 : index
      %c0_2113 = arith.constant 0 : index
      %c0_2114 = arith.constant 0 : index
      %2186 = vector.load %arg1[%c3_2111, %c19_2112, %c0_2113, %c0_2114] : memref<5x28x8x128xf32, #tpu.memory_space<vmem>>, vector<1x1x8x128xf32>
      %2187 = vector.shape_cast %2186 : vector<1x1x8x128xf32> to vector<8x128xf32>
      %2188 = arith.mulf %2187, %34 : vector<8x128xf32>
      %2189 = arith.addf %2185, %2188 : vector<8x128xf32>
      %c1_2115 = arith.constant 1 : index
      %c20_2116 = arith.constant 20 : index
      %c0_2117 = arith.constant 0 : index
      %c0_2118 = arith.constant 0 : index
      %2190 = vector.load %arg1[%c1_2115, %c20_2116, %c0_2117, %c0_2118] : memref<5x28x8x128xf32, #tpu.memory_space<vmem>>, vector<1x1x8x128xf32>
      %2191 = vector.shape_cast %2190 : vector<1x1x8x128xf32> to vector<8x128xf32>
      %2192 = arith.mulf %2191, %39 : vector<8x128xf32>
      %2193 = arith.addf %2189, %2192 : vector<8x128xf32>
      %c2_2119 = arith.constant 2 : index
      %c20_2120 = arith.constant 20 : index
      %c0_2121 = arith.constant 0 : index
      %c0_2122 = arith.constant 0 : index
      %2194 = vector.load %arg1[%c2_2119, %c20_2120, %c0_2121, %c0_2122] : memref<5x28x8x128xf32, #tpu.memory_space<vmem>>, vector<1x1x8x128xf32>
      %2195 = vector.shape_cast %2194 : vector<1x1x8x128xf32> to vector<8x128xf32>
      %2196 = arith.mulf %2195, %44 : vector<8x128xf32>
      %2197 = arith.addf %2193, %2196 : vector<8x128xf32>
      %c3_2123 = arith.constant 3 : index
      %c20_2124 = arith.constant 20 : index
      %c0_2125 = arith.constant 0 : index
      %c0_2126 = arith.constant 0 : index
      %2198 = vector.load %arg1[%c3_2123, %c20_2124, %c0_2125, %c0_2126] : memref<5x28x8x128xf32, #tpu.memory_space<vmem>>, vector<1x1x8x128xf32>
      %2199 = vector.shape_cast %2198 : vector<1x1x8x128xf32> to vector<8x128xf32>
      %2200 = arith.mulf %2199, %49 : vector<8x128xf32>
      %2201 = arith.addf %2197, %2200 : vector<8x128xf32>
      %c1_2127 = arith.constant 1 : index
      %c21_2128 = arith.constant 21 : index
      %c0_2129 = arith.constant 0 : index
      %c0_2130 = arith.constant 0 : index
      %2202 = vector.load %arg1[%c1_2127, %c21_2128, %c0_2129, %c0_2130] : memref<5x28x8x128xf32, #tpu.memory_space<vmem>>, vector<1x1x8x128xf32>
      %2203 = vector.shape_cast %2202 : vector<1x1x8x128xf32> to vector<8x128xf32>
      %2204 = arith.mulf %2203, %54 : vector<8x128xf32>
      %2205 = arith.addf %2201, %2204 : vector<8x128xf32>
      %c2_2131 = arith.constant 2 : index
      %c21_2132 = arith.constant 21 : index
      %c0_2133 = arith.constant 0 : index
      %c0_2134 = arith.constant 0 : index
      %2206 = vector.load %arg1[%c2_2131, %c21_2132, %c0_2133, %c0_2134] : memref<5x28x8x128xf32, #tpu.memory_space<vmem>>, vector<1x1x8x128xf32>
      %2207 = vector.shape_cast %2206 : vector<1x1x8x128xf32> to vector<8x128xf32>
      %2208 = arith.mulf %2207, %59 : vector<8x128xf32>
      %2209 = arith.addf %2205, %2208 : vector<8x128xf32>
      %c3_2135 = arith.constant 3 : index
      %c21_2136 = arith.constant 21 : index
      %c0_2137 = arith.constant 0 : index
      %c0_2138 = arith.constant 0 : index
      %2210 = vector.load %arg1[%c3_2135, %c21_2136, %c0_2137, %c0_2138] : memref<5x28x8x128xf32, #tpu.memory_space<vmem>>, vector<1x1x8x128xf32>
      %2211 = vector.shape_cast %2210 : vector<1x1x8x128xf32> to vector<8x128xf32>
      %2212 = arith.mulf %2211, %64 : vector<8x128xf32>
      %2213 = arith.addf %2209, %2212 : vector<8x128xf32>
      %2214 = arith.maximumf %2178, %2213 : vector<8x128xf32>
      %c2_2139 = arith.constant 2 : index
      %c19_2140 = arith.constant 19 : index
      %c0_2141 = arith.constant 0 : index
      %c0_2142 = arith.constant 0 : index
      %2215 = vector.load %arg1[%c2_2139, %c19_2140, %c0_2141, %c0_2142] : memref<5x28x8x128xf32, #tpu.memory_space<vmem>>, vector<1x1x8x128xf32>
      %2216 = vector.shape_cast %2215 : vector<1x1x8x128xf32> to vector<8x128xf32>
      %2217 = arith.mulf %2216, %24 : vector<8x128xf32>
      %c3_2143 = arith.constant 3 : index
      %c19_2144 = arith.constant 19 : index
      %c0_2145 = arith.constant 0 : index
      %c0_2146 = arith.constant 0 : index
      %2218 = vector.load %arg1[%c3_2143, %c19_2144, %c0_2145, %c0_2146] : memref<5x28x8x128xf32, #tpu.memory_space<vmem>>, vector<1x1x8x128xf32>
      %2219 = vector.shape_cast %2218 : vector<1x1x8x128xf32> to vector<8x128xf32>
      %2220 = arith.mulf %2219, %29 : vector<8x128xf32>
      %2221 = arith.addf %2217, %2220 : vector<8x128xf32>
      %c4_2147 = arith.constant 4 : index
      %c19_2148 = arith.constant 19 : index
      %c0_2149 = arith.constant 0 : index
      %c0_2150 = arith.constant 0 : index
      %2222 = vector.load %arg1[%c4_2147, %c19_2148, %c0_2149, %c0_2150] : memref<5x28x8x128xf32, #tpu.memory_space<vmem>>, vector<1x1x8x128xf32>
      %2223 = vector.shape_cast %2222 : vector<1x1x8x128xf32> to vector<8x128xf32>
      %2224 = arith.mulf %2223, %34 : vector<8x128xf32>
      %2225 = arith.addf %2221, %2224 : vector<8x128xf32>
      %c2_2151 = arith.constant 2 : index
      %c20_2152 = arith.constant 20 : index
      %c0_2153 = arith.constant 0 : index
      %c0_2154 = arith.constant 0 : index
      %2226 = vector.load %arg1[%c2_2151, %c20_2152, %c0_2153, %c0_2154] : memref<5x28x8x128xf32, #tpu.memory_space<vmem>>, vector<1x1x8x128xf32>
      %2227 = vector.shape_cast %2226 : vector<1x1x8x128xf32> to vector<8x128xf32>
      %2228 = arith.mulf %2227, %39 : vector<8x128xf32>
      %2229 = arith.addf %2225, %2228 : vector<8x128xf32>
      %c3_2155 = arith.constant 3 : index
      %c20_2156 = arith.constant 20 : index
      %c0_2157 = arith.constant 0 : index
      %c0_2158 = arith.constant 0 : index
      %2230 = vector.load %arg1[%c3_2155, %c20_2156, %c0_2157, %c0_2158] : memref<5x28x8x128xf32, #tpu.memory_space<vmem>>, vector<1x1x8x128xf32>
      %2231 = vector.shape_cast %2230 : vector<1x1x8x128xf32> to vector<8x128xf32>
      %2232 = arith.mulf %2231, %44 : vector<8x128xf32>
      %2233 = arith.addf %2229, %2232 : vector<8x128xf32>
      %c4_2159 = arith.constant 4 : index
      %c20_2160 = arith.constant 20 : index
      %c0_2161 = arith.constant 0 : index
      %c0_2162 = arith.constant 0 : index
      %2234 = vector.load %arg1[%c4_2159, %c20_2160, %c0_2161, %c0_2162] : memref<5x28x8x128xf32, #tpu.memory_space<vmem>>, vector<1x1x8x128xf32>
      %2235 = vector.shape_cast %2234 : vector<1x1x8x128xf32> to vector<8x128xf32>
      %2236 = arith.mulf %2235, %49 : vector<8x128xf32>
      %2237 = arith.addf %2233, %2236 : vector<8x128xf32>
      %c2_2163 = arith.constant 2 : index
      %c21_2164 = arith.constant 21 : index
      %c0_2165 = arith.constant 0 : index
      %c0_2166 = arith.constant 0 : index
      %2238 = vector.load %arg1[%c2_2163, %c21_2164, %c0_2165, %c0_2166] : memref<5x28x8x128xf32, #tpu.memory_space<vmem>>, vector<1x1x8x128xf32>
      %2239 = vector.shape_cast %2238 : vector<1x1x8x128xf32> to vector<8x128xf32>
      %2240 = arith.mulf %2239, %54 : vector<8x128xf32>
      %2241 = arith.addf %2237, %2240 : vector<8x128xf32>
      %c3_2167 = arith.constant 3 : index
      %c21_2168 = arith.constant 21 : index
      %c0_2169 = arith.constant 0 : index
      %c0_2170 = arith.constant 0 : index
      %2242 = vector.load %arg1[%c3_2167, %c21_2168, %c0_2169, %c0_2170] : memref<5x28x8x128xf32, #tpu.memory_space<vmem>>, vector<1x1x8x128xf32>
      %2243 = vector.shape_cast %2242 : vector<1x1x8x128xf32> to vector<8x128xf32>
      %2244 = arith.mulf %2243, %59 : vector<8x128xf32>
      %2245 = arith.addf %2241, %2244 : vector<8x128xf32>
      %c4_2171 = arith.constant 4 : index
      %c21_2172 = arith.constant 21 : index
      %c0_2173 = arith.constant 0 : index
      %c0_2174 = arith.constant 0 : index
      %2246 = vector.load %arg1[%c4_2171, %c21_2172, %c0_2173, %c0_2174] : memref<5x28x8x128xf32, #tpu.memory_space<vmem>>, vector<1x1x8x128xf32>
      %2247 = vector.shape_cast %2246 : vector<1x1x8x128xf32> to vector<8x128xf32>
      %2248 = arith.mulf %2247, %64 : vector<8x128xf32>
      %2249 = arith.addf %2245, %2248 : vector<8x128xf32>
      %2250 = arith.maximumf %2214, %2249 : vector<8x128xf32>
      %c0_2175 = arith.constant 0 : index
      %c20_2176 = arith.constant 20 : index
      %c0_2177 = arith.constant 0 : index
      %c0_2178 = arith.constant 0 : index
      %2251 = vector.load %arg1[%c0_2175, %c20_2176, %c0_2177, %c0_2178] : memref<5x28x8x128xf32, #tpu.memory_space<vmem>>, vector<1x1x8x128xf32>
      %2252 = vector.shape_cast %2251 : vector<1x1x8x128xf32> to vector<8x128xf32>
      %2253 = arith.mulf %2252, %24 : vector<8x128xf32>
      %c1_2179 = arith.constant 1 : index
      %c20_2180 = arith.constant 20 : index
      %c0_2181 = arith.constant 0 : index
      %c0_2182 = arith.constant 0 : index
      %2254 = vector.load %arg1[%c1_2179, %c20_2180, %c0_2181, %c0_2182] : memref<5x28x8x128xf32, #tpu.memory_space<vmem>>, vector<1x1x8x128xf32>
      %2255 = vector.shape_cast %2254 : vector<1x1x8x128xf32> to vector<8x128xf32>
      %2256 = arith.mulf %2255, %29 : vector<8x128xf32>
      %2257 = arith.addf %2253, %2256 : vector<8x128xf32>
      %c2_2183 = arith.constant 2 : index
      %c20_2184 = arith.constant 20 : index
      %c0_2185 = arith.constant 0 : index
      %c0_2186 = arith.constant 0 : index
      %2258 = vector.load %arg1[%c2_2183, %c20_2184, %c0_2185, %c0_2186] : memref<5x28x8x128xf32, #tpu.memory_space<vmem>>, vector<1x1x8x128xf32>
      %2259 = vector.shape_cast %2258 : vector<1x1x8x128xf32> to vector<8x128xf32>
      %2260 = arith.mulf %2259, %34 : vector<8x128xf32>
      %2261 = arith.addf %2257, %2260 : vector<8x128xf32>
      %c0_2187 = arith.constant 0 : index
      %c21_2188 = arith.constant 21 : index
      %c0_2189 = arith.constant 0 : index
      %c0_2190 = arith.constant 0 : index
      %2262 = vector.load %arg1[%c0_2187, %c21_2188, %c0_2189, %c0_2190] : memref<5x28x8x128xf32, #tpu.memory_space<vmem>>, vector<1x1x8x128xf32>
      %2263 = vector.shape_cast %2262 : vector<1x1x8x128xf32> to vector<8x128xf32>
      %2264 = arith.mulf %2263, %39 : vector<8x128xf32>
      %2265 = arith.addf %2261, %2264 : vector<8x128xf32>
      %c1_2191 = arith.constant 1 : index
      %c21_2192 = arith.constant 21 : index
      %c0_2193 = arith.constant 0 : index
      %c0_2194 = arith.constant 0 : index
      %2266 = vector.load %arg1[%c1_2191, %c21_2192, %c0_2193, %c0_2194] : memref<5x28x8x128xf32, #tpu.memory_space<vmem>>, vector<1x1x8x128xf32>
      %2267 = vector.shape_cast %2266 : vector<1x1x8x128xf32> to vector<8x128xf32>
      %2268 = arith.mulf %2267, %44 : vector<8x128xf32>
      %2269 = arith.addf %2265, %2268 : vector<8x128xf32>
      %c2_2195 = arith.constant 2 : index
      %c21_2196 = arith.constant 21 : index
      %c0_2197 = arith.constant 0 : index
      %c0_2198 = arith.constant 0 : index
      %2270 = vector.load %arg1[%c2_2195, %c21_2196, %c0_2197, %c0_2198] : memref<5x28x8x128xf32, #tpu.memory_space<vmem>>, vector<1x1x8x128xf32>
      %2271 = vector.shape_cast %2270 : vector<1x1x8x128xf32> to vector<8x128xf32>
      %2272 = arith.mulf %2271, %49 : vector<8x128xf32>
      %2273 = arith.addf %2269, %2272 : vector<8x128xf32>
      %c0_2199 = arith.constant 0 : index
      %c22 = arith.constant 22 : index
      %c0_2200 = arith.constant 0 : index
      %c0_2201 = arith.constant 0 : index
      %2274 = vector.load %arg1[%c0_2199, %c22, %c0_2200, %c0_2201] : memref<5x28x8x128xf32, #tpu.memory_space<vmem>>, vector<1x1x8x128xf32>
      %2275 = vector.shape_cast %2274 : vector<1x1x8x128xf32> to vector<8x128xf32>
      %2276 = arith.mulf %2275, %54 : vector<8x128xf32>
      %2277 = arith.addf %2273, %2276 : vector<8x128xf32>
      %c1_2202 = arith.constant 1 : index
      %c22_2203 = arith.constant 22 : index
      %c0_2204 = arith.constant 0 : index
      %c0_2205 = arith.constant 0 : index
      %2278 = vector.load %arg1[%c1_2202, %c22_2203, %c0_2204, %c0_2205] : memref<5x28x8x128xf32, #tpu.memory_space<vmem>>, vector<1x1x8x128xf32>
      %2279 = vector.shape_cast %2278 : vector<1x1x8x128xf32> to vector<8x128xf32>
      %2280 = arith.mulf %2279, %59 : vector<8x128xf32>
      %2281 = arith.addf %2277, %2280 : vector<8x128xf32>
      %c2_2206 = arith.constant 2 : index
      %c22_2207 = arith.constant 22 : index
      %c0_2208 = arith.constant 0 : index
      %c0_2209 = arith.constant 0 : index
      %2282 = vector.load %arg1[%c2_2206, %c22_2207, %c0_2208, %c0_2209] : memref<5x28x8x128xf32, #tpu.memory_space<vmem>>, vector<1x1x8x128xf32>
      %2283 = vector.shape_cast %2282 : vector<1x1x8x128xf32> to vector<8x128xf32>
      %2284 = arith.mulf %2283, %64 : vector<8x128xf32>
      %2285 = arith.addf %2281, %2284 : vector<8x128xf32>
      %2286 = arith.maximumf %2250, %2285 : vector<8x128xf32>
      %c1_2210 = arith.constant 1 : index
      %c20_2211 = arith.constant 20 : index
      %c0_2212 = arith.constant 0 : index
      %c0_2213 = arith.constant 0 : index
      %2287 = vector.load %arg1[%c1_2210, %c20_2211, %c0_2212, %c0_2213] : memref<5x28x8x128xf32, #tpu.memory_space<vmem>>, vector<1x1x8x128xf32>
      %2288 = vector.shape_cast %2287 : vector<1x1x8x128xf32> to vector<8x128xf32>
      %2289 = arith.mulf %2288, %24 : vector<8x128xf32>
      %c2_2214 = arith.constant 2 : index
      %c20_2215 = arith.constant 20 : index
      %c0_2216 = arith.constant 0 : index
      %c0_2217 = arith.constant 0 : index
      %2290 = vector.load %arg1[%c2_2214, %c20_2215, %c0_2216, %c0_2217] : memref<5x28x8x128xf32, #tpu.memory_space<vmem>>, vector<1x1x8x128xf32>
      %2291 = vector.shape_cast %2290 : vector<1x1x8x128xf32> to vector<8x128xf32>
      %2292 = arith.mulf %2291, %29 : vector<8x128xf32>
      %2293 = arith.addf %2289, %2292 : vector<8x128xf32>
      %c3_2218 = arith.constant 3 : index
      %c20_2219 = arith.constant 20 : index
      %c0_2220 = arith.constant 0 : index
      %c0_2221 = arith.constant 0 : index
      %2294 = vector.load %arg1[%c3_2218, %c20_2219, %c0_2220, %c0_2221] : memref<5x28x8x128xf32, #tpu.memory_space<vmem>>, vector<1x1x8x128xf32>
      %2295 = vector.shape_cast %2294 : vector<1x1x8x128xf32> to vector<8x128xf32>
      %2296 = arith.mulf %2295, %34 : vector<8x128xf32>
      %2297 = arith.addf %2293, %2296 : vector<8x128xf32>
      %c1_2222 = arith.constant 1 : index
      %c21_2223 = arith.constant 21 : index
      %c0_2224 = arith.constant 0 : index
      %c0_2225 = arith.constant 0 : index
      %2298 = vector.load %arg1[%c1_2222, %c21_2223, %c0_2224, %c0_2225] : memref<5x28x8x128xf32, #tpu.memory_space<vmem>>, vector<1x1x8x128xf32>
      %2299 = vector.shape_cast %2298 : vector<1x1x8x128xf32> to vector<8x128xf32>
      %2300 = arith.mulf %2299, %39 : vector<8x128xf32>
      %2301 = arith.addf %2297, %2300 : vector<8x128xf32>
      %c2_2226 = arith.constant 2 : index
      %c21_2227 = arith.constant 21 : index
      %c0_2228 = arith.constant 0 : index
      %c0_2229 = arith.constant 0 : index
      %2302 = vector.load %arg1[%c2_2226, %c21_2227, %c0_2228, %c0_2229] : memref<5x28x8x128xf32, #tpu.memory_space<vmem>>, vector<1x1x8x128xf32>
      %2303 = vector.shape_cast %2302 : vector<1x1x8x128xf32> to vector<8x128xf32>
      %2304 = arith.mulf %2303, %44 : vector<8x128xf32>
      %2305 = arith.addf %2301, %2304 : vector<8x128xf32>
      %c3_2230 = arith.constant 3 : index
      %c21_2231 = arith.constant 21 : index
      %c0_2232 = arith.constant 0 : index
      %c0_2233 = arith.constant 0 : index
      %2306 = vector.load %arg1[%c3_2230, %c21_2231, %c0_2232, %c0_2233] : memref<5x28x8x128xf32, #tpu.memory_space<vmem>>, vector<1x1x8x128xf32>
      %2307 = vector.shape_cast %2306 : vector<1x1x8x128xf32> to vector<8x128xf32>
      %2308 = arith.mulf %2307, %49 : vector<8x128xf32>
      %2309 = arith.addf %2305, %2308 : vector<8x128xf32>
      %c1_2234 = arith.constant 1 : index
      %c22_2235 = arith.constant 22 : index
      %c0_2236 = arith.constant 0 : index
      %c0_2237 = arith.constant 0 : index
      %2310 = vector.load %arg1[%c1_2234, %c22_2235, %c0_2236, %c0_2237] : memref<5x28x8x128xf32, #tpu.memory_space<vmem>>, vector<1x1x8x128xf32>
      %2311 = vector.shape_cast %2310 : vector<1x1x8x128xf32> to vector<8x128xf32>
      %2312 = arith.mulf %2311, %54 : vector<8x128xf32>
      %2313 = arith.addf %2309, %2312 : vector<8x128xf32>
      %c2_2238 = arith.constant 2 : index
      %c22_2239 = arith.constant 22 : index
      %c0_2240 = arith.constant 0 : index
      %c0_2241 = arith.constant 0 : index
      %2314 = vector.load %arg1[%c2_2238, %c22_2239, %c0_2240, %c0_2241] : memref<5x28x8x128xf32, #tpu.memory_space<vmem>>, vector<1x1x8x128xf32>
      %2315 = vector.shape_cast %2314 : vector<1x1x8x128xf32> to vector<8x128xf32>
      %2316 = arith.mulf %2315, %59 : vector<8x128xf32>
      %2317 = arith.addf %2313, %2316 : vector<8x128xf32>
      %c3_2242 = arith.constant 3 : index
      %c22_2243 = arith.constant 22 : index
      %c0_2244 = arith.constant 0 : index
      %c0_2245 = arith.constant 0 : index
      %2318 = vector.load %arg1[%c3_2242, %c22_2243, %c0_2244, %c0_2245] : memref<5x28x8x128xf32, #tpu.memory_space<vmem>>, vector<1x1x8x128xf32>
      %2319 = vector.shape_cast %2318 : vector<1x1x8x128xf32> to vector<8x128xf32>
      %2320 = arith.mulf %2319, %64 : vector<8x128xf32>
      %2321 = arith.addf %2317, %2320 : vector<8x128xf32>
      %2322 = arith.maximumf %2286, %2321 : vector<8x128xf32>
      %c2_2246 = arith.constant 2 : index
      %c20_2247 = arith.constant 20 : index
      %c0_2248 = arith.constant 0 : index
      %c0_2249 = arith.constant 0 : index
      %2323 = vector.load %arg1[%c2_2246, %c20_2247, %c0_2248, %c0_2249] : memref<5x28x8x128xf32, #tpu.memory_space<vmem>>, vector<1x1x8x128xf32>
      %2324 = vector.shape_cast %2323 : vector<1x1x8x128xf32> to vector<8x128xf32>
      %2325 = arith.mulf %2324, %24 : vector<8x128xf32>
      %c3_2250 = arith.constant 3 : index
      %c20_2251 = arith.constant 20 : index
      %c0_2252 = arith.constant 0 : index
      %c0_2253 = arith.constant 0 : index
      %2326 = vector.load %arg1[%c3_2250, %c20_2251, %c0_2252, %c0_2253] : memref<5x28x8x128xf32, #tpu.memory_space<vmem>>, vector<1x1x8x128xf32>
      %2327 = vector.shape_cast %2326 : vector<1x1x8x128xf32> to vector<8x128xf32>
      %2328 = arith.mulf %2327, %29 : vector<8x128xf32>
      %2329 = arith.addf %2325, %2328 : vector<8x128xf32>
      %c4_2254 = arith.constant 4 : index
      %c20_2255 = arith.constant 20 : index
      %c0_2256 = arith.constant 0 : index
      %c0_2257 = arith.constant 0 : index
      %2330 = vector.load %arg1[%c4_2254, %c20_2255, %c0_2256, %c0_2257] : memref<5x28x8x128xf32, #tpu.memory_space<vmem>>, vector<1x1x8x128xf32>
      %2331 = vector.shape_cast %2330 : vector<1x1x8x128xf32> to vector<8x128xf32>
      %2332 = arith.mulf %2331, %34 : vector<8x128xf32>
      %2333 = arith.addf %2329, %2332 : vector<8x128xf32>
      %c2_2258 = arith.constant 2 : index
      %c21_2259 = arith.constant 21 : index
      %c0_2260 = arith.constant 0 : index
      %c0_2261 = arith.constant 0 : index
      %2334 = vector.load %arg1[%c2_2258, %c21_2259, %c0_2260, %c0_2261] : memref<5x28x8x128xf32, #tpu.memory_space<vmem>>, vector<1x1x8x128xf32>
      %2335 = vector.shape_cast %2334 : vector<1x1x8x128xf32> to vector<8x128xf32>
      %2336 = arith.mulf %2335, %39 : vector<8x128xf32>
      %2337 = arith.addf %2333, %2336 : vector<8x128xf32>
      %c3_2262 = arith.constant 3 : index
      %c21_2263 = arith.constant 21 : index
      %c0_2264 = arith.constant 0 : index
      %c0_2265 = arith.constant 0 : index
      %2338 = vector.load %arg1[%c3_2262, %c21_2263, %c0_2264, %c0_2265] : memref<5x28x8x128xf32, #tpu.memory_space<vmem>>, vector<1x1x8x128xf32>
      %2339 = vector.shape_cast %2338 : vector<1x1x8x128xf32> to vector<8x128xf32>
      %2340 = arith.mulf %2339, %44 : vector<8x128xf32>
      %2341 = arith.addf %2337, %2340 : vector<8x128xf32>
      %c4_2266 = arith.constant 4 : index
      %c21_2267 = arith.constant 21 : index
      %c0_2268 = arith.constant 0 : index
      %c0_2269 = arith.constant 0 : index
      %2342 = vector.load %arg1[%c4_2266, %c21_2267, %c0_2268, %c0_2269] : memref<5x28x8x128xf32, #tpu.memory_space<vmem>>, vector<1x1x8x128xf32>
      %2343 = vector.shape_cast %2342 : vector<1x1x8x128xf32> to vector<8x128xf32>
      %2344 = arith.mulf %2343, %49 : vector<8x128xf32>
      %2345 = arith.addf %2341, %2344 : vector<8x128xf32>
      %c2_2270 = arith.constant 2 : index
      %c22_2271 = arith.constant 22 : index
      %c0_2272 = arith.constant 0 : index
      %c0_2273 = arith.constant 0 : index
      %2346 = vector.load %arg1[%c2_2270, %c22_2271, %c0_2272, %c0_2273] : memref<5x28x8x128xf32, #tpu.memory_space<vmem>>, vector<1x1x8x128xf32>
      %2347 = vector.shape_cast %2346 : vector<1x1x8x128xf32> to vector<8x128xf32>
      %2348 = arith.mulf %2347, %54 : vector<8x128xf32>
      %2349 = arith.addf %2345, %2348 : vector<8x128xf32>
      %c3_2274 = arith.constant 3 : index
      %c22_2275 = arith.constant 22 : index
      %c0_2276 = arith.constant 0 : index
      %c0_2277 = arith.constant 0 : index
      %2350 = vector.load %arg1[%c3_2274, %c22_2275, %c0_2276, %c0_2277] : memref<5x28x8x128xf32, #tpu.memory_space<vmem>>, vector<1x1x8x128xf32>
      %2351 = vector.shape_cast %2350 : vector<1x1x8x128xf32> to vector<8x128xf32>
      %2352 = arith.mulf %2351, %59 : vector<8x128xf32>
      %2353 = arith.addf %2349, %2352 : vector<8x128xf32>
      %c4_2278 = arith.constant 4 : index
      %c22_2279 = arith.constant 22 : index
      %c0_2280 = arith.constant 0 : index
      %c0_2281 = arith.constant 0 : index
      %2354 = vector.load %arg1[%c4_2278, %c22_2279, %c0_2280, %c0_2281] : memref<5x28x8x128xf32, #tpu.memory_space<vmem>>, vector<1x1x8x128xf32>
      %2355 = vector.shape_cast %2354 : vector<1x1x8x128xf32> to vector<8x128xf32>
      %2356 = arith.mulf %2355, %64 : vector<8x128xf32>
      %2357 = arith.addf %2353, %2356 : vector<8x128xf32>
      %2358 = arith.maximumf %2322, %2357 : vector<8x128xf32>
      %2359 = arith.addf %2358, %67 : vector<8x128xf32>
      %2360 = arith.index_cast %19 : i32 to index
      %c48 = arith.constant 48 : index
      %c0_2282 = arith.constant 0 : index
      %2361 = vector.load %arg9[%2360, %c48, %c0_2282] : memref<10x64x128xf32, #tpu.memory_space<vmem>>, vector<1x8x128xf32>
      %2362 = vector.shape_cast %2361 : vector<1x8x128xf32> to vector<8x128xf32>
      %2363 = vector.shape_cast %2359 : vector<8x128xf32> to vector<1x8x128xf32>
      tpu.vector_store %arg9[%2360, %c48, %c0_2282], %2363 {strides = array<i32>} : memref<10x64x128xf32, #tpu.memory_space<vmem>>, vector<1x8x128xf32>,
      %c0_2283 = arith.constant 0 : index
      %c21_2284 = arith.constant 21 : index
      %c0_2285 = arith.constant 0 : index
      %c0_2286 = arith.constant 0 : index
      %2364 = vector.load %arg1[%c0_2283, %c21_2284, %c0_2285, %c0_2286] : memref<5x28x8x128xf32, #tpu.memory_space<vmem>>, vector<1x1x8x128xf32>
      %2365 = vector.shape_cast %2364 : vector<1x1x8x128xf32> to vector<8x128xf32>
      %2366 = arith.mulf %2365, %24 : vector<8x128xf32>
      %c1_2287 = arith.constant 1 : index
      %c21_2288 = arith.constant 21 : index
      %c0_2289 = arith.constant 0 : index
      %c0_2290 = arith.constant 0 : index
      %2367 = vector.load %arg1[%c1_2287, %c21_2288, %c0_2289, %c0_2290] : memref<5x28x8x128xf32, #tpu.memory_space<vmem>>, vector<1x1x8x128xf32>
      %2368 = vector.shape_cast %2367 : vector<1x1x8x128xf32> to vector<8x128xf32>
      %2369 = arith.mulf %2368, %29 : vector<8x128xf32>
      %2370 = arith.addf %2366, %2369 : vector<8x128xf32>
      %c2_2291 = arith.constant 2 : index
      %c21_2292 = arith.constant 21 : index
      %c0_2293 = arith.constant 0 : index
      %c0_2294 = arith.constant 0 : index
      %2371 = vector.load %arg1[%c2_2291, %c21_2292, %c0_2293, %c0_2294] : memref<5x28x8x128xf32, #tpu.memory_space<vmem>>, vector<1x1x8x128xf32>
      %2372 = vector.shape_cast %2371 : vector<1x1x8x128xf32> to vector<8x128xf32>
      %2373 = arith.mulf %2372, %34 : vector<8x128xf32>
      %2374 = arith.addf %2370, %2373 : vector<8x128xf32>
      %c0_2295 = arith.constant 0 : index
      %c22_2296 = arith.constant 22 : index
      %c0_2297 = arith.constant 0 : index
      %c0_2298 = arith.constant 0 : index
      %2375 = vector.load %arg1[%c0_2295, %c22_2296, %c0_2297, %c0_2298] : memref<5x28x8x128xf32, #tpu.memory_space<vmem>>, vector<1x1x8x128xf32>
      %2376 = vector.shape_cast %2375 : vector<1x1x8x128xf32> to vector<8x128xf32>
      %2377 = arith.mulf %2376, %39 : vector<8x128xf32>
      %2378 = arith.addf %2374, %2377 : vector<8x128xf32>
      %c1_2299 = arith.constant 1 : index
      %c22_2300 = arith.constant 22 : index
      %c0_2301 = arith.constant 0 : index
      %c0_2302 = arith.constant 0 : index
      %2379 = vector.load %arg1[%c1_2299, %c22_2300, %c0_2301, %c0_2302] : memref<5x28x8x128xf32, #tpu.memory_space<vmem>>, vector<1x1x8x128xf32>
      %2380 = vector.shape_cast %2379 : vector<1x1x8x128xf32> to vector<8x128xf32>
      %2381 = arith.mulf %2380, %44 : vector<8x128xf32>
      %2382 = arith.addf %2378, %2381 : vector<8x128xf32>
      %c2_2303 = arith.constant 2 : index
      %c22_2304 = arith.constant 22 : index
      %c0_2305 = arith.constant 0 : index
      %c0_2306 = arith.constant 0 : index
      %2383 = vector.load %arg1[%c2_2303, %c22_2304, %c0_2305, %c0_2306] : memref<5x28x8x128xf32, #tpu.memory_space<vmem>>, vector<1x1x8x128xf32>
      %2384 = vector.shape_cast %2383 : vector<1x1x8x128xf32> to vector<8x128xf32>
      %2385 = arith.mulf %2384, %49 : vector<8x128xf32>
      %2386 = arith.addf %2382, %2385 : vector<8x128xf32>
      %c0_2307 = arith.constant 0 : index
      %c23 = arith.constant 23 : index
      %c0_2308 = arith.constant 0 : index
      %c0_2309 = arith.constant 0 : index
      %2387 = vector.load %arg1[%c0_2307, %c23, %c0_2308, %c0_2309] : memref<5x28x8x128xf32, #tpu.memory_space<vmem>>, vector<1x1x8x128xf32>
      %2388 = vector.shape_cast %2387 : vector<1x1x8x128xf32> to vector<8x128xf32>
      %2389 = arith.mulf %2388, %54 : vector<8x128xf32>
      %2390 = arith.addf %2386, %2389 : vector<8x128xf32>
      %c1_2310 = arith.constant 1 : index
      %c23_2311 = arith.constant 23 : index
      %c0_2312 = arith.constant 0 : index
      %c0_2313 = arith.constant 0 : index
      %2391 = vector.load %arg1[%c1_2310, %c23_2311, %c0_2312, %c0_2313] : memref<5x28x8x128xf32, #tpu.memory_space<vmem>>, vector<1x1x8x128xf32>
      %2392 = vector.shape_cast %2391 : vector<1x1x8x128xf32> to vector<8x128xf32>
      %2393 = arith.mulf %2392, %59 : vector<8x128xf32>
      %2394 = arith.addf %2390, %2393 : vector<8x128xf32>
      %c2_2314 = arith.constant 2 : index
      %c23_2315 = arith.constant 23 : index
      %c0_2316 = arith.constant 0 : index
      %c0_2317 = arith.constant 0 : index
      %2395 = vector.load %arg1[%c2_2314, %c23_2315, %c0_2316, %c0_2317] : memref<5x28x8x128xf32, #tpu.memory_space<vmem>>, vector<1x1x8x128xf32>
      %2396 = vector.shape_cast %2395 : vector<1x1x8x128xf32> to vector<8x128xf32>
      %2397 = arith.mulf %2396, %64 : vector<8x128xf32>
      %2398 = arith.addf %2394, %2397 : vector<8x128xf32>
      %c1_2318 = arith.constant 1 : index
      %c21_2319 = arith.constant 21 : index
      %c0_2320 = arith.constant 0 : index
      %c0_2321 = arith.constant 0 : index
      %2399 = vector.load %arg1[%c1_2318, %c21_2319, %c0_2320, %c0_2321] : memref<5x28x8x128xf32, #tpu.memory_space<vmem>>, vector<1x1x8x128xf32>
      %2400 = vector.shape_cast %2399 : vector<1x1x8x128xf32> to vector<8x128xf32>
      %2401 = arith.mulf %2400, %24 : vector<8x128xf32>
      %c2_2322 = arith.constant 2 : index
      %c21_2323 = arith.constant 21 : index
      %c0_2324 = arith.constant 0 : index
      %c0_2325 = arith.constant 0 : index
      %2402 = vector.load %arg1[%c2_2322, %c21_2323, %c0_2324, %c0_2325] : memref<5x28x8x128xf32, #tpu.memory_space<vmem>>, vector<1x1x8x128xf32>
      %2403 = vector.shape_cast %2402 : vector<1x1x8x128xf32> to vector<8x128xf32>
      %2404 = arith.mulf %2403, %29 : vector<8x128xf32>
      %2405 = arith.addf %2401, %2404 : vector<8x128xf32>
      %c3_2326 = arith.constant 3 : index
      %c21_2327 = arith.constant 21 : index
      %c0_2328 = arith.constant 0 : index
      %c0_2329 = arith.constant 0 : index
      %2406 = vector.load %arg1[%c3_2326, %c21_2327, %c0_2328, %c0_2329] : memref<5x28x8x128xf32, #tpu.memory_space<vmem>>, vector<1x1x8x128xf32>
      %2407 = vector.shape_cast %2406 : vector<1x1x8x128xf32> to vector<8x128xf32>
      %2408 = arith.mulf %2407, %34 : vector<8x128xf32>
      %2409 = arith.addf %2405, %2408 : vector<8x128xf32>
      %c1_2330 = arith.constant 1 : index
      %c22_2331 = arith.constant 22 : index
      %c0_2332 = arith.constant 0 : index
      %c0_2333 = arith.constant 0 : index
      %2410 = vector.load %arg1[%c1_2330, %c22_2331, %c0_2332, %c0_2333] : memref<5x28x8x128xf32, #tpu.memory_space<vmem>>, vector<1x1x8x128xf32>
      %2411 = vector.shape_cast %2410 : vector<1x1x8x128xf32> to vector<8x128xf32>
      %2412 = arith.mulf %2411, %39 : vector<8x128xf32>
      %2413 = arith.addf %2409, %2412 : vector<8x128xf32>
      %c2_2334 = arith.constant 2 : index
      %c22_2335 = arith.constant 22 : index
      %c0_2336 = arith.constant 0 : index
      %c0_2337 = arith.constant 0 : index
      %2414 = vector.load %arg1[%c2_2334, %c22_2335, %c0_2336, %c0_2337] : memref<5x28x8x128xf32, #tpu.memory_space<vmem>>, vector<1x1x8x128xf32>
      %2415 = vector.shape_cast %2414 : vector<1x1x8x128xf32> to vector<8x128xf32>
      %2416 = arith.mulf %2415, %44 : vector<8x128xf32>
      %2417 = arith.addf %2413, %2416 : vector<8x128xf32>
      %c3_2338 = arith.constant 3 : index
      %c22_2339 = arith.constant 22 : index
      %c0_2340 = arith.constant 0 : index
      %c0_2341 = arith.constant 0 : index
      %2418 = vector.load %arg1[%c3_2338, %c22_2339, %c0_2340, %c0_2341] : memref<5x28x8x128xf32, #tpu.memory_space<vmem>>, vector<1x1x8x128xf32>
      %2419 = vector.shape_cast %2418 : vector<1x1x8x128xf32> to vector<8x128xf32>
      %2420 = arith.mulf %2419, %49 : vector<8x128xf32>
      %2421 = arith.addf %2417, %2420 : vector<8x128xf32>
      %c1_2342 = arith.constant 1 : index
      %c23_2343 = arith.constant 23 : index
      %c0_2344 = arith.constant 0 : index
      %c0_2345 = arith.constant 0 : index
      %2422 = vector.load %arg1[%c1_2342, %c23_2343, %c0_2344, %c0_2345] : memref<5x28x8x128xf32, #tpu.memory_space<vmem>>, vector<1x1x8x128xf32>
      %2423 = vector.shape_cast %2422 : vector<1x1x8x128xf32> to vector<8x128xf32>
      %2424 = arith.mulf %2423, %54 : vector<8x128xf32>
      %2425 = arith.addf %2421, %2424 : vector<8x128xf32>
      %c2_2346 = arith.constant 2 : index
      %c23_2347 = arith.constant 23 : index
      %c0_2348 = arith.constant 0 : index
      %c0_2349 = arith.constant 0 : index
      %2426 = vector.load %arg1[%c2_2346, %c23_2347, %c0_2348, %c0_2349] : memref<5x28x8x128xf32, #tpu.memory_space<vmem>>, vector<1x1x8x128xf32>
      %2427 = vector.shape_cast %2426 : vector<1x1x8x128xf32> to vector<8x128xf32>
      %2428 = arith.mulf %2427, %59 : vector<8x128xf32>
      %2429 = arith.addf %2425, %2428 : vector<8x128xf32>
      %c3_2350 = arith.constant 3 : index
      %c23_2351 = arith.constant 23 : index
      %c0_2352 = arith.constant 0 : index
      %c0_2353 = arith.constant 0 : index
      %2430 = vector.load %arg1[%c3_2350, %c23_2351, %c0_2352, %c0_2353] : memref<5x28x8x128xf32, #tpu.memory_space<vmem>>, vector<1x1x8x128xf32>
      %2431 = vector.shape_cast %2430 : vector<1x1x8x128xf32> to vector<8x128xf32>
      %2432 = arith.mulf %2431, %64 : vector<8x128xf32>
      %2433 = arith.addf %2429, %2432 : vector<8x128xf32>
      %2434 = arith.maximumf %2398, %2433 : vector<8x128xf32>
      %c2_2354 = arith.constant 2 : index
      %c21_2355 = arith.constant 21 : index
      %c0_2356 = arith.constant 0 : index
      %c0_2357 = arith.constant 0 : index
      %2435 = vector.load %arg1[%c2_2354, %c21_2355, %c0_2356, %c0_2357] : memref<5x28x8x128xf32, #tpu.memory_space<vmem>>, vector<1x1x8x128xf32>
      %2436 = vector.shape_cast %2435 : vector<1x1x8x128xf32> to vector<8x128xf32>
      %2437 = arith.mulf %2436, %24 : vector<8x128xf32>
      %c3_2358 = arith.constant 3 : index
      %c21_2359 = arith.constant 21 : index
      %c0_2360 = arith.constant 0 : index
      %c0_2361 = arith.constant 0 : index
      %2438 = vector.load %arg1[%c3_2358, %c21_2359, %c0_2360, %c0_2361] : memref<5x28x8x128xf32, #tpu.memory_space<vmem>>, vector<1x1x8x128xf32>
      %2439 = vector.shape_cast %2438 : vector<1x1x8x128xf32> to vector<8x128xf32>
      %2440 = arith.mulf %2439, %29 : vector<8x128xf32>
      %2441 = arith.addf %2437, %2440 : vector<8x128xf32>
      %c4_2362 = arith.constant 4 : index
      %c21_2363 = arith.constant 21 : index
      %c0_2364 = arith.constant 0 : index
      %c0_2365 = arith.constant 0 : index
      %2442 = vector.load %arg1[%c4_2362, %c21_2363, %c0_2364, %c0_2365] : memref<5x28x8x128xf32, #tpu.memory_space<vmem>>, vector<1x1x8x128xf32>
      %2443 = vector.shape_cast %2442 : vector<1x1x8x128xf32> to vector<8x128xf32>
      %2444 = arith.mulf %2443, %34 : vector<8x128xf32>
      %2445 = arith.addf %2441, %2444 : vector<8x128xf32>
      %c2_2366 = arith.constant 2 : index
      %c22_2367 = arith.constant 22 : index
      %c0_2368 = arith.constant 0 : index
      %c0_2369 = arith.constant 0 : index
      %2446 = vector.load %arg1[%c2_2366, %c22_2367, %c0_2368, %c0_2369] : memref<5x28x8x128xf32, #tpu.memory_space<vmem>>, vector<1x1x8x128xf32>
      %2447 = vector.shape_cast %2446 : vector<1x1x8x128xf32> to vector<8x128xf32>
      %2448 = arith.mulf %2447, %39 : vector<8x128xf32>
      %2449 = arith.addf %2445, %2448 : vector<8x128xf32>
      %c3_2370 = arith.constant 3 : index
      %c22_2371 = arith.constant 22 : index
      %c0_2372 = arith.constant 0 : index
      %c0_2373 = arith.constant 0 : index
      %2450 = vector.load %arg1[%c3_2370, %c22_2371, %c0_2372, %c0_2373] : memref<5x28x8x128xf32, #tpu.memory_space<vmem>>, vector<1x1x8x128xf32>
      %2451 = vector.shape_cast %2450 : vector<1x1x8x128xf32> to vector<8x128xf32>
      %2452 = arith.mulf %2451, %44 : vector<8x128xf32>
      %2453 = arith.addf %2449, %2452 : vector<8x128xf32>
      %c4_2374 = arith.constant 4 : index
      %c22_2375 = arith.constant 22 : index
      %c0_2376 = arith.constant 0 : index
      %c0_2377 = arith.constant 0 : index
      %2454 = vector.load %arg1[%c4_2374, %c22_2375, %c0_2376, %c0_2377] : memref<5x28x8x128xf32, #tpu.memory_space<vmem>>, vector<1x1x8x128xf32>
      %2455 = vector.shape_cast %2454 : vector<1x1x8x128xf32> to vector<8x128xf32>
      %2456 = arith.mulf %2455, %49 : vector<8x128xf32>
      %2457 = arith.addf %2453, %2456 : vector<8x128xf32>
      %c2_2378 = arith.constant 2 : index
      %c23_2379 = arith.constant 23 : index
      %c0_2380 = arith.constant 0 : index
      %c0_2381 = arith.constant 0 : index
      %2458 = vector.load %arg1[%c2_2378, %c23_2379, %c0_2380, %c0_2381] : memref<5x28x8x128xf32, #tpu.memory_space<vmem>>, vector<1x1x8x128xf32>
      %2459 = vector.shape_cast %2458 : vector<1x1x8x128xf32> to vector<8x128xf32>
      %2460 = arith.mulf %2459, %54 : vector<8x128xf32>
      %2461 = arith.addf %2457, %2460 : vector<8x128xf32>
      %c3_2382 = arith.constant 3 : index
      %c23_2383 = arith.constant 23 : index
      %c0_2384 = arith.constant 0 : index
      %c0_2385 = arith.constant 0 : index
      %2462 = vector.load %arg1[%c3_2382, %c23_2383, %c0_2384, %c0_2385] : memref<5x28x8x128xf32, #tpu.memory_space<vmem>>, vector<1x1x8x128xf32>
      %2463 = vector.shape_cast %2462 : vector<1x1x8x128xf32> to vector<8x128xf32>
      %2464 = arith.mulf %2463, %59 : vector<8x128xf32>
      %2465 = arith.addf %2461, %2464 : vector<8x128xf32>
      %c4_2386 = arith.constant 4 : index
      %c23_2387 = arith.constant 23 : index
      %c0_2388 = arith.constant 0 : index
      %c0_2389 = arith.constant 0 : index
      %2466 = vector.load %arg1[%c4_2386, %c23_2387, %c0_2388, %c0_2389] : memref<5x28x8x128xf32, #tpu.memory_space<vmem>>, vector<1x1x8x128xf32>
      %2467 = vector.shape_cast %2466 : vector<1x1x8x128xf32> to vector<8x128xf32>
      %2468 = arith.mulf %2467, %64 : vector<8x128xf32>
      %2469 = arith.addf %2465, %2468 : vector<8x128xf32>
      %2470 = arith.maximumf %2434, %2469 : vector<8x128xf32>
      %c0_2390 = arith.constant 0 : index
      %c22_2391 = arith.constant 22 : index
      %c0_2392 = arith.constant 0 : index
      %c0_2393 = arith.constant 0 : index
      %2471 = vector.load %arg1[%c0_2390, %c22_2391, %c0_2392, %c0_2393] : memref<5x28x8x128xf32, #tpu.memory_space<vmem>>, vector<1x1x8x128xf32>
      %2472 = vector.shape_cast %2471 : vector<1x1x8x128xf32> to vector<8x128xf32>
      %2473 = arith.mulf %2472, %24 : vector<8x128xf32>
      %c1_2394 = arith.constant 1 : index
      %c22_2395 = arith.constant 22 : index
      %c0_2396 = arith.constant 0 : index
      %c0_2397 = arith.constant 0 : index
      %2474 = vector.load %arg1[%c1_2394, %c22_2395, %c0_2396, %c0_2397] : memref<5x28x8x128xf32, #tpu.memory_space<vmem>>, vector<1x1x8x128xf32>
      %2475 = vector.shape_cast %2474 : vector<1x1x8x128xf32> to vector<8x128xf32>
      %2476 = arith.mulf %2475, %29 : vector<8x128xf32>
      %2477 = arith.addf %2473, %2476 : vector<8x128xf32>
      %c2_2398 = arith.constant 2 : index
      %c22_2399 = arith.constant 22 : index
      %c0_2400 = arith.constant 0 : index
      %c0_2401 = arith.constant 0 : index
      %2478 = vector.load %arg1[%c2_2398, %c22_2399, %c0_2400, %c0_2401] : memref<5x28x8x128xf32, #tpu.memory_space<vmem>>, vector<1x1x8x128xf32>
      %2479 = vector.shape_cast %2478 : vector<1x1x8x128xf32> to vector<8x128xf32>
      %2480 = arith.mulf %2479, %34 : vector<8x128xf32>
      %2481 = arith.addf %2477, %2480 : vector<8x128xf32>
      %c0_2402 = arith.constant 0 : index
      %c23_2403 = arith.constant 23 : index
      %c0_2404 = arith.constant 0 : index
      %c0_2405 = arith.constant 0 : index
      %2482 = vector.load %arg1[%c0_2402, %c23_2403, %c0_2404, %c0_2405] : memref<5x28x8x128xf32, #tpu.memory_space<vmem>>, vector<1x1x8x128xf32>
      %2483 = vector.shape_cast %2482 : vector<1x1x8x128xf32> to vector<8x128xf32>
      %2484 = arith.mulf %2483, %39 : vector<8x128xf32>
      %2485 = arith.addf %2481, %2484 : vector<8x128xf32>
      %c1_2406 = arith.constant 1 : index
      %c23_2407 = arith.constant 23 : index
      %c0_2408 = arith.constant 0 : index
      %c0_2409 = arith.constant 0 : index
      %2486 = vector.load %arg1[%c1_2406, %c23_2407, %c0_2408, %c0_2409] : memref<5x28x8x128xf32, #tpu.memory_space<vmem>>, vector<1x1x8x128xf32>
      %2487 = vector.shape_cast %2486 : vector<1x1x8x128xf32> to vector<8x128xf32>
      %2488 = arith.mulf %2487, %44 : vector<8x128xf32>
      %2489 = arith.addf %2485, %2488 : vector<8x128xf32>
      %c2_2410 = arith.constant 2 : index
      %c23_2411 = arith.constant 23 : index
      %c0_2412 = arith.constant 0 : index
      %c0_2413 = arith.constant 0 : index
      %2490 = vector.load %arg1[%c2_2410, %c23_2411, %c0_2412, %c0_2413] : memref<5x28x8x128xf32, #tpu.memory_space<vmem>>, vector<1x1x8x128xf32>
      %2491 = vector.shape_cast %2490 : vector<1x1x8x128xf32> to vector<8x128xf32>
      %2492 = arith.mulf %2491, %49 : vector<8x128xf32>
      %2493 = arith.addf %2489, %2492 : vector<8x128xf32>
      %c0_2414 = arith.constant 0 : index
      %c24_2415 = arith.constant 24 : index
      %c0_2416 = arith.constant 0 : index
      %c0_2417 = arith.constant 0 : index
      %2494 = vector.load %arg1[%c0_2414, %c24_2415, %c0_2416, %c0_2417] : memref<5x28x8x128xf32, #tpu.memory_space<vmem>>, vector<1x1x8x128xf32>
      %2495 = vector.shape_cast %2494 : vector<1x1x8x128xf32> to vector<8x128xf32>
      %2496 = arith.mulf %2495, %54 : vector<8x128xf32>
      %2497 = arith.addf %2493, %2496 : vector<8x128xf32>
      %c1_2418 = arith.constant 1 : index
      %c24_2419 = arith.constant 24 : index
      %c0_2420 = arith.constant 0 : index
      %c0_2421 = arith.constant 0 : index
      %2498 = vector.load %arg1[%c1_2418, %c24_2419, %c0_2420, %c0_2421] : memref<5x28x8x128xf32, #tpu.memory_space<vmem>>, vector<1x1x8x128xf32>
      %2499 = vector.shape_cast %2498 : vector<1x1x8x128xf32> to vector<8x128xf32>
      %2500 = arith.mulf %2499, %59 : vector<8x128xf32>
      %2501 = arith.addf %2497, %2500 : vector<8x128xf32>
      %c2_2422 = arith.constant 2 : index
      %c24_2423 = arith.constant 24 : index
      %c0_2424 = arith.constant 0 : index
      %c0_2425 = arith.constant 0 : index
      %2502 = vector.load %arg1[%c2_2422, %c24_2423, %c0_2424, %c0_2425] : memref<5x28x8x128xf32, #tpu.memory_space<vmem>>, vector<1x1x8x128xf32>
      %2503 = vector.shape_cast %2502 : vector<1x1x8x128xf32> to vector<8x128xf32>
      %2504 = arith.mulf %2503, %64 : vector<8x128xf32>
      %2505 = arith.addf %2501, %2504 : vector<8x128xf32>
      %2506 = arith.maximumf %2470, %2505 : vector<8x128xf32>
      %c1_2426 = arith.constant 1 : index
      %c22_2427 = arith.constant 22 : index
      %c0_2428 = arith.constant 0 : index
      %c0_2429 = arith.constant 0 : index
      %2507 = vector.load %arg1[%c1_2426, %c22_2427, %c0_2428, %c0_2429] : memref<5x28x8x128xf32, #tpu.memory_space<vmem>>, vector<1x1x8x128xf32>
      %2508 = vector.shape_cast %2507 : vector<1x1x8x128xf32> to vector<8x128xf32>
      %2509 = arith.mulf %2508, %24 : vector<8x128xf32>
      %c2_2430 = arith.constant 2 : index
      %c22_2431 = arith.constant 22 : index
      %c0_2432 = arith.constant 0 : index
      %c0_2433 = arith.constant 0 : index
      %2510 = vector.load %arg1[%c2_2430, %c22_2431, %c0_2432, %c0_2433] : memref<5x28x8x128xf32, #tpu.memory_space<vmem>>, vector<1x1x8x128xf32>
      %2511 = vector.shape_cast %2510 : vector<1x1x8x128xf32> to vector<8x128xf32>
      %2512 = arith.mulf %2511, %29 : vector<8x128xf32>
      %2513 = arith.addf %2509, %2512 : vector<8x128xf32>
      %c3_2434 = arith.constant 3 : index
      %c22_2435 = arith.constant 22 : index
      %c0_2436 = arith.constant 0 : index
      %c0_2437 = arith.constant 0 : index
      %2514 = vector.load %arg1[%c3_2434, %c22_2435, %c0_2436, %c0_2437] : memref<5x28x8x128xf32, #tpu.memory_space<vmem>>, vector<1x1x8x128xf32>
      %2515 = vector.shape_cast %2514 : vector<1x1x8x128xf32> to vector<8x128xf32>
      %2516 = arith.mulf %2515, %34 : vector<8x128xf32>
      %2517 = arith.addf %2513, %2516 : vector<8x128xf32>
      %c1_2438 = arith.constant 1 : index
      %c23_2439 = arith.constant 23 : index
      %c0_2440 = arith.constant 0 : index
      %c0_2441 = arith.constant 0 : index
      %2518 = vector.load %arg1[%c1_2438, %c23_2439, %c0_2440, %c0_2441] : memref<5x28x8x128xf32, #tpu.memory_space<vmem>>, vector<1x1x8x128xf32>
      %2519 = vector.shape_cast %2518 : vector<1x1x8x128xf32> to vector<8x128xf32>
      %2520 = arith.mulf %2519, %39 : vector<8x128xf32>
      %2521 = arith.addf %2517, %2520 : vector<8x128xf32>
      %c2_2442 = arith.constant 2 : index
      %c23_2443 = arith.constant 23 : index
      %c0_2444 = arith.constant 0 : index
      %c0_2445 = arith.constant 0 : index
      %2522 = vector.load %arg1[%c2_2442, %c23_2443, %c0_2444, %c0_2445] : memref<5x28x8x128xf32, #tpu.memory_space<vmem>>, vector<1x1x8x128xf32>
      %2523 = vector.shape_cast %2522 : vector<1x1x8x128xf32> to vector<8x128xf32>
      %2524 = arith.mulf %2523, %44 : vector<8x128xf32>
      %2525 = arith.addf %2521, %2524 : vector<8x128xf32>
      %c3_2446 = arith.constant 3 : index
      %c23_2447 = arith.constant 23 : index
      %c0_2448 = arith.constant 0 : index
      %c0_2449 = arith.constant 0 : index
      %2526 = vector.load %arg1[%c3_2446, %c23_2447, %c0_2448, %c0_2449] : memref<5x28x8x128xf32, #tpu.memory_space<vmem>>, vector<1x1x8x128xf32>
      %2527 = vector.shape_cast %2526 : vector<1x1x8x128xf32> to vector<8x128xf32>
      %2528 = arith.mulf %2527, %49 : vector<8x128xf32>
      %2529 = arith.addf %2525, %2528 : vector<8x128xf32>
      %c1_2450 = arith.constant 1 : index
      %c24_2451 = arith.constant 24 : index
      %c0_2452 = arith.constant 0 : index
      %c0_2453 = arith.constant 0 : index
      %2530 = vector.load %arg1[%c1_2450, %c24_2451, %c0_2452, %c0_2453] : memref<5x28x8x128xf32, #tpu.memory_space<vmem>>, vector<1x1x8x128xf32>
      %2531 = vector.shape_cast %2530 : vector<1x1x8x128xf32> to vector<8x128xf32>
      %2532 = arith.mulf %2531, %54 : vector<8x128xf32>
      %2533 = arith.addf %2529, %2532 : vector<8x128xf32>
      %c2_2454 = arith.constant 2 : index
      %c24_2455 = arith.constant 24 : index
      %c0_2456 = arith.constant 0 : index
      %c0_2457 = arith.constant 0 : index
      %2534 = vector.load %arg1[%c2_2454, %c24_2455, %c0_2456, %c0_2457] : memref<5x28x8x128xf32, #tpu.memory_space<vmem>>, vector<1x1x8x128xf32>
      %2535 = vector.shape_cast %2534 : vector<1x1x8x128xf32> to vector<8x128xf32>
      %2536 = arith.mulf %2535, %59 : vector<8x128xf32>
      %2537 = arith.addf %2533, %2536 : vector<8x128xf32>
      %c3_2458 = arith.constant 3 : index
      %c24_2459 = arith.constant 24 : index
      %c0_2460 = arith.constant 0 : index
      %c0_2461 = arith.constant 0 : index
      %2538 = vector.load %arg1[%c3_2458, %c24_2459, %c0_2460, %c0_2461] : memref<5x28x8x128xf32, #tpu.memory_space<vmem>>, vector<1x1x8x128xf32>
      %2539 = vector.shape_cast %2538 : vector<1x1x8x128xf32> to vector<8x128xf32>
      %2540 = arith.mulf %2539, %64 : vector<8x128xf32>
      %2541 = arith.addf %2537, %2540 : vector<8x128xf32>
      %2542 = arith.maximumf %2506, %2541 : vector<8x128xf32>
      %c2_2462 = arith.constant 2 : index
      %c22_2463 = arith.constant 22 : index
      %c0_2464 = arith.constant 0 : index
      %c0_2465 = arith.constant 0 : index
      %2543 = vector.load %arg1[%c2_2462, %c22_2463, %c0_2464, %c0_2465] : memref<5x28x8x128xf32, #tpu.memory_space<vmem>>, vector<1x1x8x128xf32>
      %2544 = vector.shape_cast %2543 : vector<1x1x8x128xf32> to vector<8x128xf32>
      %2545 = arith.mulf %2544, %24 : vector<8x128xf32>
      %c3_2466 = arith.constant 3 : index
      %c22_2467 = arith.constant 22 : index
      %c0_2468 = arith.constant 0 : index
      %c0_2469 = arith.constant 0 : index
      %2546 = vector.load %arg1[%c3_2466, %c22_2467, %c0_2468, %c0_2469] : memref<5x28x8x128xf32, #tpu.memory_space<vmem>>, vector<1x1x8x128xf32>
      %2547 = vector.shape_cast %2546 : vector<1x1x8x128xf32> to vector<8x128xf32>
      %2548 = arith.mulf %2547, %29 : vector<8x128xf32>
      %2549 = arith.addf %2545, %2548 : vector<8x128xf32>
      %c4_2470 = arith.constant 4 : index
      %c22_2471 = arith.constant 22 : index
      %c0_2472 = arith.constant 0 : index
      %c0_2473 = arith.constant 0 : index
      %2550 = vector.load %arg1[%c4_2470, %c22_2471, %c0_2472, %c0_2473] : memref<5x28x8x128xf32, #tpu.memory_space<vmem>>, vector<1x1x8x128xf32>
      %2551 = vector.shape_cast %2550 : vector<1x1x8x128xf32> to vector<8x128xf32>
      %2552 = arith.mulf %2551, %34 : vector<8x128xf32>
      %2553 = arith.addf %2549, %2552 : vector<8x128xf32>
      %c2_2474 = arith.constant 2 : index
      %c23_2475 = arith.constant 23 : index
      %c0_2476 = arith.constant 0 : index
      %c0_2477 = arith.constant 0 : index
      %2554 = vector.load %arg1[%c2_2474, %c23_2475, %c0_2476, %c0_2477] : memref<5x28x8x128xf32, #tpu.memory_space<vmem>>, vector<1x1x8x128xf32>
      %2555 = vector.shape_cast %2554 : vector<1x1x8x128xf32> to vector<8x128xf32>
      %2556 = arith.mulf %2555, %39 : vector<8x128xf32>
      %2557 = arith.addf %2553, %2556 : vector<8x128xf32>
      %c3_2478 = arith.constant 3 : index
      %c23_2479 = arith.constant 23 : index
      %c0_2480 = arith.constant 0 : index
      %c0_2481 = arith.constant 0 : index
      %2558 = vector.load %arg1[%c3_2478, %c23_2479, %c0_2480, %c0_2481] : memref<5x28x8x128xf32, #tpu.memory_space<vmem>>, vector<1x1x8x128xf32>
      %2559 = vector.shape_cast %2558 : vector<1x1x8x128xf32> to vector<8x128xf32>
      %2560 = arith.mulf %2559, %44 : vector<8x128xf32>
      %2561 = arith.addf %2557, %2560 : vector<8x128xf32>
      %c4_2482 = arith.constant 4 : index
      %c23_2483 = arith.constant 23 : index
      %c0_2484 = arith.constant 0 : index
      %c0_2485 = arith.constant 0 : index
      %2562 = vector.load %arg1[%c4_2482, %c23_2483, %c0_2484, %c0_2485] : memref<5x28x8x128xf32, #tpu.memory_space<vmem>>, vector<1x1x8x128xf32>
      %2563 = vector.shape_cast %2562 : vector<1x1x8x128xf32> to vector<8x128xf32>
      %2564 = arith.mulf %2563, %49 : vector<8x128xf32>
      %2565 = arith.addf %2561, %2564 : vector<8x128xf32>
      %c2_2486 = arith.constant 2 : index
      %c24_2487 = arith.constant 24 : index
      %c0_2488 = arith.constant 0 : index
      %c0_2489 = arith.constant 0 : index
      %2566 = vector.load %arg1[%c2_2486, %c24_2487, %c0_2488, %c0_2489] : memref<5x28x8x128xf32, #tpu.memory_space<vmem>>, vector<1x1x8x128xf32>
      %2567 = vector.shape_cast %2566 : vector<1x1x8x128xf32> to vector<8x128xf32>
      %2568 = arith.mulf %2567, %54 : vector<8x128xf32>
      %2569 = arith.addf %2565, %2568 : vector<8x128xf32>
      %c3_2490 = arith.constant 3 : index
      %c24_2491 = arith.constant 24 : index
      %c0_2492 = arith.constant 0 : index
      %c0_2493 = arith.constant 0 : index
      %2570 = vector.load %arg1[%c3_2490, %c24_2491, %c0_2492, %c0_2493] : memref<5x28x8x128xf32, #tpu.memory_space<vmem>>, vector<1x1x8x128xf32>
      %2571 = vector.shape_cast %2570 : vector<1x1x8x128xf32> to vector<8x128xf32>
      %2572 = arith.mulf %2571, %59 : vector<8x128xf32>
      %2573 = arith.addf %2569, %2572 : vector<8x128xf32>
      %c4_2494 = arith.constant 4 : index
      %c24_2495 = arith.constant 24 : index
      %c0_2496 = arith.constant 0 : index
      %c0_2497 = arith.constant 0 : index
      %2574 = vector.load %arg1[%c4_2494, %c24_2495, %c0_2496, %c0_2497] : memref<5x28x8x128xf32, #tpu.memory_space<vmem>>, vector<1x1x8x128xf32>
      %2575 = vector.shape_cast %2574 : vector<1x1x8x128xf32> to vector<8x128xf32>
      %2576 = arith.mulf %2575, %64 : vector<8x128xf32>
      %2577 = arith.addf %2573, %2576 : vector<8x128xf32>
      %2578 = arith.maximumf %2542, %2577 : vector<8x128xf32>
      %c0_2498 = arith.constant 0 : index
      %c23_2499 = arith.constant 23 : index
      %c0_2500 = arith.constant 0 : index
      %c0_2501 = arith.constant 0 : index
      %2579 = vector.load %arg1[%c0_2498, %c23_2499, %c0_2500, %c0_2501] : memref<5x28x8x128xf32, #tpu.memory_space<vmem>>, vector<1x1x8x128xf32>
      %2580 = vector.shape_cast %2579 : vector<1x1x8x128xf32> to vector<8x128xf32>
      %2581 = arith.mulf %2580, %24 : vector<8x128xf32>
      %c1_2502 = arith.constant 1 : index
      %c23_2503 = arith.constant 23 : index
      %c0_2504 = arith.constant 0 : index
      %c0_2505 = arith.constant 0 : index
      %2582 = vector.load %arg1[%c1_2502, %c23_2503, %c0_2504, %c0_2505] : memref<5x28x8x128xf32, #tpu.memory_space<vmem>>, vector<1x1x8x128xf32>
      %2583 = vector.shape_cast %2582 : vector<1x1x8x128xf32> to vector<8x128xf32>
      %2584 = arith.mulf %2583, %29 : vector<8x128xf32>
      %2585 = arith.addf %2581, %2584 : vector<8x128xf32>
      %c2_2506 = arith.constant 2 : index
      %c23_2507 = arith.constant 23 : index
      %c0_2508 = arith.constant 0 : index
      %c0_2509 = arith.constant 0 : index
      %2586 = vector.load %arg1[%c2_2506, %c23_2507, %c0_2508, %c0_2509] : memref<5x28x8x128xf32, #tpu.memory_space<vmem>>, vector<1x1x8x128xf32>
      %2587 = vector.shape_cast %2586 : vector<1x1x8x128xf32> to vector<8x128xf32>
      %2588 = arith.mulf %2587, %34 : vector<8x128xf32>
      %2589 = arith.addf %2585, %2588 : vector<8x128xf32>
      %c0_2510 = arith.constant 0 : index
      %c24_2511 = arith.constant 24 : index
      %c0_2512 = arith.constant 0 : index
      %c0_2513 = arith.constant 0 : index
      %2590 = vector.load %arg1[%c0_2510, %c24_2511, %c0_2512, %c0_2513] : memref<5x28x8x128xf32, #tpu.memory_space<vmem>>, vector<1x1x8x128xf32>
      %2591 = vector.shape_cast %2590 : vector<1x1x8x128xf32> to vector<8x128xf32>
      %2592 = arith.mulf %2591, %39 : vector<8x128xf32>
      %2593 = arith.addf %2589, %2592 : vector<8x128xf32>
      %c1_2514 = arith.constant 1 : index
      %c24_2515 = arith.constant 24 : index
      %c0_2516 = arith.constant 0 : index
      %c0_2517 = arith.constant 0 : index
      %2594 = vector.load %arg1[%c1_2514, %c24_2515, %c0_2516, %c0_2517] : memref<5x28x8x128xf32, #tpu.memory_space<vmem>>, vector<1x1x8x128xf32>
      %2595 = vector.shape_cast %2594 : vector<1x1x8x128xf32> to vector<8x128xf32>
      %2596 = arith.mulf %2595, %44 : vector<8x128xf32>
      %2597 = arith.addf %2593, %2596 : vector<8x128xf32>
      %c2_2518 = arith.constant 2 : index
      %c24_2519 = arith.constant 24 : index
      %c0_2520 = arith.constant 0 : index
      %c0_2521 = arith.constant 0 : index
      %2598 = vector.load %arg1[%c2_2518, %c24_2519, %c0_2520, %c0_2521] : memref<5x28x8x128xf32, #tpu.memory_space<vmem>>, vector<1x1x8x128xf32>
      %2599 = vector.shape_cast %2598 : vector<1x1x8x128xf32> to vector<8x128xf32>
      %2600 = arith.mulf %2599, %49 : vector<8x128xf32>
      %2601 = arith.addf %2597, %2600 : vector<8x128xf32>
      %c0_2522 = arith.constant 0 : index
      %c25 = arith.constant 25 : index
      %c0_2523 = arith.constant 0 : index
      %c0_2524 = arith.constant 0 : index
      %2602 = vector.load %arg1[%c0_2522, %c25, %c0_2523, %c0_2524] : memref<5x28x8x128xf32, #tpu.memory_space<vmem>>, vector<1x1x8x128xf32>
      %2603 = vector.shape_cast %2602 : vector<1x1x8x128xf32> to vector<8x128xf32>
      %2604 = arith.mulf %2603, %54 : vector<8x128xf32>
      %2605 = arith.addf %2601, %2604 : vector<8x128xf32>
      %c1_2525 = arith.constant 1 : index
      %c25_2526 = arith.constant 25 : index
      %c0_2527 = arith.constant 0 : index
      %c0_2528 = arith.constant 0 : index
      %2606 = vector.load %arg1[%c1_2525, %c25_2526, %c0_2527, %c0_2528] : memref<5x28x8x128xf32, #tpu.memory_space<vmem>>, vector<1x1x8x128xf32>
      %2607 = vector.shape_cast %2606 : vector<1x1x8x128xf32> to vector<8x128xf32>
      %2608 = arith.mulf %2607, %59 : vector<8x128xf32>
      %2609 = arith.addf %2605, %2608 : vector<8x128xf32>
      %c2_2529 = arith.constant 2 : index
      %c25_2530 = arith.constant 25 : index
      %c0_2531 = arith.constant 0 : index
      %c0_2532 = arith.constant 0 : index
      %2610 = vector.load %arg1[%c2_2529, %c25_2530, %c0_2531, %c0_2532] : memref<5x28x8x128xf32, #tpu.memory_space<vmem>>, vector<1x1x8x128xf32>
      %2611 = vector.shape_cast %2610 : vector<1x1x8x128xf32> to vector<8x128xf32>
      %2612 = arith.mulf %2611, %64 : vector<8x128xf32>
      %2613 = arith.addf %2609, %2612 : vector<8x128xf32>
      %2614 = arith.maximumf %2578, %2613 : vector<8x128xf32>
      %c1_2533 = arith.constant 1 : index
      %c23_2534 = arith.constant 23 : index
      %c0_2535 = arith.constant 0 : index
      %c0_2536 = arith.constant 0 : index
      %2615 = vector.load %arg1[%c1_2533, %c23_2534, %c0_2535, %c0_2536] : memref<5x28x8x128xf32, #tpu.memory_space<vmem>>, vector<1x1x8x128xf32>
      %2616 = vector.shape_cast %2615 : vector<1x1x8x128xf32> to vector<8x128xf32>
      %2617 = arith.mulf %2616, %24 : vector<8x128xf32>
      %c2_2537 = arith.constant 2 : index
      %c23_2538 = arith.constant 23 : index
      %c0_2539 = arith.constant 0 : index
      %c0_2540 = arith.constant 0 : index
      %2618 = vector.load %arg1[%c2_2537, %c23_2538, %c0_2539, %c0_2540] : memref<5x28x8x128xf32, #tpu.memory_space<vmem>>, vector<1x1x8x128xf32>
      %2619 = vector.shape_cast %2618 : vector<1x1x8x128xf32> to vector<8x128xf32>
      %2620 = arith.mulf %2619, %29 : vector<8x128xf32>
      %2621 = arith.addf %2617, %2620 : vector<8x128xf32>
      %c3_2541 = arith.constant 3 : index
      %c23_2542 = arith.constant 23 : index
      %c0_2543 = arith.constant 0 : index
      %c0_2544 = arith.constant 0 : index
      %2622 = vector.load %arg1[%c3_2541, %c23_2542, %c0_2543, %c0_2544] : memref<5x28x8x128xf32, #tpu.memory_space<vmem>>, vector<1x1x8x128xf32>
      %2623 = vector.shape_cast %2622 : vector<1x1x8x128xf32> to vector<8x128xf32>
      %2624 = arith.mulf %2623, %34 : vector<8x128xf32>
      %2625 = arith.addf %2621, %2624 : vector<8x128xf32>
      %c1_2545 = arith.constant 1 : index
      %c24_2546 = arith.constant 24 : index
      %c0_2547 = arith.constant 0 : index
      %c0_2548 = arith.constant 0 : index
      %2626 = vector.load %arg1[%c1_2545, %c24_2546, %c0_2547, %c0_2548] : memref<5x28x8x128xf32, #tpu.memory_space<vmem>>, vector<1x1x8x128xf32>
      %2627 = vector.shape_cast %2626 : vector<1x1x8x128xf32> to vector<8x128xf32>
      %2628 = arith.mulf %2627, %39 : vector<8x128xf32>
      %2629 = arith.addf %2625, %2628 : vector<8x128xf32>
      %c2_2549 = arith.constant 2 : index
      %c24_2550 = arith.constant 24 : index
      %c0_2551 = arith.constant 0 : index
      %c0_2552 = arith.constant 0 : index
      %2630 = vector.load %arg1[%c2_2549, %c24_2550, %c0_2551, %c0_2552] : memref<5x28x8x128xf32, #tpu.memory_space<vmem>>, vector<1x1x8x128xf32>
      %2631 = vector.shape_cast %2630 : vector<1x1x8x128xf32> to vector<8x128xf32>
      %2632 = arith.mulf %2631, %44 : vector<8x128xf32>
      %2633 = arith.addf %2629, %2632 : vector<8x128xf32>
      %c3_2553 = arith.constant 3 : index
      %c24_2554 = arith.constant 24 : index
      %c0_2555 = arith.constant 0 : index
      %c0_2556 = arith.constant 0 : index
      %2634 = vector.load %arg1[%c3_2553, %c24_2554, %c0_2555, %c0_2556] : memref<5x28x8x128xf32, #tpu.memory_space<vmem>>, vector<1x1x8x128xf32>
      %2635 = vector.shape_cast %2634 : vector<1x1x8x128xf32> to vector<8x128xf32>
      %2636 = arith.mulf %2635, %49 : vector<8x128xf32>
      %2637 = arith.addf %2633, %2636 : vector<8x128xf32>
      %c1_2557 = arith.constant 1 : index
      %c25_2558 = arith.constant 25 : index
      %c0_2559 = arith.constant 0 : index
      %c0_2560 = arith.constant 0 : index
      %2638 = vector.load %arg1[%c1_2557, %c25_2558, %c0_2559, %c0_2560] : memref<5x28x8x128xf32, #tpu.memory_space<vmem>>, vector<1x1x8x128xf32>
      %2639 = vector.shape_cast %2638 : vector<1x1x8x128xf32> to vector<8x128xf32>
      %2640 = arith.mulf %2639, %54 : vector<8x128xf32>
      %2641 = arith.addf %2637, %2640 : vector<8x128xf32>
      %c2_2561 = arith.constant 2 : index
      %c25_2562 = arith.constant 25 : index
      %c0_2563 = arith.constant 0 : index
      %c0_2564 = arith.constant 0 : index
      %2642 = vector.load %arg1[%c2_2561, %c25_2562, %c0_2563, %c0_2564] : memref<5x28x8x128xf32, #tpu.memory_space<vmem>>, vector<1x1x8x128xf32>
      %2643 = vector.shape_cast %2642 : vector<1x1x8x128xf32> to vector<8x128xf32>
      %2644 = arith.mulf %2643, %59 : vector<8x128xf32>
      %2645 = arith.addf %2641, %2644 : vector<8x128xf32>
      %c3_2565 = arith.constant 3 : index
      %c25_2566 = arith.constant 25 : index
      %c0_2567 = arith.constant 0 : index
      %c0_2568 = arith.constant 0 : index
      %2646 = vector.load %arg1[%c3_2565, %c25_2566, %c0_2567, %c0_2568] : memref<5x28x8x128xf32, #tpu.memory_space<vmem>>, vector<1x1x8x128xf32>
      %2647 = vector.shape_cast %2646 : vector<1x1x8x128xf32> to vector<8x128xf32>
      %2648 = arith.mulf %2647, %64 : vector<8x128xf32>
      %2649 = arith.addf %2645, %2648 : vector<8x128xf32>
      %2650 = arith.maximumf %2614, %2649 : vector<8x128xf32>
      %c2_2569 = arith.constant 2 : index
      %c23_2570 = arith.constant 23 : index
      %c0_2571 = arith.constant 0 : index
      %c0_2572 = arith.constant 0 : index
      %2651 = vector.load %arg1[%c2_2569, %c23_2570, %c0_2571, %c0_2572] : memref<5x28x8x128xf32, #tpu.memory_space<vmem>>, vector<1x1x8x128xf32>
      %2652 = vector.shape_cast %2651 : vector<1x1x8x128xf32> to vector<8x128xf32>
      %2653 = arith.mulf %2652, %24 : vector<8x128xf32>
      %c3_2573 = arith.constant 3 : index
      %c23_2574 = arith.constant 23 : index
      %c0_2575 = arith.constant 0 : index
      %c0_2576 = arith.constant 0 : index
      %2654 = vector.load %arg1[%c3_2573, %c23_2574, %c0_2575, %c0_2576] : memref<5x28x8x128xf32, #tpu.memory_space<vmem>>, vector<1x1x8x128xf32>
      %2655 = vector.shape_cast %2654 : vector<1x1x8x128xf32> to vector<8x128xf32>
      %2656 = arith.mulf %2655, %29 : vector<8x128xf32>
      %2657 = arith.addf %2653, %2656 : vector<8x128xf32>
      %c4_2577 = arith.constant 4 : index
      %c23_2578 = arith.constant 23 : index
      %c0_2579 = arith.constant 0 : index
      %c0_2580 = arith.constant 0 : index
      %2658 = vector.load %arg1[%c4_2577, %c23_2578, %c0_2579, %c0_2580] : memref<5x28x8x128xf32, #tpu.memory_space<vmem>>, vector<1x1x8x128xf32>
      %2659 = vector.shape_cast %2658 : vector<1x1x8x128xf32> to vector<8x128xf32>
      %2660 = arith.mulf %2659, %34 : vector<8x128xf32>
      %2661 = arith.addf %2657, %2660 : vector<8x128xf32>
      %c2_2581 = arith.constant 2 : index
      %c24_2582 = arith.constant 24 : index
      %c0_2583 = arith.constant 0 : index
      %c0_2584 = arith.constant 0 : index
      %2662 = vector.load %arg1[%c2_2581, %c24_2582, %c0_2583, %c0_2584] : memref<5x28x8x128xf32, #tpu.memory_space<vmem>>, vector<1x1x8x128xf32>
      %2663 = vector.shape_cast %2662 : vector<1x1x8x128xf32> to vector<8x128xf32>
      %2664 = arith.mulf %2663, %39 : vector<8x128xf32>
      %2665 = arith.addf %2661, %2664 : vector<8x128xf32>
      %c3_2585 = arith.constant 3 : index
      %c24_2586 = arith.constant 24 : index
      %c0_2587 = arith.constant 0 : index
      %c0_2588 = arith.constant 0 : index
      %2666 = vector.load %arg1[%c3_2585, %c24_2586, %c0_2587, %c0_2588] : memref<5x28x8x128xf32, #tpu.memory_space<vmem>>, vector<1x1x8x128xf32>
      %2667 = vector.shape_cast %2666 : vector<1x1x8x128xf32> to vector<8x128xf32>
      %2668 = arith.mulf %2667, %44 : vector<8x128xf32>
      %2669 = arith.addf %2665, %2668 : vector<8x128xf32>
      %c4_2589 = arith.constant 4 : index
      %c24_2590 = arith.constant 24 : index
      %c0_2591 = arith.constant 0 : index
      %c0_2592 = arith.constant 0 : index
      %2670 = vector.load %arg1[%c4_2589, %c24_2590, %c0_2591, %c0_2592] : memref<5x28x8x128xf32, #tpu.memory_space<vmem>>, vector<1x1x8x128xf32>
      %2671 = vector.shape_cast %2670 : vector<1x1x8x128xf32> to vector<8x128xf32>
      %2672 = arith.mulf %2671, %49 : vector<8x128xf32>
      %2673 = arith.addf %2669, %2672 : vector<8x128xf32>
      %c2_2593 = arith.constant 2 : index
      %c25_2594 = arith.constant 25 : index
      %c0_2595 = arith.constant 0 : index
      %c0_2596 = arith.constant 0 : index
      %2674 = vector.load %arg1[%c2_2593, %c25_2594, %c0_2595, %c0_2596] : memref<5x28x8x128xf32, #tpu.memory_space<vmem>>, vector<1x1x8x128xf32>
      %2675 = vector.shape_cast %2674 : vector<1x1x8x128xf32> to vector<8x128xf32>
      %2676 = arith.mulf %2675, %54 : vector<8x128xf32>
      %2677 = arith.addf %2673, %2676 : vector<8x128xf32>
      %c3_2597 = arith.constant 3 : index
      %c25_2598 = arith.constant 25 : index
      %c0_2599 = arith.constant 0 : index
      %c0_2600 = arith.constant 0 : index
      %2678 = vector.load %arg1[%c3_2597, %c25_2598, %c0_2599, %c0_2600] : memref<5x28x8x128xf32, #tpu.memory_space<vmem>>, vector<1x1x8x128xf32>
      %2679 = vector.shape_cast %2678 : vector<1x1x8x128xf32> to vector<8x128xf32>
      %2680 = arith.mulf %2679, %59 : vector<8x128xf32>
      %2681 = arith.addf %2677, %2680 : vector<8x128xf32>
      %c4_2601 = arith.constant 4 : index
      %c25_2602 = arith.constant 25 : index
      %c0_2603 = arith.constant 0 : index
      %c0_2604 = arith.constant 0 : index
      %2682 = vector.load %arg1[%c4_2601, %c25_2602, %c0_2603, %c0_2604] : memref<5x28x8x128xf32, #tpu.memory_space<vmem>>, vector<1x1x8x128xf32>
      %2683 = vector.shape_cast %2682 : vector<1x1x8x128xf32> to vector<8x128xf32>
      %2684 = arith.mulf %2683, %64 : vector<8x128xf32>
      %2685 = arith.addf %2681, %2684 : vector<8x128xf32>
      %2686 = arith.maximumf %2650, %2685 : vector<8x128xf32>
      %2687 = arith.addf %2686, %67 : vector<8x128xf32>
      %2688 = arith.index_cast %19 : i32 to index
      %c56 = arith.constant 56 : index
      %c0_2605 = arith.constant 0 : index
      %2689 = vector.load %arg9[%2688, %c56, %c0_2605] : memref<10x64x128xf32, #tpu.memory_space<vmem>>, vector<1x8x128xf32>
      %2690 = vector.shape_cast %2689 : vector<1x8x128xf32> to vector<8x128xf32>
      %2691 = vector.shape_cast %2687 : vector<8x128xf32> to vector<1x8x128xf32>
      tpu.vector_store %arg9[%2688, %c56, %c0_2605], %2691 {strides = array<i32>} : memref<10x64x128xf32, #tpu.memory_space<vmem>>, vector<1x8x128xf32>,
    }
    %c10_i32_0 = arith.constant 10 : i32
    %c0 = arith.constant 0 : index
    %c0_1 = arith.constant 0 : index
    %c0_2 = arith.constant 0 : index
    %1 = vector.load %arg9[%c0, %c0_1, %c0_2] : memref<10x64x128xf32, #tpu.memory_space<vmem>>, vector<10x64x128xf32>
    %2 = vector.shape_cast %1 : vector<10x64x128xf32> to vector<640x128xf32>
    %c0_3 = arith.constant 0 : index
    %c0_4 = arith.constant 0 : index
    %3 = vector.load %arg4[%c0_3, %c0_4] : memref<50x640xf32, #tpu.memory_space<vmem>>, vector<50x640xf32>
    %cst = arith.constant dense<0.000000e+00> : vector<50x128xf32>
    %4 = tpu.matmul %3, %2, %cst {dimension_numbers = #tpu.dot_dimension_numbers<[1], [0], [0], [1], [0, 0, 1, 1], [], []>} : vector<50x640xf32>, vector<640x128xf32>, vector<50x128xf32> -> vector<50x128xf32>
    %c0_5 = arith.constant 0 : index
    %c0_6 = arith.constant 0 : index
    %5 = vector.load %arg5[%c0_5, %c0_6] : memref<50x1xf32, #tpu.memory_space<vmem>>, vector<50x1xf32>
    %6 = vector.shape_cast %5 : vector<50x1xf32> to vector<50x1xf32>
    %7 = vector.broadcast %6 : vector<50x1xf32> to vector<50x128xf32>
    %8 = arith.addf %4, %7 : vector<50x128xf32>
    %cst_7 = arith.constant 0.000000e+00 : f32
    %9 = vector.broadcast %cst_7 : f32 to vector<50x128xf32>
    %10 = arith.maximumf %8, %9 : vector<50x128xf32>
    %c0_8 = arith.constant 0 : index
    %c0_9 = arith.constant 0 : index
    %11 = vector.load %arg6[%c0_8, %c0_9] : memref<10x50xf32, #tpu.memory_space<vmem>>, vector<10x50xf32>
    %cst_10 = arith.constant dense<0.000000e+00> : vector<10x128xf32>
    %12 = tpu.matmul %11, %10, %cst_10 {dimension_numbers = #tpu.dot_dimension_numbers<[1], [0], [0], [1], [0, 0, 1, 1], [], []>} : vector<10x50xf32>, vector<50x128xf32>, vector<10x128xf32> -> vector<10x128xf32>
    %c0_11 = arith.constant 0 : index
    %c0_12 = arith.constant 0 : index
    %13 = vector.load %arg7[%c0_11, %c0_12] : memref<10x1xf32, #tpu.memory_space<vmem>>, vector<10x1xf32>
    %14 = vector.shape_cast %13 : vector<10x1xf32> to vector<10x1xf32>
    %15 = vector.broadcast %14 : vector<10x1xf32> to vector<10x128xf32>
    %16 = arith.addf %12, %15 : vector<10x128xf32>
    %c0_13 = arith.constant 0 : index
    %c0_14 = arith.constant 0 : index
    %17 = vector.load %arg8[%c0_13, %c0_14] : memref<10x128xf32, #tpu.memory_space<vmem>>, vector<10x128xf32>
    tpu.vector_store %arg8[%c0_13, %c0_14], %16 {strides = array<i32>} : memref<10x128xf32, #tpu.memory_space<vmem>>, vector<10x128xf32>,
    return
  }
  func.func @transform_0(%arg0: i32) -> (i32, i32, i32, i32) {
    %c0_i32 = arith.constant 0 : i32
    %c0_i32_0 = arith.constant 0 : i32
    %c0_i32_1 = arith.constant 0 : i32
    %c0_i32_2 = arith.constant 0 : i32
    return %c0_i32, %c0_i32_0, %c0_i32_1, %arg0 : i32, i32, i32, i32
  }
  func.func @transform_1(%arg0: i32) -> i32 {
    %c0_i32 = arith.constant 0 : i32
    %c0_i32_0 = arith.constant 0 : i32
    return %c0_i32 : i32
  }
  func.func @transform_2(%arg0: i32) -> i32 {
    %c0_i32 = arith.constant 0 : i32
    %c0_i32_0 = arith.constant 0 : i32
    return %c0_i32 : i32
  }
  func.func @transform_3(%arg0: i32) -> (i32, i32) {
    %c0_i32 = arith.constant 0 : i32
    %c0_i32_0 = arith.constant 0 : i32
    %c0_i32_1 = arith.constant 0 : i32
    return %c0_i32, %c0_i32_0 : i32, i32
  }
  func.func @transform_4(%arg0: i32) -> (i32, i32) {
    %c0_i32 = arith.constant 0 : i32
    %c0_i32_0 = arith.constant 0 : i32
    %c0_i32_1 = arith.constant 0 : i32
    return %c0_i32, %c0_i32_0 : i32, i32
  }
  func.func @transform_5(%arg0: i32) -> (i32, i32) {
    %c0_i32 = arith.constant 0 : i32
    %c0_i32_0 = arith.constant 0 : i32
    %c0_i32_1 = arith.constant 0 : i32
    return %c0_i32, %c0_i32_0 : i32, i32
  }
  func.func @transform_6(%arg0: i32) -> (i32, i32) {
    %c0_i32 = arith.constant 0 : i32
    %c0_i32_0 = arith.constant 0 : i32
    %c0_i32_1 = arith.constant 0 : i32
    return %c0_i32, %c0_i32_0 : i32, i32
  }
  func.func @transform_7(%arg0: i32) -> (i32, i32) {
    %c0_i32 = arith.constant 0 : i32
    %c0_i32_0 = arith.constant 0 : i32
    return %c0_i32, %arg0 : i32, i32
  }
}

</mosaic_0001>

<bundles_post_ra>
// kernel: net_forward.1
= control target key start
LH: loop header
LB: loop body
LE: loop exit
PB: predicated region body
PF: predicated region fallthrough
CT: control target
= control target key end

     0   :  { %12 = vsyncpa [#allocation4], 0  ;;  %s5020_s0 = inlined_call_operand.vmem [shape: f32[5,28,8,128], index: 0, kind: input, shape index: {}]   ;;  %s5021_s1 = inlined_call_operand.vmem [shape: f32[90], index: 1, kind: input, shape index: {}]   ;;  %s5022_s2 = inlined_call_operand.vmem [shape: f32[10], index: 2, kind: input, shape index: {}]   ;;  %s5023_s3 = inlined_call_operand.vmem [shape: f32[50,640], index: 3, kind: input, shape index: {}]   ;;  %s5024_s4 = inlined_call_operand.vmem [shape: f32[50,1], index: 4, kind: input, shape index: {}]   ;;  %s5025_s5 = inlined_call_operand.vmem [shape: f32[10,50], index: 5, kind: input, shape index: {}]   ;;  %s5026_s6 = inlined_call_operand.vmem [shape: f32[10,1], index: 6, kind: input, shape index: {}]   ;;  %s5027_s7 = inlined_call_operand.vmem [shape: f32[10,128], index: 7, kind: output, shape index: {}]  }
   0x1   :  { %s22_s26 = sshll.u32 %s5021_s1, 4  ;;  %s23_s26 = int_to_ptr.vmem [resolvable:$true] %s22_s26 }
   0x2   :  { %13 = vsyncpa [#allocation6], 0  ;;  %s32_s29 = sshll.u32 %s5022_s2, 4  ;;  %s2827_s30 = scalar_lea.vmem %s23_s26, 16  ;;  %s33_s29 = int_to_ptr.vmem [resolvable:$true] %s32_s29 }
   0x3   :  { %p2828_p0 = scmp.ne.s32.totalorder %s23_s26, %s2827_s30  ;;  %p2832_p1 = scmp.lt.s32.totalorder %s23_s26, %s23_s26 }
   0x4   :  { %p2833_p2 = scmp.lt.s32.totalorder %s2827_s30, %s2827_s30 }
   0x6   :  { %p2834_p3 = por %p2833_p2, %p2832_p1 }
   0x8   :  { %p2835_p4 = pnand %p2834_p3, %p2828_p0 }
   0xa   :  { %2838 = shalt.err (!%p2835_p4)
}
   0xb   :  { %s2863_s8 = smov [#allocation3]   ;;  %s2839_s9 = scalar_lea.vmem %s33_s29, 16 }
   0xc   :  { %25 = dma.vmem_to_smem %s23_s26, 16, %s2863_s8, [#allocation4]  }
   0xd   :  { %p2840_p5 = scmp.ne.s32.totalorder %s33_s29, %s2839_s9  ;;  %p2844_p6 = scmp.lt.s32.totalorder %s33_s29, %s33_s29 }
   0xe   :  { %p2845_p7 = scmp.lt.s32.totalorder %s2839_s9, %s2839_s9 }
  0x10   :  { %p2846_p8 = por %p2845_p7, %p2844_p6 }
  0x12   :  { %p2847_p9 = pnand %p2846_p8, %p2840_p5 }
  0x14   :  { %2850 = shalt.err (!%p2847_p9)
}
  0x15   :  { %s2864_s1 = smov [#allocation5]  }
  0x16   :  { %35 = dma.vmem_to_smem %s33_s29, 16, %s2864_s1, [#allocation6]  }
  0x17   :  { %2855 = dma.done.wait [#allocation4], 16  }
  0x18   :  { %2856 = vsyncadd [#allocation4], 4294967280 }
  0x19   :  { %2857 = dma.done.wait [#allocation6], 16  }
  0x1a   :  { %2858 = vsyncadd [#allocation6], 4294967280 }
  0x1b   :  { %50 = sfence }
  0x1c   :  { %s2915_s2 = smov 0  }
  0x1d LB: > { %s57_s10 = smul.u32 9, %s2861_s2  ;;  %v86_v0 = vld [vmem:[%s5020_s0] sm:$0xff]  ;;  %v2302_v7 = vld [vmem:[%s5020_s0 + $0x8] sm:$0xff]  ;;  %v2990_v34 = vld [vmem:[%s5020_s0 + $0xf0] sm:$0xff]  ;;  %s3010_s28 = sld [smem:[#allocation5 + %s2861_s2]]  ;;  %s2861_s2 = sphi %s2915_s2, %s56_s2  }
  0x1e   : > { %v2300_v1 = vld [vmem:[%s5020_s0 + $0xe0] sm:$0xff]  ;;  %v2948_v11 = vld [vmem:[%s5020_s0 + $0xe8] sm:$0xff]  ;;  %v2998_v38 = vld [vmem:[%s5020_s0 + $0x10] sm:$0xff] }
  0x1f   : > { %s58_s11 = sld [smem:[#allocation3 + %s57_s10]]  ;;  %s60_s12 = sadd.s32 1, %s57_s10  ;;  %v2301_v2 = vld [vmem:[%s5020_s0 + $0x1c0] sm:$0xff]  ;;  %v2957_v15 = vld [vmem:[%s5020_s0 + $0x1c8] sm:$0xff]  ;;  %v3007_v42 = vld [vmem:[%s5020_s0 + $0x1d0] sm:$0xff] }
  0x20   : > { %s61_s13 = sld [smem:[#allocation3 + %s60_s12]]  ;;  %s63_s14 = sadd.s32 2, %s57_s10  ;;  %v2308_v4 = vld [vmem:[%s5020_s0 + $0x2a0] sm:$0xff]  ;;  %v2976_v26 = vld [vmem:[%s5020_s0 + $0x2a8] sm:$0xff]  ;;  %v3026_v51 = vld [vmem:[%s5020_s0 + $0x2b0] sm:$0xff] }
  0x21   : > { %s64_s15 = sld [smem:[#allocation3 + %s63_s14]]  ;;  %s66_s16 = sadd.s32 3, %s57_s10  ;;  %v2311_v22 = vld [vmem:[%s5020_s0 + $0x380] sm:$0xff]  ;;  %v2312_v48 = vld [vmem:[%s5020_s0 + $0x388] sm:$0xff] }
  0x22   : > { %s67_s17 = sld [smem:[#allocation3 + %s66_s16]]  ;;  %s69_s18 = sadd.s32 4, %s57_s10 }
  0x23   : > { %s70_s19 = sld [smem:[#allocation3 + %s69_s18]]  ;;  %s72_s20 = sadd.s32 5, %s57_s10 }
  0x24   : > { %s73_s25 = sld [smem:[#allocation3 + %s72_s20]]  ;;  %s75_s26 = sadd.s32 6, %s57_s10 }
  0x25   : > { %v2930_v3 = vstv %s58_s11  ;;  %s76_s29 = sld [smem:[#allocation3 + %s75_s26]]  ;;  %s78_s30 = sadd.s32 7, %s57_s10 }
  0x26   : > { %v2935_v5 = vstv %s61_s13  ;;  %s79_s1 = sld [smem:[#allocation3 + %s78_s30]]  ;;  %s81_s12 = sadd.s32 8, %s57_s10  ;;  %v87_v6 = vmul.f32 %v86_v0, %v2930_v3  ;;  %v120_v8 = vmul.f32 %v2300_v1, %v2930_v3  ;;  %v144_v17 = vmul.f32 %v2301_v2, %v2930_v3 }
  0x27   : > { %v2942_v9 = vstv %s64_s15  ;;  %s82_s11 = sld [smem:[#allocation3 + %s81_s12]]  ;;  %v90_v10 = vmul.f32 %v2300_v1, %v2935_v5  ;;  %v121_v12 = vmul.f32 %v2301_v2, %v2935_v5  ;;  %v145_v27 = vmul.f32 %v2308_v4, %v2935_v5 }
  0x28   : > { %v2951_v13 = vstv %s67_s17  ;;  %v94_v14 = vmul.f32 %v2301_v2, %v2942_v9  ;;  %v125_v16 = vmul.f32 %v2308_v4, %v2942_v9  ;;  %v149_v35 = vmul.f32 %v2311_v22, %v2942_v9 }
  0x29   : > { %v2961_v18 = vstv %s70_s19  ;;  %v91_v19 = vadd.f32 %v90_v10, %v87_v6  ;;  %v98_v20 = vmul.f32 %v2302_v7, %v2951_v13  ;;  %v122_v21 = vadd.f32 %v121_v12, %v120_v8 }
  0x2a   : > { %v2967_v23 = vstv %s73_s25  ;;  %v102_v24 = vmul.f32 %v2948_v11, %v2961_v18  ;;  %v127_v25 = vmul.f32 %v2948_v11, %v2951_v13  ;;  %v129_v31 = vmul.f32 %v2957_v15, %v2961_v18 }
  0x2b   : > { %v2979_v28 = vstv %s76_s29  ;;  %v95_v29 = vadd.f32 %v94_v14, %v91_v19  ;;  %v126_v30 = vadd.f32 %v125_v16, %v122_v21  ;;  %v106_v33 = vmul.f32 %v2957_v15, %v2967_v23 }
  0x2c   : > { %v2983_v32 = vstv %s79_s1  ;;  %v133_v40 = vmul.f32 %v2976_v26, %v2967_v23  ;;  %v110_v41 = vmul.f32 %v2998_v38, %v2979_v28  ;;  %v146_v43 = vadd.f32 %v145_v27, %v144_v17  ;;  %v3053_v17 = vld [vmem:[%s5020_s0 + $0x390] sm:$0xff] }
  0x2d   : > { %v2993_v36 = vstv %s82_s11  ;;  %v99_v37 = vadd.f32 %v98_v20, %v95_v29  ;;  %v128_v39 = vadd.f32 %v127_v25, %v126_v30  ;;  %v135_v46 = vmul.f32 %v2990_v34, %v2979_v28  ;;  %v3067_v30 = vld [vmem:[%s5020_s0 + $0x18] sm:$0xff]  ;;  %s2324_s11 = sshll.u32 %s2861_s2, 6  ;;  %s56_s2 = sadd.s32 1, %s2861_s2  }
  0x2e   : > { %v151_v47 = vmul.f32 %v2957_v15, %v2951_v13  ;;  %v114_v49 = vmul.f32 %v2990_v34, %v2983_v32  ;;  %v118_v50 = vmul.f32 %v3007_v42, %v2993_v36  ;;  %v150_v52 = vadd.f32 %v149_v35, %v146_v43  ;;  %s3292_s15 = scalar_lea.vmem [#allocation2], %s2324_s11  ;;  %p53_p10 = scmp.ge.s32.totalorder %s56_s2, 10  }
  0x2f   : > { %v103_v44 = vadd.f32 %v102_v24, %v99_v37  ;;  %v130_v45 = vadd.f32 %v129_v31, %v128_v39  ;;  %v153_v53 = vmul.f32 %v2976_v26, %v2961_v18  ;;  %v137_v56 = vmul.f32 %v3007_v42, %v2983_v32  ;;  %v3072_v31 = vld [vmem:[%s5020_s0 + $0xf8] sm:$0xff] }
  0x30   : > { %v168_v57 = vmul.f32 %v2302_v7, %v2930_v3  ;;  %v152_v58 = vadd.f32 %v151_v47, %v150_v52  ;;  %v157_v59 = vmul.f32 %v2312_v48, %v2967_v23  ;;  %v169_v60 = vmul.f32 %v2948_v11, %v2935_v5 }
  0x31   : > { %v107_v54 = vadd.f32 %v106_v33, %v103_v44  ;;  %v134_v55 = vadd.f32 %v133_v40, %v130_v45  ;;  %v171_v61 = vmul.f32 %v2957_v15, %v2942_v9  ;;  %v141_v0 = vmul.f32 %v3026_v51, %v2993_v36  ;;  %v3087_v45 = vld [vmem:[%s5020_s0 + $0x1d8] sm:$0xff] }
  0x32   : > { %v159_v1 = vmul.f32 %v3007_v42, %v2979_v28  ;;  %v154_v2 = vadd.f32 %v153_v53, %v152_v58  ;;  %v161_v4 = vmul.f32 %v3026_v51, %v2983_v32  ;;  %v170_v6 = vadd.f32 %v169_v60, %v168_v57 }
  0x33   : > { %v111_v62 = vadd.f32 %v110_v41, %v107_v54  ;;  %v136_v63 = vadd.f32 %v135_v46, %v134_v55  ;;  %v173_v7 = vmul.f32 %v2998_v38, %v2951_v13  ;;  %v175_v12 = vmul.f32 %v2990_v34, %v2961_v18 }
  0x34   : > { %v192_v14 = vmul.f32 %v2948_v11, %v2930_v3  ;;  %v158_v16 = vadd.f32 %v157_v59, %v154_v2  ;;  %v172_v19 = vadd.f32 %v171_v61, %v170_v6  ;;  %v193_v20 = vmul.f32 %v2957_v15, %v2935_v5  ;;  %v3105_v59 = vld [vmem:[%s5020_s0 + $0x2b8] sm:$0xff] }
  0x35   : > { %v115_v8 = vadd.f32 %v114_v49, %v111_v62  ;;  %v138_v10 = vadd.f32 %v137_v56, %v136_v63  ;;  %v195_v21 = vmul.f32 %v2976_v26, %v2942_v9  ;;  %v3060_v22 = vstv %s3010_s28 }
  0x36   : > { %v177_v11 = vmul.f32 %v3007_v42, %v2967_v23  ;;  %v160_v27 = vadd.f32 %v159_v1, %v158_v16  ;;  %v174_v29 = vadd.f32 %v173_v7, %v172_v19  ;;  %v194_v33 = vadd.f32 %v193_v20, %v192_v14 }
  0x37   : > { %v119_v24 = vadd.f32 %v118_v50, %v115_v8  ;;  %v142_v25 = vadd.f32 %v141_v0, %v138_v10  ;;  %v197_v35 = vmul.f32 %v2990_v34, %v2951_v13  ;;  %v165_v37 = vmul.f32 %v3053_v17, %v2993_v36 }
  0x38   : > { %v181_v39 = vmul.f32 %v3067_v30, %v2979_v28  ;;  %v185_v40 = vmul.f32 %v3072_v31, %v2983_v32  ;;  %v199_v41 = vmul.f32 %v3007_v42, %v2961_v18  ;;  %v162_v43 = vadd.f32 %v161_v4, %v160_v27 }
  0x39   : > { %v176_v44 = vadd.f32 %v175_v12, %v174_v29  ;;  %v196_v46 = vadd.f32 %v195_v21, %v194_v33  ;;  %v212_v47 = vmul.f32 %v2957_v15, %v2930_v3  ;;  %v189_v49 = vmul.f32 %v3087_v45, %v2993_v36 }
  0x3a   : > { %v201_v50 = vmul.f32 %v3026_v51, %v2967_v23  ;;  %v213_v52 = vmul.f32 %v2976_v26, %v2935_v5  ;;  %v215_v53 = vmul.f32 %v2312_v48, %v2942_v9  ;;  %v143_v54 = vmax.f32 %v119_v24, %v142_v25 }
  0x3b   : > { %v178_v55 = vadd.f32 %v177_v11, %v176_v44  ;;  %v198_v56 = vadd.f32 %v197_v35, %v196_v46  ;;  %v203_v57 = vmul.f32 %v3072_v31, %v2979_v28  ;;  %v166_v58 = vadd.f32 %v165_v37, %v162_v43  ;;  %v3132_v11 = vld [vmem:[%s5020_s0 + $0x398] sm:$0xff]  ;;  %v3147_v43 = vld [vmem:[%s5020_s0 + $0x20] sm:$0xff] }
  0x3c   : > { %v205_v15 = vmul.f32 %v3087_v45, %v2983_v32  ;;  %v214_v60 = vadd.f32 %v213_v52, %v212_v47  ;;  %v217_v26 = vmul.f32 %v3007_v42, %v2951_v13  ;;  %v209_v62 = vmul.f32 %v3105_v59, %v2993_v36 }
  0x3d   : > { %v182_v48 = vadd.f32 %v181_v39, %v178_v55  ;;  %v200_v61 = vadd.f32 %v199_v41, %v198_v56  ;;  %v232_v63 = vmul.f32 %v2998_v38, %v2930_v3  ;;  %v219_v1 = vmul.f32 %v3026_v51, %v2961_v18  ;;  %v3158_v55 = vld [vmem:[%s5020_s0 + $0x100] sm:$0xff] }
  0x3e   : > { %v216_v0 = vadd.f32 %v215_v53, %v214_v60  ;;  %v233_v2 = vmul.f32 %v2990_v34, %v2935_v5  ;;  %v235_v4 = vmul.f32 %v3007_v42, %v2942_v9  ;;  %v221_v8 = vmul.f32 %v3053_v17, %v2967_v23  ;;  %v3163_v56 = vld [vmem:[%s5020_s0 + $0x1e0] sm:$0xff] }
  0x3f   : > { %v186_v6 = vadd.f32 %v185_v40, %v182_v48  ;;  %v202_v7 = vadd.f32 %v201_v50, %v200_v61  ;;  %v223_v10 = vmul.f32 %v3087_v45, %v2979_v28  ;;  %v167_v12 = vmax.f32 %v143_v54, %v166_v58 }
  0x40   : > { %v218_v38 = vadd.f32 %v217_v26, %v216_v0  ;;  %v234_v14 = vadd.f32 %v233_v2, %v232_v63  ;;  %v237_v16 = vmul.f32 %v3067_v30, %v2951_v13  ;;  %v239_v21 = vmul.f32 %v3072_v31, %v2961_v18 }
  0x41   : > { %v190_v19 = vadd.f32 %v189_v49, %v186_v6  ;;  %v204_v20 = vadd.f32 %v203_v57, %v202_v7  ;;  %v256_v24 = vmul.f32 %v2990_v34, %v2930_v3  ;;  %v257_v29 = vmul.f32 %v3007_v42, %v2935_v5 }
  0x42   : > { %v220_v25 = vadd.f32 %v219_v1, %v218_v38  ;;  %v236_v27 = vadd.f32 %v235_v4, %v234_v14  ;;  %v259_v33 = vmul.f32 %v3026_v51, %v2942_v9  ;;  %v225_v37 = vmul.f32 %v3105_v59, %v2983_v32 }
  0x43   : > { %v206_v35 = vadd.f32 %v205_v15, %v204_v20  ;;  %v229_v34 = vmul.f32 %v3132_v11, %v2993_v36  ;;  %v241_v39 = vmul.f32 %v3087_v45, %v2967_v23  ;;  %v258_v44 = vadd.f32 %v257_v29, %v256_v24  ;;  %v3196_v24 = vld [vmem:[%s5020_s0 + $0x2c0] sm:$0xff] }
  0x44   : > { %v222_v40 = vadd.f32 %v221_v8, %v220_v25  ;;  %v238_v41 = vadd.f32 %v237_v16, %v236_v27  ;;  %v261_v46 = vmul.f32 %v3072_v31, %v2951_v13  ;;  %v191_v47 = vmax.f32 %v167_v12, %v190_v19 }
  0x45   : > { %v210_v49 = vadd.f32 %v209_v62, %v206_v35  ;;  %v245_v50 = vmul.f32 %v3147_v43, %v2979_v28  ;;  %v263_v52 = vmul.f32 %v3087_v45, %v2961_v18  ;;  %v260_v57 = vadd.f32 %v259_v33, %v258_v44 }
  0x46   : > { %v224_v53 = vadd.f32 %v223_v10, %v222_v40  ;;  %v240_v54 = vadd.f32 %v239_v21, %v238_v41  ;;  %v276_v58 = vmul.f32 %v3007_v42, %v2930_v3  ;;  %v249_v15 = vmul.f32 %v3158_v55, %v2983_v32 }
  0x47   : > { %v253_v60 = vmul.f32 %v3163_v56, %v2993_v36  ;;  %v277_v26 = vmul.f32 %v3026_v51, %v2935_v5  ;;  %v279_v48 = vmul.f32 %v3053_v17, %v2942_v9  ;;  %v262_v63 = vadd.f32 %v261_v46, %v260_v57 }
  0x48   : > { %v226_v61 = vadd.f32 %v225_v37, %v224_v53  ;;  %v242_v62 = vadd.f32 %v241_v39, %v240_v54  ;;  %v265_v0 = vmul.f32 %v3105_v59, %v2967_v23  ;;  %v211_v1 = vmax.f32 %v191_v47, %v210_v49  ;;  %v3217_v53 = vld [vmem:[%s5020_s0 + $0x3a0] sm:$0xff] }
  0x49   : > { %v267_v42 = vmul.f32 %v3158_v55, %v2979_v28  ;;  %v278_v2 = vadd.f32 %v277_v26, %v276_v58  ;;  %v281_v4 = vmul.f32 %v3087_v45, %v2951_v13  ;;  %v264_v51 = vadd.f32 %v263_v52, %v262_v63 }
  0x4a   : > { %v230_v6 = vadd.f32 %v229_v34, %v226_v61  ;;  %v246_v7 = vadd.f32 %v245_v50, %v242_v62  ;;  %v283_v17 = vmul.f32 %v3105_v59, %v2961_v18  ;;  %v301_v10 = vmul.f32 %v3067_v30, %v2930_v3 }
  0x4b   : > { %v280_v8 = vadd.f32 %v279_v48, %v278_v2  ;;  %v303_v12 = vmul.f32 %v3072_v31, %v2935_v5  ;;  %v306_v38 = vmul.f32 %v3087_v45, %v2942_v9  ;;  %v266_v16 = vadd.f32 %v265_v0, %v264_v51 }
  0x4c   : > { %v250_v14 = vadd.f32 %v249_v15, %v246_v7  ;;  %v269_v19 = vmul.f32 %v3163_v56, %v2983_v32  ;;  %v285_v20 = vmul.f32 %v3132_v11, %v2967_v23  ;;  %v231_v21 = vmax.f32 %v211_v1, %v230_v6  ;;  %v3226_v15 = vld [vmem:[%s5020_s0 + $0x28] sm:$0xff] }
  0x4d   : > { %v282_v30 = vadd.f32 %v281_v4, %v280_v8  ;;  %v304_v25 = vadd.f32 %v303_v12, %v301_v10  ;;  %v309_v27 = vmul.f32 %v3147_v43, %v2951_v13  ;;  %v268_v33 = vadd.f32 %v267_v42, %v266_v16  ;;  %v3250_v8 = vld [vmem:[%s5020_s0 + $0x1e8] sm:$0xff] }
  0x4e   : > { %v254_v29 = vadd.f32 %v253_v60, %v250_v14  ;;  %v273_v35 = vmul.f32 %v3196_v24, %v2993_v36  ;;  %v287_v37 = vmul.f32 %v3163_v56, %v2979_v28  ;;  %v312_v40 = vmul.f32 %v3158_v55, %v2961_v18  ;;  %v3231_v60 = vld [vmem:[%s5020_s0 + $0x108] sm:$0xff] }
  0x4f   : > { %v284_v34 = vadd.f32 %v283_v17, %v282_v30  ;;  %v307_v39 = vadd.f32 %v306_v38, %v304_v25  ;;  %v329_v41 = vmul.f32 %v3072_v31, %v2930_v3  ;;  %v270_v44 = vadd.f32 %v269_v19, %v268_v33  ;;  %v3264_v16 = vld [vmem:[%s5020_s0 + $0x2c8] sm:$0xff] }
  0x50   : > { %v289_v46 = vmul.f32 %v3196_v24, %v2983_v32  ;;  %v330_v47 = vmul.f32 %v3087_v45, %v2935_v5  ;;  %v333_v49 = vmul.f32 %v3105_v59, %v2942_v9  ;;  %v255_v50 = vmax.f32 %v231_v21, %v254_v29 }
  0x51   : > { %v286_v52 = vadd.f32 %v285_v20, %v284_v34  ;;  %v310_v54 = vadd.f32 %v309_v27, %v307_v39  ;;  %v315_v31 = vmul.f32 %v3163_v56, %v2967_v23  ;;  %v274_v57 = vadd.f32 %v273_v35, %v270_v44  ;;  %v3286_v44 = vld [vmem:[%s5020_s0 + $0x3a8] sm:$0xff] }
  0x52   : > { %v293_v58 = vmul.f32 %v3217_v53, %v2993_v36  ;;  %v331_v26 = vadd.f32 %v330_v47, %v329_v41  ;;  %v335_v48 = vmul.f32 %v3158_v55, %v2951_v13  ;;  %v319_v63 = vmul.f32 %v3226_v15, %v2979_v28 }
  0x53   : > { %v288_v61 = vadd.f32 %v287_v37, %v286_v52  ;;  %v313_v62 = vadd.f32 %v312_v40, %v310_v54  ;;  %v323_v0 = vmul.f32 %v3231_v60, %v2983_v32  ;;  %v337_v42 = vmul.f32 %v3163_v56, %v2961_v18 }
  0x54   : > { %v334_v1 = vadd.f32 %v333_v49, %v331_v26  ;;  %v351_v2 = vmul.f32 %v3087_v45, %v2930_v3  ;;  %v352_v4 = vmul.f32 %v3105_v59, %v2935_v5  ;;  %v275_v6 = vmax.f32 %v255_v50, %v274_v57 }
  0x55   : > { %v290_v7 = vadd.f32 %v289_v46, %v288_v61  ;;  %v316_v51 = vadd.f32 %v315_v31, %v313_v62  ;;  %v355_v17 = vmul.f32 %v3132_v11, %v2942_v9  ;;  %v340_v12 = vmul.f32 %v3196_v24, %v2967_v23 }
  0x56   : > { %v336_v10 = vadd.f32 %v335_v48, %v334_v1  ;;  %v353_v38 = vadd.f32 %v352_v4, %v351_v2  ;;  %v357_v45 = vmul.f32 %v3163_v56, %v2951_v13  ;;  %v327_v14 = vmul.f32 %v3250_v8, %v2993_v36 }
  0x57   : > { %v294_v59 = vadd.f32 %v293_v58, %v290_v7  ;;  %v342_v11 = vmul.f32 %v3231_v60, %v2979_v28  ;;  %v359_v19 = vmul.f32 %v3196_v24, %v2961_v18  ;;  %v320_v20 = vadd.f32 %v319_v63, %v316_v51 }
  0x58   : > { %v338_v21 = vadd.f32 %v337_v42, %v336_v10  ;;  %v356_v30 = vadd.f32 %v355_v17, %v353_v38  ;;  %v373_v25 = vmul.f32 %v3147_v43, %v2930_v3  ;;  %v344_v29 = vmul.f32 %v3250_v8, %v2983_v32  ;;  %v3310_v42 = vld [vmem:[%s5020_s0 + $0x30] sm:$0xff] }
  0x59   : > { %v295_v27 = vmax.f32 %v275_v6, %v294_v59  ;;  %v374_v33 = vmul.f32 %v3158_v55, %v2935_v5  ;;  %v376_v35 = vmul.f32 %v3163_v56, %v2942_v9  ;;  %v348_v34 = vmul.f32 %v3264_v16, %v2993_v36 }
  0x5a   : > { %v341_v37 = vadd.f32 %v340_v12, %v338_v21  ;;  %v358_v39 = vadd.f32 %v357_v45, %v356_v30  ;;  %v362_v40 = vmul.f32 %v3217_v53, %v2967_v23  ;;  %v364_v41 = vmul.f32 %v3250_v8, %v2979_v28  ;;  %v3321_v12 = vld [vmem:[%s5020_s0 + $0x110] sm:$0xff] }
  0x5b   : > { %v296_v43 = vadd.f32 %v295_v27, %v3060_v22  ;;  %v375_v46 = vadd.f32 %v374_v33, %v373_v25  ;;  %v378_v47 = vmul.f32 %v3226_v15, %v2951_v13  ;;  %v324_v49 = vadd.f32 %v323_v0, %v320_v20 }
  0x5c   : > { %v343_v50 = vadd.f32 %v342_v11, %v341_v37  ;;  %v360_v52 = vadd.f32 %v359_v19, %v358_v39  ;;  %v366_v54 = vmul.f32 %v3264_v16, %v2983_v32  ;;  %v380_v57 = vmul.f32 %v3231_v60, %v2961_v18  ;;  %v3330_v11 = vld [vmem:[%s5020_s0 + $0x1f0] sm:$0xff] }
  0x5d   : > { %299 = vst [vmem:[%s3292_s15] sm:$0xff] %v296_v43  ;;  %v377_v31 = vadd.f32 %v376_v35, %v375_v46  ;;  %v397_v58 = vmul.f32 %v3158_v55, %v2930_v3  ;;  %v398_v26 = vmul.f32 %v3163_v56, %v2935_v5  ;;  %v370_v62 = vmul.f32 %v3286_v44, %v2993_v36  ;;  %v3349_v39 = vld [vmem:[%s5020_s0 + $0x2d0] sm:$0xff] }
  0x5e   : > { %v345_v48 = vadd.f32 %v344_v29, %v343_v50  ;;  %v363_v61 = vadd.f32 %v362_v40, %v360_v52  ;;  %v400_v63 = vmul.f32 %v3196_v24, %v2942_v9  ;;  %v382_v1 = vmul.f32 %v3250_v8, %v2967_v23 }
  0x5f   : > { %v379_v0 = vadd.f32 %v378_v47, %v377_v31  ;;  %v399_v55 = vadd.f32 %v398_v26, %v397_v58  ;;  %v402_v2 = vmul.f32 %v3231_v60, %v2951_v13  ;;  %v328_v4 = vadd.f32 %v327_v14, %v324_v49 }
  0x60   : > { %v365_v6 = vadd.f32 %v364_v41, %v363_v61  ;;  %v386_v7 = vmul.f32 %v3310_v42, %v2979_v28  ;;  %v404_v51 = vmul.f32 %v3250_v8, %v2961_v18  ;;  %v349_v17 = vadd.f32 %v348_v34, %v345_v48 }
  0x61   : > { %v381_v10 = vadd.f32 %v380_v57, %v379_v0  ;;  %v401_v38 = vadd.f32 %v400_v63, %v399_v55  ;;  %v417_v45 = vmul.f32 %v3163_v56, %v2930_v3  ;;  %v390_v14 = vmul.f32 %v3321_v12, %v2983_v32 }
  0x62   : > { %v367_v59 = vadd.f32 %v366_v54, %v365_v6  ;;  %v418_v19 = vmul.f32 %v3196_v24, %v2935_v5  ;;  %v420_v20 = vmul.f32 %v3217_v53, %v2942_v9  ;;  %v394_v30 = vmul.f32 %v3330_v11, %v2993_v36 }
  0x63   : > { %v383_v21 = vadd.f32 %v382_v1, %v381_v10  ;;  %v403_v56 = vadd.f32 %v402_v2, %v401_v38  ;;  %v406_v25 = vmul.f32 %v3264_v16, %v2967_v23  ;;  %v408_v27 = vmul.f32 %v3321_v12, %v2979_v28 }
  0x64   : > { %v410_v29 = vmul.f32 %v3330_v11, %v2983_v32  ;;  %v419_v33 = vadd.f32 %v418_v19, %v417_v45  ;;  %v422_v24 = vmul.f32 %v3250_v8, %v2951_v13  ;;  %v350_v35 = vmax.f32 %v328_v4, %v349_v17  ;;  %v3376_v4 = vld [vmem:[%s5020_s0 + $0x3b0] sm:$0xff] }
  0x65   : > { %v371_v53 = vadd.f32 %v370_v62, %v367_v59  ;;  %v387_v37 = vadd.f32 %v386_v7, %v383_v21  ;;  %v405_v34 = vadd.f32 %v404_v51, %v403_v56  ;;  %v424_v43 = vmul.f32 %v3264_v16, %v2961_v18  ;;  %v3389_v59 = vld [vmem:[%s5020_s0 + $0x38] sm:$0xff] }
  0x66   : > { %v421_v40 = vadd.f32 %v420_v20, %v419_v33  ;;  %v437_v41 = vmul.f32 %v3226_v15, %v2930_v3  ;;  %v438_v46 = vmul.f32 %v3231_v60, %v2935_v5  ;;  %v414_v50 = vmul.f32 %v3349_v39, %v2993_v36 }
  0x67   : > { %v391_v47 = vadd.f32 %v390_v14, %v387_v37  ;;  %v407_v49 = vadd.f32 %v406_v25, %v405_v34  ;;  %v440_v52 = vmul.f32 %v3250_v8, %v2942_v9  ;;  %v426_v31 = vmul.f32 %v3286_v44, %v2967_v23  ;;  %v3394_v14 = vld [vmem:[%s5020_s0 + $0x118] sm:$0xff] }
  0x68   : > { %v423_v54 = vadd.f32 %v422_v24, %v421_v40  ;;  %v439_v57 = vadd.f32 %v438_v46, %v437_v41  ;;  %v442_v58 = vmul.f32 %v3310_v42, %v2951_v13  ;;  %v372_v15 = vmax.f32 %v350_v35, %v371_v53 }
  0x69   : > { %v395_v26 = vadd.f32 %v394_v30, %v391_v47  ;;  %v409_v48 = vadd.f32 %v408_v27, %v407_v49  ;;  %v428_v61 = vmul.f32 %v3330_v11, %v2979_v28  ;;  %v444_v0 = vmul.f32 %v3321_v12, %v2961_v18 }
  0x6a   : > { %v425_v62 = vadd.f32 %v424_v43, %v423_v54  ;;  %v441_v63 = vadd.f32 %v440_v52, %v439_v57  ;;  %v461_v1 = vmul.f32 %v3231_v60, %v2930_v3  ;;  %v430_v2 = vmul.f32 %v3349_v39, %v2983_v32  ;;  %v3415_v43 = vld [vmem:[%s5020_s0 + $0x1f8] sm:$0xff] }
  0x6b   : > { %v411_v55 = vadd.f32 %v410_v29, %v409_v48  ;;  %v462_v6 = vmul.f32 %v3250_v8, %v2935_v5  ;;  %v464_v7 = vmul.f32 %v3264_v16, %v2942_v9  ;;  %v434_v17 = vmul.f32 %v3376_v4, %v2993_v36 }
  0x6c   : > { %v427_v51 = vadd.f32 %v426_v31, %v425_v62  ;;  %v443_v60 = vadd.f32 %v442_v58, %v441_v63  ;;  %v446_v10 = vmul.f32 %v3330_v11, %v2967_v23  ;;  %v396_v38 = vmax.f32 %v372_v15, %v395_v26  ;;  %v3436_v62 = vld [vmem:[%s5020_s0 + $0x2d8] sm:$0xff] }
  0x6d   : > { %v415_v45 = vadd.f32 %v414_v50, %v411_v55  ;;  %v463_v19 = vadd.f32 %v462_v6, %v461_v1  ;;  %v466_v20 = vmul.f32 %v3321_v12, %v2951_v13  ;;  %v450_v56 = vmul.f32 %v3389_v59, %v2979_v28 }
  0x6e   : > { %v429_v21 = vadd.f32 %v428_v61, %v427_v51  ;;  %v445_v30 = vadd.f32 %v444_v0, %v443_v60  ;;  %v454_v25 = vmul.f32 %v3394_v14, %v2983_v32  ;;  %v468_v29 = vmul.f32 %v3330_v11, %v2961_v18 }
  0x6f   : > { %v465_v27 = vadd.f32 %v464_v7, %v463_v19  ;;  %v481_v33 = vmul.f32 %v3250_v8, %v2930_v3  ;;  %v482_v24 = vmul.f32 %v3264_v16, %v2935_v5  ;;  %v470_v37 = vmul.f32 %v3349_v39, %v2967_v23 }
  0x70   : > { %v431_v35 = vadd.f32 %v430_v2, %v429_v21  ;;  %v447_v53 = vadd.f32 %v446_v10, %v445_v30  ;;  %v484_v34 = vmul.f32 %v3286_v44, %v2942_v9  ;;  %v416_v40 = vmax.f32 %v396_v38, %v415_v45 }
  0x71   : > { %v467_v41 = vadd.f32 %v466_v20, %v465_v27  ;;  %v483_v46 = vadd.f32 %v482_v24, %v481_v33  ;;  %v486_v8 = vmul.f32 %v3330_v11, %v2951_v13  ;;  %v458_v49 = vmul.f32 %v3415_v43, %v2993_v36 }
  0x72   : > { %v435_v16 = vadd.f32 %v434_v17, %v431_v35  ;;  %v451_v47 = vadd.f32 %v450_v56, %v447_v53  ;;  %v472_v50 = vmul.f32 %v3394_v14, %v2979_v28  ;;  %v488_v54 = vmul.f32 %v3349_v39, %v2961_v18  ;;  %v3459_v56 = vld [vmem:[%s5020_s0 + $0x3b8] sm:$0xff] }
  0x73   : > { %v469_v44 = vadd.f32 %v468_v29, %v467_v41  ;;  %v485_v52 = vadd.f32 %v484_v34, %v483_v46  ;;  %v504_v31 = vmul.f32 %v3310_v42, %v2930_v3  ;;  %v474_v58 = vmul.f32 %v3415_v43, %v2983_v32 }
  0x74   : > { %v455_v57 = vadd.f32 %v454_v25, %v451_v47  ;;  %v506_v15 = vmul.f32 %v3321_v12, %v2935_v5  ;;  %v509_v26 = vmul.f32 %v3330_v11, %v2942_v9  ;;  %v436_v48 = vmax.f32 %v416_v40, %v435_v16  ;;  %v3481_v47 = vld [vmem:[%s5020_s0 + $0x120] sm:$0xff] }
  0x75   : > { %v471_v61 = vadd.f32 %v470_v37, %v469_v44  ;;  %v487_v63 = vadd.f32 %v486_v8, %v485_v52  ;;  %v490_v42 = vmul.f32 %v3376_v4, %v2967_v23  ;;  %v478_v1 = vmul.f32 %v3436_v62, %v2993_v36 }
  0x76   : > { %v459_v0 = vadd.f32 %v458_v49, %v455_v57  ;;  %v507_v55 = vadd.f32 %v506_v15, %v504_v31  ;;  %v512_v2 = vmul.f32 %v3389_v59, %v2951_v13  ;;  %v492_v51 = vmul.f32 %v3415_v43, %v2979_v28 }
  0x77   : > { %v473_v6 = vadd.f32 %v472_v50, %v471_v61  ;;  %v489_v7 = vadd.f32 %v488_v54, %v487_v63  ;;  %v494_v17 = vmul.f32 %v3436_v62, %v2983_v32  ;;  %v515_v10 = vmul.f32 %v3394_v14, %v2961_v18 }
  0x78   : > { %v510_v60 = vadd.f32 %v509_v26, %v507_v55  ;;  %v532_v38 = vmul.f32 %v3321_v12, %v2930_v3  ;;  %v533_v45 = vmul.f32 %v3330_v11, %v2935_v5  ;;  %v460_v19 = vmax.f32 %v436_v48, %v459_v0  ;;  %v3466_v12 = vld [vmem:[%s5020_s0 + $0x40] sm:$0xff] }
  0x79   : > { %v475_v20 = vadd.f32 %v474_v58, %v473_v6  ;;  %v491_v21 = vadd.f32 %v490_v42, %v489_v7  ;;  %v536_v30 = vmul.f32 %v3349_v39, %v2942_v9  ;;  %v518_v27 = vmul.f32 %v3415_v43, %v2967_v23  ;;  %v3507_v42 = vld [vmem:[%s5020_s0 + $0x2e0] sm:$0xff] }
  0x7a   : > { %v513_v25 = vadd.f32 %v512_v2, %v510_v60  ;;  %v534_v29 = vadd.f32 %v533_v45, %v532_v38  ;;  %v538_v33 = vmul.f32 %v3394_v14, %v2951_v13  ;;  %v498_v53 = vmul.f32 %v3459_v56, %v2993_v36 }
  0x7b   : > { %v479_v24 = vadd.f32 %v478_v1, %v475_v20  ;;  %v493_v35 = vadd.f32 %v492_v51, %v491_v21  ;;  %v522_v37 = vmul.f32 %v3466_v12, %v2979_v28  ;;  %v540_v41 = vmul.f32 %v3415_v43, %v2961_v18  ;;  %v3529_v21 = vld [vmem:[%s5020_s0 + $0x3c0] sm:$0xff] }
  0x7c   : > { %v516_v34 = vadd.f32 %v515_v10, %v513_v25  ;;  %v537_v40 = vadd.f32 %v536_v30, %v534_v29  ;;  %v554_v46 = vmul.f32 %v3330_v11, %v2930_v3  ;;  %v555_v49 = vmul.f32 %v3349_v39, %v2935_v5  ;;  %v3492_v11 = vld [vmem:[%s5020_s0 + $0x200] sm:$0xff] }
  0x7d   : > { %v480_v8 = vmax.f32 %v460_v19, %v479_v24  ;;  %v495_v16 = vadd.f32 %v494_v17, %v493_v35  ;;  %v558_v50 = vmul.f32 %v3376_v4, %v2942_v9  ;;  %v526_v52 = vmul.f32 %v3481_v47, %v2983_v32 }
  0x7e   : > { %v519_v44 = vadd.f32 %v518_v27, %v516_v34  ;;  %v539_v54 = vadd.f32 %v538_v33, %v537_v40  ;;  %v543_v31 = vmul.f32 %v3436_v62, %v2967_v23  ;;  %v530_v39 = vmul.f32 %v3492_v11, %v2993_v36 }
  0x7f   : > { %v499_v57 = vadd.f32 %v498_v53, %v495_v16  ;;  %v556_v58 = vadd.f32 %v555_v49, %v554_v46  ;;  %v560_v4 = vmul.f32 %v3415_v43, %v2951_v13  ;;  %v545_v48 = vmul.f32 %v3481_v47, %v2979_v28  ;;  %v3549_v46 = vld [vmem:[%s5020_s0 + $0x48] sm:$0xff] }
  0x80   : > { %v523_v15 = vadd.f32 %v522_v37, %v519_v44  ;;  %v541_v26 = vadd.f32 %v540_v41, %v539_v54  ;;  %v562_v61 = vmul.f32 %v3436_v62, %v2961_v18  ;;  %v576_v1 = vmul.f32 %v3389_v59, %v2930_v3  ;;  %v3556_v16 = vld [vmem:[%s5020_s0 + $0x128] sm:$0xff] }
  0x81   : > { %v500_v63 = vmax.f32 %v480_v8, %v499_v57  ;;  %v559_v0 = vadd.f32 %v558_v50, %v556_v58  ;;  %v577_v55 = vmul.f32 %v3394_v14, %v2935_v5  ;;  %v547_v6 = vmul.f32 %v3492_v11, %v2983_v32  ;;  %v3565_v57 = vld [vmem:[%s5020_s0 + $0x208] sm:$0xff] }
  0x82   : > { %v544_v2 = vadd.f32 %v543_v31, %v541_v26  ;;  %v565_v7 = vmul.f32 %v3459_v56, %v2967_v23  ;;  %v579_v51 = vmul.f32 %v3415_v43, %v2942_v9  ;;  %v581_v59 = vmul.f32 %v3466_v12, %v2951_v13 }
  0x83   : > { %v501_v17 = vadd.f32 %v500_v63, %v3060_v22  ;;  %v561_v60 = vadd.f32 %v560_v4, %v559_v0  ;;  %v578_v10 = vadd.f32 %v577_v55, %v576_v1  ;;  %v527_v38 = vadd.f32 %v526_v52, %v523_v15 }
  0x84   : > { %v546_v45 = vadd.f32 %v545_v48, %v544_v2  ;;  %v551_v19 = vmul.f32 %v3507_v42, %v2993_v36  ;;  %v567_v20 = vmul.f32 %v3492_v11, %v2979_v28  ;;  %v569_v25 = vmul.f32 %v3507_v42, %v2983_v32 }
  0x85   : > { %502 = vst [vmem:[%s3292_s15 + $0x8] sm:$0xff] %v501_v17  ;;  %v563_v30 = vadd.f32 %v562_v61, %v561_v60  ;;  %v580_v27 = vadd.f32 %v579_v51, %v578_v10  ;;  %v583_v29 = vmul.f32 %v3481_v47, %v2961_v18  ;;  %v600_v24 = vmul.f32 %v3394_v14, %v2930_v3 }
  0x86   : > { %v548_v33 = vadd.f32 %v547_v6, %v546_v45  ;;  %v601_v35 = vmul.f32 %v3415_v43, %v2935_v5  ;;  %v603_v53 = vmul.f32 %v3436_v62, %v2942_v9  ;;  %v573_v34 = vmul.f32 %v3529_v21, %v2993_v36 }
  0x87   : > { %v566_v37 = vadd.f32 %v565_v7, %v563_v30  ;;  %v582_v40 = vadd.f32 %v581_v59, %v580_v27  ;;  %v585_v41 = vmul.f32 %v3492_v11, %v2967_v23  ;;  %v531_v14 = vadd.f32 %v530_v39, %v527_v38  ;;  %v3592_v38 = vld [vmem:[%s5020_s0 + $0x2e8] sm:$0xff] }
  0x88   : > { %v589_v8 = vmul.f32 %v3549_v46, %v2979_v28  ;;  %v602_v49 = vadd.f32 %v601_v35, %v600_v24  ;;  %v605_v50 = vmul.f32 %v3481_v47, %v2951_v13  ;;  %v552_v44 = vadd.f32 %v551_v19, %v548_v33 }
  0x89   : > { %v568_v52 = vadd.f32 %v567_v20, %v566_v37  ;;  %v584_v54 = vadd.f32 %v583_v29, %v582_v40  ;;  %v593_v31 = vmul.f32 %v3556_v16, %v2983_v32  ;;  %v607_v58 = vmul.f32 %v3492_v11, %v2961_v18  ;;  %v3611_v40 = vld [vmem:[%s5020_s0 + $0x3c8] sm:$0xff] }
  0x8a   : > { %v604_v39 = vadd.f32 %v603_v53, %v602_v49  ;;  %v620_v4 = vmul.f32 %v3415_v43, %v2930_v3  ;;  %v621_v15 = vmul.f32 %v3436_v62, %v2935_v5  ;;  %v597_v61 = vmul.f32 %v3565_v57, %v2993_v36 }
  0x8b   : > { %v570_v26 = vadd.f32 %v569_v25, %v568_v52  ;;  %v586_v48 = vadd.f32 %v585_v41, %v584_v54  ;;  %v623_v63 = vmul.f32 %v3459_v56, %v2942_v9  ;;  %v609_v1 = vmul.f32 %v3507_v42, %v2967_v23 }
  0x8c   : > { %v606_v0 = vadd.f32 %v605_v50, %v604_v39  ;;  %v622_v55 = vadd.f32 %v621_v15, %v620_v4  ;;  %v625_v2 = vmul.f32 %v3492_v11, %v2951_v13  ;;  %v553_v43 = vmax.f32 %v531_v14, %v552_v44 }
  0x8d   : > { %v590_v6 = vadd.f32 %v589_v8, %v586_v48  ;;  %v611_v62 = vmul.f32 %v3556_v16, %v2979_v28  ;;  %v627_v7 = vmul.f32 %v3507_v42, %v2961_v18  ;;  %v574_v51 = vadd.f32 %v573_v34, %v570_v26 }
  0x8e   : > { %v608_v17 = vadd.f32 %v607_v58, %v606_v0  ;;  %v624_v60 = vadd.f32 %v623_v63, %v622_v55  ;;  %v640_v56 = vmul.f32 %v3466_v12, %v2930_v3  ;;  %v613_v59 = vmul.f32 %v3565_v57, %v2983_v32  ;;  %v3628_v58 = vld [vmem:[%s5020_s0 + $0x50] sm:$0xff] }
  0x8f   : > { %v594_v10 = vadd.f32 %v593_v31, %v590_v6  ;;  %v641_v45 = vmul.f32 %v3481_v47, %v2935_v5  ;;  %v643_v19 = vmul.f32 %v3492_v11, %v2942_v9  ;;  %v617_v30 = vmul.f32 %v3592_v38, %v2993_v36  ;;  %v3637_v0 = vld [vmem:[%s5020_s0 + $0x130] sm:$0xff] }
  0x90   : > { %v610_v20 = vadd.f32 %v609_v1, %v608_v17  ;;  %v626_v12 = vadd.f32 %v625_v2, %v624_v60  ;;  %v629_v25 = vmul.f32 %v3529_v21, %v2967_v23  ;;  %v631_v27 = vmul.f32 %v3565_v57, %v2979_v28 }
  0x91   : > { %v633_v29 = vmul.f32 %v3592_v38, %v2983_v32  ;;  %v642_v33 = vadd.f32 %v641_v45, %v640_v56  ;;  %v645_v24 = vmul.f32 %v3549_v46, %v2951_v13  ;;  %v575_v35 = vmax.f32 %v553_v43, %v574_v51 }
  0x92   : > { %v598_v53 = vadd.f32 %v597_v61, %v594_v10  ;;  %v612_v37 = vadd.f32 %v611_v62, %v610_v20  ;;  %v628_v34 = vadd.f32 %v627_v7, %v626_v12  ;;  %v647_v14 = vmul.f32 %v3556_v16, %v2961_v18  ;;  %v3648_v62 = vld [vmem:[%s5020_s0 + $0x210] sm:$0xff] }
  0x93   : > { %v644_v41 = vadd.f32 %v643_v19, %v642_v33  ;;  %v664_v8 = vmul.f32 %v3481_v47, %v2930_v3  ;;  %v665_v49 = vmul.f32 %v3492_v11, %v2935_v5  ;;  %v637_v52 = vmul.f32 %v3611_v40, %v2993_v36 }
  0x94   : > { %v614_v50 = vadd.f32 %v613_v59, %v612_v37  ;;  %v630_v44 = vadd.f32 %v629_v25, %v628_v34  ;;  %v667_v54 = vmul.f32 %v3507_v42, %v2942_v9  ;;  %v649_v39 = vmul.f32 %v3565_v57, %v2967_v23  ;;  %v3677_v34 = vld [vmem:[%s5020_s0 + $0x2f0] sm:$0xff] }
  0x95   : > { %v646_v31 = vadd.f32 %v645_v24, %v644_v41  ;;  %v666_v47 = vadd.f32 %v665_v49, %v664_v8  ;;  %v669_v4 = vmul.f32 %v3556_v16, %v2951_v13  ;;  %v599_v15 = vmax.f32 %v575_v35, %v598_v53 }
  0x96   : > { %v618_v26 = vadd.f32 %v617_v30, %v614_v50  ;;  %v632_v48 = vadd.f32 %v631_v27, %v630_v44  ;;  %v653_v61 = vmul.f32 %v3628_v58, %v2979_v28  ;;  %v671_v55 = vmul.f32 %v3565_v57, %v2961_v18 }
  0x97   : > { %v648_v63 = vadd.f32 %v647_v14, %v646_v31  ;;  %v668_v1 = vadd.f32 %v667_v54, %v666_v47  ;;  %v684_v2 = vmul.f32 %v3492_v11, %v2930_v3  ;;  %v657_v6 = vmul.f32 %v3637_v0, %v2983_v32 }
  0x98   : > { %v634_v43 = vadd.f32 %v633_v29, %v632_v48  ;;  %v685_v7 = vmul.f32 %v3507_v42, %v2935_v5  ;;  %v687_v51 = vmul.f32 %v3529_v21, %v2942_v9  ;;  %v661_v60 = vmul.f32 %v3648_v62, %v2993_v36 }
  0x99   : > { %v650_v17 = vadd.f32 %v649_v39, %v648_v63  ;;  %v670_v11 = vadd.f32 %v669_v4, %v668_v1  ;;  %v673_v56 = vmul.f32 %v3592_v38, %v2967_v23  ;;  %v619_v10 = vmax.f32 %v599_v15, %v618_v26  ;;  %v3698_v63 = vld [vmem:[%s5020_s0 + $0x3d0] sm:$0xff] }
  0x9a   : > { %v638_v59 = vadd.f32 %v637_v52, %v634_v43  ;;  %v686_v45 = vadd.f32 %v685_v7, %v684_v2  ;;  %v689_v19 = vmul.f32 %v3565_v57, %v2951_v13  ;;  %v675_v42 = vmul.f32 %v3637_v0, %v2979_v28  ;;  %v3707_v43 = vld [vmem:[%s5020_s0 + $0x58] sm:$0xff] }
  0x9b   : > { %v654_v20 = vadd.f32 %v653_v61, %v650_v17  ;;  %v672_v30 = vadd.f32 %v671_v55, %v670_v11  ;;  %v677_v21 = vmul.f32 %v3648_v62, %v2983_v32  ;;  %v691_v25 = vmul.f32 %v3592_v38, %v2961_v18 }
  0x9c   : > { %v688_v12 = vadd.f32 %v687_v51, %v686_v45  ;;  %v707_v27 = vmul.f32 %v3549_v46, %v2930_v3  ;;  %v709_v29 = vmul.f32 %v3556_v16, %v2935_v5  ;;  %v693_v35 = vmul.f32 %v3611_v40, %v2967_v23 }
  0x9d   : > { %v658_v33 = vadd.f32 %v657_v6, %v654_v20  ;;  %v674_v24 = vadd.f32 %v673_v56, %v672_v30  ;;  %v712_v53 = vmul.f32 %v3565_v57, %v2942_v9  ;;  %v639_v37 = vmax.f32 %v619_v10, %v638_v59  ;;  %v3712_v6 = vld [vmem:[%s5020_s0 + $0x138] sm:$0xff] }
  0x9e   : > { %v690_v41 = vadd.f32 %v689_v19, %v688_v12  ;;  %v710_v14 = vadd.f32 %v709_v29, %v707_v27  ;;  %v715_v46 = vmul.f32 %v3628_v58, %v2951_v13  ;;  %v681_v50 = vmul.f32 %v3677_v34, %v2993_v36  ;;  %v3731_v12 = vld [vmem:[%s5020_s0 + $0x218] sm:$0xff] }
  0x9f   : > { %v662_v8 = vadd.f32 %v661_v60, %v658_v33  ;;  %v676_v49 = vadd.f32 %v675_v42, %v674_v24  ;;  %v695_v44 = vmul.f32 %v3648_v62, %v2979_v28  ;;  %v718_v31 = vmul.f32 %v3637_v0, %v2961_v18  ;;  %v3744_v24 = vld [vmem:[%s5020_s0 + $0x2f8] sm:$0xff] }
  0xa0   : > { %v692_v52 = vadd.f32 %v691_v25, %v690_v41  ;;  %v713_v54 = vadd.f32 %v712_v53, %v710_v14  ;;  %v735_v39 = vmul.f32 %v3556_v16, %v2930_v3  ;;  %v697_v4 = vmul.f32 %v3677_v34, %v2983_v32 }
  0xa1   : > { %v678_v47 = vadd.f32 %v677_v21, %v676_v49  ;;  %v736_v15 = vmul.f32 %v3565_v57, %v2935_v5  ;;  %v739_v26 = vmul.f32 %v3592_v38, %v2942_v9  ;;  %v663_v48 = vmax.f32 %v639_v37, %v662_v8 }
  0xa2   : > { %v694_v61 = vadd.f32 %v693_v35, %v692_v52  ;;  %v716_v1 = vadd.f32 %v715_v46, %v713_v54  ;;  %v721_v16 = vmul.f32 %v3648_v62, %v2967_v23  ;;  %v701_v2 = vmul.f32 %v3698_v63, %v2993_v36 }
  0xa3   : > { %v682_v55 = vadd.f32 %v681_v50, %v678_v47  ;;  %v737_v7 = vadd.f32 %v736_v15, %v735_v39  ;;  %v741_v51 = vmul.f32 %v3637_v0, %v2951_v13  ;;  %v725_v11 = vmul.f32 %v3707_v43, %v2979_v28  ;;  %v3766_v47 = vld [vmem:[%s5020_s0 + $0x3d8] sm:$0xff] }
  0xa4   : > { %v696_v17 = vadd.f32 %v695_v44, %v694_v61  ;;  %v719_v60 = vadd.f32 %v718_v31, %v716_v1  ;;  %v729_v56 = vmul.f32 %v3712_v6, %v2983_v32  ;;  %v743_v59 = vmul.f32 %v3648_v62, %v2961_v18 }
  0xa5   : > { %v740_v10 = vadd.f32 %v739_v26, %v737_v7  ;;  %v757_v45 = vmul.f32 %v3565_v57, %v2930_v3  ;;  %v758_v19 = vmul.f32 %v3592_v38, %v2935_v5  ;;  %v683_v20 = vmax.f32 %v663_v48, %v682_v55 }
  0xa6   : > { %v698_v30 = vadd.f32 %v697_v4, %v696_v17  ;;  %v722_v42 = vadd.f32 %v721_v16, %v719_v60  ;;  %v761_v21 = vmul.f32 %v3611_v40, %v2942_v9  ;;  %v746_v27 = vmul.f32 %v3677_v34, %v2967_v23 }
  0xa7   : > { %v742_v25 = vadd.f32 %v741_v51, %v740_v10  ;;  %v759_v29 = vadd.f32 %v758_v19, %v757_v45  ;;  %v763_v57 = vmul.f32 %v3648_v62, %v2951_v13  ;;  %v733_v33 = vmul.f32 %v3731_v12, %v2993_v36 }
  0xa8   : > { %v702_v38 = vadd.f32 %v701_v2, %v698_v30  ;;  %v748_v40 = vmul.f32 %v3712_v6, %v2979_v28  ;;  %v765_v35 = vmul.f32 %v3677_v34, %v2961_v18  ;;  %v726_v53 = vadd.f32 %v725_v11, %v722_v42 }
  0xa9   : > { %v744_v37 = vadd.f32 %v743_v59, %v742_v25  ;;  %v762_v41 = vadd.f32 %v761_v21, %v759_v29  ;;  %v779_v14 = vmul.f32 %v3628_v58, %v2930_v3  ;;  %v750_v8 = vmul.f32 %v3731_v12, %v2983_v32  ;;  %v3788_v59 = vld [vmem:[%s5020_s0 + $0x60] sm:$0xff] }
  0xaa   : > { %v703_v46 = vmax.f32 %v683_v20, %v702_v38  ;;  %v780_v49 = vmul.f32 %v3637_v0, %v2935_v5  ;;  %v782_v50 = vmul.f32 %v3648_v62, %v2942_v9  ;;  %v754_v52 = vmul.f32 %v3744_v24, %v2993_v36 }
  0xab   : > { %v747_v44 = vadd.f32 %v746_v27, %v744_v37  ;;  %v764_v54 = vadd.f32 %v763_v57, %v762_v41  ;;  %v768_v31 = vmul.f32 %v3698_v63, %v2967_v23  ;;  %v770_v39 = vmul.f32 %v3731_v12, %v2979_v28  ;;  %v3799_v27 = vld [vmem:[%s5020_s0 + $0x140] sm:$0xff] }
  0xac   : > { %v704_v58 = vadd.f32 %v703_v46, %v3060_v22  ;;  %v781_v4 = vadd.f32 %v780_v49, %v779_v14  ;;  %v784_v15 = vmul.f32 %v3707_v43, %v2951_v13  ;;  %v730_v26 = vadd.f32 %v729_v56, %v726_v53 }
  0xad   : > { %v749_v48 = vadd.f32 %v748_v40, %v747_v44  ;;  %v766_v61 = vadd.f32 %v765_v35, %v764_v54  ;;  %v772_v1 = vmul.f32 %v3744_v24, %v2983_v32  ;;  %v786_v55 = vmul.f32 %v3712_v6, %v2961_v18  ;;  %v3808_v40 = vld [vmem:[%s5020_s0 + $0x220] sm:$0xff] }
  0xae   : > { %705 = vst [vmem:[%s3292_s15 + $0x10] sm:$0xff] %v704_v58  ;;  %v783_v16 = vadd.f32 %v782_v50, %v781_v4  ;;  %v803_v2 = vmul.f32 %v3637_v0, %v2930_v3  ;;  %v804_v7 = vmul.f32 %v3648_v62, %v2935_v5  ;;  %v776_v60 = vmul.f32 %v3766_v47, %v2993_v36  ;;  %v3827_v54 = vld [vmem:[%s5020_s0 + $0x300] sm:$0xff] }
  0xaf   : > { %v751_v51 = vadd.f32 %v750_v8, %v749_v48  ;;  %v769_v17 = vadd.f32 %v768_v31, %v766_v61  ;;  %v806_v11 = vmul.f32 %v3677_v34, %v2942_v9  ;;  %v788_v10 = vmul.f32 %v3731_v12, %v2967_v23 }
  0xb0   : > { %v785_v56 = vadd.f32 %v784_v15, %v783_v16  ;;  %v805_v0 = vadd.f32 %v804_v7, %v803_v2  ;;  %v808_v45 = vmul.f32 %v3712_v6, %v2951_v13  ;;  %v734_v19 = vadd.f32 %v733_v33, %v730_v26 }
  0xb1   : > { %v771_v20 = vadd.f32 %v770_v39, %v769_v17  ;;  %v792_v30 = vmul.f32 %v3788_v59, %v2979_v28  ;;  %v810_v42 = vmul.f32 %v3731_v12, %v2961_v18  ;;  %v755_v21 = vadd.f32 %v754_v52, %v751_v51 }
  0xb2   : > { %v787_v25 = vadd.f32 %v786_v55, %v785_v56  ;;  %v807_v29 = vadd.f32 %v806_v11, %v805_v0  ;;  %v823_v57 = vmul.f32 %v3648_v62, %v2930_v3  ;;  %v796_v33 = vmul.f32 %v3799_v27, %v2983_v32 }
  0xb3   : > { %v773_v38 = vadd.f32 %v772_v1, %v771_v20  ;;  %v824_v35 = vmul.f32 %v3677_v34, %v2935_v5  ;;  %v826_v53 = vmul.f32 %v3698_v63, %v2942_v9  ;;  %v800_v41 = vmul.f32 %v3808_v40, %v2993_v36 }
  0xb4   : > { %v789_v37 = vadd.f32 %v788_v10, %v787_v25  ;;  %v809_v62 = vadd.f32 %v808_v45, %v807_v29  ;;  %v812_v14 = vmul.f32 %v3744_v24, %v2967_v23  ;;  %v814_v46 = vmul.f32 %v3799_v27, %v2979_v28 }
  0xb5   : > { %v816_v8 = vmul.f32 %v3808_v40, %v2983_v32  ;;  %v825_v49 = vadd.f32 %v824_v35, %v823_v57  ;;  %v828_v34 = vmul.f32 %v3731_v12, %v2951_v13  ;;  %v756_v50 = vmax.f32 %v734_v19, %v755_v21  ;;  %v3854_v19 = vld [vmem:[%s5020_s0 + $0x3e0] sm:$0xff] }
  0xb6   : > { %v777_v63 = vadd.f32 %v776_v60, %v773_v38  ;;  %v793_v44 = vadd.f32 %v792_v30, %v789_v37  ;;  %v811_v52 = vadd.f32 %v810_v42, %v809_v62  ;;  %v830_v58 = vmul.f32 %v3744_v24, %v2961_v18  ;;  %v3867_v38 = vld [vmem:[%s5020_s0 + $0x68] sm:$0xff] }
  0xb7   : > { %v827_v31 = vadd.f32 %v826_v53, %v825_v49  ;;  %v843_v39 = vmul.f32 %v3707_v43, %v2930_v3  ;;  %v844_v4 = vmul.f32 %v3712_v6, %v2935_v5  ;;  %v820_v48 = vmul.f32 %v3827_v54, %v2993_v36 }
  0xb8   : > { %v797_v15 = vadd.f32 %v796_v33, %v793_v44  ;;  %v813_v26 = vadd.f32 %v812_v14, %v811_v52  ;;  %v846_v61 = vmul.f32 %v3731_v12, %v2942_v9  ;;  %v832_v16 = vmul.f32 %v3766_v47, %v2967_v23  ;;  %v3872_v33 = vld [vmem:[%s5020_s0 + $0x148] sm:$0xff] }
  0xb9   : > { %v829_v1 = vadd.f32 %v828_v34, %v827_v31  ;;  %v845_v55 = vadd.f32 %v844_v4, %v843_v39  ;;  %v848_v2 = vmul.f32 %v3788_v59, %v2951_v13  ;;  %v778_v43 = vmax.f32 %v756_v50, %v777_v63 }
  0xba   : > { %v801_v7 = vadd.f32 %v800_v41, %v797_v15  ;;  %v815_v51 = vadd.f32 %v814_v46, %v813_v26  ;;  %v834_v17 = vmul.f32 %v3808_v40, %v2979_v28  ;;  %v850_v56 = vmul.f32 %v3799_v27, %v2961_v18 }
  0xbb   : > { %v831_v60 = vadd.f32 %v830_v58, %v829_v1  ;;  %v847_v11 = vadd.f32 %v846_v61, %v845_v55  ;;  %v867_v10 = vmul.f32 %v3712_v6, %v2930_v3  ;;  %v836_v45 = vmul.f32 %v3827_v54, %v2983_v32  ;;  %v3893_v58 = vld [vmem:[%s5020_s0 + $0x228] sm:$0xff] }
  0xbc   : > { %v817_v0 = vadd.f32 %v816_v8, %v815_v51  ;;  %v868_v20 = vmul.f32 %v3731_v12, %v2935_v5  ;;  %v870_v30 = vmul.f32 %v3744_v24, %v2942_v9  ;;  %v840_v21 = vmul.f32 %v3854_v19, %v2993_v36 }
  0xbd   : > { %v833_v42 = vadd.f32 %v832_v16, %v831_v60  ;;  %v849_v6 = vadd.f32 %v848_v2, %v847_v11  ;;  %v852_v25 = vmul.f32 %v3808_v40, %v2967_v23  ;;  %v802_v29 = vmax.f32 %v778_v43, %v801_v7  ;;  %v3914_v60 = vld [vmem:[%s5020_s0 + $0x308] sm:$0xff] }
  0xbe   : > { %v821_v57 = vadd.f32 %v820_v48, %v817_v0  ;;  %v869_v35 = vadd.f32 %v868_v20, %v867_v10  ;;  %v872_v53 = vmul.f32 %v3799_v27, %v2951_v13  ;;  %v856_v62 = vmul.f32 %v3867_v38, %v2979_v28 }
  0xbf   : > { %v835_v37 = vadd.f32 %v834_v17, %v833_v42  ;;  %v851_v41 = vadd.f32 %v850_v56, %v849_v6  ;;  %v860_v14 = vmul.f32 %v3872_v33, %v2983_v32  ;;  %v874_v8 = vmul.f32 %v3808_v40, %v2961_v18 }
  0xc0   : > { %v871_v46 = vadd.f32 %v870_v30, %v869_v35  ;;  %v887_v49 = vmul.f32 %v3731_v12, %v2930_v3  ;;  %v888_v34 = vmul.f32 %v3744_v24, %v2935_v5  ;;  %v876_v44 = vmul.f32 %v3827_v54, %v2967_v23 }
  0xc1   : > { %v837_v50 = vadd.f32 %v836_v45, %v835_v37  ;;  %v853_v63 = vadd.f32 %v852_v25, %v851_v41  ;;  %v890_v52 = vmul.f32 %v3766_v47, %v2942_v9  ;;  %v822_v31 = vmax.f32 %v802_v29, %v821_v57 }
  0xc2   : > { %v873_v39 = vadd.f32 %v872_v53, %v871_v46  ;;  %v889_v4 = vadd.f32 %v888_v34, %v887_v49  ;;  %v892_v12 = vmul.f32 %v3808_v40, %v2951_v13  ;;  %v864_v26 = vmul.f32 %v3893_v58, %v2993_v36 }
  0xc3   : > { %v841_v24 = vadd.f32 %v840_v21, %v837_v50  ;;  %v857_v15 = vadd.f32 %v856_v62, %v853_v63  ;;  %v878_v48 = vmul.f32 %v3872_v33, %v2979_v28  ;;  %v894_v1 = vmul.f32 %v3827_v54, %v2961_v18  ;;  %v3937_v62 = vld [vmem:[%s5020_s0 + $0x3e8] sm:$0xff] }
  0xc4   : > { %v875_v47 = vadd.f32 %v874_v8, %v873_v39  ;;  %v891_v61 = vadd.f32 %v890_v52, %v889_v4  ;;  %v910_v16 = vmul.f32 %v3788_v59, %v2930_v3  ;;  %v880_v2 = vmul.f32 %v3893_v58, %v2983_v32 }
  0xc5   : > { %v861_v55 = vadd.f32 %v860_v14, %v857_v15  ;;  %v912_v43 = vmul.f32 %v3799_v27, %v2935_v5  ;;  %v915_v7 = vmul.f32 %v3808_v40, %v2942_v9  ;;  %v842_v51 = vmax.f32 %v822_v31, %v841_v24  ;;  %v3959_v15 = vld [vmem:[%s5020_s0 + $0x150] sm:$0xff] }
  0xc6   : > { %v877_v17 = vadd.f32 %v876_v44, %v875_v47  ;;  %v893_v11 = vadd.f32 %v892_v12, %v891_v61  ;;  %v896_v59 = vmul.f32 %v3854_v19, %v2967_v23  ;;  %v884_v10 = vmul.f32 %v3914_v60, %v2993_v36 }
  0xc7   : > { %v865_v56 = vadd.f32 %v864_v26, %v861_v55  ;;  %v913_v0 = vadd.f32 %v912_v43, %v910_v16  ;;  %v918_v45 = vmul.f32 %v3867_v38, %v2951_v13  ;;  %v898_v42 = vmul.f32 %v3893_v58, %v2979_v28 }
  0xc8   : > { %v879_v20 = vadd.f32 %v878_v48, %v877_v17  ;;  %v895_v30 = vadd.f32 %v894_v1, %v893_v11  ;;  %v900_v21 = vmul.f32 %v3914_v60, %v2983_v32  ;;  %v921_v25 = vmul.f32 %v3872_v33, %v2961_v18 }
  0xc9   : > { %v916_v6 = vadd.f32 %v915_v7, %v913_v0  ;;  %v938_v29 = vmul.f32 %v3799_v27, %v2930_v3  ;;  %v939_v57 = vmul.f32 %v3808_v40, %v2935_v5  ;;  %v866_v35 = vmax.f32 %v842_v51, %v865_v56  ;;  %v3944_v27 = vld [vmem:[%s5020_s0 + $0x70] sm:$0xff] }
  0xca   : > { %v881_v53 = vadd.f32 %v880_v2, %v879_v20  ;;  %v897_v37 = vadd.f32 %v896_v59, %v895_v30  ;;  %v942_v41 = vmul.f32 %v3827_v54, %v2942_v9  ;;  %v924_v46 = vmul.f32 %v3893_v58, %v2967_v23  ;;  %v3985_v59 = vld [vmem:[%s5020_s0 + $0x310] sm:$0xff] }
  0xcb   : > { %v919_v14 = vadd.f32 %v918_v45, %v916_v6  ;;  %v940_v8 = vadd.f32 %v939_v57, %v938_v29  ;;  %v944_v49 = vmul.f32 %v3872_v33, %v2951_v13  ;;  %v904_v63 = vmul.f32 %v3937_v62, %v2993_v36 }
  0xcc   : > { %v885_v34 = vadd.f32 %v884_v10, %v881_v53  ;;  %v899_v50 = vadd.f32 %v898_v42, %v897_v37  ;;  %v928_v44 = vmul.f32 %v3944_v27, %v2979_v28  ;;  %v946_v39 = vmul.f32 %v3893_v58, %v2961_v18  ;;  %v4007_v37 = vld [vmem:[%s5020_s0 + $0x3f0] sm:$0xff] }
  0xcd   : > { %v922_v52 = vadd.f32 %v921_v25, %v919_v14  ;;  %v943_v31 = vadd.f32 %v942_v41, %v940_v8  ;;  %v960_v4 = vmul.f32 %v3808_v40, %v2930_v3  ;;  %v961_v26 = vmul.f32 %v3827_v54, %v2935_v5  ;;  %v3970_v40 = vld [vmem:[%s5020_s0 + $0x230] sm:$0xff] }
  0xce   : > { %v886_v12 = vmax.f32 %v866_v35, %v885_v34  ;;  %v901_v24 = vadd.f32 %v900_v21, %v899_v50  ;;  %v964_v48 = vmul.f32 %v3854_v19, %v2942_v9  ;;  %v932_v61 = vmul.f32 %v3959_v15, %v2983_v32 }
  0xcf   : > { %v925_v47 = vadd.f32 %v924_v46, %v922_v52  ;;  %v945_v1 = vadd.f32 %v944_v49, %v943_v31  ;;  %v949_v16 = vmul.f32 %v3914_v60, %v2967_v23  ;;  %v936_v54 = vmul.f32 %v3970_v40, %v2993_v36 }
  0xd0   : > { %v905_v55 = vadd.f32 %v904_v63, %v901_v24  ;;  %v962_v2 = vadd.f32 %v961_v26, %v960_v4  ;;  %v966_v19 = vmul.f32 %v3893_v58, %v2951_v13  ;;  %v951_v51 = vmul.f32 %v3959_v15, %v2979_v28  ;;  %v4027_v4 = vld [vmem:[%s5020_s0 + $0x78] sm:$0xff] }
  0xd1   : > { %v929_v43 = vadd.f32 %v928_v44, %v925_v47  ;;  %v947_v7 = vadd.f32 %v946_v39, %v945_v1  ;;  %v968_v17 = vmul.f32 %v3914_v60, %v2961_v18  ;;  %v982_v10 = vmul.f32 %v3867_v38, %v2930_v3  ;;  %v4034_v24 = vld [vmem:[%s5020_s0 + $0x158] sm:$0xff] }
  0xd2   : > { %v906_v11 = vmax.f32 %v886_v12, %v905_v55  ;;  %v965_v56 = vadd.f32 %v964_v48, %v962_v2  ;;  %v983_v0 = vmul.f32 %v3872_v33, %v2935_v5  ;;  %v953_v20 = vmul.f32 %v3970_v40, %v2983_v32  ;;  %v4043_v55 = vld [vmem:[%s5020_s0 + $0x238] sm:$0xff] }
  0xd3   : > { %v950_v45 = vadd.f32 %v949_v16, %v947_v7  ;;  %v971_v30 = vmul.f32 %v3937_v62, %v2967_v23  ;;  %v985_v42 = vmul.f32 %v3893_v58, %v2942_v9  ;;  %v987_v38 = vmul.f32 %v3944_v27, %v2951_v13 }
  0xd4   : > { %v907_v21 = vadd.f32 %v906_v11, %v3060_v22  ;;  %v967_v6 = vadd.f32 %v966_v19, %v965_v56  ;;  %v984_v25 = vadd.f32 %v983_v0, %v982_v10  ;;  %v933_v29 = vadd.f32 %v932_v61, %v929_v43 }
  0xd5   : > { %v952_v57 = vadd.f32 %v951_v51, %v950_v45  ;;  %v957_v35 = vmul.f32 %v3985_v59, %v2993_v36  ;;  %v973_v53 = vmul.f32 %v3970_v40, %v2979_v28  ;;  %v975_v14 = vmul.f32 %v3985_v59, %v2983_v32 }
  0xd6   : > { %908 = vst [vmem:[%s3292_s15 + $0x18] sm:$0xff] %v907_v21  ;;  %v969_v41 = vadd.f32 %v968_v17, %v967_v6  ;;  %v986_v46 = vadd.f32 %v985_v42, %v984_v25  ;;  %v989_v8 = vmul.f32 %v3959_v15, %v2961_v18  ;;  %v1006_v34 = vmul.f32 %v3872_v33, %v2930_v3 }
  0xd7   : > { %v954_v49 = vadd.f32 %v953_v20, %v952_v57  ;;  %v1007_v50 = vmul.f32 %v3893_v58, %v2935_v5  ;;  %v1009_v63 = vmul.f32 %v3914_v60, %v2942_v9  ;;  %v979_v52 = vmul.f32 %v4007_v37, %v2993_v36 }
  0xd8   : > { %v972_v44 = vadd.f32 %v971_v30, %v969_v41  ;;  %v988_v31 = vadd.f32 %v987_v38, %v986_v46  ;;  %v991_v39 = vmul.f32 %v3970_v40, %v2967_v23  ;;  %v937_v33 = vadd.f32 %v936_v54, %v933_v29  ;;  %v4070_v29 = vld [vmem:[%s5020_s0 + $0x318] sm:$0xff] }
  0xd9   : > { %v995_v12 = vmul.f32 %v4027_v4, %v2979_v28  ;;  %v1008_v26 = vadd.f32 %v1007_v50, %v1006_v34  ;;  %v1011_v48 = vmul.f32 %v3959_v15, %v2951_v13  ;;  %v958_v47 = vadd.f32 %v957_v35, %v954_v49 }
  0xda   : > { %v974_v61 = vadd.f32 %v973_v53, %v972_v44  ;;  %v990_v1 = vadd.f32 %v989_v8, %v988_v31  ;;  %v999_v16 = vmul.f32 %v4034_v24, %v2983_v32  ;;  %v1013_v2 = vmul.f32 %v3970_v40, %v2961_v18  ;;  %v4089_v31 = vld [vmem:[%s5020_s0 + $0x3f8] sm:$0xff] }
  0xdb   : > { %v1010_v54 = vadd.f32 %v1009_v63, %v1008_v26  ;;  %v1026_v19 = vmul.f32 %v3893_v58, %v2930_v3  ;;  %v1027_v43 = vmul.f32 %v3914_v60, %v2935_v5  ;;  %v1003_v17 = vmul.f32 %v4043_v55, %v2993_v36 }
  0xdc   : > { %v976_v7 = vadd.f32 %v975_v14, %v974_v61  ;;  %v992_v51 = vadd.f32 %v991_v39, %v990_v1  ;;  %v1029_v11 = vmul.f32 %v3937_v62, %v2942_v9  ;;  %v1015_v10 = vmul.f32 %v3985_v59, %v2967_v23 }
  0xdd   : > { %v1012_v56 = vadd.f32 %v1011_v48, %v1010_v54  ;;  %v1028_v0 = vadd.f32 %v1027_v43, %v1026_v19  ;;  %v1031_v45 = vmul.f32 %v3970_v40, %v2951_v13  ;;  %v959_v58 = vmax.f32 %v937_v33, %v958_v47 }
  0xde   : > { %v996_v20 = vadd.f32 %v995_v12, %v992_v51  ;;  %v1017_v60 = vmul.f32 %v4034_v24, %v2979_v28  ;;  %v1033_v30 = vmul.f32 %v3985_v59, %v2961_v18  ;;  %v980_v42 = vadd.f32 %v979_v52, %v976_v7 }
  0xdf   : > { %v1014_v21 = vadd.f32 %v1013_v2, %v1012_v56  ;;  %v1030_v6 = vadd.f32 %v1029_v11, %v1028_v0  ;;  %v1046_v62 = vmul.f32 %v3944_v27, %v2930_v3  ;;  %v1019_v38 = vmul.f32 %v4043_v55, %v2983_v32  ;;  %v4106_v2 = vld [vmem:[%s5020_s0 + $0x80] sm:$0xff] }
  0xe0   : > { %v1000_v25 = vadd.f32 %v999_v16, %v996_v20  ;;  %v1047_v57 = vmul.f32 %v3959_v15, %v2935_v5  ;;  %v1049_v35 = vmul.f32 %v3970_v40, %v2942_v9  ;;  %v1023_v41 = vmul.f32 %v4070_v29, %v2993_v36  ;;  %v4115_v56 = vld [vmem:[%s5020_s0 + $0x160] sm:$0xff] }
  0xe1   : > { %v1016_v53 = vadd.f32 %v1015_v10, %v1014_v21  ;;  %v1032_v27 = vadd.f32 %v1031_v45, %v1030_v6  ;;  %v1035_v14 = vmul.f32 %v4007_v37, %v2967_v23  ;;  %v1037_v46 = vmul.f32 %v4043_v55, %v2979_v28 }
  0xe2   : > { %v1039_v8 = vmul.f32 %v4070_v29, %v2983_v32  ;;  %v1048_v49 = vadd.f32 %v1047_v57, %v1046_v62  ;;  %v1051_v34 = vmul.f32 %v4027_v4, %v2951_v13  ;;  %v981_v50 = vmax.f32 %v959_v58, %v980_v42 }
  0xe3   : > { %v1004_v63 = vadd.f32 %v1003_v17, %v1000_v25  ;;  %v1018_v44 = vadd.f32 %v1017_v60, %v1016_v53  ;;  %v1034_v52 = vadd.f32 %v1033_v30, %v1032_v27  ;;  %v1053_v33 = vmul.f32 %v4034_v24, %v2961_v18  ;;  %v4126_v60 = vld [vmem:[%s5020_s0 + $0x240] sm:$0xff] }
  0xe4   : > { %v1050_v39 = vadd.f32 %v1049_v35, %v1048_v49  ;;  %v1070_v12 = vmul.f32 %v3959_v15, %v2930_v3  ;;  %v1071_v26 = vmul.f32 %v3970_v40, %v2935_v5  ;;  %v1043_v61 = vmul.f32 %v4089_v31, %v2993_v36 }
  0xe5   : > { %v1020_v48 = vadd.f32 %v1019_v38, %v1018_v44  ;;  %v1036_v47 = vadd.f32 %v1035_v14, %v1034_v52  ;;  %v1073_v1 = vmul.f32 %v3985_v59, %v2942_v9  ;;  %v1055_v54 = vmul.f32 %v4043_v55, %v2967_v23  ;;  %v4155_v52 = vld [vmem:[%s5020_s0 + $0x320] sm:$0xff] }
  0xe6   : > { %v1052_v16 = vadd.f32 %v1051_v34, %v1050_v39  ;;  %v1072_v15 = vadd.f32 %v1071_v26, %v1070_v12  ;;  %v1075_v19 = vmul.f32 %v4034_v24, %v2951_v13  ;;  %v1005_v43 = vmax.f32 %v981_v50, %v1004_v63 }
  0xe7   : > { %v1024_v7 = vadd.f32 %v1023_v41, %v1020_v48  ;;  %v1038_v51 = vadd.f32 %v1037_v46, %v1036_v47  ;;  %v1059_v17 = vmul.f32 %v4106_v2, %v2979_v28  ;;  %v1077_v0 = vmul.f32 %v4043_v55, %v2961_v18 }
  0xe8   : > { %v1054_v11 = vadd.f32 %v1053_v33, %v1052_v16  ;;  %v1074_v10 = vadd.f32 %v1073_v1, %v1072_v15  ;;  %v1090_v45 = vmul.f32 %v3970_v40, %v2930_v3  ;;  %v1063_v20 = vmul.f32 %v4115_v56, %v2983_v32 }
  0xe9   : > { %v1040_v58 = vadd.f32 %v1039_v8, %v1038_v51  ;;  %v1091_v30 = vmul.f32 %v3985_v59, %v2935_v5  ;;  %v1093_v42 = vmul.f32 %v4007_v37, %v2942_v9  ;;  %v1067_v6 = vmul.f32 %v4126_v60, %v2993_v36 }
  0xea   : > { %v1056_v21 = vadd.f32 %v1055_v54, %v1054_v11  ;;  %v1076_v40 = vadd.f32 %v1075_v19, %v1074_v10  ;;  %v1079_v62 = vmul.f32 %v4070_v29, %v2967_v23  ;;  %v1025_v25 = vmax.f32 %v1005_v43, %v1024_v7  ;;  %v4176_v11 = vld [vmem:[%s5020_s0 + $0x400] sm:$0xff] }
  0xeb   : > { %v1044_v38 = vadd.f32 %v1043_v61, %v1040_v58  ;;  %v1092_v57 = vadd.f32 %v1091_v30, %v1090_v45  ;;  %v1095_v35 = vmul.f32 %v4043_v55, %v2951_v13  ;;  %v1081_v59 = vmul.f32 %v4115_v56, %v2979_v28  ;;  %v4185_v58 = vld [vmem:[%s5020_s0 + $0x88] sm:$0xff] }
  0xec   : > { %v1060_v53 = vadd.f32 %v1059_v17, %v1056_v21  ;;  %v1078_v41 = vadd.f32 %v1077_v0, %v1076_v40  ;;  %v1083_v37 = vmul.f32 %v4126_v60, %v2983_v32  ;;  %v1097_v14 = vmul.f32 %v4070_v29, %v2961_v18 }
  0xed   : > { %v1094_v27 = vadd.f32 %v1093_v42, %v1092_v57  ;;  %v1113_v46 = vmul.f32 %v4027_v4, %v2930_v3  ;;  %v1115_v8 = vmul.f32 %v4034_v24, %v2935_v5  ;;  %v1099_v50 = vmul.f32 %v4089_v31, %v2967_v23 }
  0xee   : > { %v1064_v49 = vadd.f32 %v1063_v20, %v1060_v53  ;;  %v1080_v34 = vadd.f32 %v1079_v62, %v1078_v41  ;;  %v1118_v63 = vmul.f32 %v4043_v55, %v2942_v9  ;;  %v1045_v44 = vmax.f32 %v1025_v25, %v1044_v38  ;;  %v4190_v20 = vld [vmem:[%s5020_s0 + $0x168] sm:$0xff] }
  0xef   : > { %v1096_v39 = vadd.f32 %v1095_v35, %v1094_v27  ;;  %v1116_v33 = vadd.f32 %v1115_v8, %v1113_v46  ;;  %v1121_v4 = vmul.f32 %v4106_v2, %v2951_v13  ;;  %v1087_v48 = vmul.f32 %v4155_v52, %v2993_v36  ;;  %v4209_v27 = vld [vmem:[%s5020_s0 + $0x248] sm:$0xff] }
  0xf0   : > { %v1068_v12 = vadd.f32 %v1067_v6, %v1064_v49  ;;  %v1082_v26 = vadd.f32 %v1081_v59, %v1080_v34  ;;  %v1101_v47 = vmul.f32 %v4126_v60, %v2979_v28  ;;  %v1124_v16 = vmul.f32 %v4115_v56, %v2961_v18  ;;  %v4222_v34 = vld [vmem:[%s5020_s0 + $0x328] sm:$0xff] }
  0xf1   : > { %v1098_v61 = vadd.f32 %v1097_v14, %v1096_v39  ;;  %v1119_v1 = vadd.f32 %v1118_v63, %v1116_v33  ;;  %v1141_v54 = vmul.f32 %v4034_v24, %v2930_v3  ;;  %v1103_v19 = vmul.f32 %v4155_v52, %v2983_v32 }
  0xf2   : > { %v1084_v15 = vadd.f32 %v1083_v37, %v1082_v26  ;;  %v1142_v43 = vmul.f32 %v4043_v55, %v2935_v5  ;;  %v1145_v7 = vmul.f32 %v4070_v29, %v2942_v9  ;;  %v1069_v51 = vmax.f32 %v1045_v44, %v1068_v12 }
  0xf3   : > { %v1100_v17 = vadd.f32 %v1099_v50, %v1098_v61  ;;  %v1122_v10 = vadd.f32 %v1121_v4, %v1119_v1  ;;  %v1127_v24 = vmul.f32 %v4126_v60, %v2967_v23  ;;  %v1107_v45 = vmul.f32 %v4176_v11, %v2993_v36 }
  0xf4   : > { %v1088_v0 = vadd.f32 %v1087_v48, %v1084_v15  ;;  %v1143_v30 = vadd.f32 %v1142_v43, %v1141_v54  ;;  %v1147_v42 = vmul.f32 %v4115_v56, %v2951_v13  ;;  %v1131_v40 = vmul.f32 %v4185_v58, %v2979_v28  ;;  %v4244_v15 = vld [vmem:[%s5020_s0 + $0x408] sm:$0xff] }
  0xf5   : > { %v1102_v21 = vadd.f32 %v1101_v47, %v1100_v17  ;;  %v1125_v6 = vadd.f32 %v1124_v16, %v1122_v10  ;;  %v1135_v62 = vmul.f32 %v4190_v20, %v2983_v32  ;;  %v1149_v38 = vmul.f32 %v4126_v60, %v2961_v18 }
  0xf6   : > { %v1146_v25 = vadd.f32 %v1145_v7, %v1143_v30  ;;  %v1163_v57 = vmul.f32 %v4043_v55, %v2930_v3  ;;  %v1164_v35 = vmul.f32 %v4070_v29, %v2935_v5  ;;  %v1089_v53 = vmax.f32 %v1069_v51, %v1088_v0 }
  0xf7   : > { %v1104_v41 = vadd.f32 %v1103_v19, %v1102_v21  ;;  %v1128_v59 = vadd.f32 %v1127_v24, %v1125_v6  ;;  %v1167_v37 = vmul.f32 %v4089_v31, %v2942_v9  ;;  %v1152_v46 = vmul.f32 %v4155_v52, %v2967_v23 }
  0xf8   : > { %v1148_v14 = vadd.f32 %v1147_v42, %v1146_v25  ;;  %v1165_v8 = vadd.f32 %v1164_v35, %v1163_v57  ;;  %v1169_v55 = vmul.f32 %v4126_v60, %v2951_v13  ;;  %v1139_v49 = vmul.f32 %v4209_v27, %v2993_v36 }
  0xf9   : > { %v1108_v29 = vadd.f32 %v1107_v45, %v1104_v41  ;;  %v1154_v31 = vmul.f32 %v4190_v20, %v2979_v28  ;;  %v1171_v50 = vmul.f32 %v4155_v52, %v2961_v18  ;;  %v1132_v63 = vadd.f32 %v1131_v40, %v1128_v59 }
  0xfa   : > { %v1150_v44 = vadd.f32 %v1149_v38, %v1148_v14  ;;  %v1168_v39 = vadd.f32 %v1167_v37, %v1165_v8  ;;  %v1185_v33 = vmul.f32 %v4106_v2, %v2930_v3  ;;  %v1156_v12 = vmul.f32 %v4209_v27, %v2983_v32  ;;  %v4266_v38 = vld [vmem:[%s5020_s0 + $0x90] sm:$0xff] }
  0xfb   : > { %v1109_v4 = vmax.f32 %v1089_v53, %v1108_v29  ;;  %v1186_v26 = vmul.f32 %v4115_v56, %v2935_v5  ;;  %v1188_v48 = vmul.f32 %v4126_v60, %v2942_v9  ;;  %v1160_v61 = vmul.f32 %v4222_v34, %v2993_v36 }
  0xfc   : > { %v1153_v47 = vadd.f32 %v1152_v46, %v1150_v44  ;;  %v1170_v1 = vadd.f32 %v1169_v55, %v1168_v39  ;;  %v1174_v16 = vmul.f32 %v4176_v11, %v2967_v23  ;;  %v1176_v54 = vmul.f32 %v4209_v27, %v2979_v28  ;;  %v4277_v46 = vld [vmem:[%s5020_s0 + $0x170] sm:$0xff] }
  0xfd   : > { %v1110_v2 = vadd.f32 %v1109_v4, %v3060_v22  ;;  %v1187_v19 = vadd.f32 %v1186_v26, %v1185_v33  ;;  %v1190_v43 = vmul.f32 %v4185_v58, %v2951_v13  ;;  %v1136_v7 = vadd.f32 %v1135_v62, %v1132_v63 }
  0xfe   : > { %v1155_v51 = vadd.f32 %v1154_v31, %v1153_v47  ;;  %v1172_v17 = vadd.f32 %v1171_v50, %v1170_v1  ;;  %v1178_v10 = vmul.f32 %v4222_v34, %v2983_v32  ;;  %v1192_v0 = vmul.f32 %v4190_v20, %v2961_v18  ;;  %v4286_v31 = vld [vmem:[%s5020_s0 + $0x250] sm:$0xff] }
  0xff   : > { %1111 = vst [vmem:[%s3292_s15 + $0x20] sm:$0xff] %v1110_v2  ;;  %v1189_v24 = vadd.f32 %v1188_v48, %v1187_v19  ;;  %v1209_v45 = vmul.f32 %v4115_v56, %v2930_v3  ;;  %v1210_v30 = vmul.f32 %v4126_v60, %v2935_v5  ;;  %v1182_v6 = vmul.f32 %v4244_v15, %v2993_v36  ;;  %v4305_v1 = vld [vmem:[%s5020_s0 + $0x330] sm:$0xff] }
 0x100   : > { %v1157_v42 = vadd.f32 %v1156_v12, %v1155_v51  ;;  %v1175_v21 = vadd.f32 %v1174_v16, %v1172_v17  ;;  %v1212_v40 = vmul.f32 %v4155_v52, %v2942_v9  ;;  %v1194_v25 = vmul.f32 %v4209_v27, %v2967_v23 }
 0x101   : > { %v1191_v62 = vadd.f32 %v1190_v43, %v1189_v24  ;;  %v1211_v56 = vadd.f32 %v1210_v30, %v1209_v45  ;;  %v1214_v57 = vmul.f32 %v4190_v20, %v2951_v13  ;;  %v1140_v35 = vadd.f32 %v1139_v49, %v1136_v7 }
 0x102   : > { %v1177_v53 = vadd.f32 %v1176_v54, %v1175_v21  ;;  %v1198_v41 = vmul.f32 %v4266_v38, %v2979_v28  ;;  %v1216_v59 = vmul.f32 %v4209_v27, %v2961_v18  ;;  %v1161_v37 = vadd.f32 %v1160_v61, %v1157_v42 }
 0x103   : > { %v1193_v14 = vadd.f32 %v1192_v0, %v1191_v62  ;;  %v1213_v8 = vadd.f32 %v1212_v40, %v1211_v56  ;;  %v1229_v55 = vmul.f32 %v4126_v60, %v2930_v3  ;;  %v1202_v49 = vmul.f32 %v4277_v46, %v2983_v32 }
 0x104   : > { %v1179_v29 = vadd.f32 %v1178_v10, %v1177_v53  ;;  %v1230_v50 = vmul.f32 %v4155_v52, %v2935_v5  ;;  %v1232_v63 = vmul.f32 %v4176_v11, %v2942_v9  ;;  %v1206_v39 = vmul.f32 %v4286_v31, %v2993_v36 }
 0x105   : > { %v1195_v44 = vadd.f32 %v1194_v25, %v1193_v14  ;;  %v1215_v60 = vadd.f32 %v1214_v57, %v1213_v8  ;;  %v1218_v33 = vmul.f32 %v4222_v34, %v2967_v23  ;;  %v1220_v4 = vmul.f32 %v4277_v46, %v2979_v28 }
 0x106   : > { %v1222_v12 = vmul.f32 %v4286_v31, %v2983_v32  ;;  %v1231_v26 = vadd.f32 %v1230_v50, %v1229_v55  ;;  %v1234_v52 = vmul.f32 %v4209_v27, %v2951_v13  ;;  %v1162_v48 = vmax.f32 %v1140_v35, %v1161_v37  ;;  %v4332_v35 = vld [vmem:[%s5020_s0 + $0x410] sm:$0xff] }
 0x107   : > { %v1183_v11 = vadd.f32 %v1182_v6, %v1179_v29  ;;  %v1199_v47 = vadd.f32 %v1198_v41, %v1195_v44  ;;  %v1217_v61 = vadd.f32 %v1216_v59, %v1215_v60  ;;  %v1236_v2 = vmul.f32 %v4222_v34, %v2961_v18  ;;  %v4345_v29 = vld [vmem:[%s5020_s0 + $0x98] sm:$0xff] }
 0x108   : > { %v1233_v16 = vadd.f32 %v1232_v63, %v1231_v26  ;;  %v1249_v54 = vmul.f32 %v4185_v58, %v2930_v3  ;;  %v1250_v19 = vmul.f32 %v4190_v20, %v2935_v5  ;;  %v1226_v51 = vmul.f32 %v4305_v1, %v2993_v36 }
 0x109   : > { %v1203_v43 = vadd.f32 %v1202_v49, %v1199_v47  ;;  %v1219_v7 = vadd.f32 %v1218_v33, %v1217_v61  ;;  %v1252_v17 = vmul.f32 %v4209_v27, %v2942_v9  ;;  %v1238_v24 = vmul.f32 %v4244_v15, %v2967_v23  ;;  %v4350_v49 = vld [vmem:[%s5020_s0 + $0x178] sm:$0xff] }
 0x10a   : > { %v1235_v10 = vadd.f32 %v1234_v52, %v1233_v16  ;;  %v1251_v0 = vadd.f32 %v1250_v19, %v1249_v54  ;;  %v1254_v45 = vmul.f32 %v4266_v38, %v2951_v13  ;;  %v1184_v58 = vmax.f32 %v1162_v48, %v1183_v11 }
 0x10b   : > { %v1207_v30 = vadd.f32 %v1206_v39, %v1203_v43  ;;  %v1221_v42 = vadd.f32 %v1220_v4, %v1219_v7  ;;  %v1240_v21 = vmul.f32 %v4286_v31, %v2979_v28  ;;  %v1256_v62 = vmul.f32 %v4277_v46, %v2961_v18 }
 0x10c   : > { %v1237_v6 = vadd.f32 %v1236_v2, %v1235_v10  ;;  %v1253_v40 = vadd.f32 %v1252_v17, %v1251_v0  ;;  %v1273_v25 = vmul.f32 %v4190_v20, %v2930_v3  ;;  %v1242_v57 = vmul.f32 %v4305_v1, %v2983_v32  ;;  %v4371_v2 = vld [vmem:[%s5020_s0 + $0x258] sm:$0xff] }
 0x10d   : > { %v1223_v56 = vadd.f32 %v1222_v12, %v1221_v42  ;;  %v1274_v53 = vmul.f32 %v4209_v27, %v2935_v5  ;;  %v1276_v41 = vmul.f32 %v4222_v34, %v2942_v9  ;;  %v1246_v37 = vmul.f32 %v4332_v35, %v2993_v36 }
 0x10e   : > { %v1239_v59 = vadd.f32 %v1238_v24, %v1237_v6  ;;  %v1255_v20 = vadd.f32 %v1254_v45, %v1253_v40  ;;  %v1258_v14 = vmul.f32 %v4286_v31, %v2967_v23  ;;  %v1208_v8 = vmax.f32 %v1184_v58, %v1207_v30  ;;  %v4392_v6 = vld [vmem:[%s5020_s0 + $0x338] sm:$0xff] }
 0x10f   : > { %v1227_v55 = vadd.f32 %v1226_v51, %v1223_v56  ;;  %v1275_v50 = vadd.f32 %v1274_v53, %v1273_v25  ;;  %v1278_v63 = vmul.f32 %v4277_v46, %v2951_v13  ;;  %v1262_v60 = vmul.f32 %v4345_v29, %v2979_v28 }
 0x110   : > { %v1241_v44 = vadd.f32 %v1240_v21, %v1239_v59  ;;  %v1257_v39 = vadd.f32 %v1256_v62, %v1255_v20  ;;  %v1266_v33 = vmul.f32 %v4350_v49, %v2983_v32  ;;  %v1280_v12 = vmul.f32 %v4286_v31, %v2961_v18 }
 0x111   : > { %v1277_v4 = vadd.f32 %v1276_v41, %v1275_v50  ;;  %v1293_v26 = vmul.f32 %v4209_v27, %v2930_v3  ;;  %v1294_v52 = vmul.f32 %v4222_v34, %v2935_v5  ;;  %v1282_v47 = vmul.f32 %v4305_v1, %v2967_v23 }
 0x112   : > { %v1243_v48 = vadd.f32 %v1242_v57, %v1241_v44  ;;  %v1259_v11 = vadd.f32 %v1258_v14, %v1257_v39  ;;  %v1296_v61 = vmul.f32 %v4244_v15, %v2942_v9  ;;  %v1228_v16 = vmax.f32 %v1208_v8, %v1227_v55 }
 0x113   : > { %v1279_v54 = vadd.f32 %v1278_v63, %v1277_v4  ;;  %v1295_v19 = vadd.f32 %v1294_v52, %v1293_v26  ;;  %v1298_v27 = vmul.f32 %v4286_v31, %v2951_v13  ;;  %v1270_v7 = vmul.f32 %v4371_v2, %v2993_v36 }
 0x114   : > { %v1247_v34 = vadd.f32 %v1246_v37, %v1243_v48  ;;  %v1263_v43 = vadd.f32 %v1262_v60, %v1259_v11  ;;  %v1284_v51 = vmul.f32 %v4350_v49, %v2979_v28  ;;  %v1300_v10 = vmul.f32 %v4305_v1, %v2961_v18  ;;  %v4415_v60 = vld [vmem:[%s5020_s0 + $0x418] sm:$0xff] }
 0x115   : > { %v1281_v15 = vadd.f32 %v1280_v12, %v1279_v54  ;;  %v1297_v17 = vadd.f32 %v1296_v61, %v1295_v19  ;;  %v1316_v24 = vmul.f32 %v4266_v38, %v2930_v3  ;;  %v1286_v45 = vmul.f32 %v4371_v2, %v2983_v32 }
 0x116   : > { %v1267_v0 = vadd.f32 %v1266_v33, %v1263_v43  ;;  %v1318_v58 = vmul.f32 %v4277_v46, %v2935_v5  ;;  %v1321_v30 = vmul.f32 %v4286_v31, %v2942_v9  ;;  %v1248_v42 = vmax.f32 %v1228_v16, %v1247_v34  ;;  %v4437_v43 = vld [vmem:[%s5020_s0 + $0x180] sm:$0xff] }
 0x117   : > { %v1283_v21 = vadd.f32 %v1282_v47, %v1281_v15  ;;  %v1299_v40 = vadd.f32 %v1298_v27, %v1297_v17  ;;  %v1302_v38 = vmul.f32 %v4332_v35, %v2967_v23  ;;  %v1290_v25 = vmul.f32 %v4392_v6, %v2993_v36 }
 0x118   : > { %v1271_v62 = vadd.f32 %v1270_v7, %v1267_v0  ;;  %v1319_v56 = vadd.f32 %v1318_v58, %v1316_v24  ;;  %v1324_v57 = vmul.f32 %v4345_v29, %v2951_v13  ;;  %v1304_v59 = vmul.f32 %v4371_v2, %v2979_v28 }
 0x119   : > { %v1285_v53 = vadd.f32 %v1284_v51, %v1283_v21  ;;  %v1301_v41 = vadd.f32 %v1300_v10, %v1299_v40  ;;  %v1306_v37 = vmul.f32 %v4392_v6, %v2983_v32  ;;  %v1327_v14 = vmul.f32 %v4350_v49, %v2961_v18 }
 0x11a   : > { %v1322_v20 = vadd.f32 %v1321_v30, %v1319_v56  ;;  %v1344_v8 = vmul.f32 %v4277_v46, %v2930_v3  ;;  %v1345_v55 = vmul.f32 %v4286_v31, %v2935_v5  ;;  %v1272_v50 = vmax.f32 %v1248_v42, %v1271_v62  ;;  %v4422_v46 = vld [vmem:[%s5020_s0 + $0xa0] sm:$0xff] }
 0x11b   : > { %v1287_v63 = vadd.f32 %v1286_v45, %v1285_v53  ;;  %v1303_v44 = vadd.f32 %v1302_v38, %v1301_v41  ;;  %v1348_v39 = vmul.f32 %v4305_v1, %v2942_v9  ;;  %v1330_v4 = vmul.f32 %v4371_v2, %v2967_v23  ;;  %v4463_v38 = vld [vmem:[%s5020_s0 + $0x340] sm:$0xff] }
 0x11c   : > { %v1325_v33 = vadd.f32 %v1324_v57, %v1322_v20  ;;  %v1346_v12 = vadd.f32 %v1345_v55, %v1344_v8  ;;  %v1350_v26 = vmul.f32 %v4350_v49, %v2951_v13  ;;  %v1310_v11 = vmul.f32 %v4415_v60, %v2993_v36 }
 0x11d   : > { %v1291_v52 = vadd.f32 %v1290_v25, %v1287_v63  ;;  %v1305_v48 = vadd.f32 %v1304_v59, %v1303_v44  ;;  %v1334_v47 = vmul.f32 %v4422_v46, %v2979_v28  ;;  %v1352_v54 = vmul.f32 %v4371_v2, %v2961_v18  ;;  %v4485_v44 = vld [vmem:[%s5020_s0 + $0x420] sm:$0xff] }
 0x11e   : > { %v1328_v61 = vadd.f32 %v1327_v14, %v1325_v33  ;;  %v1349_v16 = vadd.f32 %v1348_v39, %v1346_v12  ;;  %v1366_v19 = vmul.f32 %v4286_v31, %v2930_v3  ;;  %v1367_v7 = vmul.f32 %v4305_v1, %v2935_v5  ;;  %v4448_v31 = vld [vmem:[%s5020_s0 + $0x260] sm:$0xff] }
 0x11f   : > { %v1292_v27 = vmax.f32 %v1272_v50, %v1291_v52  ;;  %v1307_v34 = vadd.f32 %v1306_v37, %v1305_v48  ;;  %v1370_v51 = vmul.f32 %v4332_v35, %v2942_v9  ;;  %v1338_v17 = vmul.f32 %v4437_v43, %v2983_v32 }
 0x120   : > { %v1331_v15 = vadd.f32 %v1330_v4, %v1328_v61  ;;  %v1351_v10 = vadd.f32 %v1350_v26, %v1349_v16  ;;  %v1355_v24 = vmul.f32 %v4392_v6, %v2967_v23  ;;  %v1342_v1 = vmul.f32 %v4448_v31, %v2993_v36 }
 0x121   : > { %v1311_v0 = vadd.f32 %v1310_v11, %v1307_v34  ;;  %v1368_v45 = vadd.f32 %v1367_v7, %v1366_v19  ;;  %v1372_v35 = vmul.f32 %v4371_v2, %v2951_v13  ;;  %v1357_v42 = vmul.f32 %v4437_v43, %v2979_v28  ;;  %v4505_v19 = vld [vmem:[%s5020_s0 + $0xa8] sm:$0xff] }
 0x122   : > { %v1335_v58 = vadd.f32 %v1334_v47, %v1331_v15  ;;  %v1353_v30 = vadd.f32 %v1352_v54, %v1351_v10  ;;  %v1374_v21 = vmul.f32 %v4392_v6, %v2961_v18  ;;  %v1388_v25 = vmul.f32 %v4345_v29, %v2930_v3  ;;  %v4512_v34 = vld [vmem:[%s5020_s0 + $0x188] sm:$0xff] }
 0x123   : > { %v1312_v40 = vmax.f32 %v1292_v27, %v1311_v0  ;;  %v1371_v62 = vadd.f32 %v1370_v51, %v1368_v45  ;;  %v1389_v56 = vmul.f32 %v4350_v49, %v2935_v5  ;;  %v1359_v53 = vmul.f32 %v4448_v31, %v2983_v32  ;;  %v4521_v0 = vld [vmem:[%s5020_s0 + $0x268] sm:$0xff] }
 0x124   : > { %v1356_v57 = vadd.f32 %v1355_v24, %v1353_v30  ;;  %v1377_v41 = vmul.f32 %v4415_v60, %v2967_v23  ;;  %v1391_v59 = vmul.f32 %v4371_v2, %v2942_v9  ;;  %v1393_v29 = vmul.f32 %v4422_v46, %v2951_v13 }
 0x125   : > { %v1313_v37 = vadd.f32 %v1312_v40, %v3060_v22  ;;  %v1373_v20 = vadd.f32 %v1372_v35, %v1371_v62  ;;  %v1390_v14 = vadd.f32 %v1389_v56, %v1388_v25  ;;  %v1339_v8 = vadd.f32 %v1338_v17, %v1335_v58 }
 0x126   : > { %v1358_v55 = vadd.f32 %v1357_v42, %v1356_v57  ;;  %v1363_v50 = vmul.f32 %v4463_v38, %v2993_v36  ;;  %v1379_v63 = vmul.f32 %v4448_v31, %v2979_v28  ;;  %v1381_v33 = vmul.f32 %v4463_v38, %v2983_v32 }
 0x127   : > { %1314 = vst [vmem:[%s3292_s15 + $0x28] sm:$0xff] %v1313_v37  ;;  %v1375_v39 = vadd.f32 %v1374_v21, %v1373_v20  ;;  %v1392_v4 = vadd.f32 %v1391_v59, %v1390_v14  ;;  %v1395_v12 = vmul.f32 %v4437_v43, %v2961_v18  ;;  %v1412_v52 = vmul.f32 %v4350_v49, %v2930_v3 }
 0x128   : > { %v1360_v26 = vadd.f32 %v1359_v53, %v1358_v55  ;;  %v1413_v48 = vmul.f32 %v4371_v2, %v2935_v5  ;;  %v1415_v11 = vmul.f32 %v4392_v6, %v2942_v9  ;;  %v1385_v61 = vmul.f32 %v4485_v44, %v2993_v36 }
 0x129   : > { %v1378_v47 = vadd.f32 %v1377_v41, %v1375_v39  ;;  %v1394_v16 = vadd.f32 %v1393_v29, %v1392_v4  ;;  %v1397_v54 = vmul.f32 %v4448_v31, %v2967_v23  ;;  %v1343_v49 = vadd.f32 %v1342_v1, %v1339_v8  ;;  %v4548_v8 = vld [vmem:[%s5020_s0 + $0x348] sm:$0xff] }
 0x12a   : > { %v1401_v27 = vmul.f32 %v4505_v19, %v2979_v28  ;;  %v1414_v7 = vadd.f32 %v1413_v48, %v1412_v52  ;;  %v1417_v51 = vmul.f32 %v4437_v43, %v2951_v13  ;;  %v1364_v15 = vadd.f32 %v1363_v50, %v1360_v26 }
 0x12b   : > { %v1380_v17 = vadd.f32 %v1379_v63, %v1378_v47  ;;  %v1396_v10 = vadd.f32 %v1395_v12, %v1394_v16  ;;  %v1405_v24 = vmul.f32 %v4512_v34, %v2983_v32  ;;  %v1419_v45 = vmul.f32 %v4448_v31, %v2961_v18  ;;  %v4567_v16 = vld [vmem:[%s5020_s0 + $0x428] sm:$0xff] }
 0x12c   : > { %v1416_v1 = vadd.f32 %v1415_v11, %v1414_v7  ;;  %v1432_v35 = vmul.f32 %v4371_v2, %v2930_v3  ;;  %v1433_v58 = vmul.f32 %v4392_v6, %v2935_v5  ;;  %v1409_v21 = vmul.f32 %v4521_v0, %v2993_v36 }
 0x12d   : > { %v1382_v30 = vadd.f32 %v1381_v33, %v1380_v17  ;;  %v1398_v42 = vadd.f32 %v1397_v54, %v1396_v10  ;;  %v1435_v40 = vmul.f32 %v4415_v60, %v2942_v9  ;;  %v1421_v25 = vmul.f32 %v4463_v38, %v2967_v23 }
 0x12e   : > { %v1418_v62 = vadd.f32 %v1417_v51, %v1416_v1  ;;  %v1434_v56 = vadd.f32 %v1433_v58, %v1432_v35  ;;  %v1437_v57 = vmul.f32 %v4448_v31, %v2951_v13  ;;  %v1365_v2 = vmax.f32 %v1343_v49, %v1364_v15 }
 0x12f   : > { %v1402_v53 = vadd.f32 %v1401_v27, %v1398_v42  ;;  %v1423_v6 = vmul.f32 %v4512_v34, %v2979_v28  ;;  %v1439_v41 = vmul.f32 %v4463_v38, %v2961_v18  ;;  %v1386_v59 = vadd.f32 %v1385_v61, %v1382_v30 }
 0x130   : > { %v1420_v37 = vadd.f32 %v1419_v45, %v1418_v62  ;;  %v1436_v20 = vadd.f32 %v1435_v40, %v1434_v56  ;;  %v1452_v60 = vmul.f32 %v4422_v46, %v2930_v3  ;;  %v1425_v29 = vmul.f32 %v4521_v0, %v2983_v32  ;;  %v4584_v45 = vld [vmem:[%s5020_s0 + $0xb0] sm:$0xff] }
 0x131   : > { %v1406_v14 = vadd.f32 %v1405_v24, %v1402_v53  ;;  %v1453_v55 = vmul.f32 %v4437_v43, %v2935_v5  ;;  %v1455_v50 = vmul.f32 %v4448_v31, %v2942_v9  ;;  %v1429_v39 = vmul.f32 %v4548_v8, %v2993_v36  ;;  %v4593_v62 = vld [vmem:[%s5020_s0 + $0x190] sm:$0xff] }
 0x132   : > { %v1422_v63 = vadd.f32 %v1421_v25, %v1420_v37  ;;  %v1438_v46 = vadd.f32 %v1437_v57, %v1436_v20  ;;  %v1441_v33 = vmul.f32 %v4485_v44, %v2967_v23  ;;  %v1443_v4 = vmul.f32 %v4521_v0, %v2979_v28 }
 0x133   : > { %v1445_v12 = vmul.f32 %v4548_v8, %v2983_v32  ;;  %v1454_v26 = vadd.f32 %v1453_v55, %v1452_v60  ;;  %v1457_v52 = vmul.f32 %v4505_v19, %v2951_v13  ;;  %v1387_v48 = vmax.f32 %v1365_v2, %v1386_v59 }
 0x134   : > { %v1410_v11 = vadd.f32 %v1409_v21, %v1406_v14  ;;  %v1424_v47 = vadd.f32 %v1423_v6, %v1422_v63  ;;  %v1440_v61 = vadd.f32 %v1439_v41, %v1438_v46  ;;  %v1459_v49 = vmul.f32 %v4512_v34, %v2961_v18  ;;  %v4604_v6 = vld [vmem:[%s5020_s0 + $0x270] sm:$0xff] }
 0x135   : > { %v1456_v54 = vadd.f32 %v1455_v50, %v1454_v26  ;;  %v1476_v27 = vmul.f32 %v4437_v43, %v2930_v3  ;;  %v1477_v7 = vmul.f32 %v4448_v31, %v2935_v5  ;;  %v1449_v17 = vmul.f32 %v4567_v16, %v2993_v36 }
 0x136   : > { %v1426_v51 = vadd.f32 %v1425_v29, %v1424_v47  ;;  %v1442_v15 = vadd.f32 %v1441_v33, %v1440_v61  ;;  %v1479_v10 = vmul.f32 %v4463_v38, %v2942_v9  ;;  %v1461_v1 = vmul.f32 %v4521_v0, %v2967_v23  ;;  %v4633_v61 = vld [vmem:[%s5020_s0 + $0x350] sm:$0xff] }
 0x137   : > { %v1458_v24 = vadd.f32 %v1457_v52, %v1456_v54  ;;  %v1478_v43 = vadd.f32 %v1477_v7, %v1476_v27  ;;  %v1481_v35 = vmul.f32 %v4512_v34, %v2951_v13  ;;  %v1411_v58 = vmax.f32 %v1387_v48, %v1410_v11 }
 0x138   : > { %v1430_v30 = vadd.f32 %v1429_v39, %v1426_v51  ;;  %v1444_v42 = vadd.f32 %v1443_v4, %v1442_v15  ;;  %v1465_v21 = vmul.f32 %v4584_v45, %v2979_v28  ;;  %v1483_v56 = vmul.f32 %v4521_v0, %v2961_v18 }
 0x139   : > { %v1460_v40 = vadd.f32 %v1459_v49, %v1458_v24  ;;  %v1480_v25 = vadd.f32 %v1479_v10, %v1478_v43  ;;  %v1496_v57 = vmul.f32 %v4448_v31, %v2930_v3  ;;  %v1469_v53 = vmul.f32 %v4593_v62, %v2983_v32 }
 0x13a   : > { %v1446_v2 = vadd.f32 %v1445_v12, %v1444_v42  ;;  %v1497_v41 = vmul.f32 %v4463_v38, %v2935_v5  ;;  %v1499_v59 = vmul.f32 %v4485_v44, %v2942_v9  ;;  %v1473_v20 = vmul.f32 %v4604_v6, %v2993_v36 }
 0x13b   : > { %v1462_v37 = vadd.f32 %v1461_v1, %v1460_v40  ;;  %v1482_v31 = vadd.f32 %v1481_v35, %v1480_v25  ;;  %v1485_v60 = vmul.f32 %v4548_v8, %v2967_v23  ;;  %v1431_v14 = vmax.f32 %v1411_v58, %v1430_v30  ;;  %v4654_v40 = vld [vmem:[%s5020_s0 + $0x430] sm:$0xff] }
 0x13c   : > { %v1450_v29 = vadd.f32 %v1449_v17, %v1446_v2  ;;  %v1498_v55 = vadd.f32 %v1497_v41, %v1496_v57  ;;  %v1501_v50 = vmul.f32 %v4521_v0, %v2951_v13  ;;  %v1487_v38 = vmul.f32 %v4593_v62, %v2979_v28  ;;  %v4663_v2 = vld [vmem:[%s5020_s0 + $0xb8] sm:$0xff] }
 0x13d   : > { %v1466_v63 = vadd.f32 %v1465_v21, %v1462_v37  ;;  %v1484_v39 = vadd.f32 %v1483_v56, %v1482_v31  ;;  %v1489_v44 = vmul.f32 %v4604_v6, %v2983_v32  ;;  %v1503_v33 = vmul.f32 %v4548_v8, %v2961_v18 }
 0x13e   : > { %v1500_v46 = vadd.f32 %v1499_v59, %v1498_v55  ;;  %v1519_v4 = vmul.f32 %v4505_v19, %v2930_v3  ;;  %v1521_v12 = vmul.f32 %v4512_v34, %v2935_v5  ;;  %v1505_v48 = vmul.f32 %v4567_v16, %v2967_v23 }
 0x13f   : > { %v1470_v26 = vadd.f32 %v1469_v53, %v1466_v63  ;;  %v1486_v52 = vadd.f32 %v1485_v60, %v1484_v39  ;;  %v1524_v11 = vmul.f32 %v4521_v0, %v2942_v9  ;;  %v1451_v47 = vmax.f32 %v1431_v14, %v1450_v29  ;;  %v4668_v53 = vld [vmem:[%s5020_s0 + $0x198] sm:$0xff] }
 0x140   : > { %v1502_v54 = vadd.f32 %v1501_v50, %v1500_v46  ;;  %v1522_v49 = vadd.f32 %v1521_v12, %v1519_v4  ;;  %v1527_v19 = vmul.f32 %v4584_v45, %v2951_v13  ;;  %v1493_v51 = vmul.f32 %v4633_v61, %v2993_v36  ;;  %v4687_v46 = vld [vmem:[%s5020_s0 + $0x278] sm:$0xff] }
 0x141   : > { %v1474_v27 = vadd.f32 %v1473_v20, %v1470_v26  ;;  %v1488_v7 = vadd.f32 %v1487_v38, %v1486_v52  ;;  %v1507_v15 = vmul.f32 %v4604_v6, %v2979_v28  ;;  %v1530_v24 = vmul.f32 %v4593_v62, %v2961_v18  ;;  %v4700_v52 = vld [vmem:[%s5020_s0 + $0x358] sm:$0xff] }
 0x142   : > { %v1504_v17 = vadd.f32 %v1503_v33, %v1502_v54  ;;  %v1525_v10 = vadd.f32 %v1524_v11, %v1522_v49  ;;  %v1547_v1 = vmul.f32 %v4512_v34, %v2930_v3  ;;  %v1509_v35 = vmul.f32 %v4633_v61, %v2983_v32 }
 0x143   : > { %v1490_v43 = vadd.f32 %v1489_v44, %v1488_v7  ;;  %v1548_v58 = vmul.f32 %v4521_v0, %v2935_v5  ;;  %v1551_v30 = vmul.f32 %v4548_v8, %v2942_v9  ;;  %v1475_v42 = vmax.f32 %v1451_v47, %v1474_v27 }
 0x144   : > { %v1506_v21 = vadd.f32 %v1505_v48, %v1504_v17  ;;  %v1528_v25 = vadd.f32 %v1527_v19, %v1525_v10  ;;  %v1533_v34 = vmul.f32 %v4604_v6, %v2967_v23  ;;  %v1513_v57 = vmul.f32 %v4654_v40, %v2993_v36 }
 0x145   : > { %v1494_v56 = vadd.f32 %v1493_v51, %v1490_v43  ;;  %v1549_v41 = vadd.f32 %v1548_v58, %v1547_v1  ;;  %v1553_v59 = vmul.f32 %v4593_v62, %v2951_v13  ;;  %v1537_v31 = vmul.f32 %v4663_v2, %v2979_v28  ;;  %v4722_v43 = vld [vmem:[%s5020_s0 + $0x438] sm:$0xff] }
 0x146   : > { %v1508_v37 = vadd.f32 %v1507_v15, %v1506_v21  ;;  %v1531_v20 = vadd.f32 %v1530_v24, %v1528_v25  ;;  %v1541_v60 = vmul.f32 %v4668_v53, %v2983_v32  ;;  %v1555_v29 = vmul.f32 %v4604_v6, %v2961_v18 }
 0x147   : > { %v1552_v14 = vadd.f32 %v1551_v30, %v1549_v41  ;;  %v1569_v55 = vmul.f32 %v4521_v0, %v2930_v3  ;;  %v1570_v50 = vmul.f32 %v4548_v8, %v2935_v5  ;;  %v1495_v63 = vmax.f32 %v1475_v42, %v1494_v56 }
 0x148   : > { %v1510_v39 = vadd.f32 %v1509_v35, %v1508_v37  ;;  %v1534_v38 = vadd.f32 %v1533_v34, %v1531_v20  ;;  %v1573_v44 = vmul.f32 %v4567_v16, %v2942_v9  ;;  %v1558_v4 = vmul.f32 %v4633_v61, %v2967_v23 }
 0x149   : > { %v1554_v33 = vadd.f32 %v1553_v59, %v1552_v14  ;;  %v1571_v12 = vadd.f32 %v1570_v50, %v1569_v55  ;;  %v1575_v0 = vmul.f32 %v4604_v6, %v2951_v13  ;;  %v1545_v26 = vmul.f32 %v4687_v46, %v2993_v36  ;;  %v4747_v55 = vld [vmem:[%s5020_s0 + $0x1a0] sm:$0xff] }
 0x14a   : > { %v1514_v8 = vadd.f32 %v1513_v57, %v1510_v39  ;;  %v1560_v16 = vmul.f32 %v4668_v53, %v2979_v28  ;;  %v1577_v48 = vmul.f32 %v4633_v61, %v2961_v18  ;;  %v1538_v11 = vadd.f32 %v1537_v31, %v1534_v38  ;;  %v2490_v57 = vld [vmem:[%s5020_s0 + $0xc0] sm:$0xff] }
 0x14b   : > { %v1556_v47 = vadd.f32 %v1555_v29, %v1554_v33  ;;  %v1574_v54 = vadd.f32 %v1573_v44, %v1571_v12  ;;  %v1591_v49 = vmul.f32 %v4584_v45, %v2930_v3  ;;  %v1562_v27 = vmul.f32 %v4687_v46, %v2983_v32  ;;  %v4755_v44 = vld [vmem:[%s5020_s0 + $0x280] sm:$0xff] }
 0x14c   : > { %v1515_v19 = vmax.f32 %v1495_v63, %v1514_v8  ;;  %v1592_v7 = vmul.f32 %v4593_v62, %v2935_v5  ;;  %v1594_v51 = vmul.f32 %v4604_v6, %v2942_v9  ;;  %v1566_v17 = vmul.f32 %v4700_v52, %v2993_v36 }
 0x14d   : > { %v1559_v15 = vadd.f32 %v1558_v4, %v1556_v47  ;;  %v1576_v10 = vadd.f32 %v1575_v0, %v1574_v54  ;;  %v1580_v24 = vmul.f32 %v4654_v40, %v2967_v23  ;;  %v1582_v1 = vmul.f32 %v4687_v46, %v2979_v28 }
 0x14e   : > { %v1516_v45 = vadd.f32 %v1515_v19, %v3060_v22  ;;  %v1593_v35 = vadd.f32 %v1592_v7, %v1591_v49  ;;  %v1596_v58 = vmul.f32 %v4663_v2, %v2951_v13  ;;  %v1542_v30 = vadd.f32 %v1541_v60, %v1538_v11 }
 0x14f   : > { %v1561_v42 = vadd.f32 %v1560_v16, %v1559_v15  ;;  %v1578_v21 = vadd.f32 %v1577_v48, %v1576_v10  ;;  %v1584_v25 = vmul.f32 %v4700_v52, %v2983_v32  ;;  %v1598_v56 = vmul.f32 %v4668_v53, %v2961_v18 }
 0x150   : > { %1517 = vst [vmem:[%s3292_s15 + $0x30] sm:$0xff] %v1516_v45  ;;  %v1595_v34 = vadd.f32 %v1594_v51, %v1593_v35  ;;  %v1615_v41 = vmul.f32 %v4593_v62, %v2930_v3  ;;  %v1616_v59 = vmul.f32 %v4604_v6, %v2935_v5  ;;  %v1588_v31 = vmul.f32 %v4722_v43, %v2993_v36 }
 0x151   : > { %v1563_v37 = vadd.f32 %v1562_v27, %v1561_v42  ;;  %v1581_v20 = vadd.f32 %v1580_v24, %v1578_v21  ;;  %v1618_v60 = vmul.f32 %v4633_v61, %v2942_v9  ;;  %v1600_v29 = vmul.f32 %v4687_v46, %v2967_v23 }
 0x152   : > { %v1597_v14 = vadd.f32 %v1596_v58, %v1595_v34  ;;  %v1617_v62 = vadd.f32 %v1616_v59, %v1615_v41  ;;  %v1620_v50 = vmul.f32 %v4668_v53, %v2951_v13  ;;  %v1546_v63 = vadd.f32 %v1545_v26, %v1542_v30 }
 0x153   : > { %v1583_v39 = vadd.f32 %v1582_v1, %v1581_v20  ;;  %v1604_v38 = vmul.f32 %v2490_v57, %v2979_v28  ;;  %v1622_v33 = vmul.f32 %v4687_v46, %v2961_v18  ;;  %v1567_v4 = vadd.f32 %v1566_v17, %v1563_v37 }
 0x154   : > { %v1599_v12 = vadd.f32 %v1598_v56, %v1597_v14  ;;  %v1619_v0 = vadd.f32 %v1618_v60, %v1617_v62  ;;  %v1635_v8 = vmul.f32 %v4604_v6, %v2930_v3  ;;  %v1608_v26 = vmul.f32 %v4747_v55, %v2983_v32 }
 0x155   : > { %v1585_v16 = vadd.f32 %v1584_v25, %v1583_v39  ;;  %v1636_v48 = vmul.f32 %v4633_v61, %v2935_v5  ;;  %v1638_v11 = vmul.f32 %v4654_v40, %v2942_v9  ;;  %v1612_v54 = vmul.f32 %v4755_v44, %v2993_v36  ;;  %v4778_v61 = vld [vmem:[%s5020_s0 + $0x360] sm:$0xff]  ;;  %v2496_v39 = vld [vmem:[%s5020_s0 + $0x1a8] sm:$0xff] }
 0x156   : > { %v1601_v47 = vadd.f32 %v1600_v29, %v1599_v12  ;;  %v1621_v49 = vadd.f32 %v1620_v50, %v1619_v0  ;;  %v1624_v19 = vmul.f32 %v4700_v52, %v2967_v23  ;;  %v1626_v6 = vmul.f32 %v4747_v55, %v2979_v28 }
 0x157   : > { %v1628_v27 = vmul.f32 %v4755_v44, %v2983_v32  ;;  %v1637_v40 = vadd.f32 %v1636_v48, %v1635_v8  ;;  %v1640_v7 = vmul.f32 %v4687_v46, %v2951_v13  ;;  %v1568_v51 = vmax.f32 %v1546_v63, %v1567_v4  ;;  %v2495_v63 = vld [vmem:[%s5020_s0 + $0xc8] sm:$0xff] }
 0x158   : > { %v1589_v15 = vadd.f32 %v1588_v31, %v1585_v16  ;;  %v1605_v17 = vadd.f32 %v1604_v38, %v1601_v47  ;;  %v1623_v10 = vadd.f32 %v1622_v33, %v1621_v49  ;;  %v1642_v45 = vmul.f32 %v4700_v52, %v2961_v18  ;;  %v2494_v31 = vld [vmem:[%s5020_s0 + $0x440] sm:$0xff] }
 0x159   : > { %v1639_v24 = vadd.f32 %v1638_v11, %v1637_v40  ;;  %v1655_v1 = vmul.f32 %v4663_v2, %v2930_v3  ;;  %v1656_v35 = vmul.f32 %v4668_v53, %v2935_v5  ;;  %v1632_v42 = vmul.f32 %v4778_v61, %v2993_v36 }
 0x15a   : > { %v1609_v58 = vadd.f32 %v1608_v26, %v1605_v17  ;;  %v1625_v30 = vadd.f32 %v1624_v19, %v1623_v10  ;;  %v1658_v21 = vmul.f32 %v4687_v46, %v2942_v9  ;;  %v1644_v34 = vmul.f32 %v4722_v43, %v2967_v23  ;;  %v2497_v19 = vld [vmem:[%s5020_s0 + $0x288] sm:$0xff] }
 0x15b   : > { %v1641_v25 = vadd.f32 %v1640_v7, %v1639_v24  ;;  %v1657_v56 = vadd.f32 %v1656_v35, %v1655_v1  ;;  %v1660_v41 = vmul.f32 %v2490_v57, %v2951_v13  ;;  %v1590_v59 = vmax.f32 %v1568_v51, %v1589_v15 }
 0x15c   : > { %v1613_v2 = vadd.f32 %v1612_v54, %v1609_v58  ;;  %v1627_v37 = vadd.f32 %v1626_v6, %v1625_v30  ;;  %v1646_v20 = vmul.f32 %v4755_v44, %v2979_v28  ;;  %v1662_v29 = vmul.f32 %v4747_v55, %v2961_v18 }
 0x15d   : > { %v1643_v60 = vadd.f32 %v1642_v45, %v1641_v25  ;;  %v1659_v14 = vadd.f32 %v1658_v21, %v1657_v56  ;;  %v1679_v62 = vmul.f32 %v4668_v53, %v2930_v3  ;;  %v1648_v57 = vmul.f32 %v4778_v61, %v2983_v32 }
 0x15e   : > { %v1629_v50 = vadd.f32 %v1628_v27, %v1627_v37  ;;  %v1680_v38 = vmul.f32 %v4687_v46, %v2935_v5  ;;  %v1682_v33 = vmul.f32 %v4700_v52, %v2942_v9  ;;  %v1652_v53 = vmul.f32 %v2494_v31, %v2993_v36 }
 0x15f   : > { %v1645_v4 = vadd.f32 %v1644_v34, %v1643_v60  ;;  %v1661_v12 = vadd.f32 %v1660_v41, %v1659_v14  ;;  %v1664_v0 = vmul.f32 %v4755_v44, %v2967_v23  ;;  %v1614_v8 = vmax.f32 %v1590_v59, %v1613_v2 }
 0x160   : > { %v1633_v16 = vadd.f32 %v1632_v42, %v1629_v50  ;;  %v1681_v26 = vadd.f32 %v1680_v38, %v1679_v62  ;;  %v1684_v48 = vmul.f32 %v4747_v55, %v2951_v13  ;;  %v1668_v54 = vmul.f32 %v2495_v63, %v2979_v28 }
 0x161   : > { %v1647_v11 = vadd.f32 %v1646_v20, %v1645_v4  ;;  %v1663_v47 = vadd.f32 %v1662_v29, %v1661_v12  ;;  %v1672_v49 = vmul.f32 %v2496_v39, %v2983_v32  ;;  %v1686_v27 = vmul.f32 %v4755_v44, %v2961_v18 }
 0x162   : > { %v1683_v6 = vadd.f32 %v1682_v33, %v1681_v26  ;;  %v1699_v40 = vmul.f32 %v4687_v46, %v2930_v3  ;;  %v1700_v55 = vmul.f32 %v4700_v52, %v2935_v5  ;;  %v1688_v15 = vmul.f32 %v4778_v61, %v2967_v23 }
 0x163   : > { %v1649_v7 = vadd.f32 %v1648_v57, %v1647_v11  ;;  %v1665_v51 = vadd.f32 %v1664_v0, %v1663_v47  ;;  %v1702_v17 = vmul.f32 %v4722_v43, %v2942_v9  ;;  %v1634_v10 = vmax.f32 %v1614_v8, %v1633_v16  ;;  %v2498_v43 = vld [vmem:[%s5020_s0 + $0x368] sm:$0xff] }
 0x164   : > { %v1685_v24 = vadd.f32 %v1684_v48, %v1683_v6  ;;  %v1701_v45 = vadd.f32 %v1700_v55, %v1699_v40  ;;  %v1704_v1 = vmul.f32 %v4755_v44, %v2951_v13  ;;  %v1676_v3 = vmul.f32 %v2497_v19, %v2993_v36 }
 0x165   : > { %v1653_v35 = vadd.f32 %v1652_v53, %v1649_v7  ;;  %v1669_v58 = vadd.f32 %v1668_v54, %v1665_v51  ;;  %v1690_v5 = vmul.f32 %v2496_v39, %v2979_v28  ;;  %v1706_v30 = vmul.f32 %v4778_v61, %v2961_v18  ;;  %v2499_v61 = vld [vmem:[%s5020_s0 + $0x448] sm:$0xff] }
 0x166   : > { %v1687_v46 = vadd.f32 %v1686_v27, %v1685_v24  ;;  %v1703_v52 = vadd.f32 %v1702_v17, %v1701_v45  ;;  %v1692_v9 = vmul.f32 %v2497_v19, %v2983_v32  ;;  %v1708_v25 = vmul.f32 %v2494_v31, %v2967_v23 }
 0x167   : > { %v1673_v42 = vadd.f32 %v1672_v49, %v1669_v58  ;;  %v1654_v21 = vmax.f32 %v1634_v10, %v1653_v35  ;;  %v1696_v41 = vmul.f32 %v2498_v43, %v2993_v36  ;;  %v1710_v18 = vmul.f32 %v2497_v19, %v2979_v28 }
 0x168   : > { %v1689_v13 = vadd.f32 %v1688_v15, %v1687_v46  ;;  %v1705_v44 = vadd.f32 %v1704_v1, %v1703_v52  ;;  %v1712_v60 = vmul.f32 %v2498_v43, %v2983_v32  ;;  %v1716_v23 = vmul.f32 %v2499_v61, %v2993_v36 }
 0x169   : > { %v1677_v34 = vadd.f32 %v1676_v3, %v1673_v42  ;;  %vm2867_vm0 = vmmov (%p53_p10), 0   ;;  %vm2199_vm1 = vcmask (%p53_p10), 408576   ;;  %vm2206_vm2 = vcmask (%p53_p10), 1041408  }
 0x16a   : > { %v1691_v56 = vadd.f32 %v1690_v5, %v1689_v13  ;;  %v1707_v59 = vadd.f32 %v1706_v30, %v1705_v44 }
 0x16b   : > { %v1678_v2 = vmax.f32 %v1654_v21, %v1677_v34 }
 0x16c   : > { %v1693_v37 = vadd.f32 %v1692_v9, %v1691_v56  ;;  %v1709_v20 = vadd.f32 %v1708_v25, %v1707_v59 }
 0x16e   : > { %v1697_v14 = vadd.f32 %v1696_v41, %v1693_v37  ;;  %v1711_v29 = vadd.f32 %v1710_v18, %v1709_v20 }
 0x170   : > { %v1698_v31 = vmax.f32 %v1678_v2, %v1697_v14  ;;  %v1713_v62 = vadd.f32 %v1712_v60, %v1711_v29 }
 0x172   : > { %v1717_v50 = vadd.f32 %v1716_v23, %v1713_v62  ;;  %55 = sbr.rel (!%p53_p10) target bundleno = 29 (0x1d), region = 193 }
 0x174   : > { %v1718_v57 = vmax.f32 %v1698_v31, %v1717_v50 }
 0x176   : > { %v1719_v63 = vadd.f32 %v1718_v57, %v3060_v22  ;;  %v2865_v22 = vmov (%p53_p10), 0  }
 0x177   :  { %2825 = vset.pattern.permute.xlu0 (%p53_p10), %v2865_v22  ;;  %2826 = vset.pattern.permute.xlu1 (%p53_p10), %v2865_v22 }
 0x178   : > { %1720 = vst [vmem:[%s3292_s15 + $0x38] sm:$0xff] %v1719_v63 }
 0x17f   :  { %v1737_v28 = vld [vmem:[#allocation2 + $0x80] sm:$0xff]  ;;  %v1738_v39 = vld [vmem:[#allocation2 + $0x88] sm:$0xff]  ;;  %v1739_v16 = vld [vmem:[#allocation2 + $0x90] sm:$0xff] }
 0x180   :  { %v1721_v32 = vld [vmem:[#allocation2] sm:$0xff]  ;;  %v2711_v38 = vpack.c.bf16 %v1738_v39, %v1737_v28  ;;  %v1722_v33 = vld [vmem:[#allocation2 + $0x8] sm:$0xff]  ;;  %v1740_v48 = vld [vmem:[#allocation2 + $0x98] sm:$0xff] }
 0x181   :  { %v1769_v4 = vld [vmem:[#allocation2 + $0x180] sm:$0xff]  ;;  %v1770_v36 = vld [vmem:[#allocation2 + $0x188] sm:$0xff]  ;;  %v2713_v53 = vpack.c.bf16 %v1722_v33, %v1721_v32  ;;  %v1723_v11 = vld [vmem:[#allocation2 + $0x10] sm:$0xff]  ;;  %v2715_v54 = vpack.c.bf16 %v1740_v48, %v1739_v16 }
 0x182   :  { %v2743_v12 = vpack.c.bf16 %v1770_v36, %v1769_v4  ;;  %v1753_v0 = vld [vmem:[#allocation2 + $0x100] sm:$0xff]  ;;  %v1754_v8 = vld [vmem:[#allocation2 + $0x108] sm:$0xff]  ;;  %2712 = vmatprep.subr.bf16.mxu0 %v2711_v38  ;;  %v1724_v47 = vld [vmem:[#allocation2 + $0x18] sm:$0xff] }
 0x183   :  { %v2745_v26 = vpack.c.bf16 %v1754_v8, %v1753_v0  ;;  %2714 = vmatpush3.bf16.msra.mxu0 %v2713_v53  ;;  %v2717_v49 = vpack.c.bf16 %v1724_v47, %v1723_v11  ;;  %v1771_v19 = vld [vmem:[#allocation2 + $0x190] sm:$0xff]  ;;  %v1772_v6 = vld [vmem:[#allocation2 + $0x198] sm:$0xff]  ;;  %v1741_v7 = vld [vmem:[#allocation2 + $0xa0] sm:$0xff] }
 0x184   :  { %2744 = vmatprep.subr.bf16.mxu1 %v2743_v12  ;;  %v1755_v27 = vld [vmem:[#allocation2 + $0x110] sm:$0xff]  ;;  %v2747_v40 = vpack.c.bf16 %v1772_v6, %v1771_v19  ;;  %v1756_v55 = vld [vmem:[#allocation2 + $0x118] sm:$0xff]  ;;  %v1742_v51 = vld [vmem:[#allocation2 + $0xa8] sm:$0xff]  ;;  %2716 = vmatprep.subr.bf16.mxu0 %v2715_v54 }
 0x185   :  { %2746 = vmatpush3.bf16.msra.mxu1 %v2745_v26  ;;  %v2749_v15 = vpack.c.bf16 %v1756_v55, %v1755_v27  ;;  %v2719_v17 = vpack.c.bf16 %v1742_v51, %v1741_v7  ;;  %v1725_v10 = vld [vmem:[#allocation2 + $0x20] sm:$0xff]  ;;  %v1726_v24 = vld [vmem:[#allocation2 + $0x28] sm:$0xff]  ;;  %v1743_v5 = vld [vmem:[#allocation2 + $0xb0] sm:$0xff] }
 0x186   :  { %v1773_v45 = vld [vmem:[#allocation2 + $0x1a0] sm:$0xff]  ;;  %2748 = vmatprep.subr.bf16.mxu1 %v2747_v40  ;;  %v1774_v1 = vld [vmem:[#allocation2 + $0x1a8] sm:$0xff]  ;;  %v2721_v3 = vpack.c.bf16 %v1726_v24, %v1725_v10  ;;  %v1744_v52 = vld [vmem:[#allocation2 + $0xb8] sm:$0xff] }
 0x187   :  { %v1757_v35 = vld [vmem:[#allocation2 + $0x120] sm:$0xff]  ;;  %v1758_v58 = vld [vmem:[#allocation2 + $0x128] sm:$0xff]  ;;  %2718 = vmatpush3.bf16.msra.mxu0 %v2717_v49  ;;  %v2751_v46 = vpack.c.bf16 %v1774_v1, %v1773_v45  ;;  %v1727_v30 = vld [vmem:[#allocation2 + $0x30] sm:$0xff]  ;;  %v2723_v9 = vpack.c.bf16 %v1744_v52, %v1743_v5 }
 0x188   :  { %2720 = vmatprep.subr.bf16.mxu0 %v2719_v17  ;;  %v2753_v42 = vpack.c.bf16 %v1758_v58, %v1757_v35  ;;  %v1728_v43 = vld [vmem:[#allocation2 + $0x38] sm:$0xff]  ;;  %v1775_v21 = vld [vmem:[#allocation2 + $0x1b0] sm:$0xff]  ;;  %v1745_v56 = vld [vmem:[#allocation2 + $0xc0] sm:$0xff] }
 0x189   :  { %2750 = vmatpush3.bf16.msra.mxu1 %v2749_v15  ;;  %v1776_v13 = vld [vmem:[#allocation2 + $0x1b8] sm:$0xff]  ;;  %v1759_v25 = vld [vmem:[#allocation2 + $0x130] sm:$0xff]  ;;  %v1746_v41 = vld [vmem:[#allocation2 + $0xc8] sm:$0xff]  ;;  %v2725_v59 = vpack.c.bf16 %v1728_v43, %v1727_v30 }
 0x18a   :  { %2752 = vmatprep.subr.bf16.mxu1 %v2751_v46  ;;  %v2755_v44 = vpack.c.bf16 %v1776_v13, %v1775_v21  ;;  %v1760_v34 = vld [vmem:[#allocation2 + $0x138] sm:$0xff]  ;;  %v1777_v18 = vld [vmem:[#allocation2 + $0x1c0] sm:$0xff]  ;;  %v1778_v61 = vld [vmem:[#allocation2 + $0x1c8] sm:$0xff]  ;;  %v2727_v37 = vpack.c.bf16 %v1746_v41, %v1745_v56 }
 0x18b   :  { %2722 = vmatpush3.bf16.msra.mxu0 %v2721_v3  ;;  %v2757_v2 = vpack.c.bf16 %v1760_v34, %v1759_v25  ;;  %v1729_v20 = vld [vmem:[#allocation2 + $0x40] sm:$0xff]  ;;  %v1730_v60 = vld [vmem:[#allocation2 + $0x48] sm:$0xff]  ;;  %v2759_v29 = vpack.c.bf16 %v1778_v61, %v1777_v18  ;;  %v1747_v31 = vld [vmem:[#allocation2 + $0xd0] sm:$0xff] }
 0x18c   :  { %2724 = vmatprep.subr.bf16.mxu0 %v2723_v9  ;;  %v1761_v14 = vld [vmem:[#allocation2 + $0x140] sm:$0xff]  ;;  %v1762_v23 = vld [vmem:[#allocation2 + $0x148] sm:$0xff]  ;;  %v1748_v62 = vld [vmem:[#allocation2 + $0xd8] sm:$0xff]  ;;  %v2729_v63 = vpack.c.bf16 %v1730_v60, %v1729_v20 }
 0x18d   :  { %2754 = vmatpush3.bf16.msra.mxu1 %v2753_v42  ;;  %v1779_v50 = vld [vmem:[#allocation2 + $0x1d0] sm:$0xff]  ;;  %v1780_v57 = vld [vmem:[#allocation2 + $0x1d8] sm:$0xff]  ;;  %v2761_v28 = vpack.c.bf16 %v1762_v23, %v1761_v14  ;;  %v2731_v39 = vpack.c.bf16 %v1748_v62, %v1747_v31  ;;  %v1749_v53 = vld [vmem:[#allocation2 + $0xe0] sm:$0xff]  ;;  %v2866_v42 = vmov 0.0|0.0  }
 0x18e   :  { %2756 = vmatprep.subr.bf16.mxu1 %v2755_v44  ;;  %v1731_v32 = vld [vmem:[#allocation2 + $0x50] sm:$0xff]  ;;  %v1732_v38 = vld [vmem:[#allocation2 + $0x58] sm:$0xff]  ;;  %v2763_v4 = vpack.c.bf16 %v1780_v57, %v1779_v50  ;;  %v1750_v12 = vld [vmem:[#allocation2 + $0xe8] sm:$0xff] }
 0x18f   :  { %2726 = vmatpush3.bf16.msra.mxu0 %v2725_v59  ;;  %v1763_v33 = vld [vmem:[#allocation2 + $0x150] sm:$0xff]  ;;  %v1764_v36 = vld [vmem:[#allocation2 + $0x158] sm:$0xff]  ;;  %v1781_v0 = vld [vmem:[#allocation2 + $0x1e0] sm:$0xff]  ;;  %v2733_v16 = vpack.c.bf16 %v1732_v38, %v1731_v32  ;;  %v2735_v11 = vpack.c.bf16 %v1750_v12, %v1749_v53 }
 0x190   :  { %2728 = vmatprep.subr.bf16.mxu0 %v2727_v37  ;;  %v1782_v8 = vld [vmem:[#allocation2 + $0x1e8] sm:$0xff]  ;;  %v1733_v22 = vld [vmem:[#allocation2 + $0x60] sm:$0xff]  ;;  %v2765_v48 = vpack.c.bf16 %v1764_v36, %v1763_v33  ;;  %v1751_v6 = vld [vmem:[#allocation2 + $0xf0] sm:$0xff] }
 0x191   :  { %2758 = vmatpush3.bf16.msra.mxu1 %v2757_v2  ;;  %v1802_v26 = vld [vmem:[%s5023_s3 + $0x8] sm:$0xff]  ;;  %v1765_v54 = vld [vmem:[#allocation2 + $0x160] sm:$0xff]  ;;  %v2767_v19 = vpack.c.bf16 %v1782_v8, %v1781_v0  ;;  %v1752_v27 = vld [vmem:[#allocation2 + $0xf8] sm:$0xff] }
 0x192   :  { %2760 = vmatprep.subr.bf16.mxu1 %v2759_v29  ;;  %v1734_v47 = vld [vmem:[#allocation2 + $0x68] sm:$0xff]  ;;  %1942 = vmatprep.mubr.f32.mxu0 %v1802_v26  ;;  %v1804_v40 = vld [vmem:[%s5023_s3 + $0x18] sm:$0xff]  ;;  %v1783_v55 = vld [vmem:[#allocation2 + $0x1f0] sm:$0xff]  ;;  %v2739_v17 = vpack.c.bf16 %v1752_v27, %v1751_v6 }
 0x193   :  { %2730 = vmatpush3.bf16.msra.mxu0 %v2729_v63  ;;  %v1766_v49 = vld [vmem:[#allocation2 + $0x168] sm:$0xff]  ;;  %v1784_v7 = vld [vmem:[#allocation2 + $0x1f8] sm:$0xff]  ;;  %2042 = vmatprep.mubr.f32.mxu1 %v1804_v40  ;;  %v2737_v51 = vpack.c.bf16 %v1734_v47, %v1733_v22  ;;  %v1735_v10 = vld [vmem:[#allocation2 + $0x70] sm:$0xff] }
 0x194   :  { %2732 = vmatprep.subr.bf16.mxu0 %v2731_v39  ;;  %v2769_v15 = vpack.c.bf16 %v1766_v49, %v1765_v54  ;;  %v1736_v24 = vld [vmem:[#allocation2 + $0x78] sm:$0xff]  ;;  %v2771_v45 = vpack.c.bf16 %v1784_v7, %v1783_v55  ;;  %v1767_v1 = vld [vmem:[#allocation2 + $0x170] sm:$0xff]  ;;  %v1785_v46 = vld [vmem:[#allocation2 + $0x200] sm:$0xff] }
 0x195   :  { %2762 = vmatpush3.bf16.msra.mxu1 %v2761_v28  ;;  %v1768_v35 = vld [vmem:[#allocation2 + $0x178] sm:$0xff]  ;;  %v2741_v58 = vpack.c.bf16 %v1736_v24, %v1735_v10  ;;  %v1786_v5 = vld [vmem:[#allocation2 + $0x208] sm:$0xff]  ;;  %v1801_v52 = vld [vmem:[%s5023_s3] sm:$0xff] }
 0x196   :  { %2764 = vmatprep.subr.bf16.mxu1 %v2763_v4  ;;  %v2773_v3 = vpack.c.bf16 %v1768_v35, %v1767_v1  ;;  %v2776_v30 = vpack.c.bf16 %v1786_v5, %v1785_v46  ;;  %v1803_v9 = vld [vmem:[%s5023_s3 + $0x10] sm:$0xff]  ;;  %v1788_v21 = vld [vmem:[#allocation2 + $0x218] sm:$0xff]  ;;  %v1809_v44 = vld [vmem:[%s5023_s3 + $0x40] sm:$0xff]  ;;  %v2868_v1 = vmov 0.0  }
 0x197   :  { %2734 = vmatpush3.bf16.msra.mxu0 %v2733_v16  ;;  %v1787_v43 = vld [vmem:[#allocation2 + $0x210] sm:$0xff]  ;;  %v1806_v34 = vld [vmem:[%s5023_s3 + $0x28] sm:$0xff]  ;;  %v1808_v56 = vld [vmem:[%s5023_s3 + $0x38] sm:$0xff] }
 0x198   :  { %2736 = vmatprep.subr.bf16.mxu0 %v2735_v11  ;;  %v1807_v13 = vld [vmem:[%s5023_s3 + $0x30] sm:$0xff]  ;;  %v2779_v25 = vpack.c.bf16 %v1788_v21, %v1787_v43  ;;  %v1789_v41 = vld [vmem:[#allocation2 + $0x220] sm:$0xff]  ;;  %v1790_v59 = vld [vmem:[#allocation2 + $0x228] sm:$0xff] }
 0x199   :  { %2766 = vmatpush3.bf16.msra.mxu1 %v2765_v48  ;;  %v1812_v18 = vld [vmem:[%s5023_s3 + $0x58] sm:$0xff]  ;;  %v1836_v61 = vld [vmem:[%s5024_s4] sm:$0xff]  ;;  %v1814_v2 = vld [vmem:[%s5023_s3 + $0x68] sm:$0xff]  ;;  %v2782_v20 = vpack.c.bf16 %v1790_v59, %v1789_v41 }
 0x19a   :  { %2768 = vmatprep.subr.bf16.mxu1 %v2767_v19  ;;  %1845 = vperm.xlu0 %2825, %v1836_v61   ;;  %v1838_v37 = vld [vmem:[%s5024_s4 + $0x10] sm:$0xff]  ;;  %v1837_v14 = vld [vmem:[%s5024_s4 + $0x8] sm:$0xff]  ;;  %v1813_v29 = vld [vmem:[%s5023_s3 + $0x60] sm:$0xff] }
 0x19b   :  { %2738 = vmatpush3.bf16.msra.mxu0 %v2737_v51  ;;  %v1811_v60 = vld [vmem:[%s5023_s3 + $0x50] sm:$0xff]  ;;  %v1792_v31 = vld [vmem:[#allocation2 + $0x238] sm:$0xff]  ;;  %v1817_v62 = vld [vmem:[%s5023_s3 + $0x80] sm:$0xff]  ;;  %1855 = vperm.xlu1 %2826, %v1838_v37  }
 0x19c   :  { %2740 = vmatprep.subr.bf16.mxu0 %v2739_v17  ;;  %v1791_v23 = vld [vmem:[#allocation2 + $0x230] sm:$0xff]  ;;  %v1839_v57 = vld [vmem:[%s5024_s4 + $0x18] sm:$0xff]  ;;  %v1840_v39 = vld [vmem:[%s5024_s4 + $0x20] sm:$0xff] }
 0x19d   :  { %2770 = vmatpush3.bf16.msra.mxu1 %v2769_v15  ;;  %v1819_v50 = vld [vmem:[%s5023_s3 + $0x90] sm:$0xff]  ;;  %v2785_v63 = vpack.c.bf16 %v1792_v31, %v1791_v23  ;;  %v1816_v28 = vld [vmem:[%s5023_s3 + $0x78] sm:$0xff]  ;;  %v1818_v32 = vld [vmem:[%s5023_s3 + $0x88] sm:$0xff] }
 0x19e   :  { %2772 = vmatprep.subr.bf16.mxu1 %v2771_v45  ;;  %1850 = vperm.xlu0 %2825, %v1837_v14   ;;  %v1793_v38 = vld [vmem:[#allocation2 + $0x240] sm:$0xff]  ;;  %v1794_v33 = vld [vmem:[#allocation2 + $0x248] sm:$0xff]  ;;  %v1824_v36 = vld [vmem:[%s5023_s3 + $0xb8] sm:$0xff] }
 0x19f   :  { %2742 = vmatpush3.bf16.msra.mxu0 %v2741_v58  ;;  %v1822_v4 = vld [vmem:[%s5023_s3 + $0xa8] sm:$0xff]  ;;  %1860 = vperm.xlu1 %2826, %v1839_v57   ;;  %v2788_v12 = vpack.c.bf16 %v1794_v33, %v1793_v38  ;;  %v1821_v0 = vld [vmem:[%s5023_s3 + $0xa0] sm:$0xff]  ;;  %v1842_v8 = vld [vmem:[%s5024_s4 + $0x30] sm:$0x3] }
 0x1a0   :  { %2775 = vmatprep.subr.bf16.mxu0 %v2866_v42  ;;  %v1841_v53 = vld [vmem:[%s5024_s4 + $0x28] sm:$0xff]  ;;  %v1823_v16 = vld [vmem:[%s5023_s3 + $0xb0] sm:$0xff]  ;;  %v1796_v26 = vld [vmem:[#allocation2 + $0x258] sm:$0xff] }
 0x1a1   :  { %2774 = vmatpush3.bf16.msra.mxu1 %v2773_v3  ;;  %v1795_v22 = vld [vmem:[#allocation2 + $0x250] sm:$0xff]  ;;  %v1829_v11 = vld [vmem:[%s5023_s3 + $0xe0] sm:$0xff]  ;;  %v1826_v49 = vld [vmem:[%s5023_s3 + $0xc8] sm:$0xff] }
 0x1a2   :  { %1943 = vmatmul.mubr.f32.vlgmr.msra.gmra.mrb[0].mxu0 %v1801_v52  ;;  %1865 = vperm.xlu0 %2825, %v1840_v39   ;;  %v1827_v48 = vld [vmem:[%s5023_s3 + $0xd0] sm:$0xff]  ;;  %v2187_v47 = vld [vmem:[%s5026_s6] sm:$0xff]  ;;  %v2791_v54 = vpack.c.bf16 %v1796_v26, %v1795_v22  ;;  %v2188_v19 = vld [vmem:[%s5026_s6 + $0x8] sm:$0x3] }
 0x1a3   :  { %2777 = vmatpush3.bf16.msra.mxu0 %v2776_v30  ;;  %1947 = vmatprep.mubr.f32.mxu0 %v1807_v13  ;;  %v1828_v6 = vld [vmem:[%s5023_s3 + $0xd8] sm:$0xff]  ;;  %v1797_v27 = vld [vmem:[#allocation2 + $0x260] sm:$0xff]  ;;  %v1798_v40 = vld [vmem:[#allocation2 + $0x268] sm:$0xff] }
 0x1a4   :  { %2043 = vmatmul.mubr.f32.vlgmr.msra.gmra.mrb[0].mxu1 %v1803_v9  ;;  %2778 = vmatprep.subr.bf16.mxu0 %v2866_v42  ;;  %v1832_v55 = vld [vmem:[%s5023_s3 + $0xf8] sm:$0x3]  ;;  %v1834_v7 = vld [vmem:[%s5023_s3 + $0x108] sm:$0x3]  ;;  %v2794_v51 = vpack.c.bf16 %v1798_v40, %v1797_v27  ;;  %v1831_v15 = vld [vmem:[%s5023_s3 + $0xf0] sm:$0x3] }
 0x1a5   :  { %2047 = vmatprep.mubr.f32.mxu1 %v1809_v44  ;;  %1870 = vperm.xlu1 %2826, %v1841_v53   ;;  %v1833_v17 = vld [vmem:[%s5023_s3 + $0x100] sm:$0x3]  ;;  %v1799_v10 = vld [vmem:[#allocation2 + $0x270] sm:$0xff]  ;;  %v1800_v24 = vld [vmem:[#allocation2 + $0x278] sm:$0xff] }
 0x1a6   :  { %1948 = vmatmul.mubr.f32.gmra.mrb[2].mxu0 %v1806_v34  ;;  %1875 = vperm.xlu0 %2825, %v1842_v8   ;;  %v2797_v45 = vpack.c.bf16 %v1800_v24, %v1799_v10  ;;  %v1805_v35 = vld [vmem:[%s5023_s3 + $0x20] sm:$0xff]  ;;  %v1810_v58 = vld [vmem:[%s5023_s3 + $0x48] sm:$0xff]  ;;  %v1815_v3 = vld [vmem:[%s5023_s3 + $0x70] sm:$0xff] }
 0x1a7   :  { %2780 = vmatpush3.bf16.msra.mxu0 %v2779_v25  ;;  %1952 = vmatprep.mubr.f32.mxu0 %v1812_v18  ;;  %v1820_v46 = vld [vmem:[%s5023_s3 + $0x98] sm:$0xff]  ;;  %v1825_v5 = vld [vmem:[%s5023_s3 + $0xc0] sm:$0xff]  ;;  %v1830_v52 = vld [vmem:[%s5023_s3 + $0xe8] sm:$0xff] }
 0x1a8   :  { %2048 = vmatmul.mubr.f32.gmra.mrb[2].mxu1 %v1808_v56  ;;  %2781 = vmatprep.subr.bf16.mxu0 %v2866_v42  ;;  %v1835_v30 = vld [vmem:[%s5023_s3 + $0x110] sm:$0x3] }
 0x1a9   :  { %2052 = vmatprep.mubr.f32.mxu1 %v1814_v2  ;;  %2191 = vperm.xlu1 %2826, %v2187_v47  }
 0x1aa   :  { %1953 = vmatmul.mubr.f32.gmra.mrb[4].mxu0 %v1811_v60  ;;  %2196 = vperm.xlu0 %2825, %v2188_v19  }
 0x1ab   :  { %2783 = vmatpush3.bf16.msra.mxu0 %v2782_v20  ;;  %1957 = vmatprep.mubr.f32.mxu0 %v1817_v62 }
 0x1ac   :  { %2053 = vmatmul.mubr.f32.gmra.mrb[4].mxu1 %v1813_v29  ;;  %2784 = vmatprep.subr.bf16.mxu0 %v2866_v42 }
 0x1ad   :  { %2057 = vmatprep.mubr.f32.mxu1 %v1819_v50 }
 0x1ae   :  { %1958 = vmatmul.mubr.f32.gmra.mrb[6].mxu0 %v1816_v28 }
 0x1af   :  { %2786 = vmatpush3.bf16.msra.mxu0 %v2785_v63  ;;  %1962 = vmatprep.mubr.f32.mxu0 %v1822_v4 }
 0x1b0   :  { %2058 = vmatmul.mubr.f32.gmra.mrb[6].mxu1 %v1818_v32  ;;  %2787 = vmatprep.subr.bf16.mxu0 %v2866_v42 }
 0x1b1   :  { %2062 = vmatprep.mubr.f32.mxu1 %v1824_v36 }
 0x1b2   :  { %1963 = vmatmul.mubr.f32.gmra.mrb[8].mxu0 %v1821_v0 }
 0x1b3   :  { %2789 = vmatpush3.bf16.msra.mxu0 %v2788_v12  ;;  %1967 = vmatprep.mubr.f32.mxu0 %v1827_v48 }
 0x1b4   :  { %2063 = vmatmul.mubr.f32.gmra.mrb[8].mxu1 %v1823_v16  ;;  %2790 = vmatprep.subr.bf16.mxu0 %v2866_v42 }
 0x1b5   :  { %2067 = vmatprep.mubr.f32.mxu1 %v1829_v11 }
 0x1b6   :  { %1968 = vmatmul.mubr.f32.gmra.mrb[10].mxu0 %v1826_v49 }
 0x1b7   :  { %2792 = vmatpush3.bf16.msra.mxu0 %v2791_v54  ;;  %1972 = vmatprep.mubr.f32.mxu0 %v1832_v55 }
 0x1b8   :  { %2068 = vmatmul.mubr.f32.gmra.mrb[10].mxu1 %v1828_v6  ;;  %2793 = vmatprep.subr.bf16.mxu0 %v2866_v42 }
 0x1b9   :  { %2072 = vmatprep.mubr.f32.mxu1 %v1834_v7 }
 0x1ba   :  { %1973 = vmatmul.mubr.f32.gmra.mrb[12].mxu0 %v1831_v15 }
 0x1bb   :  { %2795 = vmatpush3.bf16.msra.mxu0 %v2794_v51  ;;  %2673 = vmatprep.mubr.msk.f32.mxu0 %vm2867_vm0, %v2868_v1 }
 0x1bc   :  { %2073 = vmatmul.mubr.f32.gmra.mrb[12].mxu1 %v1833_v17  ;;  %2796 = vmatprep.subr.bf16.mxu0 %v2866_v42  ;;  %v2185_v42 = vld [vmem:[%s5025_s5] sm:$0xff] }
 0x1bd   :  { %2708 = vmatprep.mubr.msk.f32.mxu1 %vm2199_vm1, %v2185_v42 }
 0x1bf   :  { %2798 = vmatpush3.bf16.msra.mxu0 %v2797_v45 }
 0x1c2   :  { %2674 = vmatmul.mubr.f32.vlgmr.msra.gmra.mrb[14].mxu0 %v1805_v35 }
 0x1c3   :  { %2676 = vmatprep.mubr.msk.f32.mxu0 %vm2867_vm0, %v2868_v1 }
 0x1c6   :  { %2677 = vmatmul.mubr.f32.gmra.mrb[16].mxu0 %v1810_v58 }
 0x1c7   :  { %2679 = vmatprep.mubr.msk.f32.mxu0 %vm2867_vm0, %v2868_v1 }
 0x1ca   :  { %2680 = vmatmul.mubr.f32.gmra.mrb[18].mxu0 %v1815_v3 }
 0x1cb   :  { %2682 = vmatprep.mubr.msk.f32.mxu0 %vm2867_vm0, %v2868_v1 }
 0x1ce   :  { %2683 = vmatmul.mubr.f32.gmra.mrb[20].mxu0 %v1820_v46 }
 0x1cf   :  { %2685 = vmatprep.mubr.msk.f32.mxu0 %vm2867_vm0, %v2868_v1 }
 0x1d2   :  { %2686 = vmatmul.mubr.f32.gmra.mrb[22].mxu0 %v1825_v5 }
 0x1d3   :  { %2688 = vmatprep.mubr.msk.f32.mxu0 %vm2867_vm0, %v2868_v1 }
 0x1d6   :  { %2689 = vmatmul.mubr.f32.gmra.mrb[24].mxu0 %v1830_v52 }
 0x1d7   :  { %2691 = vmatprep.mubr.msk.f32.mxu0 %vm2867_vm0, %v2868_v1 }
 0x1da   :  { %2692 = vmatmul.mubr.f32.gmra.mrb[26].mxu0 %v1835_v30 }
 0x219   :  { %v1846_v43 = vpop.permute.xlu0 %1845 }
 0x21a   :  { %v1856_v20 = vpop.permute.xlu1 %1855 }
 0x21d   :  { %v1851_v59 = vpop.permute.xlu0 %1850 }
 0x21e   :  { %v1861_v38 = vpop.permute.xlu1 %1860 }
 0x221   :  { %v1866_v22 = vpop.permute.xlu0 %1865 }
 0x224   :  { %v1871_v27 = vpop.permute.xlu1 %1870 }
 0x225   :  { %v1876_v24 = vpop.permute.xlu0 %1875 }
 0x275   :  { %v2535_v9 = vpop.f32.mrb[0].mxu0 }
 0x276   :  { %v2536_v21 = vpop.f32.mrb[1].mxu0 }
 0x277   :  { %v2588_v13 = vpop.f32.mrb[0].mxu1  ;;  %v2537_v44 = vadd.f32 %v2536_v21, %v2535_v9 }
 0x278   :  { %v2589_v25 = vpop.f32.mrb[1].mxu1 }
 0x279   :  { %v2590_v34 = vadd.f32 %v2589_v25, %v2588_v13  ;;  %v1945_v56 = vadd.f32 %v2537_v44, %v1846_v43  ;;  %v2538_v41 = vpop.f32.mrb[2].mxu0 }
 0x27a   :  { %v2539_v18 = vpop.f32.mrb[3].mxu0 }
 0x27b   :  { %v2591_v61 = vpop.f32.mrb[2].mxu1  ;;  %v2540_v2 = vadd.f32 %v2539_v18, %v2538_v41  ;;  %v2045_v60 = vadd.f32 %v2590_v34, %v1945_v56 }
 0x27c   :  { %v2592_v37 = vpop.f32.mrb[3].mxu1 }
 0x27d   :  { %v2593_v14 = vadd.f32 %v2592_v37, %v2591_v61  ;;  %v1950_v29 = vadd.f32 %v2540_v2, %v1851_v59  ;;  %v2541_v23 = vpop.f32.mrb[4].mxu0 }
 0x27e   :  { %v2542_v31 = vpop.f32.mrb[5].mxu0 }
 0x27f   :  { %v2594_v62 = vpop.f32.mrb[4].mxu1  ;;  %v2543_v50 = vadd.f32 %v2542_v31, %v2541_v23  ;;  %v2050_v63 = vadd.f32 %v2593_v14, %v1950_v29 }
 0x280   :  { %v2595_v57 = vpop.f32.mrb[5].mxu1 }
 0x281   :  { %v2596_v28 = vadd.f32 %v2595_v57, %v2594_v62  ;;  %v1955_v39 = vadd.f32 %v2543_v50, %v1856_v20  ;;  %v2544_v32 = vpop.f32.mrb[6].mxu0 }
 0x282   :  { %v2545_v33 = vpop.f32.mrb[7].mxu0 }
 0x283   :  { %v2597_v4 = vpop.f32.mrb[6].mxu1  ;;  %v2546_v36 = vadd.f32 %v2545_v33, %v2544_v32  ;;  %v2055_v12 = vadd.f32 %v2596_v28, %v1955_v39 }
 0x284   :  { %v2598_v53 = vpop.f32.mrb[7].mxu1 }
 0x285   :  { %v2599_v0 = vadd.f32 %v2598_v53, %v2597_v4  ;;  %v1960_v8 = vadd.f32 %v2546_v36, %v1861_v38  ;;  %v2547_v16 = vpop.f32.mrb[8].mxu0  ;;  %v2186_v36 = vld [vmem:[%s5025_s5 + $0x8] sm:$0x3]  ;;  %v2197_v53 = vpop.permute.xlu0 %2196 }
 0x286   :  { %v2548_v26 = vpop.f32.mrb[9].mxu0 }
 0x287   :  { %v2600_v48 = vpop.f32.mrb[8].mxu1  ;;  %v2549_v11 = vadd.f32 %v2548_v26, %v2547_v16  ;;  %v2060_v54 = vadd.f32 %v2599_v0, %v1960_v8  ;;  %v2192_v0 = vpop.permute.xlu1 %2191 }
 0x288   :  { %v2601_v47 = vpop.f32.mrb[9].mxu1 }
 0x289   :  { %v2602_v49 = vadd.f32 %v2601_v47, %v2600_v48  ;;  %v1965_v19 = vadd.f32 %v2549_v11, %v1866_v22  ;;  %v2550_v6 = vpop.f32.mrb[10].mxu0 }
 0x28a   :  { %v2551_v40 = vpop.f32.mrb[11].mxu0 }
 0x28b   :  { %v2603_v55 = vpop.f32.mrb[10].mxu1  ;;  %v2552_v7 = vadd.f32 %v2551_v40, %v2550_v6  ;;  %v2065_v15 = vadd.f32 %v2602_v49, %v1965_v19 }
 0x28c   :  { %v2604_v51 = vpop.f32.mrb[11].mxu1 }
 0x28d   :  { %v2605_v17 = vadd.f32 %v2604_v51, %v2603_v55  ;;  %v1970_v10 = vadd.f32 %v2552_v7, %v1871_v27  ;;  %v2553_v45 = vpop.f32.mrb[12].mxu0 }
 0x28e   :  { %v2554_v1 = vpop.f32.mrb[13].mxu0 }
 0x28f   :  { %v2606_v35 = vpop.f32.mrb[12].mxu1  ;;  %v2555_v58 = vadd.f32 %v2554_v1, %v2553_v45  ;;  %v2070_v46 = vadd.f32 %v2605_v17, %v1970_v10 }
 0x290   :  { %v2607_v3 = vpop.f32.mrb[13].mxu1 }
 0x291   :  { %v2608_v5 = vadd.f32 %v2607_v3, %v2606_v35  ;;  %v1975_v52 = vadd.f32 %v2555_v58, %v1876_v24 }
 0x293   :  { %v2075_v30 = vadd.f32 %v2608_v5, %v1975_v52 }
 0x295   :  { %v2144_v42 = vpop.f32.mrb[14].mxu0 }
 0x296   :  { %v2145_v9 = vadd.f32 %v2144_v42, %v2045_v60  ;;  %v2675_v43 = vpop.f32.mrb[15].mxu0 }
 0x298   :  { %v2178_v25 = vmax.f32 %v2145_v9, 0.0 }
 0x299   :  { %v2149_v21 = vpop.f32.mrb[16].mxu0 }
 0x29a   :  { %v2150_v13 = vadd.f32 %v2149_v21, %v2050_v63  ;;  %v2678_v44 = vpop.f32.mrb[17].mxu0 }
 0x29c   :  { %v2179_v34 = vmax.f32 %v2150_v13, 0.0 }
 0x29d   :  { %v2154_v56 = vpop.f32.mrb[18].mxu0 }
 0x29e   :  { %v2799_v41 = vpack.c.bf16 %v2179_v34, %v2178_v25  ;;  %v2155_v59 = vadd.f32 %v2154_v56, %v2055_v12  ;;  %v2681_v18 = vpop.f32.mrb[19].mxu0 }
 0x2a0   :  { %2800 = vmatprep.subr.bf16.mxu1 %v2799_v41  ;;  %v2180_v20 = vmax.f32 %v2155_v59, 0.0 }
 0x2a1   :  { %v2159_v61 = vpop.f32.mrb[20].mxu0  ;;  %2802 = vmatpush3.bf16.msra.mxu1 %v2799_v41 }
 0x2a2   :  { %v2160_v2 = vadd.f32 %v2159_v61, %v2060_v54  ;;  %v2684_v37 = vpop.f32.mrb[21].mxu0 }
 0x2a4   :  { %v2181_v14 = vmax.f32 %v2160_v2, 0.0 }
 0x2a5   :  { %v2164_v29 = vpop.f32.mrb[22].mxu0 }
 0x2a6   :  { %v2803_v23 = vpack.c.bf16 %v2181_v14, %v2180_v20  ;;  %v2165_v60 = vadd.f32 %v2164_v29, %v2065_v15  ;;  %v2687_v31 = vpop.f32.mrb[23].mxu0 }
 0x2a8   :  { %2804 = vmatprep.subr.bf16.mxu1 %v2803_v23  ;;  %v2182_v63 = vmax.f32 %v2165_v60, 0.0 }
 0x2a9   :  { %v2169_v62 = vpop.f32.mrb[24].mxu0  ;;  %2806 = vmatpush3.bf16.msra.mxu1 %v2803_v23 }
 0x2aa   :  { %v2170_v50 = vadd.f32 %v2169_v62, %v2070_v46  ;;  %v2690_v57 = vpop.f32.mrb[25].mxu0 }
 0x2ac   :  { %v2183_v28 = vmax.f32 %v2170_v50, 0.0 }
 0x2ad   :  { %v2174_v39 = vpop.f32.mrb[26].mxu0 }
 0x2ae   :  { %v2807_v32 = vpack.c.bf16 %v2183_v28, %v2182_v63  ;;  %v2175_v38 = vadd.f32 %v2174_v39, %v2075_v30  ;;  %v2693_v33 = vpop.f32.mrb[27].mxu0 }
 0x2b0   :  { %v2184_v4 = vmax.f32 %v2175_v38, 0.0  ;;  %2808 = vmatprep.subr.bf16.mxu1 %v2807_v32 }
 0x2b1   :  { %2810 = vmatpush3.bf16.msra.mxu1 %v2807_v32 }
 0x2b2   :  { %2706 = vmatprep.subr.msk.mxu1 %vm2206_vm2, %v2184_v4 }
 0x2b5   :  { %2707 = vmatpush3.msk.msra.mxu1 %vm2206_vm2, %v2184_v4 }
 0x2b6   :  { %2709 = vmatmul.mubr.msk.f32.vlgmr.msra.gmra.mrb[14].mxu1 %vm2199_vm1, %v2186_v36 }
 0x389   :  { %v2710_v12 = vpop.f32.mrb[14].mxu1 }
 0x38a   :  { %v2282_v8 = vadd.f32 %v2710_v12, %v2197_v53  ;;  %v2276_v16 = vpop.f32.mrb[15].mxu1 }
 0x38b   :  { %v2277_v22 = vadd.f32 %v2276_v16, %v2192_v0 }
 0x38c   :  { %2286 = vst [vmem:[%s5027_s7 + $0x8] sm:$0x3] %v2282_v8 }
 0x38d   :  { %2285 = vst [vmem:[%s5027_s7] sm:$0xff] %v2277_v22 }
 0x38e   :  { %2291 = vsyncpa [#allocation4], 1 }
 0x38f   :  { %2292 = vsyncpa [#allocation6], 1 }

</bundles_post_ra>
